<compile_context>
chip_gen: v7x
topology: tpu7x:2x2x1
jax: 0.10.0
libtpu: 0.0.40
codegen_flags: <defaults>
</compile_context>

<pallas_src>
import functools

import jax
import jax.numpy as jnp
from jax.experimental import pallas as pl
from jax.experimental.pallas import tpu as pltpu

EPS_IN = 1e-5      # nn.InstanceNorm2d default eps (biased variance)
EPS_ADAIN = 1e-8   # eps used in FastStyleNetwork.adaptive_instance_norm


def _round_up(x, m):
    return ((x + m - 1) // m) * m


def _cdiv(a, b):
    return -(-a // b)


def _vmem_limit_bytes():
    # Generation-aware scoped-VMEM limit: ~3/4 of physical VMEM per TensorCore
    # (v7x: 64 MiB -> 48 MiB; v5e/v6e: 128 MiB -> 96 MiB).
    try:
        cap = int(pltpu.get_tpu_info().vmem_capacity_bytes)
    except Exception:
        cap = 64 * 1024 * 1024
    return min((cap * 3) // 4, 112 * 1024 * 1024)


_VMEM_LIMIT = _vmem_limit_bytes()
_TM_CAP = 2048 if _VMEM_LIMIT >= (80 << 20) else 1024   # v7x gets 1024


# ----------------------------- Pallas kernels ------------------------------

def _matmul_bias_act_kernel(x_ref, w_ref, b_ref, o_ref, *, act):
    # x: (tm, K) bf16, w: (K, tn) bf16, b: (1, tn) f32 -> o: (tm, tn)
    acc = jnp.dot(x_ref[...], w_ref[...], preferred_element_type=jnp.float32)
    acc = acc + b_ref[...]
    if act == "relu":
        acc = jnp.maximum(acc, 0.0)
    elif act == "tanh":
        acc = jnp.tanh(acc)
    o_ref[...] = acc.astype(o_ref.dtype)


def _stats_kernel(x_ref, mean_ref, rstd_ref, *, count, C, mode):
    # x block: (1, rt, L) with L = f*C (f spatial positions folded into lanes).
    # Accumulates per-lane sum / sumsq into the output refs across the HW grid
    # axis; on the last step folds lanes to per-channel stats (broadcast back
    # to L lanes) and overwrites the outputs with mean / rstd.
    r = pl.program_id(1)

    @pl.when(r == 0)
    def _():
        mean_ref[...] = jnp.zeros_like(mean_ref)
        rstd_ref[...] = jnp.zeros_like(rstd_ref)

    x = x_ref[...].astype(jnp.float32)
    mean_ref[...] += jnp.sum(x, axis=1, keepdims=True)
    rstd_ref[...] += jnp.sum(x * x, axis=1, keepdims=True)

    L = mean_ref.shape[-1]
    s1 = mean_ref[...][0]                        # (1, L) running sums
    s2 = rstd_ref[...][0]
    if L != C:
        # fold-and-broadcast: out[l] = sum_{l': l'%C == l%C} in[l']
        rows = jax.lax.broadcasted_iota(jnp.int32, (L, L), 0) % C
        cols = jax.lax.broadcasted_iota(jnp.int32, (L, L), 1) % C
        fold = (rows == cols).astype(jnp.float32)
        s1 = jnp.dot(s1, fold, preferred_element_type=jnp.float32)
        s2 = jnp.dot(s2, fold, preferred_element_type=jnp.float32)
    n = float(count)
    mu = s1 / n
    if mode == "in":                              # biased variance, eps on var
        var = jnp.maximum(s2 / n - mu * mu, 0.0)
        rs = jax.lax.rsqrt(var + EPS_IN)
    else:                                         # adain: unbiased std, eps on std
        var = jnp.maximum((s2 - n * mu * mu) / max(n - 1.0, 1.0), 0.0)
        rs = pl.reciprocal(jnp.sqrt(var) + EPS_ADAIN, approx=True)

    @pl.when(r == pl.num_programs(1) - 1)
    def _():
        mean_ref[...] = mu[None]
        rstd_ref[...] = rs[None]


def _norm_apply_kernel(x_ref, mu_ref, rs_ref, o_ref, *, relu, scale):
    y = (x_ref[...].astype(jnp.float32) - mu_ref[...]) * (rs_ref[...] * scale)
    if relu:
        y = jnp.maximum(y, 0.0)
    o_ref[...] = y.astype(o_ref.dtype)


def _norm_apply_add_kernel(x_ref, mu_ref, rs_ref, a_ref, o_ref, *, scale):
    # Used for the residual add (a = residual tile) and for AdaIN
    # (a = spatially-constant style mean, scale = 1e-8).
    y = (x_ref[...].astype(jnp.float32) - mu_ref[...]) * (rs_ref[...] * scale)
    o_ref[...] = (y + a_ref[...].astype(jnp.float32)).astype(o_ref.dtype)


# --------------------------- Pallas call wrappers ---------------------------

def matmul_bias_act(x, w, b, act="none", out_dtype=jnp.float32):
    """(M, K) @ (K, Np) + b, fused activation. Full-K, 2-D parallel grid."""
    M, K = x.shape
    K2, Np = w.shape
    assert K == K2 and Np % 128 == 0
    tn = 256 if Np % 256 == 0 else 128
    tm = _round_up(M, 8) if M <= _TM_CAP else _TM_CAP
    Mp = _round_up(M, tm)

    xp = x.astype(jnp.bfloat16)
    if Mp > M:
        xp = jnp.pad(xp, ((0, Mp - M), (0, 0)))

    kernel = functools.partial(_matmul_bias_act_kernel, act=act)
    out = pl.pallas_call(
        kernel,
        out_shape=jax.ShapeDtypeStruct((Mp, Np), out_dtype),
        grid=(Mp // tm, Np // tn),
        in_specs=[
            pl.BlockSpec((tm, K), lambda i, j: (i, 0)),
            pl.BlockSpec((K, tn), lambda i, j: (0, j)),
            pl.BlockSpec((1, tn), lambda i, j: (0, j)),
        ],
        out_specs=pl.BlockSpec((tm, tn), lambda i, j: (i, j)),
        compiler_params=pltpu.CompilerParams(
            dimension_semantics=("parallel", "parallel"),
            vmem_limit_bytes=_VMEM_LIMIT),
    )(xp, w, b)
    return out[:M] if Mp > M else out


def _fold_cfg(HW, C):
    # Fold f spatial positions into lanes so the last dim is 128 (lane-dense).
    f = max(1, 128 // C)
    if C * f != 128 or HW % f != 0:
        f = 1
    L = C * f
    R = HW // f
    cap = 4096                                    # rows per block (f32 <= 2 MiB)
    chunks = _cdiv(R, cap)
    rt = _round_up(_cdiv(R, chunks), 8)
    Rp = _round_up(R, rt)
    return f, L, R, rt, Rp


def _fold_view(x):
    B, H, W, C = x.shape
    HW = H * W
    f, L, R, rt, Rp = _fold_cfg(HW, C)
    xf = x.reshape(B, R, L)                       # contiguous reshape (free)
    if Rp > R:
        xf = jnp.pad(xf, ((0, 0), (0, Rp - R), (0, 0)))
    return xf, (B, H, W, C, HW, f, L, R, rt, Rp)


def _unfold(y, cfg):
    B, H, W, C, HW, f, L, R, rt, Rp = cfg
    if Rp > R:
        y = y[:, :R, :]
    return y.reshape(B, H, W, C)


def _norm_stats(xf, *, C, count, mode, rt):
    B, Rp, L = xf.shape
    kernel = functools.partial(_stats_kernel, count=count, C=C, mode=mode)
    mean, rstd = pl.pallas_call(
        kernel,
        out_shape=(jax.ShapeDtypeStruct((B, 1, L), jnp.float32),
                   jax.ShapeDtypeStruct((B, 1, L), jnp.float32)),
        grid=(B, Rp // rt),
        in_specs=[pl.BlockSpec((1, rt, L), lambda b, r: (b, r, 0))],
        out_specs=[pl.BlockSpec((1, 1, L), lambda b, r: (b, 0, 0)),
                   pl.BlockSpec((1, 1, L), lambda b, r: (b, 0, 0))],
        compiler_params=pltpu.CompilerParams(
            dimension_semantics=("parallel", "arbitrary"),
            vmem_limit_bytes=_VMEM_LIMIT),
    )(xf)
    return mean, rstd


def _norm_apply(xf, mean, rstd, *, rt, relu=False, scale=1.0, add=None,
                add_spatial=True, out_dtype=jnp.bfloat16):
    B, Rp, L = xf.shape
    x_spec = pl.BlockSpec((1, rt, L), lambda b, r: (b, r, 0))
    v_spec = pl.BlockSpec((1, 1, L), lambda b, r: (b, 0, 0))
    if add is None:
        kernel = functools.partial(_norm_apply_kernel, relu=relu, scale=scale)
        in_specs = [x_spec, v_spec, v_spec]
        args = (xf, mean, rstd)
    else:
        kernel = functools.partial(_norm_apply_add_kernel, scale=scale)
        in_specs = [x_spec, v_spec, v_spec, x_spec if add_spatial else v_spec]
        args = (xf, mean, rstd, add)
    return pl.pallas_call(
        kernel,
        out_shape=jax.ShapeDtypeStruct((B, Rp, L), out_dtype),
        grid=(B, Rp // rt),
        in_specs=in_specs,
        out_specs=x_spec,
        compiler_params=pltpu.CompilerParams(
            dimension_semantics=("parallel", "parallel"),
            vmem_limit_bytes=_VMEM_LIMIT),
    )(*args)


def instance_norm(x, relu):
    xf, cfg = _fold_view(x)
    B, H, W, C, HW, f, L, R, rt, Rp = cfg
    mean, rstd = _norm_stats(xf, C=C, count=HW, mode="in", rt=rt)
    y = _norm_apply(xf, mean, rstd, rt=rt, relu=relu)
    return _unfold(y, cfg)


def instance_norm_add(x, res):
    # InstanceNorm(x) + res  (ResidualBlock tail)
    xf, cfg = _fold_view(x)
    B, H, W, C, HW, f, L, R, rt, Rp = cfg
    rf, _ = _fold_view(res)
    mean, rstd = _norm_stats(xf, C=C, count=HW, mode="in", rt=rt)
    y = _norm_apply(xf, mean, rstd, rt=rt, add=rf, add_spatial=True)
    return _unfold(y, cfg)


def adain(content, style_vec):
    # styled = (c - mean_c) / (std_c + 1e-8) * (0 + 1e-8) + style_mean
    # (expanded style features are spatially constant -> style_std == 0).
    cf, cfg = _fold_view(content)
    B, H, W, C, HW, f, L, R, rt, Rp = cfg
    mean, rstd = _norm_stats(cf, C=C, count=HW, mode="adain", rt=rt)
    s = style_vec.reshape(B, 1, C).astype(jnp.float32)
    if L != C:
        s = jnp.tile(s, (1, 1, L // C))
    y = _norm_apply(cf, mean, rstd, rt=rt, scale=EPS_ADAIN,
                    add=s, add_spatial=False)
    return _unfold(y, cfg)


def global_avg_pool(x):
    # AdaptiveAvgPool2d((1,1)) == the mean part of the stats kernel.
    xf, cfg = _fold_view(x)
    B, H, W, C, HW, f, L, R, rt, Rp = cfg
    mean, _ = _norm_stats(xf, C=C, count=HW, mode="in", rt=rt)
    return mean[:, 0, :C].reshape(B, 1, 1, C)


# ------------------------------ conv plumbing -------------------------------

def _im2col(x, kh, kw, stride, padding):
    # Pure data movement (XLA glue); all MACs happen in the Pallas matmul.
    B, H, W, C = x.shape
    xp = jnp.pad(x, ((0, 0), (padding, padding), (padding, padding), (0, 0)))
    Ho = (H + 2 * padding - kh) // stride + 1
    Wo = (W + 2 * padding - kw) // stride + 1
    cols = []
    for i in range(kh):
        for j in range(kw):
            cols.append(xp[:, i:i + stride * Ho:stride, j:j + stride * Wo:stride, :])
    col = jnp.concatenate(cols, axis=-1)          # (B, Ho, Wo, KH*KW*C) bf16
    return col.reshape(B * Ho * Wo, kh * kw * C), Ho, Wo


def conv2d(x, p, stride=1, padding=0, act="none", out_dtype=jnp.bfloat16):
    B = x.shape[0]
    col, Ho, Wo = _im2col(x.astype(jnp.bfloat16), p["kh"], p["kw"], stride, padding)
    out = matmul_bias_act(col, p["w"], p["b"], act=act, out_dtype=out_dtype)
    return out[:, :p["cout"]].reshape(B, Ho, Wo, p["cout"])


def conv_transpose2d(x, p):
    # nn.ConvTranspose2d(Cin, Cout, 3, stride=2, padding=1, output_padding=1)
    # as ONE matmul: 2x2-window im2col on the bottom/right zero-padded input
    # (K = 4*Cin) against a combined (4*Cin, 4*Cout) subpixel weight, followed
    # by a reshape pixel-shuffle.
    B, H, W, Cin = x.shape
    Cout = p["cout"]
    xp = jnp.pad(x.astype(jnp.bfloat16), ((0, 0), (0, 1), (0, 1), (0, 0)))
    col, _, _ = _im2col(xp, 2, 2, 1, 0)           # (B*H*W, 4*Cin)
    out = matmul_bias_act(col, p["w"], p["b"], act="none",
                          out_dtype=jnp.bfloat16)
    out = out[:, :4 * Cout].reshape(B, H, W, 2, 2, Cout)
    out = jnp.transpose(out, (0, 1, 3, 2, 4, 5))  # (B, H, 2, W, 2, Cout)
    return out.reshape(B, 2 * H, 2 * W, Cout)


# ------------------------------ parameters ----------------------------------

def _conv_params(key, kh, kw, cin, cout):
    k1, k2 = jax.random.split(key)
    bound = 1.0 / jnp.sqrt(kh * kw * cin)
    w = jax.random.uniform(k1, (kh, kw, cin, cout), jnp.float32, -bound, bound)
    b = jax.random.uniform(k2, (cout,), jnp.float32, -bound, bound)
    return w, b


def _convt_params(key, cin, cout, kh, kw):
    k1, k2 = jax.random.split(key)
    bound = 1.0 / jnp.sqrt(cin * kh * kw)
    w = jax.random.uniform(k1, (cin, cout, kh, kw), jnp.float32, -bound, bound)
    b = jax.random.uniform(k2, (cout,), jnp.float32, -bound, bound)
    return w, b


def init_params(key, style_dim=128):
    keys = iter(jax.random.split(key, 24))
    p = {}
    p["enc1"] = _conv_params(next(keys), 9, 9, 3, 32)
    p["enc2"] = _conv_params(next(keys), 3, 3, 32, 64)
    p["enc3"] = _conv_params(next(keys), 3, 3, 64, 128)
    p["res"] = [(_conv_params(next(keys), 3, 3, 128, 128),
                 _conv_params(next(keys), 3, 3, 128, 128)) for _ in range(5)]
    p["dec1"] = _convt_params(next(keys), 128, 64, 3, 3)
    p["dec2"] = _convt_params(next(keys), 64, 32, 3, 3)
    p["dec3"] = _conv_params(next(keys), 9, 9, 32, 3)
    p["s1"] = _conv_params(next(keys), 9, 9, 3, 32)
    p["s2"] = _conv_params(next(keys), 3, 3, 32, 64)
    p["s3"] = _conv_params(next(keys), 3, 3, 64, 128)
    p["s4"] = _conv_params(next(keys), 1, 1, 128, style_dim)
    return p


def _pack_matmul(w2d, b):
    K, N = w2d.shape
    Np = _round_up(N, 128)
    w = jnp.pad(w2d, ((0, 0), (0, Np - N))).astype(jnp.bfloat16)
    bp = jnp.pad(b.astype(jnp.float32), (0, Np - N)).reshape(1, Np)
    return {"w": w, "b": bp}


def _pack_conv(wb):
    w, b = wb
    KH, KW, Cin, Cout = w.shape
    p = _pack_matmul(w.reshape(KH * KW * Cin, Cout), b)
    p.update(kh=KH, kw=KW, cin=Cin, cout=Cout)
    return p


def _pack_deconv(wt, b):
    # Combined subpixel weight.  Output columns grouped by subpixel q=(dr,dc),
    # rows grouped by input tap t in {(m,n),(m,n+1),(m+1,n),(m+1,n+1)}:
    #   out[2m,  2n  ] = x[m,n].w[1,1]
    #   out[2m,  2n+1] = x[m,n].w[1,2] + x[m,n+1].w[1,0]
    #   out[2m+1,2n  ] = x[m,n].w[2,1] + x[m+1,n].w[0,1]
    #   out[2m+1,2n+1] = x[m,n].w[2,2] + x[m,n+1].w[2,0]
    #                  + x[m+1,n].w[0,2] + x[m+1,n+1].w[0,0]
    Cin, Cout = wt.shape[0], wt.shape[1]
    w = jnp.transpose(wt, (2, 3, 0, 1))           # (KH, KW, Cin, Cout)
    z = jnp.zeros((Cin, Cout), jnp.float32)
    rows = [
        [w[1, 1], w[1, 2], w[2, 1], w[2, 2]],     # tap (m,   n)
        [z,       w[1, 0], z,       w[2, 0]],     # tap (m,   n+1)
        [z,       z,       w[0, 1], w[0, 2]],     # tap (m+1, n)
        [z,       z,       z,       w[0, 0]],     # tap (m+1, n+1)
    ]
    wc = jnp.concatenate([jnp.concatenate(r, axis=1) for r in rows], axis=0)
    bc = jnp.tile(b, 4)
    p = _pack_matmul(wc, bc)
    p["cout"] = Cout
    return p


def prepare_params(p):
    q = {name: _pack_conv(p[name])
         for name in ("enc1", "enc2", "enc3", "dec3", "s1", "s2", "s3", "s4")}
    q["res"] = [(_pack_conv(c1), _pack_conv(c2)) for (c1, c2) in p["res"]]
    q["dec1"] = _pack_deconv(*p["dec1"])
    q["dec2"] = _pack_deconv(*p["dec2"])
    return q


# ------------------------------ forward pass ---------------------------------

def _encoder(q, x, names):
    x = instance_norm(conv2d(x, q[names[0]], stride=1, padding=4), relu=True)
    x = instance_norm(conv2d(x, q[names[1]], stride=2, padding=1), relu=True)
    x = instance_norm(conv2d(x, q[names[2]], stride=2, padding=1), relu=True)
    return x


def _residual_block(bp, x):
    p1, p2 = bp
    out = conv2d(x, p1, stride=1, padding=1)
    out = instance_norm(out, relu=True)
    out = conv2d(out, p2, stride=1, padding=1)
    return instance_norm_add(out, x)


def _style_encoder(q, x):
    feats = _encoder(q, x, ("s1", "s2", "s3"))
    pooled = global_avg_pool(feats)                         # (B,1,1,128) f32
    p = q["s4"]                                             # 1x1 conv == matmul
    B = pooled.shape[0]
    out = matmul_bias_act(pooled.reshape(B, p["cin"]), p["w"], p["b"],
                          out_dtype=jnp.float32)
    return out[:, :p["cout"]].reshape(B, 1, 1, p["cout"])


def _decoder(q, x):
    x = instance_norm(conv_transpose2d(x, q["dec1"]), relu=True)
    x = instance_norm(conv_transpose2d(x, q["dec2"]), relu=True)
    return conv2d(x, q["dec3"], stride=1, padding=4, act="tanh",
                  out_dtype=jnp.float32)


def fast_style_network(params, content_nchw, style_nchw):
    content = jnp.transpose(content_nchw, (0, 2, 3, 1))     # NCHW -> NHWC
    style = jnp.transpose(style_nchw, (0, 2, 3, 1))
    content_features = _encoder(params, content, ("enc1", "enc2", "enc3"))
    style_features = _style_encoder(params, style)          # (B,1,1,128)
    styled = adain(content_features, style_features)
    for bp in params["res"]:
        styled = _residual_block(bp, styled)
    out = _decoder(params, styled)
    return jnp.transpose(out, (0, 3, 1, 2))                 # back to NCHW


# ----------------------------------- main ------------------------------------

if __name__ == "__main__":
    key = jax.random.PRNGKey(0)
    kp, kc, ks = jax.random.split(key, 3)
    raw_params = init_params(kp, style_dim=128)
    packed = prepare_params(raw_params)                     # bf16 pack once

    content = jax.random.normal(kc, (2, 3, 16, 16), jnp.float32)
    style = jax.random.normal(ks, (2, 3, 16, 16), jnp.float32)

    fwd = jax.jit(functools.partial(fast_style_network, packed))
    out = jax.block_until_ready(fwd(content, style))
    assert out.shape == (2, 3, 16, 16), out.shape
    assert bool(jnp.all(jnp.isfinite(out)))
    print("KERNEL_OK")
</pallas_src>

<mosaic_0001>
module attributes {stable_mosaic.version = 11 : i64} {
  func.func @_matmul_bias_act_kernel(%arg0: i32, %arg1: i32, %arg2: memref<512x243xbf16, #tpu.memory_space<vmem>>, %arg3: memref<243x128xbf16, #tpu.memory_space<vmem>>, %arg4: memref<1x128xf32, #tpu.memory_space<vmem>>, %arg5: memref<512x128xbf16, #tpu.memory_space<vmem>>) attributes {dimension_semantics = [#tpu.dimension_semantics<parallel>, #tpu.dimension_semantics<parallel>], iteration_bounds = array<i64: 1, 1>, scalar_prefetch = 0 : i64, scratch_operands = 0 : i64, tpu.core_type = #tpu.core_type<tc>, window_params = [{transform_indices = @transform_0, window_bounds = array<i64: 512, 243>}, {transform_indices = @transform_1, window_bounds = array<i64: 243, 128>}, {transform_indices = @transform_2, window_bounds = array<i64: 1, 128>}, {transform_indices = @transform_3, window_bounds = array<i64: 512, 128>}]} {
    %c0 = arith.constant 0 : index
    %c0_0 = arith.constant 0 : index
    %0 = vector.load %arg2[%c0, %c0_0] : memref<512x243xbf16, #tpu.memory_space<vmem>>, vector<512x243xbf16>
    %c0_1 = arith.constant 0 : index
    %c0_2 = arith.constant 0 : index
    %1 = vector.load %arg3[%c0_1, %c0_2] : memref<243x128xbf16, #tpu.memory_space<vmem>>, vector<243x128xbf16>
    %cst = arith.constant dense<0.000000e+00> : vector<512x128xf32>
    %2 = tpu.matmul %0, %1, %cst {dimension_numbers = #tpu.dot_dimension_numbers<[1], [0], [0], [1], [0, 0, 1, 1], [], []>} : vector<512x243xbf16>, vector<243x128xbf16>, vector<512x128xf32> -> vector<512x128xf32>
    %c0_3 = arith.constant 0 : index
    %c0_4 = arith.constant 0 : index
    %3 = vector.load %arg4[%c0_3, %c0_4] : memref<1x128xf32, #tpu.memory_space<vmem>>, vector<1x128xf32>
    %4 = vector.broadcast %3 : vector<1x128xf32> to vector<512x128xf32>
    %5 = arith.addf %2, %4 : vector<512x128xf32>
    %6 = arith.truncf %5 : vector<512x128xf32> to vector<512x128xbf16>
    %c0_5 = arith.constant 0 : index
    %c0_6 = arith.constant 0 : index
    %7 = vector.load %arg5[%c0_5, %c0_6] : memref<512x128xbf16, #tpu.memory_space<vmem>>, vector<512x128xbf16>
    tpu.vector_store %arg5[%c0_5, %c0_6], %6 {strides = array<i32>} : memref<512x128xbf16, #tpu.memory_space<vmem>>, vector<512x128xbf16>,
    return
  }
  func.func @transform_0(%arg0: i32, %arg1: i32) -> (i32, i32) {
    %c0_i32 = arith.constant 0 : i32
    %c0_i32_0 = arith.constant 0 : i32
    return %arg0, %c0_i32 : i32, i32
  }
  func.func @transform_1(%arg0: i32, %arg1: i32) -> (i32, i32) {
    %c0_i32 = arith.constant 0 : i32
    %c0_i32_0 = arith.constant 0 : i32
    return %c0_i32, %arg1 : i32, i32
  }
  func.func @transform_2(%arg0: i32, %arg1: i32) -> (i32, i32) {
    %c0_i32 = arith.constant 0 : i32
    %c0_i32_0 = arith.constant 0 : i32
    return %c0_i32, %arg1 : i32, i32
  }
  func.func @transform_3(%arg0: i32, %arg1: i32) -> (i32, i32) {
    %c0_i32 = arith.constant 0 : i32
    return %arg0, %arg1 : i32, i32
  }
}

module attributes {stable_mosaic.version = 11 : i64} {
  func.func @_stats_kernel(%arg0: i32, %arg1: i32, %arg2: memref<1x64x128xbf16, #tpu.memory_space<vmem>>, %arg3: memref<1x1x128xf32, #tpu.memory_space<vmem>>, %arg4: memref<1x1x128xf32, #tpu.memory_space<vmem>>) attributes {dimension_semantics = [#tpu.dimension_semantics<parallel>, #tpu.dimension_semantics<arbitrary>], iteration_bounds = array<i64: 2, 1>, scalar_prefetch = 0 : i64, scratch_operands = 0 : i64, tpu.core_type = #tpu.core_type<tc>, window_params = [{transform_indices = @transform_0, window_bounds = array<i64: 1, 64, 128>}, {transform_indices = @transform_1, window_bounds = array<i64: 1, 1, 128>}, {transform_indices = @transform_2, window_bounds = array<i64: 1, 1, 128>}]} {
    %c0_i32 = arith.constant 0 : i32
    %0 = arith.cmpi eq, %arg1, %c0_i32 : i32
    %1 = arith.extui %0 : i1 to i32
    %c0_i32_0 = arith.constant 0 : i32
    %2 = arith.cmpi ne, %1, %c0_i32_0 : i32
    scf.if %2 {
      %cst_40 = arith.constant 0.000000e+00 : f32
      %73 = vector.broadcast %cst_40 : f32 to vector<1x1x128xf32>
      %c0_41 = arith.constant 0 : index
      %c0_42 = arith.constant 0 : index
      %c0_43 = arith.constant 0 : index
      %74 = vector.load %arg3[%c0_41, %c0_42, %c0_43] : memref<1x1x128xf32, #tpu.memory_space<vmem>>, vector<1x1x128xf32>
      tpu.vector_store %arg3[%c0_41, %c0_42, %c0_43], %73 {strides = array<i32>} : memref<1x1x128xf32, #tpu.memory_space<vmem>>, vector<1x1x128xf32>,
      %cst_44 = arith.constant 0.000000e+00 : f32
      %75 = vector.broadcast %cst_44 : f32 to vector<1x1x128xf32>
      %c0_45 = arith.constant 0 : index
      %c0_46 = arith.constant 0 : index
      %c0_47 = arith.constant 0 : index
      %76 = vector.load %arg4[%c0_45, %c0_46, %c0_47] : memref<1x1x128xf32, #tpu.memory_space<vmem>>, vector<1x1x128xf32>
      tpu.vector_store %arg4[%c0_45, %c0_46, %c0_47], %75 {strides = array<i32>} : memref<1x1x128xf32, #tpu.memory_space<vmem>>, vector<1x1x128xf32>,
    } else {
    }
    %c0 = arith.constant 0 : index
    %c0_1 = arith.constant 0 : index
    %c0_2 = arith.constant 0 : index
    %3 = vector.load %arg2[%c0, %c0_1, %c0_2] : memref<1x64x128xbf16, #tpu.memory_space<vmem>>, vector<1x64x128xbf16>
    %4 = arith.extf %3 : vector<1x64x128xbf16> to vector<1x64x128xf32>
    %c0_3 = arith.constant 0 : index
    %c0_4 = arith.constant 0 : index
    %c0_5 = arith.constant 0 : index
    %5 = vector.load %arg3[%c0_3, %c0_4, %c0_5] : memref<1x1x128xf32, #tpu.memory_space<vmem>>, vector<1x1x128xf32>
    %cst = arith.constant dense<0.000000e+00> : vector<1x128xf32>
    %6 = vector.multi_reduction <add>, %4, %cst [1] : vector<1x64x128xf32> to vector<1x128xf32>
    %7 = vector.shape_cast %6 : vector<1x128xf32> to vector<1x1x128xf32>
    %8 = arith.addf %5, %7 : vector<1x1x128xf32>
    %c0_6 = arith.constant 0 : index
    %c0_7 = arith.constant 0 : index
    %c0_8 = arith.constant 0 : index
    %9 = vector.load %arg3[%c0_6, %c0_7, %c0_8] : memref<1x1x128xf32, #tpu.memory_space<vmem>>, vector<1x1x128xf32>
    tpu.vector_store %arg3[%c0_6, %c0_7, %c0_8], %8 {strides = array<i32>} : memref<1x1x128xf32, #tpu.memory_space<vmem>>, vector<1x1x128xf32>,
    %c0_9 = arith.constant 0 : index
    %c0_10 = arith.constant 0 : index
    %c0_11 = arith.constant 0 : index
    %10 = vector.load %arg4[%c0_9, %c0_10, %c0_11] : memref<1x1x128xf32, #tpu.memory_space<vmem>>, vector<1x1x128xf32>
    %11 = arith.mulf %4, %4 : vector<1x64x128xf32>
    %cst_12 = arith.constant dense<0.000000e+00> : vector<1x128xf32>
    %12 = vector.multi_reduction <add>, %11, %cst_12 [1] : vector<1x64x128xf32> to vector<1x128xf32>
    %13 = vector.shape_cast %12 : vector<1x128xf32> to vector<1x1x128xf32>
    %14 = arith.addf %10, %13 : vector<1x1x128xf32>
    %c0_13 = arith.constant 0 : index
    %c0_14 = arith.constant 0 : index
    %c0_15 = arith.constant 0 : index
    %15 = vector.load %arg4[%c0_13, %c0_14, %c0_15] : memref<1x1x128xf32, #tpu.memory_space<vmem>>, vector<1x1x128xf32>
    tpu.vector_store %arg4[%c0_13, %c0_14, %c0_15], %14 {strides = array<i32>} : memref<1x1x128xf32, #tpu.memory_space<vmem>>, vector<1x1x128xf32>,
    %c0_16 = arith.constant 0 : index
    %c0_17 = arith.constant 0 : index
    %c0_18 = arith.constant 0 : index
    %16 = vector.load %arg3[%c0_16, %c0_17, %c0_18] : memref<1x1x128xf32, #tpu.memory_space<vmem>>, vector<1x1x128xf32>
    %17 = vector.shape_cast %16 : vector<1x1x128xf32> to vector<1x128xf32>
    %c0_19 = arith.constant 0 : index
    %c0_20 = arith.constant 0 : index
    %c0_21 = arith.constant 0 : index
    %18 = vector.load %arg4[%c0_19, %c0_20, %c0_21] : memref<1x1x128xf32, #tpu.memory_space<vmem>>, vector<1x1x128xf32>
    %19 = vector.shape_cast %18 : vector<1x1x128xf32> to vector<1x128xf32>
    %20 = tpu.iota {dimensions = array<i32: 0>} : vector<128x128xi32>
    %c32_i32 = arith.constant 32 : i32
    %c0_i32_22 = arith.constant 0 : i32
    %21 = arith.cmpi eq, %c32_i32, %c0_i32_22 : i32
    %c1_i32 = arith.constant 1 : i32
    %22 = arith.select %21, %c1_i32, %c32_i32 : i32
    %23 = vector.broadcast %22 : i32 to vector<128x128xi32>
    %24 = arith.remsi %20, %23 : vector<128x128xi32>
    %c0_i32_23 = arith.constant 0 : i32
    %25 = vector.broadcast %c0_i32_23 : i32 to vector<128x128xi32>
    %26 = arith.cmpi ne, %24, %25 : vector<128x128xi32>
    %c0_i32_24 = arith.constant 0 : i32
    %27 = vector.broadcast %c0_i32_24 : i32 to vector<128x128xi32>
    %28 = arith.cmpi slt, %24, %27 : vector<128x128xi32>
    %c0_i32_25 = arith.constant 0 : i32
    %29 = arith.cmpi slt, %22, %c0_i32_25 : i32
    %30 = vector.broadcast %29 : i1 to vector<128x128xi1>
    %31 = vector.broadcast %30 : vector<128x128xi1> to vector<128x128xi1>
    %32 = arith.xori %28, %31 : vector<128x128xi1>
    %33 = arith.andi %32, %26 : vector<128x128xi1>
    %34 = vector.broadcast %22 : i32 to vector<128x128xi32>
    %35 = arith.addi %24, %34 : vector<128x128xi32>
    %36 = arith.select %33, %35, %24 : vector<128x128xi1>, vector<128x128xi32>
    %37 = tpu.iota {dimensions = array<i32: 1>} : vector<128x128xi32>
    %c32_i32_26 = arith.constant 32 : i32
    %c0_i32_27 = arith.constant 0 : i32
    %38 = arith.cmpi eq, %c32_i32_26, %c0_i32_27 : i32
    %c1_i32_28 = arith.constant 1 : i32
    %39 = arith.select %38, %c1_i32_28, %c32_i32_26 : i32
    %40 = vector.broadcast %39 : i32 to vector<128x128xi32>
    %41 = arith.remsi %37, %40 : vector<128x128xi32>
    %c0_i32_29 = arith.constant 0 : i32
    %42 = vector.broadcast %c0_i32_29 : i32 to vector<128x128xi32>
    %43 = arith.cmpi ne, %41, %42 : vector<128x128xi32>
    %c0_i32_30 = arith.constant 0 : i32
    %44 = vector.broadcast %c0_i32_30 : i32 to vector<128x128xi32>
    %45 = arith.cmpi slt, %41, %44 : vector<128x128xi32>
    %c0_i32_31 = arith.constant 0 : i32
    %46 = arith.cmpi slt, %39, %c0_i32_31 : i32
    %47 = vector.broadcast %46 : i1 to vector<128x128xi1>
    %48 = vector.broadcast %47 : vector<128x128xi1> to vector<128x128xi1>
    %49 = arith.xori %45, %48 : vector<128x128xi1>
    %50 = arith.andi %49, %43 : vector<128x128xi1>
    %51 = vector.broadcast %39 : i32 to vector<128x128xi32>
    %52 = arith.addi %41, %51 : vector<128x128xi32>
    %53 = arith.select %50, %52, %41 : vector<128x128xi1>, vector<128x128xi32>
    %54 = arith.cmpi eq, %36, %53 : vector<128x128xi32>
    %55 = arith.extui %54 : vector<128x128xi1> to vector<128x128xi32>
    %56 = arith.sitofp %55 : vector<128x128xi32> to vector<128x128xf32>
    %cst_32 = arith.constant dense<0.000000e+00> : vector<1x128xf32>
    %57 = tpu.matmul %17, %56, %cst_32 {dimension_numbers = #tpu.dot_dimension_numbers<[1], [0], [0], [1], [0, 0, 1, 1], [], []>} : vector<1x128xf32>, vector<128x128xf32>, vector<1x128xf32> -> vector<1x128xf32>
    %cst_33 = arith.constant dense<0.000000e+00> : vector<1x128xf32>
    %58 = tpu.matmul %19, %56, %cst_33 {dimension_numbers = #tpu.dot_dimension_numbers<[1], [0], [0], [1], [0, 0, 1, 1], [], []>} : vector<1x128xf32>, vector<128x128xf32>, vector<1x128xf32> -> vector<1x128xf32>
    %cst_34 = arith.constant 2.560000e+02 : f32
    %59 = vector.broadcast %cst_34 : f32 to vector<1x128xf32>
    %60 = arith.divf %57, %59 : vector<1x128xf32>
    %cst_35 = arith.constant 2.560000e+02 : f32
    %61 = vector.broadcast %cst_35 : f32 to vector<1x128xf32>
    %62 = arith.divf %58, %61 : vector<1x128xf32>
    %63 = arith.mulf %60, %60 : vector<1x128xf32>
    %64 = arith.subf %62, %63 : vector<1x128xf32>
    %cst_36 = arith.constant 0.000000e+00 : f32
    %65 = vector.broadcast %cst_36 : f32 to vector<1x128xf32>
    %66 = arith.maximumf %64, %65 : vector<1x128xf32>
    %cst_37 = arith.constant 9.99999974E-6 : f32
    %67 = vector.broadcast %cst_37 : f32 to vector<1x128xf32>
    %68 = arith.addf %66, %67 : vector<1x128xf32>
    %69 = math.rsqrt %68 : vector<1x128xf32>
    %c0_i32_38 = arith.constant 0 : i32
    %70 = arith.cmpi eq, %arg1, %c0_i32_38 : i32
    %71 = arith.extui %70 : i1 to i32
    %c0_i32_39 = arith.constant 0 : i32
    %72 = arith.cmpi ne, %71, %c0_i32_39 : i32
    scf.if %72 {
      %73 = vector.shape_cast %60 : vector<1x128xf32> to vector<1x1x128xf32>
      %c0_40 = arith.constant 0 : index
      %c0_41 = arith.constant 0 : index
      %c0_42 = arith.constant 0 : index
      %74 = vector.load %arg3[%c0_40, %c0_41, %c0_42] : memref<1x1x128xf32, #tpu.memory_space<vmem>>, vector<1x1x128xf32>
      tpu.vector_store %arg3[%c0_40, %c0_41, %c0_42], %73 {strides = array<i32>} : memref<1x1x128xf32, #tpu.memory_space<vmem>>, vector<1x1x128xf32>,
      %75 = vector.shape_cast %69 : vector<1x128xf32> to vector<1x1x128xf32>
      %c0_43 = arith.constant 0 : index
      %c0_44 = arith.constant 0 : index
      %c0_45 = arith.constant 0 : index
      %76 = vector.load %arg4[%c0_43, %c0_44, %c0_45] : memref<1x1x128xf32, #tpu.memory_space<vmem>>, vector<1x1x128xf32>
      tpu.vector_store %arg4[%c0_43, %c0_44, %c0_45], %75 {strides = array<i32>} : memref<1x1x128xf32, #tpu.memory_space<vmem>>, vector<1x1x128xf32>,
    } else {
    }
    return
  }
  func.func @transform_0(%arg0: i32, %arg1: i32) -> (i32, i32, i32) {
    %c0_i32 = arith.constant 0 : i32
    %c0_i32_0 = arith.constant 0 : i32
    return %arg0, %arg1, %c0_i32 : i32, i32, i32
  }
  func.func @transform_1(%arg0: i32, %arg1: i32) -> (i32, i32, i32) {
    %c0_i32 = arith.constant 0 : i32
    %c0_i32_0 = arith.constant 0 : i32
    %c0_i32_1 = arith.constant 0 : i32
    return %arg0, %c0_i32, %c0_i32_0 : i32, i32, i32
  }
  func.func @transform_2(%arg0: i32, %arg1: i32) -> (i32, i32, i32) {
    %c0_i32 = arith.constant 0 : i32
    %c0_i32_0 = arith.constant 0 : i32
    %c0_i32_1 = arith.constant 0 : i32
    return %arg0, %c0_i32, %c0_i32_0 : i32, i32, i32
  }
}

module attributes {stable_mosaic.version = 11 : i64} {
  func.func @_norm_apply_kernel(%arg0: i32, %arg1: i32, %arg2: memref<1x64x128xbf16, #tpu.memory_space<vmem>>, %arg3: memref<1x1x128xf32, #tpu.memory_space<vmem>>, %arg4: memref<1x1x128xf32, #tpu.memory_space<vmem>>, %arg5: memref<1x64x128xbf16, #tpu.memory_space<vmem>>) attributes {dimension_semantics = [#tpu.dimension_semantics<parallel>, #tpu.dimension_semantics<parallel>], iteration_bounds = array<i64: 2, 1>, scalar_prefetch = 0 : i64, scratch_operands = 0 : i64, tpu.core_type = #tpu.core_type<tc>, window_params = [{transform_indices = @transform_0, window_bounds = array<i64: 1, 64, 128>}, {transform_indices = @transform_1, window_bounds = array<i64: 1, 1, 128>}, {transform_indices = @transform_2, window_bounds = array<i64: 1, 1, 128>}, {transform_indices = @transform_3, window_bounds = array<i64: 1, 64, 128>}]} {
    %c0 = arith.constant 0 : index
    %c0_0 = arith.constant 0 : index
    %c0_1 = arith.constant 0 : index
    %0 = vector.load %arg2[%c0, %c0_0, %c0_1] : memref<1x64x128xbf16, #tpu.memory_space<vmem>>, vector<1x64x128xbf16>
    %1 = arith.extf %0 : vector<1x64x128xbf16> to vector<1x64x128xf32>
    %c0_2 = arith.constant 0 : index
    %c0_3 = arith.constant 0 : index
    %c0_4 = arith.constant 0 : index
    %2 = vector.load %arg3[%c0_2, %c0_3, %c0_4] : memref<1x1x128xf32, #tpu.memory_space<vmem>>, vector<1x1x128xf32>
    %3 = vector.broadcast %2 : vector<1x1x128xf32> to vector<1x64x128xf32>
    %4 = arith.subf %1, %3 : vector<1x64x128xf32>
    %c0_5 = arith.constant 0 : index
    %c0_6 = arith.constant 0 : index
    %c0_7 = arith.constant 0 : index
    %5 = vector.load %arg4[%c0_5, %c0_6, %c0_7] : memref<1x1x128xf32, #tpu.memory_space<vmem>>, vector<1x1x128xf32>
    %cst = arith.constant 1.000000e+00 : f32
    %6 = vector.broadcast %cst : f32 to vector<1x1x128xf32>
    %7 = arith.mulf %5, %6 : vector<1x1x128xf32>
    %8 = vector.broadcast %7 : vector<1x1x128xf32> to vector<1x64x128xf32>
    %9 = arith.mulf %4, %8 : vector<1x64x128xf32>
    %cst_8 = arith.constant 0.000000e+00 : f32
    %10 = vector.broadcast %cst_8 : f32 to vector<1x64x128xf32>
    %11 = arith.maximumf %9, %10 : vector<1x64x128xf32>
    %12 = arith.truncf %11 : vector<1x64x128xf32> to vector<1x64x128xbf16>
    %c0_9 = arith.constant 0 : index
    %c0_10 = arith.constant 0 : index
    %c0_11 = arith.constant 0 : index
    %13 = vector.load %arg5[%c0_9, %c0_10, %c0_11] : memref<1x64x128xbf16, #tpu.memory_space<vmem>>, vector<1x64x128xbf16>
    tpu.vector_store %arg5[%c0_9, %c0_10, %c0_11], %12 {strides = array<i32>} : memref<1x64x128xbf16, #tpu.memory_space<vmem>>, vector<1x64x128xbf16>,
    return
  }
  func.func @transform_0(%arg0: i32, %arg1: i32) -> (i32, i32, i32) {
    %c0_i32 = arith.constant 0 : i32
    %c0_i32_0 = arith.constant 0 : i32
    return %arg0, %arg1, %c0_i32 : i32, i32, i32
  }
  func.func @transform_1(%arg0: i32, %arg1: i32) -> (i32, i32, i32) {
    %c0_i32 = arith.constant 0 : i32
    %c0_i32_0 = arith.constant 0 : i32
    %c0_i32_1 = arith.constant 0 : i32
    return %arg0, %c0_i32, %c0_i32_0 : i32, i32, i32
  }
  func.func @transform_2(%arg0: i32, %arg1: i32) -> (i32, i32, i32) {
    %c0_i32 = arith.constant 0 : i32
    %c0_i32_0 = arith.constant 0 : i32
    %c0_i32_1 = arith.constant 0 : i32
    return %arg0, %c0_i32, %c0_i32_0 : i32, i32, i32
  }
  func.func @transform_3(%arg0: i32, %arg1: i32) -> (i32, i32, i32) {
    %c0_i32 = arith.constant 0 : i32
    %c0_i32_0 = arith.constant 0 : i32
    return %arg0, %arg1, %c0_i32 : i32, i32, i32
  }
}

module attributes {stable_mosaic.version = 11 : i64} {
  func.func @_matmul_bias_act_kernel(%arg0: i32, %arg1: i32, %arg2: memref<128x288xbf16, #tpu.memory_space<vmem>>, %arg3: memref<288x128xbf16, #tpu.memory_space<vmem>>, %arg4: memref<1x128xf32, #tpu.memory_space<vmem>>, %arg5: memref<128x128xbf16, #tpu.memory_space<vmem>>) attributes {dimension_semantics = [#tpu.dimension_semantics<parallel>, #tpu.dimension_semantics<parallel>], iteration_bounds = array<i64: 1, 1>, scalar_prefetch = 0 : i64, scratch_operands = 0 : i64, tpu.core_type = #tpu.core_type<tc>, window_params = [{transform_indices = @transform_0, window_bounds = array<i64: 128, 288>}, {transform_indices = @transform_1, window_bounds = array<i64: 288, 128>}, {transform_indices = @transform_2, window_bounds = array<i64: 1, 128>}, {transform_indices = @transform_3, window_bounds = array<i64: 128, 128>}]} {
    %c0 = arith.constant 0 : index
    %c0_0 = arith.constant 0 : index
    %0 = vector.load %arg2[%c0, %c0_0] : memref<128x288xbf16, #tpu.memory_space<vmem>>, vector<128x288xbf16>
    %c0_1 = arith.constant 0 : index
    %c0_2 = arith.constant 0 : index
    %1 = vector.load %arg3[%c0_1, %c0_2] : memref<288x128xbf16, #tpu.memory_space<vmem>>, vector<288x128xbf16>
    %cst = arith.constant dense<0.000000e+00> : vector<128x128xf32>
    %2 = tpu.matmul %0, %1, %cst {dimension_numbers = #tpu.dot_dimension_numbers<[1], [0], [0], [1], [0, 0, 1, 1], [], []>} : vector<128x288xbf16>, vector<288x128xbf16>, vector<128x128xf32> -> vector<128x128xf32>
    %c0_3 = arith.constant 0 : index
    %c0_4 = arith.constant 0 : index
    %3 = vector.load %arg4[%c0_3, %c0_4] : memref<1x128xf32, #tpu.memory_space<vmem>>, vector<1x128xf32>
    %4 = vector.broadcast %3 : vector<1x128xf32> to vector<128x128xf32>
    %5 = arith.addf %2, %4 : vector<128x128xf32>
    %6 = arith.truncf %5 : vector<128x128xf32> to vector<128x128xbf16>
    %c0_5 = arith.constant 0 : index
    %c0_6 = arith.constant 0 : index
    %7 = vector.load %arg5[%c0_5, %c0_6] : memref<128x128xbf16, #tpu.memory_space<vmem>>, vector<128x128xbf16>
    tpu.vector_store %arg5[%c0_5, %c0_6], %6 {strides = array<i32>} : memref<128x128xbf16, #tpu.memory_space<vmem>>, vector<128x128xbf16>,
    return
  }
  func.func @transform_0(%arg0: i32, %arg1: i32) -> (i32, i32) {
    %c0_i32 = arith.constant 0 : i32
    %c0_i32_0 = arith.constant 0 : i32
    return %arg0, %c0_i32 : i32, i32
  }
  func.func @transform_1(%arg0: i32, %arg1: i32) -> (i32, i32) {
    %c0_i32 = arith.constant 0 : i32
    %c0_i32_0 = arith.constant 0 : i32
    return %c0_i32, %arg1 : i32, i32
  }
  func.func @transform_2(%arg0: i32, %arg1: i32) -> (i32, i32) {
    %c0_i32 = arith.constant 0 : i32
    %c0_i32_0 = arith.constant 0 : i32
    return %c0_i32, %arg1 : i32, i32
  }
  func.func @transform_3(%arg0: i32, %arg1: i32) -> (i32, i32) {
    %c0_i32 = arith.constant 0 : i32
    return %arg0, %arg1 : i32, i32
  }
}

module attributes {stable_mosaic.version = 11 : i64} {
  func.func @_stats_kernel(%arg0: i32, %arg1: i32, %arg2: memref<1x32x128xbf16, #tpu.memory_space<vmem>>, %arg3: memref<1x1x128xf32, #tpu.memory_space<vmem>>, %arg4: memref<1x1x128xf32, #tpu.memory_space<vmem>>) attributes {dimension_semantics = [#tpu.dimension_semantics<parallel>, #tpu.dimension_semantics<arbitrary>], iteration_bounds = array<i64: 2, 1>, scalar_prefetch = 0 : i64, scratch_operands = 0 : i64, tpu.core_type = #tpu.core_type<tc>, window_params = [{transform_indices = @transform_0, window_bounds = array<i64: 1, 32, 128>}, {transform_indices = @transform_1, window_bounds = array<i64: 1, 1, 128>}, {transform_indices = @transform_2, window_bounds = array<i64: 1, 1, 128>}]} {
    %c0_i32 = arith.constant 0 : i32
    %0 = arith.cmpi eq, %arg1, %c0_i32 : i32
    %1 = arith.extui %0 : i1 to i32
    %c0_i32_0 = arith.constant 0 : i32
    %2 = arith.cmpi ne, %1, %c0_i32_0 : i32
    scf.if %2 {
      %cst_40 = arith.constant 0.000000e+00 : f32
      %73 = vector.broadcast %cst_40 : f32 to vector<1x1x128xf32>
      %c0_41 = arith.constant 0 : index
      %c0_42 = arith.constant 0 : index
      %c0_43 = arith.constant 0 : index
      %74 = vector.load %arg3[%c0_41, %c0_42, %c0_43] : memref<1x1x128xf32, #tpu.memory_space<vmem>>, vector<1x1x128xf32>
      tpu.vector_store %arg3[%c0_41, %c0_42, %c0_43], %73 {strides = array<i32>} : memref<1x1x128xf32, #tpu.memory_space<vmem>>, vector<1x1x128xf32>,
      %cst_44 = arith.constant 0.000000e+00 : f32
      %75 = vector.broadcast %cst_44 : f32 to vector<1x1x128xf32>
      %c0_45 = arith.constant 0 : index
      %c0_46 = arith.constant 0 : index
      %c0_47 = arith.constant 0 : index
      %76 = vector.load %arg4[%c0_45, %c0_46, %c0_47] : memref<1x1x128xf32, #tpu.memory_space<vmem>>, vector<1x1x128xf32>
      tpu.vector_store %arg4[%c0_45, %c0_46, %c0_47], %75 {strides = array<i32>} : memref<1x1x128xf32, #tpu.memory_space<vmem>>, vector<1x1x128xf32>,
    } else {
    }
    %c0 = arith.constant 0 : index
    %c0_1 = arith.constant 0 : index
    %c0_2 = arith.constant 0 : index
    %3 = vector.load %arg2[%c0, %c0_1, %c0_2] : memref<1x32x128xbf16, #tpu.memory_space<vmem>>, vector<1x32x128xbf16>
    %4 = arith.extf %3 : vector<1x32x128xbf16> to vector<1x32x128xf32>
    %c0_3 = arith.constant 0 : index
    %c0_4 = arith.constant 0 : index
    %c0_5 = arith.constant 0 : index
    %5 = vector.load %arg3[%c0_3, %c0_4, %c0_5] : memref<1x1x128xf32, #tpu.memory_space<vmem>>, vector<1x1x128xf32>
    %cst = arith.constant dense<0.000000e+00> : vector<1x128xf32>
    %6 = vector.multi_reduction <add>, %4, %cst [1] : vector<1x32x128xf32> to vector<1x128xf32>
    %7 = vector.shape_cast %6 : vector<1x128xf32> to vector<1x1x128xf32>
    %8 = arith.addf %5, %7 : vector<1x1x128xf32>
    %c0_6 = arith.constant 0 : index
    %c0_7 = arith.constant 0 : index
    %c0_8 = arith.constant 0 : index
    %9 = vector.load %arg3[%c0_6, %c0_7, %c0_8] : memref<1x1x128xf32, #tpu.memory_space<vmem>>, vector<1x1x128xf32>
    tpu.vector_store %arg3[%c0_6, %c0_7, %c0_8], %8 {strides = array<i32>} : memref<1x1x128xf32, #tpu.memory_space<vmem>>, vector<1x1x128xf32>,
    %c0_9 = arith.constant 0 : index
    %c0_10 = arith.constant 0 : index
    %c0_11 = arith.constant 0 : index
    %10 = vector.load %arg4[%c0_9, %c0_10, %c0_11] : memref<1x1x128xf32, #tpu.memory_space<vmem>>, vector<1x1x128xf32>
    %11 = arith.mulf %4, %4 : vector<1x32x128xf32>
    %cst_12 = arith.constant dense<0.000000e+00> : vector<1x128xf32>
    %12 = vector.multi_reduction <add>, %11, %cst_12 [1] : vector<1x32x128xf32> to vector<1x128xf32>
    %13 = vector.shape_cast %12 : vector<1x128xf32> to vector<1x1x128xf32>
    %14 = arith.addf %10, %13 : vector<1x1x128xf32>
    %c0_13 = arith.constant 0 : index
    %c0_14 = arith.constant 0 : index
    %c0_15 = arith.constant 0 : index
    %15 = vector.load %arg4[%c0_13, %c0_14, %c0_15] : memref<1x1x128xf32, #tpu.memory_space<vmem>>, vector<1x1x128xf32>
    tpu.vector_store %arg4[%c0_13, %c0_14, %c0_15], %14 {strides = array<i32>} : memref<1x1x128xf32, #tpu.memory_space<vmem>>, vector<1x1x128xf32>,
    %c0_16 = arith.constant 0 : index
    %c0_17 = arith.constant 0 : index
    %c0_18 = arith.constant 0 : index
    %16 = vector.load %arg3[%c0_16, %c0_17, %c0_18] : memref<1x1x128xf32, #tpu.memory_space<vmem>>, vector<1x1x128xf32>
    %17 = vector.shape_cast %16 : vector<1x1x128xf32> to vector<1x128xf32>
    %c0_19 = arith.constant 0 : index
    %c0_20 = arith.constant 0 : index
    %c0_21 = arith.constant 0 : index
    %18 = vector.load %arg4[%c0_19, %c0_20, %c0_21] : memref<1x1x128xf32, #tpu.memory_space<vmem>>, vector<1x1x128xf32>
    %19 = vector.shape_cast %18 : vector<1x1x128xf32> to vector<1x128xf32>
    %20 = tpu.iota {dimensions = array<i32: 0>} : vector<128x128xi32>
    %c64_i32 = arith.constant 64 : i32
    %c0_i32_22 = arith.constant 0 : i32
    %21 = arith.cmpi eq, %c64_i32, %c0_i32_22 : i32
    %c1_i32 = arith.constant 1 : i32
    %22 = arith.select %21, %c1_i32, %c64_i32 : i32
    %23 = vector.broadcast %22 : i32 to vector<128x128xi32>
    %24 = arith.remsi %20, %23 : vector<128x128xi32>
    %c0_i32_23 = arith.constant 0 : i32
    %25 = vector.broadcast %c0_i32_23 : i32 to vector<128x128xi32>
    %26 = arith.cmpi ne, %24, %25 : vector<128x128xi32>
    %c0_i32_24 = arith.constant 0 : i32
    %27 = vector.broadcast %c0_i32_24 : i32 to vector<128x128xi32>
    %28 = arith.cmpi slt, %24, %27 : vector<128x128xi32>
    %c0_i32_25 = arith.constant 0 : i32
    %29 = arith.cmpi slt, %22, %c0_i32_25 : i32
    %30 = vector.broadcast %29 : i1 to vector<128x128xi1>
    %31 = vector.broadcast %30 : vector<128x128xi1> to vector<128x128xi1>
    %32 = arith.xori %28, %31 : vector<128x128xi1>
    %33 = arith.andi %32, %26 : vector<128x128xi1>
    %34 = vector.broadcast %22 : i32 to vector<128x128xi32>
    %35 = arith.addi %24, %34 : vector<128x128xi32>
    %36 = arith.select %33, %35, %24 : vector<128x128xi1>, vector<128x128xi32>
    %37 = tpu.iota {dimensions = array<i32: 1>} : vector<128x128xi32>
    %c64_i32_26 = arith.constant 64 : i32
    %c0_i32_27 = arith.constant 0 : i32
    %38 = arith.cmpi eq, %c64_i32_26, %c0_i32_27 : i32
    %c1_i32_28 = arith.constant 1 : i32
    %39 = arith.select %38, %c1_i32_28, %c64_i32_26 : i32
    %40 = vector.broadcast %39 : i32 to vector<128x128xi32>
    %41 = arith.remsi %37, %40 : vector<128x128xi32>
    %c0_i32_29 = arith.constant 0 : i32
    %42 = vector.broadcast %c0_i32_29 : i32 to vector<128x128xi32>
    %43 = arith.cmpi ne, %41, %42 : vector<128x128xi32>
    %c0_i32_30 = arith.constant 0 : i32
    %44 = vector.broadcast %c0_i32_30 : i32 to vector<128x128xi32>
    %45 = arith.cmpi slt, %41, %44 : vector<128x128xi32>
    %c0_i32_31 = arith.constant 0 : i32
    %46 = arith.cmpi slt, %39, %c0_i32_31 : i32
    %47 = vector.broadcast %46 : i1 to vector<128x128xi1>
    %48 = vector.broadcast %47 : vector<128x128xi1> to vector<128x128xi1>
    %49 = arith.xori %45, %48 : vector<128x128xi1>
    %50 = arith.andi %49, %43 : vector<128x128xi1>
    %51 = vector.broadcast %39 : i32 to vector<128x128xi32>
    %52 = arith.addi %41, %51 : vector<128x128xi32>
    %53 = arith.select %50, %52, %41 : vector<128x128xi1>, vector<128x128xi32>
    %54 = arith.cmpi eq, %36, %53 : vector<128x128xi32>
    %55 = arith.extui %54 : vector<128x128xi1> to vector<128x128xi32>
    %56 = arith.sitofp %55 : vector<128x128xi32> to vector<128x128xf32>
    %cst_32 = arith.constant dense<0.000000e+00> : vector<1x128xf32>
    %57 = tpu.matmul %17, %56, %cst_32 {dimension_numbers = #tpu.dot_dimension_numbers<[1], [0], [0], [1], [0, 0, 1, 1], [], []>} : vector<1x128xf32>, vector<128x128xf32>, vector<1x128xf32> -> vector<1x128xf32>
    %cst_33 = arith.constant dense<0.000000e+00> : vector<1x128xf32>
    %58 = tpu.matmul %19, %56, %cst_33 {dimension_numbers = #tpu.dot_dimension_numbers<[1], [0], [0], [1], [0, 0, 1, 1], [], []>} : vector<1x128xf32>, vector<128x128xf32>, vector<1x128xf32> -> vector<1x128xf32>
    %cst_34 = arith.constant 6.400000e+01 : f32
    %59 = vector.broadcast %cst_34 : f32 to vector<1x128xf32>
    %60 = arith.divf %57, %59 : vector<1x128xf32>
    %cst_35 = arith.constant 6.400000e+01 : f32
    %61 = vector.broadcast %cst_35 : f32 to vector<1x128xf32>
    %62 = arith.divf %58, %61 : vector<1x128xf32>
    %63 = arith.mulf %60, %60 : vector<1x128xf32>
    %64 = arith.subf %62, %63 : vector<1x128xf32>
    %cst_36 = arith.constant 0.000000e+00 : f32
    %65 = vector.broadcast %cst_36 : f32 to vector<1x128xf32>
    %66 = arith.maximumf %64, %65 : vector<1x128xf32>
    %cst_37 = arith.constant 9.99999974E-6 : f32
    %67 = vector.broadcast %cst_37 : f32 to vector<1x128xf32>
    %68 = arith.addf %66, %67 : vector<1x128xf32>
    %69 = math.rsqrt %68 : vector<1x128xf32>
    %c0_i32_38 = arith.constant 0 : i32
    %70 = arith.cmpi eq, %arg1, %c0_i32_38 : i32
    %71 = arith.extui %70 : i1 to i32
    %c0_i32_39 = arith.constant 0 : i32
    %72 = arith.cmpi ne, %71, %c0_i32_39 : i32
    scf.if %72 {
      %73 = vector.shape_cast %60 : vector<1x128xf32> to vector<1x1x128xf32>
      %c0_40 = arith.constant 0 : index
      %c0_41 = arith.constant 0 : index
      %c0_42 = arith.constant 0 : index
      %74 = vector.load %arg3[%c0_40, %c0_41, %c0_42] : memref<1x1x128xf32, #tpu.memory_space<vmem>>, vector<1x1x128xf32>
      tpu.vector_store %arg3[%c0_40, %c0_41, %c0_42], %73 {strides = array<i32>} : memref<1x1x128xf32, #tpu.memory_space<vmem>>, vector<1x1x128xf32>,
      %75 = vector.shape_cast %69 : vector<1x128xf32> to vector<1x1x128xf32>
      %c0_43 = arith.constant 0 : index
      %c0_44 = arith.constant 0 : index
      %c0_45 = arith.constant 0 : index
      %76 = vector.load %arg4[%c0_43, %c0_44, %c0_45] : memref<1x1x128xf32, #tpu.memory_space<vmem>>, vector<1x1x128xf32>
      tpu.vector_store %arg4[%c0_43, %c0_44, %c0_45], %75 {strides = array<i32>} : memref<1x1x128xf32, #tpu.memory_space<vmem>>, vector<1x1x128xf32>,
    } else {
    }
    return
  }
  func.func @transform_0(%arg0: i32, %arg1: i32) -> (i32, i32, i32) {
    %c0_i32 = arith.constant 0 : i32
    %c0_i32_0 = arith.constant 0 : i32
    return %arg0, %arg1, %c0_i32 : i32, i32, i32
  }
  func.func @transform_1(%arg0: i32, %arg1: i32) -> (i32, i32, i32) {
    %c0_i32 = arith.constant 0 : i32
    %c0_i32_0 = arith.constant 0 : i32
    %c0_i32_1 = arith.constant 0 : i32
    return %arg0, %c0_i32, %c0_i32_0 : i32, i32, i32
  }
  func.func @transform_2(%arg0: i32, %arg1: i32) -> (i32, i32, i32) {
    %c0_i32 = arith.constant 0 : i32
    %c0_i32_0 = arith.constant 0 : i32
    %c0_i32_1 = arith.constant 0 : i32
    return %arg0, %c0_i32, %c0_i32_0 : i32, i32, i32
  }
}

module attributes {stable_mosaic.version = 11 : i64} {
  func.func @_norm_apply_kernel(%arg0: i32, %arg1: i32, %arg2: memref<1x32x128xbf16, #tpu.memory_space<vmem>>, %arg3: memref<1x1x128xf32, #tpu.memory_space<vmem>>, %arg4: memref<1x1x128xf32, #tpu.memory_space<vmem>>, %arg5: memref<1x32x128xbf16, #tpu.memory_space<vmem>>) attributes {dimension_semantics = [#tpu.dimension_semantics<parallel>, #tpu.dimension_semantics<parallel>], iteration_bounds = array<i64: 2, 1>, scalar_prefetch = 0 : i64, scratch_operands = 0 : i64, tpu.core_type = #tpu.core_type<tc>, window_params = [{transform_indices = @transform_0, window_bounds = array<i64: 1, 32, 128>}, {transform_indices = @transform_1, window_bounds = array<i64: 1, 1, 128>}, {transform_indices = @transform_2, window_bounds = array<i64: 1, 1, 128>}, {transform_indices = @transform_3, window_bounds = array<i64: 1, 32, 128>}]} {
    %c0 = arith.constant 0 : index
    %c0_0 = arith.constant 0 : index
    %c0_1 = arith.constant 0 : index
    %0 = vector.load %arg2[%c0, %c0_0, %c0_1] : memref<1x32x128xbf16, #tpu.memory_space<vmem>>, vector<1x32x128xbf16>
    %1 = arith.extf %0 : vector<1x32x128xbf16> to vector<1x32x128xf32>
    %c0_2 = arith.constant 0 : index
    %c0_3 = arith.constant 0 : index
    %c0_4 = arith.constant 0 : index
    %2 = vector.load %arg3[%c0_2, %c0_3, %c0_4] : memref<1x1x128xf32, #tpu.memory_space<vmem>>, vector<1x1x128xf32>
    %3 = vector.broadcast %2 : vector<1x1x128xf32> to vector<1x32x128xf32>
    %4 = arith.subf %1, %3 : vector<1x32x128xf32>
    %c0_5 = arith.constant 0 : index
    %c0_6 = arith.constant 0 : index
    %c0_7 = arith.constant 0 : index
    %5 = vector.load %arg4[%c0_5, %c0_6, %c0_7] : memref<1x1x128xf32, #tpu.memory_space<vmem>>, vector<1x1x128xf32>
    %cst = arith.constant 1.000000e+00 : f32
    %6 = vector.broadcast %cst : f32 to vector<1x1x128xf32>
    %7 = arith.mulf %5, %6 : vector<1x1x128xf32>
    %8 = vector.broadcast %7 : vector<1x1x128xf32> to vector<1x32x128xf32>
    %9 = arith.mulf %4, %8 : vector<1x32x128xf32>
    %cst_8 = arith.constant 0.000000e+00 : f32
    %10 = vector.broadcast %cst_8 : f32 to vector<1x32x128xf32>
    %11 = arith.maximumf %9, %10 : vector<1x32x128xf32>
    %12 = arith.truncf %11 : vector<1x32x128xf32> to vector<1x32x128xbf16>
    %c0_9 = arith.constant 0 : index
    %c0_10 = arith.constant 0 : index
    %c0_11 = arith.constant 0 : index
    %13 = vector.load %arg5[%c0_9, %c0_10, %c0_11] : memref<1x32x128xbf16, #tpu.memory_space<vmem>>, vector<1x32x128xbf16>
    tpu.vector_store %arg5[%c0_9, %c0_10, %c0_11], %12 {strides = array<i32>} : memref<1x32x128xbf16, #tpu.memory_space<vmem>>, vector<1x32x128xbf16>,
    return
  }
  func.func @transform_0(%arg0: i32, %arg1: i32) -> (i32, i32, i32) {
    %c0_i32 = arith.constant 0 : i32
    %c0_i32_0 = arith.constant 0 : i32
    return %arg0, %arg1, %c0_i32 : i32, i32, i32
  }
  func.func @transform_1(%arg0: i32, %arg1: i32) -> (i32, i32, i32) {
    %c0_i32 = arith.constant 0 : i32
    %c0_i32_0 = arith.constant 0 : i32
    %c0_i32_1 = arith.constant 0 : i32
    return %arg0, %c0_i32, %c0_i32_0 : i32, i32, i32
  }
  func.func @transform_2(%arg0: i32, %arg1: i32) -> (i32, i32, i32) {
    %c0_i32 = arith.constant 0 : i32
    %c0_i32_0 = arith.constant 0 : i32
    %c0_i32_1 = arith.constant 0 : i32
    return %arg0, %c0_i32, %c0_i32_0 : i32, i32, i32
  }
  func.func @transform_3(%arg0: i32, %arg1: i32) -> (i32, i32, i32) {
    %c0_i32 = arith.constant 0 : i32
    %c0_i32_0 = arith.constant 0 : i32
    return %arg0, %arg1, %c0_i32 : i32, i32, i32
  }
}

module attributes {stable_mosaic.version = 11 : i64} {
  func.func @_matmul_bias_act_kernel(%arg0: i32, %arg1: i32, %arg2: memref<32x576xbf16, #tpu.memory_space<vmem>>, %arg3: memref<576x128xbf16, #tpu.memory_space<vmem>>, %arg4: memref<1x128xf32, #tpu.memory_space<vmem>>, %arg5: memref<32x128xbf16, #tpu.memory_space<vmem>>) attributes {dimension_semantics = [#tpu.dimension_semantics<parallel>, #tpu.dimension_semantics<parallel>], iteration_bounds = array<i64: 1, 1>, scalar_prefetch = 0 : i64, scratch_operands = 0 : i64, tpu.core_type = #tpu.core_type<tc>, window_params = [{transform_indices = @transform_0, window_bounds = array<i64: 32, 576>}, {transform_indices = @transform_1, window_bounds = array<i64: 576, 128>}, {transform_indices = @transform_2, window_bounds = array<i64: 1, 128>}, {transform_indices = @transform_3, window_bounds = array<i64: 32, 128>}]} {
    %c0 = arith.constant 0 : index
    %c0_0 = arith.constant 0 : index
    %0 = vector.load %arg2[%c0, %c0_0] : memref<32x576xbf16, #tpu.memory_space<vmem>>, vector<32x576xbf16>
    %c0_1 = arith.constant 0 : index
    %c0_2 = arith.constant 0 : index
    %1 = vector.load %arg3[%c0_1, %c0_2] : memref<576x128xbf16, #tpu.memory_space<vmem>>, vector<576x128xbf16>
    %cst = arith.constant dense<0.000000e+00> : vector<32x128xf32>
    %2 = tpu.matmul %0, %1, %cst {dimension_numbers = #tpu.dot_dimension_numbers<[1], [0], [0], [1], [0, 0, 1, 1], [], []>} : vector<32x576xbf16>, vector<576x128xbf16>, vector<32x128xf32> -> vector<32x128xf32>
    %c0_3 = arith.constant 0 : index
    %c0_4 = arith.constant 0 : index
    %3 = vector.load %arg4[%c0_3, %c0_4] : memref<1x128xf32, #tpu.memory_space<vmem>>, vector<1x128xf32>
    %4 = vector.broadcast %3 : vector<1x128xf32> to vector<32x128xf32>
    %5 = arith.addf %2, %4 : vector<32x128xf32>
    %6 = arith.truncf %5 : vector<32x128xf32> to vector<32x128xbf16>
    %c0_5 = arith.constant 0 : index
    %c0_6 = arith.constant 0 : index
    %7 = vector.load %arg5[%c0_5, %c0_6] : memref<32x128xbf16, #tpu.memory_space<vmem>>, vector<32x128xbf16>
    tpu.vector_store %arg5[%c0_5, %c0_6], %6 {strides = array<i32>} : memref<32x128xbf16, #tpu.memory_space<vmem>>, vector<32x128xbf16>,
    return
  }
  func.func @transform_0(%arg0: i32, %arg1: i32) -> (i32, i32) {
    %c0_i32 = arith.constant 0 : i32
    %c0_i32_0 = arith.constant 0 : i32
    return %arg0, %c0_i32 : i32, i32
  }
  func.func @transform_1(%arg0: i32, %arg1: i32) -> (i32, i32) {
    %c0_i32 = arith.constant 0 : i32
    %c0_i32_0 = arith.constant 0 : i32
    return %c0_i32, %arg1 : i32, i32
  }
  func.func @transform_2(%arg0: i32, %arg1: i32) -> (i32, i32) {
    %c0_i32 = arith.constant 0 : i32
    %c0_i32_0 = arith.constant 0 : i32
    return %c0_i32, %arg1 : i32, i32
  }
  func.func @transform_3(%arg0: i32, %arg1: i32) -> (i32, i32) {
    %c0_i32 = arith.constant 0 : i32
    return %arg0, %arg1 : i32, i32
  }
}

module attributes {stable_mosaic.version = 11 : i64} {
  func.func @_norm_apply_kernel(%arg0: i32, %arg1: i32, %arg2: memref<1x16x128xbf16, #tpu.memory_space<vmem>>, %arg3: memref<1x1x128xf32, #tpu.memory_space<vmem>>, %arg4: memref<1x1x128xf32, #tpu.memory_space<vmem>>, %arg5: memref<1x16x128xbf16, #tpu.memory_space<vmem>>) attributes {dimension_semantics = [#tpu.dimension_semantics<parallel>, #tpu.dimension_semantics<parallel>], iteration_bounds = array<i64: 2, 1>, scalar_prefetch = 0 : i64, scratch_operands = 0 : i64, tpu.core_type = #tpu.core_type<tc>, window_params = [{transform_indices = @transform_0, window_bounds = array<i64: 1, 16, 128>}, {transform_indices = @transform_1, window_bounds = array<i64: 1, 1, 128>}, {transform_indices = @transform_2, window_bounds = array<i64: 1, 1, 128>}, {transform_indices = @transform_3, window_bounds = array<i64: 1, 16, 128>}]} {
    %c0 = arith.constant 0 : index
    %c0_0 = arith.constant 0 : index
    %c0_1 = arith.constant 0 : index
    %0 = vector.load %arg2[%c0, %c0_0, %c0_1] : memref<1x16x128xbf16, #tpu.memory_space<vmem>>, vector<1x16x128xbf16>
    %1 = arith.extf %0 : vector<1x16x128xbf16> to vector<1x16x128xf32>
    %c0_2 = arith.constant 0 : index
    %c0_3 = arith.constant 0 : index
    %c0_4 = arith.constant 0 : index
    %2 = vector.load %arg3[%c0_2, %c0_3, %c0_4] : memref<1x1x128xf32, #tpu.memory_space<vmem>>, vector<1x1x128xf32>
    %3 = vector.broadcast %2 : vector<1x1x128xf32> to vector<1x16x128xf32>
    %4 = arith.subf %1, %3 : vector<1x16x128xf32>
    %c0_5 = arith.constant 0 : index
    %c0_6 = arith.constant 0 : index
    %c0_7 = arith.constant 0 : index
    %5 = vector.load %arg4[%c0_5, %c0_6, %c0_7] : memref<1x1x128xf32, #tpu.memory_space<vmem>>, vector<1x1x128xf32>
    %cst = arith.constant 1.000000e+00 : f32
    %6 = vector.broadcast %cst : f32 to vector<1x1x128xf32>
    %7 = arith.mulf %5, %6 : vector<1x1x128xf32>
    %8 = vector.broadcast %7 : vector<1x1x128xf32> to vector<1x16x128xf32>
    %9 = arith.mulf %4, %8 : vector<1x16x128xf32>
    %cst_8 = arith.constant 0.000000e+00 : f32
    %10 = vector.broadcast %cst_8 : f32 to vector<1x16x128xf32>
    %11 = arith.maximumf %9, %10 : vector<1x16x128xf32>
    %12 = arith.truncf %11 : vector<1x16x128xf32> to vector<1x16x128xbf16>
    %c0_9 = arith.constant 0 : index
    %c0_10 = arith.constant 0 : index
    %c0_11 = arith.constant 0 : index
    %13 = vector.load %arg5[%c0_9, %c0_10, %c0_11] : memref<1x16x128xbf16, #tpu.memory_space<vmem>>, vector<1x16x128xbf16>
    tpu.vector_store %arg5[%c0_9, %c0_10, %c0_11], %12 {strides = array<i32>} : memref<1x16x128xbf16, #tpu.memory_space<vmem>>, vector<1x16x128xbf16>,
    return
  }
  func.func @transform_0(%arg0: i32, %arg1: i32) -> (i32, i32, i32) {
    %c0_i32 = arith.constant 0 : i32
    %c0_i32_0 = arith.constant 0 : i32
    return %arg0, %arg1, %c0_i32 : i32, i32, i32
  }
  func.func @transform_1(%arg0: i32, %arg1: i32) -> (i32, i32, i32) {
    %c0_i32 = arith.constant 0 : i32
    %c0_i32_0 = arith.constant 0 : i32
    %c0_i32_1 = arith.constant 0 : i32
    return %arg0, %c0_i32, %c0_i32_0 : i32, i32, i32
  }
  func.func @transform_2(%arg0: i32, %arg1: i32) -> (i32, i32, i32) {
    %c0_i32 = arith.constant 0 : i32
    %c0_i32_0 = arith.constant 0 : i32
    %c0_i32_1 = arith.constant 0 : i32
    return %arg0, %c0_i32, %c0_i32_0 : i32, i32, i32
  }
  func.func @transform_3(%arg0: i32, %arg1: i32) -> (i32, i32, i32) {
    %c0_i32 = arith.constant 0 : i32
    %c0_i32_0 = arith.constant 0 : i32
    return %arg0, %arg1, %c0_i32 : i32, i32, i32
  }
}

module attributes {stable_mosaic.version = 11 : i64} {
  func.func @_stats_kernel(%arg0: i32, %arg1: i32, %arg2: memref<1x16x128xbf16, #tpu.memory_space<vmem>>, %arg3: memref<1x1x128xf32, #tpu.memory_space<vmem>>, %arg4: memref<1x1x128xf32, #tpu.memory_space<vmem>>) attributes {dimension_semantics = [#tpu.dimension_semantics<parallel>, #tpu.dimension_semantics<arbitrary>], iteration_bounds = array<i64: 2, 1>, scalar_prefetch = 0 : i64, scratch_operands = 0 : i64, tpu.core_type = #tpu.core_type<tc>, window_params = [{transform_indices = @transform_0, window_bounds = array<i64: 1, 16, 128>}, {transform_indices = @transform_1, window_bounds = array<i64: 1, 1, 128>}, {transform_indices = @transform_2, window_bounds = array<i64: 1, 1, 128>}]} {
    %c0_i32 = arith.constant 0 : i32
    %0 = arith.cmpi eq, %arg1, %c0_i32 : i32
    %1 = arith.extui %0 : i1 to i32
    %c0_i32_0 = arith.constant 0 : i32
    %2 = arith.cmpi ne, %1, %c0_i32_0 : i32
    scf.if %2 {
      %cst_28 = arith.constant 0.000000e+00 : f32
      %34 = vector.broadcast %cst_28 : f32 to vector<1x1x128xf32>
      %c0_29 = arith.constant 0 : index
      %c0_30 = arith.constant 0 : index
      %c0_31 = arith.constant 0 : index
      %35 = vector.load %arg3[%c0_29, %c0_30, %c0_31] : memref<1x1x128xf32, #tpu.memory_space<vmem>>, vector<1x1x128xf32>
      tpu.vector_store %arg3[%c0_29, %c0_30, %c0_31], %34 {strides = array<i32>} : memref<1x1x128xf32, #tpu.memory_space<vmem>>, vector<1x1x128xf32>,
      %cst_32 = arith.constant 0.000000e+00 : f32
      %36 = vector.broadcast %cst_32 : f32 to vector<1x1x128xf32>
      %c0_33 = arith.constant 0 : index
      %c0_34 = arith.constant 0 : index
      %c0_35 = arith.constant 0 : index
      %37 = vector.load %arg4[%c0_33, %c0_34, %c0_35] : memref<1x1x128xf32, #tpu.memory_space<vmem>>, vector<1x1x128xf32>
      tpu.vector_store %arg4[%c0_33, %c0_34, %c0_35], %36 {strides = array<i32>} : memref<1x1x128xf32, #tpu.memory_space<vmem>>, vector<1x1x128xf32>,
    } else {
    }
    %c0 = arith.constant 0 : index
    %c0_1 = arith.constant 0 : index
    %c0_2 = arith.constant 0 : index
    %3 = vector.load %arg2[%c0, %c0_1, %c0_2] : memref<1x16x128xbf16, #tpu.memory_space<vmem>>, vector<1x16x128xbf16>
    %4 = arith.extf %3 : vector<1x16x128xbf16> to vector<1x16x128xf32>
    %c0_3 = arith.constant 0 : index
    %c0_4 = arith.constant 0 : index
    %c0_5 = arith.constant 0 : index
    %5 = vector.load %arg3[%c0_3, %c0_4, %c0_5] : memref<1x1x128xf32, #tpu.memory_space<vmem>>, vector<1x1x128xf32>
    %cst = arith.constant dense<0.000000e+00> : vector<1x128xf32>
    %6 = vector.multi_reduction <add>, %4, %cst [1] : vector<1x16x128xf32> to vector<1x128xf32>
    %7 = vector.shape_cast %6 : vector<1x128xf32> to vector<1x1x128xf32>
    %8 = arith.addf %5, %7 : vector<1x1x128xf32>
    %c0_6 = arith.constant 0 : index
    %c0_7 = arith.constant 0 : index
    %c0_8 = arith.constant 0 : index
    %9 = vector.load %arg3[%c0_6, %c0_7, %c0_8] : memref<1x1x128xf32, #tpu.memory_space<vmem>>, vector<1x1x128xf32>
    tpu.vector_store %arg3[%c0_6, %c0_7, %c0_8], %8 {strides = array<i32>} : memref<1x1x128xf32, #tpu.memory_space<vmem>>, vector<1x1x128xf32>,
    %c0_9 = arith.constant 0 : index
    %c0_10 = arith.constant 0 : index
    %c0_11 = arith.constant 0 : index
    %10 = vector.load %arg4[%c0_9, %c0_10, %c0_11] : memref<1x1x128xf32, #tpu.memory_space<vmem>>, vector<1x1x128xf32>
    %11 = arith.mulf %4, %4 : vector<1x16x128xf32>
    %cst_12 = arith.constant dense<0.000000e+00> : vector<1x128xf32>
    %12 = vector.multi_reduction <add>, %11, %cst_12 [1] : vector<1x16x128xf32> to vector<1x128xf32>
    %13 = vector.shape_cast %12 : vector<1x128xf32> to vector<1x1x128xf32>
    %14 = arith.addf %10, %13 : vector<1x1x128xf32>
    %c0_13 = arith.constant 0 : index
    %c0_14 = arith.constant 0 : index
    %c0_15 = arith.constant 0 : index
    %15 = vector.load %arg4[%c0_13, %c0_14, %c0_15] : memref<1x1x128xf32, #tpu.memory_space<vmem>>, vector<1x1x128xf32>
    tpu.vector_store %arg4[%c0_13, %c0_14, %c0_15], %14 {strides = array<i32>} : memref<1x1x128xf32, #tpu.memory_space<vmem>>, vector<1x1x128xf32>,
    %c0_16 = arith.constant 0 : index
    %c0_17 = arith.constant 0 : index
    %c0_18 = arith.constant 0 : index
    %16 = vector.load %arg3[%c0_16, %c0_17, %c0_18] : memref<1x1x128xf32, #tpu.memory_space<vmem>>, vector<1x1x128xf32>
    %17 = vector.shape_cast %16 : vector<1x1x128xf32> to vector<1x128xf32>
    %c0_19 = arith.constant 0 : index
    %c0_20 = arith.constant 0 : index
    %c0_21 = arith.constant 0 : index
    %18 = vector.load %arg4[%c0_19, %c0_20, %c0_21] : memref<1x1x128xf32, #tpu.memory_space<vmem>>, vector<1x1x128xf32>
    %19 = vector.shape_cast %18 : vector<1x1x128xf32> to vector<1x128xf32>
    %cst_22 = arith.constant 1.600000e+01 : f32
    %20 = vector.broadcast %cst_22 : f32 to vector<1x128xf32>
    %21 = arith.divf %17, %20 : vector<1x128xf32>
    %cst_23 = arith.constant 1.600000e+01 : f32
    %22 = vector.broadcast %cst_23 : f32 to vector<1x128xf32>
    %23 = arith.divf %19, %22 : vector<1x128xf32>
    %24 = arith.mulf %21, %21 : vector<1x128xf32>
    %25 = arith.subf %23, %24 : vector<1x128xf32>
    %cst_24 = arith.constant 0.000000e+00 : f32
    %26 = vector.broadcast %cst_24 : f32 to vector<1x128xf32>
    %27 = arith.maximumf %25, %26 : vector<1x128xf32>
    %cst_25 = arith.constant 9.99999974E-6 : f32
    %28 = vector.broadcast %cst_25 : f32 to vector<1x128xf32>
    %29 = arith.addf %27, %28 : vector<1x128xf32>
    %30 = math.rsqrt %29 : vector<1x128xf32>
    %c0_i32_26 = arith.constant 0 : i32
    %31 = arith.cmpi eq, %arg1, %c0_i32_26 : i32
    %32 = arith.extui %31 : i1 to i32
    %c0_i32_27 = arith.constant 0 : i32
    %33 = arith.cmpi ne, %32, %c0_i32_27 : i32
    scf.if %33 {
      %34 = vector.shape_cast %21 : vector<1x128xf32> to vector<1x1x128xf32>
      %c0_28 = arith.constant 0 : index
      %c0_29 = arith.constant 0 : index
      %c0_30 = arith.constant 0 : index
      %35 = vector.load %arg3[%c0_28, %c0_29, %c0_30] : memref<1x1x128xf32, #tpu.memory_space<vmem>>, vector<1x1x128xf32>
      tpu.vector_store %arg3[%c0_28, %c0_29, %c0_30], %34 {strides = array<i32>} : memref<1x1x128xf32, #tpu.memory_space<vmem>>, vector<1x1x128xf32>,
      %36 = vector.shape_cast %30 : vector<1x128xf32> to vector<1x1x128xf32>
      %c0_31 = arith.constant 0 : index
      %c0_32 = arith.constant 0 : index
      %c0_33 = arith.constant 0 : index
      %37 = vector.load %arg4[%c0_31, %c0_32, %c0_33] : memref<1x1x128xf32, #tpu.memory_space<vmem>>, vector<1x1x128xf32>
      tpu.vector_store %arg4[%c0_31, %c0_32, %c0_33], %36 {strides = array<i32>} : memref<1x1x128xf32, #tpu.memory_space<vmem>>, vector<1x1x128xf32>,
    } else {
    }
    return
  }
  func.func @transform_0(%arg0: i32, %arg1: i32) -> (i32, i32, i32) {
    %c0_i32 = arith.constant 0 : i32
    %c0_i32_0 = arith.constant 0 : i32
    return %arg0, %arg1, %c0_i32 : i32, i32, i32
  }
  func.func @transform_1(%arg0: i32, %arg1: i32) -> (i32, i32, i32) {
    %c0_i32 = arith.constant 0 : i32
    %c0_i32_0 = arith.constant 0 : i32
    %c0_i32_1 = arith.constant 0 : i32
    return %arg0, %c0_i32, %c0_i32_0 : i32, i32, i32
  }
  func.func @transform_2(%arg0: i32, %arg1: i32) -> (i32, i32, i32) {
    %c0_i32 = arith.constant 0 : i32
    %c0_i32_0 = arith.constant 0 : i32
    %c0_i32_1 = arith.constant 0 : i32
    return %arg0, %c0_i32, %c0_i32_0 : i32, i32, i32
  }
}

module attributes {stable_mosaic.version = 11 : i64} {
  func.func @_stats_kernel(%arg0: i32, %arg1: i32, %arg2: memref<1x16x128xbf16, #tpu.memory_space<vmem>>, %arg3: memref<1x1x128xf32, #tpu.memory_space<vmem>>, %arg4: memref<1x1x128xf32, #tpu.memory_space<vmem>>) attributes {dimension_semantics = [#tpu.dimension_semantics<parallel>, #tpu.dimension_semantics<arbitrary>], iteration_bounds = array<i64: 2, 1>, scalar_prefetch = 0 : i64, scratch_operands = 0 : i64, tpu.core_type = #tpu.core_type<tc>, window_params = [{transform_indices = @transform_0, window_bounds = array<i64: 1, 16, 128>}, {transform_indices = @transform_1, window_bounds = array<i64: 1, 1, 128>}, {transform_indices = @transform_2, window_bounds = array<i64: 1, 1, 128>}]} {
    %c0_i32 = arith.constant 0 : i32
    %0 = arith.cmpi eq, %arg1, %c0_i32 : i32
    %1 = arith.extui %0 : i1 to i32
    %c0_i32_0 = arith.constant 0 : i32
    %2 = arith.cmpi ne, %1, %c0_i32_0 : i32
    scf.if %2 {
      %cst_28 = arith.constant 0.000000e+00 : f32
      %34 = vector.broadcast %cst_28 : f32 to vector<1x1x128xf32>
      %c0_29 = arith.constant 0 : index
      %c0_30 = arith.constant 0 : index
      %c0_31 = arith.constant 0 : index
      %35 = vector.load %arg3[%c0_29, %c0_30, %c0_31] : memref<1x1x128xf32, #tpu.memory_space<vmem>>, vector<1x1x128xf32>
      tpu.vector_store %arg3[%c0_29, %c0_30, %c0_31], %34 {strides = array<i32>} : memref<1x1x128xf32, #tpu.memory_space<vmem>>, vector<1x1x128xf32>,
      %cst_32 = arith.constant 0.000000e+00 : f32
      %36 = vector.broadcast %cst_32 : f32 to vector<1x1x128xf32>
      %c0_33 = arith.constant 0 : index
      %c0_34 = arith.constant 0 : index
      %c0_35 = arith.constant 0 : index
      %37 = vector.load %arg4[%c0_33, %c0_34, %c0_35] : memref<1x1x128xf32, #tpu.memory_space<vmem>>, vector<1x1x128xf32>
      tpu.vector_store %arg4[%c0_33, %c0_34, %c0_35], %36 {strides = array<i32>} : memref<1x1x128xf32, #tpu.memory_space<vmem>>, vector<1x1x128xf32>,
    } else {
    }
    %c0 = arith.constant 0 : index
    %c0_1 = arith.constant 0 : index
    %c0_2 = arith.constant 0 : index
    %3 = vector.load %arg2[%c0, %c0_1, %c0_2] : memref<1x16x128xbf16, #tpu.memory_space<vmem>>, vector<1x16x128xbf16>
    %4 = arith.extf %3 : vector<1x16x128xbf16> to vector<1x16x128xf32>
    %c0_3 = arith.constant 0 : index
    %c0_4 = arith.constant 0 : index
    %c0_5 = arith.constant 0 : index
    %5 = vector.load %arg3[%c0_3, %c0_4, %c0_5] : memref<1x1x128xf32, #tpu.memory_space<vmem>>, vector<1x1x128xf32>
    %cst = arith.constant dense<0.000000e+00> : vector<1x128xf32>
    %6 = vector.multi_reduction <add>, %4, %cst [1] : vector<1x16x128xf32> to vector<1x128xf32>
    %7 = vector.shape_cast %6 : vector<1x128xf32> to vector<1x1x128xf32>
    %8 = arith.addf %5, %7 : vector<1x1x128xf32>
    %c0_6 = arith.constant 0 : index
    %c0_7 = arith.constant 0 : index
    %c0_8 = arith.constant 0 : index
    %9 = vector.load %arg3[%c0_6, %c0_7, %c0_8] : memref<1x1x128xf32, #tpu.memory_space<vmem>>, vector<1x1x128xf32>
    tpu.vector_store %arg3[%c0_6, %c0_7, %c0_8], %8 {strides = array<i32>} : memref<1x1x128xf32, #tpu.memory_space<vmem>>, vector<1x1x128xf32>,
    %c0_9 = arith.constant 0 : index
    %c0_10 = arith.constant 0 : index
    %c0_11 = arith.constant 0 : index
    %10 = vector.load %arg4[%c0_9, %c0_10, %c0_11] : memref<1x1x128xf32, #tpu.memory_space<vmem>>, vector<1x1x128xf32>
    %11 = arith.mulf %4, %4 : vector<1x16x128xf32>
    %cst_12 = arith.constant dense<0.000000e+00> : vector<1x128xf32>
    %12 = vector.multi_reduction <add>, %11, %cst_12 [1] : vector<1x16x128xf32> to vector<1x128xf32>
    %13 = vector.shape_cast %12 : vector<1x128xf32> to vector<1x1x128xf32>
    %14 = arith.addf %10, %13 : vector<1x1x128xf32>
    %c0_13 = arith.constant 0 : index
    %c0_14 = arith.constant 0 : index
    %c0_15 = arith.constant 0 : index
    %15 = vector.load %arg4[%c0_13, %c0_14, %c0_15] : memref<1x1x128xf32, #tpu.memory_space<vmem>>, vector<1x1x128xf32>
    tpu.vector_store %arg4[%c0_13, %c0_14, %c0_15], %14 {strides = array<i32>} : memref<1x1x128xf32, #tpu.memory_space<vmem>>, vector<1x1x128xf32>,
    %c0_16 = arith.constant 0 : index
    %c0_17 = arith.constant 0 : index
    %c0_18 = arith.constant 0 : index
    %16 = vector.load %arg3[%c0_16, %c0_17, %c0_18] : memref<1x1x128xf32, #tpu.memory_space<vmem>>, vector<1x1x128xf32>
    %17 = vector.shape_cast %16 : vector<1x1x128xf32> to vector<1x128xf32>
    %c0_19 = arith.constant 0 : index
    %c0_20 = arith.constant 0 : index
    %c0_21 = arith.constant 0 : index
    %18 = vector.load %arg4[%c0_19, %c0_20, %c0_21] : memref<1x1x128xf32, #tpu.memory_space<vmem>>, vector<1x1x128xf32>
    %19 = vector.shape_cast %18 : vector<1x1x128xf32> to vector<1x128xf32>
    %cst_22 = arith.constant 1.600000e+01 : f32
    %20 = vector.broadcast %cst_22 : f32 to vector<1x128xf32>
    %21 = arith.divf %17, %20 : vector<1x128xf32>
    %cst_23 = arith.constant 1.600000e+01 : f32
    %22 = vector.broadcast %cst_23 : f32 to vector<1x128xf32>
    %23 = arith.divf %19, %22 : vector<1x128xf32>
    %24 = arith.mulf %21, %21 : vector<1x128xf32>
    %25 = arith.subf %23, %24 : vector<1x128xf32>
    %cst_24 = arith.constant 0.000000e+00 : f32
    %26 = vector.broadcast %cst_24 : f32 to vector<1x128xf32>
    %27 = arith.maximumf %25, %26 : vector<1x128xf32>
    %cst_25 = arith.constant 9.99999974E-6 : f32
    %28 = vector.broadcast %cst_25 : f32 to vector<1x128xf32>
    %29 = arith.addf %27, %28 : vector<1x128xf32>
    %30 = math.rsqrt %29 : vector<1x128xf32>
    %c0_i32_26 = arith.constant 0 : i32
    %31 = arith.cmpi eq, %arg1, %c0_i32_26 : i32
    %32 = arith.extui %31 : i1 to i32
    %c0_i32_27 = arith.constant 0 : i32
    %33 = arith.cmpi ne, %32, %c0_i32_27 : i32
    scf.if %33 {
      %34 = vector.shape_cast %21 : vector<1x128xf32> to vector<1x1x128xf32>
      %c0_28 = arith.constant 0 : index
      %c0_29 = arith.constant 0 : index
      %c0_30 = arith.constant 0 : index
      %35 = vector.load %arg3[%c0_28, %c0_29, %c0_30] : memref<1x1x128xf32, #tpu.memory_space<vmem>>, vector<1x1x128xf32>
      tpu.vector_store %arg3[%c0_28, %c0_29, %c0_30], %34 {strides = array<i32>} : memref<1x1x128xf32, #tpu.memory_space<vmem>>, vector<1x1x128xf32>,
      %36 = vector.shape_cast %30 : vector<1x128xf32> to vector<1x1x128xf32>
      %c0_31 = arith.constant 0 : index
      %c0_32 = arith.constant 0 : index
      %c0_33 = arith.constant 0 : index
      %37 = vector.load %arg4[%c0_31, %c0_32, %c0_33] : memref<1x1x128xf32, #tpu.memory_space<vmem>>, vector<1x1x128xf32>
      tpu.vector_store %arg4[%c0_31, %c0_32, %c0_33], %36 {strides = array<i32>} : memref<1x1x128xf32, #tpu.memory_space<vmem>>, vector<1x1x128xf32>,
    } else {
    }
    return
  }
  func.func @transform_0(%arg0: i32, %arg1: i32) -> (i32, i32, i32) {
    %c0_i32 = arith.constant 0 : i32
    %c0_i32_0 = arith.constant 0 : i32
    return %arg0, %arg1, %c0_i32 : i32, i32, i32
  }
  func.func @transform_1(%arg0: i32, %arg1: i32) -> (i32, i32, i32) {
    %c0_i32 = arith.constant 0 : i32
    %c0_i32_0 = arith.constant 0 : i32
    %c0_i32_1 = arith.constant 0 : i32
    return %arg0, %c0_i32, %c0_i32_0 : i32, i32, i32
  }
  func.func @transform_2(%arg0: i32, %arg1: i32) -> (i32, i32, i32) {
    %c0_i32 = arith.constant 0 : i32
    %c0_i32_0 = arith.constant 0 : i32
    %c0_i32_1 = arith.constant 0 : i32
    return %arg0, %c0_i32, %c0_i32_0 : i32, i32, i32
  }
}

module attributes {stable_mosaic.version = 11 : i64} {
  func.func @_matmul_bias_act_kernel(%arg0: i32, %arg1: i32, %arg2: memref<8x128xbf16, #tpu.memory_space<vmem>>, %arg3: memref<128x128xbf16, #tpu.memory_space<vmem>>, %arg4: memref<1x128xf32, #tpu.memory_space<vmem>>, %arg5: memref<8x128xf32, #tpu.memory_space<vmem>>) attributes {dimension_semantics = [#tpu.dimension_semantics<parallel>, #tpu.dimension_semantics<parallel>], iteration_bounds = array<i64: 1, 1>, scalar_prefetch = 0 : i64, scratch_operands = 0 : i64, tpu.core_type = #tpu.core_type<tc>, window_params = [{transform_indices = @transform_0, window_bounds = array<i64: 8, 128>}, {transform_indices = @transform_1, window_bounds = array<i64: 128, 128>}, {transform_indices = @transform_2, window_bounds = array<i64: 1, 128>}, {transform_indices = @transform_3, window_bounds = array<i64: 8, 128>}]} {
    %c0 = arith.constant 0 : index
    %c0_0 = arith.constant 0 : index
    %0 = vector.load %arg2[%c0, %c0_0] : memref<8x128xbf16, #tpu.memory_space<vmem>>, vector<8x128xbf16>
    %c0_1 = arith.constant 0 : index
    %c0_2 = arith.constant 0 : index
    %1 = vector.load %arg3[%c0_1, %c0_2] : memref<128x128xbf16, #tpu.memory_space<vmem>>, vector<128x128xbf16>
    %cst = arith.constant dense<0.000000e+00> : vector<8x128xf32>
    %2 = tpu.matmul %0, %1, %cst {dimension_numbers = #tpu.dot_dimension_numbers<[1], [0], [0], [1], [0, 0, 1, 1], [], []>} : vector<8x128xbf16>, vector<128x128xbf16>, vector<8x128xf32> -> vector<8x128xf32>
    %c0_3 = arith.constant 0 : index
    %c0_4 = arith.constant 0 : index
    %3 = vector.load %arg4[%c0_3, %c0_4] : memref<1x128xf32, #tpu.memory_space<vmem>>, vector<1x128xf32>
    %4 = vector.broadcast %3 : vector<1x128xf32> to vector<8x128xf32>
    %5 = arith.addf %2, %4 : vector<8x128xf32>
    %c0_5 = arith.constant 0 : index
    %c0_6 = arith.constant 0 : index
    %6 = vector.load %arg5[%c0_5, %c0_6] : memref<8x128xf32, #tpu.memory_space<vmem>>, vector<8x128xf32>
    tpu.vector_store %arg5[%c0_5, %c0_6], %5 {strides = array<i32>} : memref<8x128xf32, #tpu.memory_space<vmem>>, vector<8x128xf32>,
    return
  }
  func.func @transform_0(%arg0: i32, %arg1: i32) -> (i32, i32) {
    %c0_i32 = arith.constant 0 : i32
    %c0_i32_0 = arith.constant 0 : i32
    return %arg0, %c0_i32 : i32, i32
  }
  func.func @transform_1(%arg0: i32, %arg1: i32) -> (i32, i32) {
    %c0_i32 = arith.constant 0 : i32
    %c0_i32_0 = arith.constant 0 : i32
    return %c0_i32, %arg1 : i32, i32
  }
  func.func @transform_2(%arg0: i32, %arg1: i32) -> (i32, i32) {
    %c0_i32 = arith.constant 0 : i32
    %c0_i32_0 = arith.constant 0 : i32
    return %c0_i32, %arg1 : i32, i32
  }
  func.func @transform_3(%arg0: i32, %arg1: i32) -> (i32, i32) {
    %c0_i32 = arith.constant 0 : i32
    return %arg0, %arg1 : i32, i32
  }
}

module attributes {stable_mosaic.version = 11 : i64} {
  func.func @_stats_kernel(%arg0: i32, %arg1: i32, %arg2: memref<1x16x128xbf16, #tpu.memory_space<vmem>>, %arg3: memref<1x1x128xf32, #tpu.memory_space<vmem>>, %arg4: memref<1x1x128xf32, #tpu.memory_space<vmem>>) attributes {dimension_semantics = [#tpu.dimension_semantics<parallel>, #tpu.dimension_semantics<arbitrary>], iteration_bounds = array<i64: 2, 1>, scalar_prefetch = 0 : i64, scratch_operands = 0 : i64, tpu.core_type = #tpu.core_type<tc>, window_params = [{transform_indices = @transform_0, window_bounds = array<i64: 1, 16, 128>}, {transform_indices = @transform_1, window_bounds = array<i64: 1, 1, 128>}, {transform_indices = @transform_2, window_bounds = array<i64: 1, 1, 128>}]} {
    %c0_i32 = arith.constant 0 : i32
    %0 = arith.cmpi eq, %arg1, %c0_i32 : i32
    %1 = arith.extui %0 : i1 to i32
    %c0_i32_0 = arith.constant 0 : i32
    %2 = arith.cmpi ne, %1, %c0_i32_0 : i32
    scf.if %2 {
      %cst_29 = arith.constant 0.000000e+00 : f32
      %37 = vector.broadcast %cst_29 : f32 to vector<1x1x128xf32>
      %c0_30 = arith.constant 0 : index
      %c0_31 = arith.constant 0 : index
      %c0_32 = arith.constant 0 : index
      %38 = vector.load %arg3[%c0_30, %c0_31, %c0_32] : memref<1x1x128xf32, #tpu.memory_space<vmem>>, vector<1x1x128xf32>
      tpu.vector_store %arg3[%c0_30, %c0_31, %c0_32], %37 {strides = array<i32>} : memref<1x1x128xf32, #tpu.memory_space<vmem>>, vector<1x1x128xf32>,
      %cst_33 = arith.constant 0.000000e+00 : f32
      %39 = vector.broadcast %cst_33 : f32 to vector<1x1x128xf32>
      %c0_34 = arith.constant 0 : index
      %c0_35 = arith.constant 0 : index
      %c0_36 = arith.constant 0 : index
      %40 = vector.load %arg4[%c0_34, %c0_35, %c0_36] : memref<1x1x128xf32, #tpu.memory_space<vmem>>, vector<1x1x128xf32>
      tpu.vector_store %arg4[%c0_34, %c0_35, %c0_36], %39 {strides = array<i32>} : memref<1x1x128xf32, #tpu.memory_space<vmem>>, vector<1x1x128xf32>,
    } else {
    }
    %c0 = arith.constant 0 : index
    %c0_1 = arith.constant 0 : index
    %c0_2 = arith.constant 0 : index
    %3 = vector.load %arg2[%c0, %c0_1, %c0_2] : memref<1x16x128xbf16, #tpu.memory_space<vmem>>, vector<1x16x128xbf16>
    %4 = arith.extf %3 : vector<1x16x128xbf16> to vector<1x16x128xf32>
    %c0_3 = arith.constant 0 : index
    %c0_4 = arith.constant 0 : index
    %c0_5 = arith.constant 0 : index
    %5 = vector.load %arg3[%c0_3, %c0_4, %c0_5] : memref<1x1x128xf32, #tpu.memory_space<vmem>>, vector<1x1x128xf32>
    %cst = arith.constant dense<0.000000e+00> : vector<1x128xf32>
    %6 = vector.multi_reduction <add>, %4, %cst [1] : vector<1x16x128xf32> to vector<1x128xf32>
    %7 = vector.shape_cast %6 : vector<1x128xf32> to vector<1x1x128xf32>
    %8 = arith.addf %5, %7 : vector<1x1x128xf32>
    %c0_6 = arith.constant 0 : index
    %c0_7 = arith.constant 0 : index
    %c0_8 = arith.constant 0 : index
    %9 = vector.load %arg3[%c0_6, %c0_7, %c0_8] : memref<1x1x128xf32, #tpu.memory_space<vmem>>, vector<1x1x128xf32>
    tpu.vector_store %arg3[%c0_6, %c0_7, %c0_8], %8 {strides = array<i32>} : memref<1x1x128xf32, #tpu.memory_space<vmem>>, vector<1x1x128xf32>,
    %c0_9 = arith.constant 0 : index
    %c0_10 = arith.constant 0 : index
    %c0_11 = arith.constant 0 : index
    %10 = vector.load %arg4[%c0_9, %c0_10, %c0_11] : memref<1x1x128xf32, #tpu.memory_space<vmem>>, vector<1x1x128xf32>
    %11 = arith.mulf %4, %4 : vector<1x16x128xf32>
    %cst_12 = arith.constant dense<0.000000e+00> : vector<1x128xf32>
    %12 = vector.multi_reduction <add>, %11, %cst_12 [1] : vector<1x16x128xf32> to vector<1x128xf32>
    %13 = vector.shape_cast %12 : vector<1x128xf32> to vector<1x1x128xf32>
    %14 = arith.addf %10, %13 : vector<1x1x128xf32>
    %c0_13 = arith.constant 0 : index
    %c0_14 = arith.constant 0 : index
    %c0_15 = arith.constant 0 : index
    %15 = vector.load %arg4[%c0_13, %c0_14, %c0_15] : memref<1x1x128xf32, #tpu.memory_space<vmem>>, vector<1x1x128xf32>
    tpu.vector_store %arg4[%c0_13, %c0_14, %c0_15], %14 {strides = array<i32>} : memref<1x1x128xf32, #tpu.memory_space<vmem>>, vector<1x1x128xf32>,
    %c0_16 = arith.constant 0 : index
    %c0_17 = arith.constant 0 : index
    %c0_18 = arith.constant 0 : index
    %16 = vector.load %arg3[%c0_16, %c0_17, %c0_18] : memref<1x1x128xf32, #tpu.memory_space<vmem>>, vector<1x1x128xf32>
    %17 = vector.shape_cast %16 : vector<1x1x128xf32> to vector<1x128xf32>
    %c0_19 = arith.constant 0 : index
    %c0_20 = arith.constant 0 : index
    %c0_21 = arith.constant 0 : index
    %18 = vector.load %arg4[%c0_19, %c0_20, %c0_21] : memref<1x1x128xf32, #tpu.memory_space<vmem>>, vector<1x1x128xf32>
    %19 = vector.shape_cast %18 : vector<1x1x128xf32> to vector<1x128xf32>
    %cst_22 = arith.constant 1.600000e+01 : f32
    %20 = vector.broadcast %cst_22 : f32 to vector<1x128xf32>
    %21 = arith.divf %17, %20 : vector<1x128xf32>
    %cst_23 = arith.constant 1.600000e+01 : f32
    %22 = vector.broadcast %cst_23 : f32 to vector<1x128xf32>
    %23 = arith.mulf %22, %21 : vector<1x128xf32>
    %24 = arith.mulf %23, %21 : vector<1x128xf32>
    %25 = arith.subf %19, %24 : vector<1x128xf32>
    %cst_24 = arith.constant 1.500000e+01 : f32
    %26 = vector.broadcast %cst_24 : f32 to vector<1x128xf32>
    %27 = arith.divf %25, %26 : vector<1x128xf32>
    %cst_25 = arith.constant 0.000000e+00 : f32
    %28 = vector.broadcast %cst_25 : f32 to vector<1x128xf32>
    %29 = arith.maximumf %27, %28 : vector<1x128xf32>
    %30 = math.sqrt %29 : vector<1x128xf32>
    %cst_26 = arith.constant 9.99999993E-9 : f32
    %31 = vector.broadcast %cst_26 : f32 to vector<1x128xf32>
    %32 = arith.addf %30, %31 : vector<1x128xf32>
    %33 = tpu.reciprocal %32 {approx = true} : vector<1x128xf32> -> vector<1x128xf32>
    %c0_i32_27 = arith.constant 0 : i32
    %34 = arith.cmpi eq, %arg1, %c0_i32_27 : i32
    %35 = arith.extui %34 : i1 to i32
    %c0_i32_28 = arith.constant 0 : i32
    %36 = arith.cmpi ne, %35, %c0_i32_28 : i32
    scf.if %36 {
      %37 = vector.shape_cast %21 : vector<1x128xf32> to vector<1x1x128xf32>
      %c0_29 = arith.constant 0 : index
      %c0_30 = arith.constant 0 : index
      %c0_31 = arith.constant 0 : index
      %38 = vector.load %arg3[%c0_29, %c0_30, %c0_31] : memref<1x1x128xf32, #tpu.memory_space<vmem>>, vector<1x1x128xf32>
      tpu.vector_store %arg3[%c0_29, %c0_30, %c0_31], %37 {strides = array<i32>} : memref<1x1x128xf32, #tpu.memory_space<vmem>>, vector<1x1x128xf32>,
      %39 = vector.shape_cast %33 : vector<1x128xf32> to vector<1x1x128xf32>
      %c0_32 = arith.constant 0 : index
      %c0_33 = arith.constant 0 : index
      %c0_34 = arith.constant 0 : index
      %40 = vector.load %arg4[%c0_32, %c0_33, %c0_34] : memref<1x1x128xf32, #tpu.memory_space<vmem>>, vector<1x1x128xf32>
      tpu.vector_store %arg4[%c0_32, %c0_33, %c0_34], %39 {strides = array<i32>} : memref<1x1x128xf32, #tpu.memory_space<vmem>>, vector<1x1x128xf32>,
    } else {
    }
    return
  }
  func.func @transform_0(%arg0: i32, %arg1: i32) -> (i32, i32, i32) {
    %c0_i32 = arith.constant 0 : i32
    %c0_i32_0 = arith.constant 0 : i32
    return %arg0, %arg1, %c0_i32 : i32, i32, i32
  }
  func.func @transform_1(%arg0: i32, %arg1: i32) -> (i32, i32, i32) {
    %c0_i32 = arith.constant 0 : i32
    %c0_i32_0 = arith.constant 0 : i32
    %c0_i32_1 = arith.constant 0 : i32
    return %arg0, %c0_i32, %c0_i32_0 : i32, i32, i32
  }
  func.func @transform_2(%arg0: i32, %arg1: i32) -> (i32, i32, i32) {
    %c0_i32 = arith.constant 0 : i32
    %c0_i32_0 = arith.constant 0 : i32
    %c0_i32_1 = arith.constant 0 : i32
    return %arg0, %c0_i32, %c0_i32_0 : i32, i32, i32
  }
}

module attributes {stable_mosaic.version = 11 : i64} {
  func.func @_norm_apply_add_kernel(%arg0: i32, %arg1: i32, %arg2: memref<1x16x128xbf16, #tpu.memory_space<vmem>>, %arg3: memref<1x1x128xf32, #tpu.memory_space<vmem>>, %arg4: memref<1x1x128xf32, #tpu.memory_space<vmem>>, %arg5: memref<1x1x128xf32, #tpu.memory_space<vmem>>, %arg6: memref<1x16x128xbf16, #tpu.memory_space<vmem>>) attributes {dimension_semantics = [#tpu.dimension_semantics<parallel>, #tpu.dimension_semantics<parallel>], iteration_bounds = array<i64: 2, 1>, scalar_prefetch = 0 : i64, scratch_operands = 0 : i64, tpu.core_type = #tpu.core_type<tc>, window_params = [{transform_indices = @transform_0, window_bounds = array<i64: 1, 16, 128>}, {transform_indices = @transform_1, window_bounds = array<i64: 1, 1, 128>}, {transform_indices = @transform_2, window_bounds = array<i64: 1, 1, 128>}, {transform_indices = @transform_3, window_bounds = array<i64: 1, 1, 128>}, {transform_indices = @transform_4, window_bounds = array<i64: 1, 16, 128>}]} {
    %c0 = arith.constant 0 : index
    %c0_0 = arith.constant 0 : index
    %c0_1 = arith.constant 0 : index
    %0 = vector.load %arg2[%c0, %c0_0, %c0_1] : memref<1x16x128xbf16, #tpu.memory_space<vmem>>, vector<1x16x128xbf16>
    %1 = arith.extf %0 : vector<1x16x128xbf16> to vector<1x16x128xf32>
    %c0_2 = arith.constant 0 : index
    %c0_3 = arith.constant 0 : index
    %c0_4 = arith.constant 0 : index
    %2 = vector.load %arg3[%c0_2, %c0_3, %c0_4] : memref<1x1x128xf32, #tpu.memory_space<vmem>>, vector<1x1x128xf32>
    %3 = vector.broadcast %2 : vector<1x1x128xf32> to vector<1x16x128xf32>
    %4 = arith.subf %1, %3 : vector<1x16x128xf32>
    %c0_5 = arith.constant 0 : index
    %c0_6 = arith.constant 0 : index
    %c0_7 = arith.constant 0 : index
    %5 = vector.load %arg4[%c0_5, %c0_6, %c0_7] : memref<1x1x128xf32, #tpu.memory_space<vmem>>, vector<1x1x128xf32>
    %cst = arith.constant 9.99999993E-9 : f32
    %6 = vector.broadcast %cst : f32 to vector<1x1x128xf32>
    %7 = arith.mulf %5, %6 : vector<1x1x128xf32>
    %8 = vector.broadcast %7 : vector<1x1x128xf32> to vector<1x16x128xf32>
    %9 = arith.mulf %4, %8 : vector<1x16x128xf32>
    %c0_8 = arith.constant 0 : index
    %c0_9 = arith.constant 0 : index
    %c0_10 = arith.constant 0 : index
    %10 = vector.load %arg5[%c0_8, %c0_9, %c0_10] : memref<1x1x128xf32, #tpu.memory_space<vmem>>, vector<1x1x128xf32>
    %11 = vector.broadcast %10 : vector<1x1x128xf32> to vector<1x16x128xf32>
    %12 = arith.addf %9, %11 : vector<1x16x128xf32>
    %13 = arith.truncf %12 : vector<1x16x128xf32> to vector<1x16x128xbf16>
    %c0_11 = arith.constant 0 : index
    %c0_12 = arith.constant 0 : index
    %c0_13 = arith.constant 0 : index
    %14 = vector.load %arg6[%c0_11, %c0_12, %c0_13] : memref<1x16x128xbf16, #tpu.memory_space<vmem>>, vector<1x16x128xbf16>
    tpu.vector_store %arg6[%c0_11, %c0_12, %c0_13], %13 {strides = array<i32>} : memref<1x16x128xbf16, #tpu.memory_space<vmem>>, vector<1x16x128xbf16>,
    return
  }
  func.func @transform_0(%arg0: i32, %arg1: i32) -> (i32, i32, i32) {
    %c0_i32 = arith.constant 0 : i32
    %c0_i32_0 = arith.constant 0 : i32
    return %arg0, %arg1, %c0_i32 : i32, i32, i32
  }
  func.func @transform_1(%arg0: i32, %arg1: i32) -> (i32, i32, i32) {
    %c0_i32 = arith.constant 0 : i32
    %c0_i32_0 = arith.constant 0 : i32
    %c0_i32_1 = arith.constant 0 : i32
    return %arg0, %c0_i32, %c0_i32_0 : i32, i32, i32
  }
  func.func @transform_2(%arg0: i32, %arg1: i32) -> (i32, i32, i32) {
    %c0_i32 = arith.constant 0 : i32
    %c0_i32_0 = arith.constant 0 : i32
    %c0_i32_1 = arith.constant 0 : i32
    return %arg0, %c0_i32, %c0_i32_0 : i32, i32, i32
  }
  func.func @transform_3(%arg0: i32, %arg1: i32) -> (i32, i32, i32) {
    %c0_i32 = arith.constant 0 : i32
    %c0_i32_0 = arith.constant 0 : i32
    %c0_i32_1 = arith.constant 0 : i32
    return %arg0, %c0_i32, %c0_i32_0 : i32, i32, i32
  }
  func.func @transform_4(%arg0: i32, %arg1: i32) -> (i32, i32, i32) {
    %c0_i32 = arith.constant 0 : i32
    %c0_i32_0 = arith.constant 0 : i32
    return %arg0, %arg1, %c0_i32 : i32, i32, i32
  }
}

module attributes {stable_mosaic.version = 11 : i64} {
  func.func @_norm_apply_add_kernel(%arg0: i32, %arg1: i32, %arg2: memref<1x16x128xbf16, #tpu.memory_space<vmem>>, %arg3: memref<1x1x128xf32, #tpu.memory_space<vmem>>, %arg4: memref<1x1x128xf32, #tpu.memory_space<vmem>>, %arg5: memref<1x16x128xbf16, #tpu.memory_space<vmem>>, %arg6: memref<1x16x128xbf16, #tpu.memory_space<vmem>>) attributes {dimension_semantics = [#tpu.dimension_semantics<parallel>, #tpu.dimension_semantics<parallel>], iteration_bounds = array<i64: 2, 1>, scalar_prefetch = 0 : i64, scratch_operands = 0 : i64, tpu.core_type = #tpu.core_type<tc>, window_params = [{transform_indices = @transform_0, window_bounds = array<i64: 1, 16, 128>}, {transform_indices = @transform_1, window_bounds = array<i64: 1, 1, 128>}, {transform_indices = @transform_2, window_bounds = array<i64: 1, 1, 128>}, {transform_indices = @transform_3, window_bounds = array<i64: 1, 16, 128>}, {transform_indices = @transform_4, window_bounds = array<i64: 1, 16, 128>}]} {
    %c0 = arith.constant 0 : index
    %c0_0 = arith.constant 0 : index
    %c0_1 = arith.constant 0 : index
    %0 = vector.load %arg2[%c0, %c0_0, %c0_1] : memref<1x16x128xbf16, #tpu.memory_space<vmem>>, vector<1x16x128xbf16>
    %1 = arith.extf %0 : vector<1x16x128xbf16> to vector<1x16x128xf32>
    %c0_2 = arith.constant 0 : index
    %c0_3 = arith.constant 0 : index
    %c0_4 = arith.constant 0 : index
    %2 = vector.load %arg3[%c0_2, %c0_3, %c0_4] : memref<1x1x128xf32, #tpu.memory_space<vmem>>, vector<1x1x128xf32>
    %3 = vector.broadcast %2 : vector<1x1x128xf32> to vector<1x16x128xf32>
    %4 = arith.subf %1, %3 : vector<1x16x128xf32>
    %c0_5 = arith.constant 0 : index
    %c0_6 = arith.constant 0 : index
    %c0_7 = arith.constant 0 : index
    %5 = vector.load %arg4[%c0_5, %c0_6, %c0_7] : memref<1x1x128xf32, #tpu.memory_space<vmem>>, vector<1x1x128xf32>
    %cst = arith.constant 1.000000e+00 : f32
    %6 = vector.broadcast %cst : f32 to vector<1x1x128xf32>
    %7 = arith.mulf %5, %6 : vector<1x1x128xf32>
    %8 = vector.broadcast %7 : vector<1x1x128xf32> to vector<1x16x128xf32>
    %9 = arith.mulf %4, %8 : vector<1x16x128xf32>
    %c0_8 = arith.constant 0 : index
    %c0_9 = arith.constant 0 : index
    %c0_10 = arith.constant 0 : index
    %10 = vector.load %arg5[%c0_8, %c0_9, %c0_10] : memref<1x16x128xbf16, #tpu.memory_space<vmem>>, vector<1x16x128xbf16>
    %11 = arith.extf %10 : vector<1x16x128xbf16> to vector<1x16x128xf32>
    %12 = arith.addf %9, %11 : vector<1x16x128xf32>
    %13 = arith.truncf %12 : vector<1x16x128xf32> to vector<1x16x128xbf16>
    %c0_11 = arith.constant 0 : index
    %c0_12 = arith.constant 0 : index
    %c0_13 = arith.constant 0 : index
    %14 = vector.load %arg6[%c0_11, %c0_12, %c0_13] : memref<1x16x128xbf16, #tpu.memory_space<vmem>>, vector<1x16x128xbf16>
    tpu.vector_store %arg6[%c0_11, %c0_12, %c0_13], %13 {strides = array<i32>} : memref<1x16x128xbf16, #tpu.memory_space<vmem>>, vector<1x16x128xbf16>,
    return
  }
  func.func @transform_0(%arg0: i32, %arg1: i32) -> (i32, i32, i32) {
    %c0_i32 = arith.constant 0 : i32
    %c0_i32_0 = arith.constant 0 : i32
    return %arg0, %arg1, %c0_i32 : i32, i32, i32
  }
  func.func @transform_1(%arg0: i32, %arg1: i32) -> (i32, i32, i32) {
    %c0_i32 = arith.constant 0 : i32
    %c0_i32_0 = arith.constant 0 : i32
    %c0_i32_1 = arith.constant 0 : i32
    return %arg0, %c0_i32, %c0_i32_0 : i32, i32, i32
  }
  func.func @transform_2(%arg0: i32, %arg1: i32) -> (i32, i32, i32) {
    %c0_i32 = arith.constant 0 : i32
    %c0_i32_0 = arith.constant 0 : i32
    %c0_i32_1 = arith.constant 0 : i32
    return %arg0, %c0_i32, %c0_i32_0 : i32, i32, i32
  }
  func.func @transform_3(%arg0: i32, %arg1: i32) -> (i32, i32, i32) {
    %c0_i32 = arith.constant 0 : i32
    %c0_i32_0 = arith.constant 0 : i32
    return %arg0, %arg1, %c0_i32 : i32, i32, i32
  }
  func.func @transform_4(%arg0: i32, %arg1: i32) -> (i32, i32, i32) {
    %c0_i32 = arith.constant 0 : i32
    %c0_i32_0 = arith.constant 0 : i32
    return %arg0, %arg1, %c0_i32 : i32, i32, i32
  }
}

module attributes {stable_mosaic.version = 11 : i64} {
  func.func @_matmul_bias_act_kernel(%arg0: i32, %arg1: i32, %arg2: memref<32x1152xbf16, #tpu.memory_space<vmem>>, %arg3: memref<1152x128xbf16, #tpu.memory_space<vmem>>, %arg4: memref<1x128xf32, #tpu.memory_space<vmem>>, %arg5: memref<32x128xbf16, #tpu.memory_space<vmem>>) attributes {dimension_semantics = [#tpu.dimension_semantics<parallel>, #tpu.dimension_semantics<parallel>], iteration_bounds = array<i64: 1, 1>, scalar_prefetch = 0 : i64, scratch_operands = 0 : i64, tpu.core_type = #tpu.core_type<tc>, window_params = [{transform_indices = @transform_0, window_bounds = array<i64: 32, 1152>}, {transform_indices = @transform_1, window_bounds = array<i64: 1152, 128>}, {transform_indices = @transform_2, window_bounds = array<i64: 1, 128>}, {transform_indices = @transform_3, window_bounds = array<i64: 32, 128>}]} {
    %c0 = arith.constant 0 : index
    %c0_0 = arith.constant 0 : index
    %0 = vector.load %arg2[%c0, %c0_0] : memref<32x1152xbf16, #tpu.memory_space<vmem>>, vector<32x1152xbf16>
    %c0_1 = arith.constant 0 : index
    %c0_2 = arith.constant 0 : index
    %1 = vector.load %arg3[%c0_1, %c0_2] : memref<1152x128xbf16, #tpu.memory_space<vmem>>, vector<1152x128xbf16>
    %cst = arith.constant dense<0.000000e+00> : vector<32x128xf32>
    %2 = tpu.matmul %0, %1, %cst {dimension_numbers = #tpu.dot_dimension_numbers<[1], [0], [0], [1], [0, 0, 1, 1], [], []>} : vector<32x1152xbf16>, vector<1152x128xbf16>, vector<32x128xf32> -> vector<32x128xf32>
    %c0_3 = arith.constant 0 : index
    %c0_4 = arith.constant 0 : index
    %3 = vector.load %arg4[%c0_3, %c0_4] : memref<1x128xf32, #tpu.memory_space<vmem>>, vector<1x128xf32>
    %4 = vector.broadcast %3 : vector<1x128xf32> to vector<32x128xf32>
    %5 = arith.addf %2, %4 : vector<32x128xf32>
    %6 = arith.truncf %5 : vector<32x128xf32> to vector<32x128xbf16>
    %c0_5 = arith.constant 0 : index
    %c0_6 = arith.constant 0 : index
    %7 = vector.load %arg5[%c0_5, %c0_6] : memref<32x128xbf16, #tpu.memory_space<vmem>>, vector<32x128xbf16>
    tpu.vector_store %arg5[%c0_5, %c0_6], %6 {strides = array<i32>} : memref<32x128xbf16, #tpu.memory_space<vmem>>, vector<32x128xbf16>,
    return
  }
  func.func @transform_0(%arg0: i32, %arg1: i32) -> (i32, i32) {
    %c0_i32 = arith.constant 0 : i32
    %c0_i32_0 = arith.constant 0 : i32
    return %arg0, %c0_i32 : i32, i32
  }
  func.func @transform_1(%arg0: i32, %arg1: i32) -> (i32, i32) {
    %c0_i32 = arith.constant 0 : i32
    %c0_i32_0 = arith.constant 0 : i32
    return %c0_i32, %arg1 : i32, i32
  }
  func.func @transform_2(%arg0: i32, %arg1: i32) -> (i32, i32) {
    %c0_i32 = arith.constant 0 : i32
    %c0_i32_0 = arith.constant 0 : i32
    return %c0_i32, %arg1 : i32, i32
  }
  func.func @transform_3(%arg0: i32, %arg1: i32) -> (i32, i32) {
    %c0_i32 = arith.constant 0 : i32
    return %arg0, %arg1 : i32, i32
  }
}

module attributes {stable_mosaic.version = 11 : i64} {
  func.func @_matmul_bias_act_kernel(%arg0: i32, %arg1: i32, %arg2: memref<32x512xbf16, #tpu.memory_space<vmem>>, %arg3: memref<512x256xbf16, #tpu.memory_space<vmem>>, %arg4: memref<1x256xf32, #tpu.memory_space<vmem>>, %arg5: memref<32x256xbf16, #tpu.memory_space<vmem>>) attributes {dimension_semantics = [#tpu.dimension_semantics<parallel>, #tpu.dimension_semantics<parallel>], iteration_bounds = array<i64: 1, 1>, scalar_prefetch = 0 : i64, scratch_operands = 0 : i64, tpu.core_type = #tpu.core_type<tc>, window_params = [{transform_indices = @transform_0, window_bounds = array<i64: 32, 512>}, {transform_indices = @transform_1, window_bounds = array<i64: 512, 256>}, {transform_indices = @transform_2, window_bounds = array<i64: 1, 256>}, {transform_indices = @transform_3, window_bounds = array<i64: 32, 256>}]} {
    %c0 = arith.constant 0 : index
    %c0_0 = arith.constant 0 : index
    %0 = vector.load %arg2[%c0, %c0_0] : memref<32x512xbf16, #tpu.memory_space<vmem>>, vector<32x512xbf16>
    %c0_1 = arith.constant 0 : index
    %c0_2 = arith.constant 0 : index
    %1 = vector.load %arg3[%c0_1, %c0_2] : memref<512x256xbf16, #tpu.memory_space<vmem>>, vector<512x256xbf16>
    %cst = arith.constant dense<0.000000e+00> : vector<32x256xf32>
    %2 = tpu.matmul %0, %1, %cst {dimension_numbers = #tpu.dot_dimension_numbers<[1], [0], [0], [1], [0, 0, 1, 1], [], []>} : vector<32x512xbf16>, vector<512x256xbf16>, vector<32x256xf32> -> vector<32x256xf32>
    %c0_3 = arith.constant 0 : index
    %c0_4 = arith.constant 0 : index
    %3 = vector.load %arg4[%c0_3, %c0_4] : memref<1x256xf32, #tpu.memory_space<vmem>>, vector<1x256xf32>
    %4 = vector.broadcast %3 : vector<1x256xf32> to vector<32x256xf32>
    %5 = arith.addf %2, %4 : vector<32x256xf32>
    %6 = arith.truncf %5 : vector<32x256xf32> to vector<32x256xbf16>
    %c0_5 = arith.constant 0 : index
    %c0_6 = arith.constant 0 : index
    %7 = vector.load %arg5[%c0_5, %c0_6] : memref<32x256xbf16, #tpu.memory_space<vmem>>, vector<32x256xbf16>
    tpu.vector_store %arg5[%c0_5, %c0_6], %6 {strides = array<i32>} : memref<32x256xbf16, #tpu.memory_space<vmem>>, vector<32x256xbf16>,
    return
  }
  func.func @transform_0(%arg0: i32, %arg1: i32) -> (i32, i32) {
    %c0_i32 = arith.constant 0 : i32
    %c0_i32_0 = arith.constant 0 : i32
    return %arg0, %c0_i32 : i32, i32
  }
  func.func @transform_1(%arg0: i32, %arg1: i32) -> (i32, i32) {
    %c0_i32 = arith.constant 0 : i32
    %c0_i32_0 = arith.constant 0 : i32
    return %c0_i32, %arg1 : i32, i32
  }
  func.func @transform_2(%arg0: i32, %arg1: i32) -> (i32, i32) {
    %c0_i32 = arith.constant 0 : i32
    %c0_i32_0 = arith.constant 0 : i32
    return %c0_i32, %arg1 : i32, i32
  }
  func.func @transform_3(%arg0: i32, %arg1: i32) -> (i32, i32) {
    %c0_i32 = arith.constant 0 : i32
    return %arg0, %arg1 : i32, i32
  }
}

module attributes {stable_mosaic.version = 11 : i64} {
  func.func @_matmul_bias_act_kernel(%arg0: i32, %arg1: i32, %arg2: memref<128x256xbf16, #tpu.memory_space<vmem>>, %arg3: memref<256x128xbf16, #tpu.memory_space<vmem>>, %arg4: memref<1x128xf32, #tpu.memory_space<vmem>>, %arg5: memref<128x128xbf16, #tpu.memory_space<vmem>>) attributes {dimension_semantics = [#tpu.dimension_semantics<parallel>, #tpu.dimension_semantics<parallel>], iteration_bounds = array<i64: 1, 1>, scalar_prefetch = 0 : i64, scratch_operands = 0 : i64, tpu.core_type = #tpu.core_type<tc>, window_params = [{transform_indices = @transform_0, window_bounds = array<i64: 128, 256>}, {transform_indices = @transform_1, window_bounds = array<i64: 256, 128>}, {transform_indices = @transform_2, window_bounds = array<i64: 1, 128>}, {transform_indices = @transform_3, window_bounds = array<i64: 128, 128>}]} {
    %c0 = arith.constant 0 : index
    %c0_0 = arith.constant 0 : index
    %0 = vector.load %arg2[%c0, %c0_0] : memref<128x256xbf16, #tpu.memory_space<vmem>>, vector<128x256xbf16>
    %c0_1 = arith.constant 0 : index
    %c0_2 = arith.constant 0 : index
    %1 = vector.load %arg3[%c0_1, %c0_2] : memref<256x128xbf16, #tpu.memory_space<vmem>>, vector<256x128xbf16>
    %cst = arith.constant dense<0.000000e+00> : vector<128x128xf32>
    %2 = tpu.matmul %0, %1, %cst {dimension_numbers = #tpu.dot_dimension_numbers<[1], [0], [0], [1], [0, 0, 1, 1], [], []>} : vector<128x256xbf16>, vector<256x128xbf16>, vector<128x128xf32> -> vector<128x128xf32>
    %c0_3 = arith.constant 0 : index
    %c0_4 = arith.constant 0 : index
    %3 = vector.load %arg4[%c0_3, %c0_4] : memref<1x128xf32, #tpu.memory_space<vmem>>, vector<1x128xf32>
    %4 = vector.broadcast %3 : vector<1x128xf32> to vector<128x128xf32>
    %5 = arith.addf %2, %4 : vector<128x128xf32>
    %6 = arith.truncf %5 : vector<128x128xf32> to vector<128x128xbf16>
    %c0_5 = arith.constant 0 : index
    %c0_6 = arith.constant 0 : index
    %7 = vector.load %arg5[%c0_5, %c0_6] : memref<128x128xbf16, #tpu.memory_space<vmem>>, vector<128x128xbf16>
    tpu.vector_store %arg5[%c0_5, %c0_6], %6 {strides = array<i32>} : memref<128x128xbf16, #tpu.memory_space<vmem>>, vector<128x128xbf16>,
    return
  }
  func.func @transform_0(%arg0: i32, %arg1: i32) -> (i32, i32) {
    %c0_i32 = arith.constant 0 : i32
    %c0_i32_0 = arith.constant 0 : i32
    return %arg0, %c0_i32 : i32, i32
  }
  func.func @transform_1(%arg0: i32, %arg1: i32) -> (i32, i32) {
    %c0_i32 = arith.constant 0 : i32
    %c0_i32_0 = arith.constant 0 : i32
    return %c0_i32, %arg1 : i32, i32
  }
  func.func @transform_2(%arg0: i32, %arg1: i32) -> (i32, i32) {
    %c0_i32 = arith.constant 0 : i32
    %c0_i32_0 = arith.constant 0 : i32
    return %c0_i32, %arg1 : i32, i32
  }
  func.func @transform_3(%arg0: i32, %arg1: i32) -> (i32, i32) {
    %c0_i32 = arith.constant 0 : i32
    return %arg0, %arg1 : i32, i32
  }
}

module attributes {stable_mosaic.version = 11 : i64} {
  func.func @_matmul_bias_act_kernel(%arg0: i32, %arg1: i32, %arg2: memref<512x2592xbf16, #tpu.memory_space<vmem>>, %arg3: memref<2592x128xbf16, #tpu.memory_space<vmem>>, %arg4: memref<1x128xf32, #tpu.memory_space<vmem>>, %arg5: memref<512x128xf32, #tpu.memory_space<vmem>>) attributes {dimension_semantics = [#tpu.dimension_semantics<parallel>, #tpu.dimension_semantics<parallel>], iteration_bounds = array<i64: 1, 1>, scalar_prefetch = 0 : i64, scratch_operands = 0 : i64, tpu.core_type = #tpu.core_type<tc>, window_params = [{transform_indices = @transform_0, window_bounds = array<i64: 512, 2592>}, {transform_indices = @transform_1, window_bounds = array<i64: 2592, 128>}, {transform_indices = @transform_2, window_bounds = array<i64: 1, 128>}, {transform_indices = @transform_3, window_bounds = array<i64: 512, 128>}]} {
    %c0 = arith.constant 0 : index
    %c0_0 = arith.constant 0 : index
    %0 = vector.load %arg2[%c0, %c0_0] : memref<512x2592xbf16, #tpu.memory_space<vmem>>, vector<512x2592xbf16>
    %c0_1 = arith.constant 0 : index
    %c0_2 = arith.constant 0 : index
    %1 = vector.load %arg3[%c0_1, %c0_2] : memref<2592x128xbf16, #tpu.memory_space<vmem>>, vector<2592x128xbf16>
    %cst = arith.constant dense<0.000000e+00> : vector<512x128xf32>
    %2 = tpu.matmul %0, %1, %cst {dimension_numbers = #tpu.dot_dimension_numbers<[1], [0], [0], [1], [0, 0, 1, 1], [], []>} : vector<512x2592xbf16>, vector<2592x128xbf16>, vector<512x128xf32> -> vector<512x128xf32>
    %c0_3 = arith.constant 0 : index
    %c0_4 = arith.constant 0 : index
    %3 = vector.load %arg4[%c0_3, %c0_4] : memref<1x128xf32, #tpu.memory_space<vmem>>, vector<1x128xf32>
    %4 = vector.broadcast %3 : vector<1x128xf32> to vector<512x128xf32>
    %5 = arith.addf %2, %4 : vector<512x128xf32>
    %6 = math.tanh %5 : vector<512x128xf32>
    %c0_5 = arith.constant 0 : index
    %c0_6 = arith.constant 0 : index
    %7 = vector.load %arg5[%c0_5, %c0_6] : memref<512x128xf32, #tpu.memory_space<vmem>>, vector<512x128xf32>
    tpu.vector_store %arg5[%c0_5, %c0_6], %6 {strides = array<i32>} : memref<512x128xf32, #tpu.memory_space<vmem>>, vector<512x128xf32>,
    return
  }
  func.func @transform_0(%arg0: i32, %arg1: i32) -> (i32, i32) {
    %c0_i32 = arith.constant 0 : i32
    %c0_i32_0 = arith.constant 0 : i32
    return %arg0, %c0_i32 : i32, i32
  }
  func.func @transform_1(%arg0: i32, %arg1: i32) -> (i32, i32) {
    %c0_i32 = arith.constant 0 : i32
    %c0_i32_0 = arith.constant 0 : i32
    return %c0_i32, %arg1 : i32, i32
  }
  func.func @transform_2(%arg0: i32, %arg1: i32) -> (i32, i32) {
    %c0_i32 = arith.constant 0 : i32
    %c0_i32_0 = arith.constant 0 : i32
    return %c0_i32, %arg1 : i32, i32
  }
  func.func @transform_3(%arg0: i32, %arg1: i32) -> (i32, i32) {
    %c0_i32 = arith.constant 0 : i32
    return %arg0, %arg1 : i32, i32
  }
}

</mosaic_0001>

<bundles_post_ra>
// kernel: fast_style_network.70
= control target key start
LH: loop header
LB: loop body
LE: loop exit
PB: predicated region body
PF: predicated region fallthrough
CT: control target
= control target key end

     0   :  { %s578_s12 = smov 0   ;;  %s580_s13 = smov 0   ;;  %s626_s0 = inlined_call_operand.vmem [shape: bf16[2,64,128], index: 0, kind: input, shape index: {}]   ;;  %s627_s1 = inlined_call_operand.vmem [shape: f32[2,1,128], index: 1, kind: input, shape index: {}]   ;;  %s628_s2 = inlined_call_operand.vmem [shape: f32[2,1,128], index: 2, kind: input, shape index: {}]   ;;  %s629_s3 = inlined_call_operand.vmem [shape: bf16[2,64,128], index: 3, kind: output, shape index: {}]  }
   0x1   :  { %s582_s14 = smov 0  }
   0x2 LB: > { %s25_s15 = sadd.s32 1, %s552_s13  ;;  %p441_p0 = scmp.ge.s32.totalorder %s556_s14, 1  ;;  %s556_s14 = sphi %s582_s14, %s13_s14   ;;  %s552_s13 = sphi %s580_s13, %s631_s13   ;;  %s548_s12 = sphi %s578_s12, %s630_s12  }
   0x3   : > { %p27_p1 = scmp.ge.s32.totalorder %s25_s15, 2  ;;  %p174_p2 = scmp.lt.s32.totalorder %s556_s14, 3 }
   0x5   : > { %s633_s15 = smov (%p27_p1, %s25_s15), 0  ;;  %p175_p3 = pnand %p441_p0, %p174_p2 }
   0x6   : > { %p213_p4 = scmp.lt.s32.totalorder (!%p175_p3), %s548_s12, 1 }
   0x7   : > { %178 = sbr.rel (%p175_p3) target bundleno = 30 (0x1e), region = 32 }
   0xe   : > { %s635_s12 = smov (!%p213_p4, %s548_s12), 1 }
   0xf   : > { %s458_s16 = sshll.u32 %s635_s12, 5  ;;  %s224_s19 = scalar_lea.vmem %s627_s1, %s635_s12 }
  0x10   : > { %s220_s22 = scalar_lea.vmem %s626_s0, %s458_s16  ;;  %s227_s25 = scalar_lea.vmem %s628_s2, %s635_s12  ;;  %v446_v1 = vld [vmem:[%s224_s19] ss:$0 sm:$0xff] }
  0x11   : > { %v469_v0 = vld [vmem:[%s220_s22] sm:$0xff]   ;;  %v504_v2 = vld [vmem:[%s220_s22 + $0x8] sm:$0xff]   ;;  %v505_v7 = vld [vmem:[%s220_s22 + $0x10] sm:$0xff]   ;;  %s236_s28 = scalar_lea.vmem %s629_s3, %s458_s16 }
  0x12   : > { %v470_v3 = vunpack.c.l.bf16 %v469_v0  ;;  %v471_v4 = vunpack.c.h.bf16 %v469_v0  ;;  %v474_v5 = vunpack.c.l.bf16 %v504_v2  ;;  %v475_v6 = vunpack.c.h.bf16 %v504_v2  ;;  %v506_v8 = vld [vmem:[%s220_s22 + $0x18] sm:$0xff]   ;;  %v447_v9 = vld [vmem:[%s227_s25] ss:$0 sm:$0xff] }
  0x13   : > { %v478_v10 = vunpack.c.l.bf16 %v505_v7  ;;  %v479_v11 = vunpack.c.h.bf16 %v505_v7  ;;  %v482_v12 = vunpack.c.l.bf16 %v506_v8  ;;  %v483_v13 = vunpack.c.h.bf16 %v506_v8 }
  0x14   : > { %v261_v14 = vsub.f32 %v470_v3, %v446_v1  ;;  %v262_v15 = vsub.f32 %v471_v4, %v446_v1  ;;  %v263_v16 = vsub.f32 %v474_v5, %v446_v1  ;;  %v264_v17 = vsub.f32 %v475_v6, %v446_v1 }
  0x15   : > { %v265_v18 = vsub.f32 %v478_v10, %v446_v1  ;;  %v266_v19 = vsub.f32 %v479_v11, %v446_v1  ;;  %v267_v20 = vsub.f32 %v482_v12, %v446_v1  ;;  %v268_v21 = vsub.f32 %v483_v13, %v446_v1 }
  0x16   : > { %v276_v22 = vmul.f32 %v447_v9, %v261_v14  ;;  %v277_v23 = vmul.f32 %v447_v9, %v262_v15  ;;  %v278_v24 = vmul.f32 %v447_v9, %v263_v16  ;;  %v279_v25 = vmul.f32 %v447_v9, %v264_v17 }
  0x17   : > { %v280_v26 = vmul.f32 %v447_v9, %v265_v18  ;;  %v281_v27 = vmul.f32 %v447_v9, %v266_v19  ;;  %v282_v28 = vmul.f32 %v447_v9, %v267_v20  ;;  %v283_v29 = vmul.f32 %v447_v9, %v268_v21 }
  0x18   : > { %v284_v30 = vmax.f32 %v276_v22, 0.0  ;;  %v285_v31 = vmax.f32 %v277_v23, 0.0  ;;  %v286_v32 = vmax.f32 %v278_v24, 0.0  ;;  %v287_v33 = vmax.f32 %v279_v25, 0.0 }
  0x19   : > { %v288_v34 = vmax.f32 %v280_v26, 0.0  ;;  %v289_v35 = vmax.f32 %v281_v27, 0.0  ;;  %v290_v36 = vmax.f32 %v282_v28, 0.0  ;;  %v291_v37 = vmax.f32 %v283_v29, 0.0 }
  0x1a   : > { %v487_v38 = vpack.c.bf16 %v285_v31, %v284_v30  ;;  %v492_v39 = vpack.c.bf16 %v287_v33, %v286_v32 }
  0x1b   : > { %v497_v40 = vpack.c.bf16 %v289_v35, %v288_v34  ;;  %v502_v41 = vpack.c.bf16 %v291_v37, %v290_v36 }
  0x1c   : > { %488 = vst [vmem:[%s236_s28] sm:$0xff] %v487_v38   ;;  %507 = vst [vmem:[%s236_s28 + $0x8] sm:$0xff] %v492_v39  }
  0x1d   : > { %508 = vst [vmem:[%s236_s28 + $0x10] sm:$0xff] %v497_v40   ;;  %509 = vst [vmem:[%s236_s28 + $0x18] sm:$0xff] %v502_v41  }
  0x1e PF: > { %s13_s14 = sadd.s32 1, %s556_s14   ;;  %s630_s12 = smov %s552_s13 }
  0x1f   : > { %p10_p5 = scmp.ge.s32.totalorder %s13_s14, 4   ;;  %s631_s13 = smov %s633_s15 }
  0x21   :  { %12 = sbr.rel (!%p10_p5) target bundleno = 2 (0x2), region = 68 }

// kernel: fast_style_network.69
= control target key start
LH: loop header
LB: loop body
LE: loop exit
PB: predicated region body
PF: predicated region fallthrough
CT: control target
= control target key end

     0   :  { %s1053_s9 = smov 0   ;;  %s1055_s10 = smov 0   ;;  %s1261_s0 = inlined_call_operand.vmem [shape: bf16[2,64,128], index: 0, kind: input, shape index: {}]   ;;  %s1262_s1 = inlined_call_operand.vmem [shape: f32[2,1,128], index: 1, kind: output, shape index: {0}]   ;;  %s1263_s2 = inlined_call_operand.vmem [shape: f32[2,1,128], index: 2, kind: output, shape index: {1}]  }
   0x1   :  { %s1057_s11 = smov 0  }
   0x2 LB: > { %s25_s12 = sadd.s32 1, %s1028_s10  ;;  %p755_p0 = scmp.ge.s32.totalorder %s1032_s11, 1  ;;  %s1032_s11 = sphi %s1057_s11, %s13_s11   ;;  %s1028_s10 = sphi %s1055_s10, %s1293_s10   ;;  %s1024_s9 = sphi %s1053_s9, %s1292_s9  }
   0x3   : > { %p27_p1 = scmp.ge.s32.totalorder %s25_s12, 2  ;;  %p134_p2 = scmp.lt.s32.totalorder %s1032_s11, 3 }
   0x5   : > { %s1295_s12 = smov (%p27_p1, %s25_s12), 0  ;;  %p135_p3 = pnand %p755_p0, %p134_p2 }
   0x6   : > { %v241_v0 = vlaneseq (!%p135_p3)  ;;  %p162_p4 = scmp.lt.s32.totalorder (!%p135_p3), %s1024_s9, 1  ;;  %v1034_v1 = vmov (!%p135_p3), 0.0|0.0   ;;  %vm1035_vm0 = vmmov (!%p135_p3), 0   ;;  %v1036_v4 = vmov (!%p135_p3), 0.0  }
   0x7   : > { %138 = sbr.rel (%p135_p3) target bundleno = 290 (0x122), region = 24  ;;  %932 = vmatprep.subr.bf16.mxu0 (!%p135_p3), %v1034_v1  ;;  %956 = vmatprep.subr.bf16.mxu1 (!%p135_p3), %v1034_v1  ;;  %v1037_v22 = vmov (!%p135_p3), 1.0|1.0  }
   0x8   : > { %v1073_v2 = vshrl.u32 (!%p135_p3), %v241_v0, 7  ;;  %v451_v3 = vand.u32 (!%p135_p3), 127, %v241_v0  ;;  %894 = vmatprep.mubr.msk.f32.mxu0 (!%p135_p3), %vm1035_vm0, %v1036_v4  ;;  %929 = vmatprep.mubr.msk.f32.mxu1 (!%p135_p3), %vm1035_vm0, %v1036_v4 }
   0xa   : > { %v243_v5 = vadd.s32 (!%p135_p3), 8, %v1073_v2  ;;  %v262_v6 = vand.u32 (!%p135_p3), 31, %v1073_v2  ;;  %v1077_v7 = vand.u32 (!%p135_p3), 31, %v451_v3  ;;  %v244_v8 = vadd.s32 (!%p135_p3), 16, %v1073_v2 }
   0xb   : > { %v245_v9 = vadd.s32 (!%p135_p3), 24, %v1073_v2  ;;  %v246_v10 = vadd.s32 (!%p135_p3), 32, %v1073_v2  ;;  %v247_v11 = vadd.s32 (!%p135_p3), 40, %v1073_v2  ;;  %v248_v16 = vadd.s32 (!%p135_p3), 48, %v1073_v2 }
   0xc   : > { %v269_v12 = vand.u32 (!%p135_p3), 31, %v243_v5  ;;  %vm1095_vm1 = vcmp.eq.s32.totalorder (!%p135_p3), %v262_v6, %v1077_v7  ;;  %v276_v14 = vand.u32 (!%p135_p3), 31, %v244_v8  ;;  %v249_v17 = vadd.s32 (!%p135_p3), 56, %v1073_v2 }
   0xd   : > { %v283_v15 = vand.u32 (!%p135_p3), 31, %v245_v9  ;;  %v290_v19 = vand.u32 (!%p135_p3), 31, %v246_v10  ;;  %v297_v20 = vand.u32 (!%p135_p3), 31, %v247_v11  ;;  %v304_v23 = vand.u32 (!%p135_p3), 31, %v248_v16 }
   0xe   : > { %s1297_s9 = smov (!%p162_p4, %s1024_s9), 1  ;;  %vm465_vm2 = vcmp.eq.s32.totalorder %v269_v12, %v1077_v7  ;;  %vm1104_vm3 = vcmp.eq.s32.totalorder %v276_v14, %v1077_v7  ;;  %v311_v24 = vand.u32 31, %v249_v17  ;;  %v250_v25 = vadd.s32 64, %v1073_v2 }
   0xf   : > { %s1083_s15 = scalar_lea.vmem %s1262_s1, %s1297_s9  ;;  %s808_s16 = sshll.u32 %s1297_s9, 5  ;;  %vm933_vm4 = vmpackc.low %vm465_vm2, %vm1095_vm1  ;;  %vm1116_vm5 = vcmp.eq.s32.totalorder %v283_v15, %v1077_v7  ;;  %vm1131_vm7 = vcmp.eq.s32.totalorder %v290_v19, %v1077_v7  ;;  %vm1136_vm8 = vcmp.eq.s32.totalorder %v297_v20, %v1077_v7  ;;  %v251_v29 = vadd.s32 72, %v1073_v2 }
  0x10   : > { %s1091_s19 = scalar_lea.vmem %s1263_s2, %s1297_s9  ;;  %181 = vst [vmem:[%s1083_s15] sm:$0x1] %v1036_v4  ;;  %s1111_s22 = scalar_lea.vmem %s1261_s0, %s808_s16  ;;  %934 = vmatpush3.bf16.msk.msra.mxu0 %vm933_vm4, %v1037_v22  ;;  %958 = vmatpush3.bf16.msk.msra.mxu1 %vm933_vm4, %v1037_v22  ;;  %vm936_vm6 = vmpackc.low %vm1116_vm5, %vm1104_vm3  ;;  %vm1151_vm10 = vcmp.eq.s32.totalorder %v304_v23, %v1077_v7  ;;  %vm1156_vm11 = vcmp.eq.s32.totalorder %v311_v24, %v1077_v7  ;;  %v318_v34 = vand.u32 31, %v250_v25  ;;  %v252_v37 = vadd.s32 80, %v1073_v2 }
  0x11   : > { %182 = vst [vmem:[%s1091_s19] sm:$0x1] %v1036_v4  ;;  %935 = vmatprep.subr.bf16.mxu0 %v1034_v1  ;;  %959 = vmatprep.subr.bf16.mxu1 %v1034_v1  ;;  %v810_v26 = vld [vmem:[%s1111_s22] sm:$0xff]   ;;  %v825_v30 = vld [vmem:[%s1111_s22 + $0x8] sm:$0xff]   ;;  %vm939_vm9 = vmpackc.low %vm1136_vm8, %vm1131_vm7  ;;  %v325_v36 = vand.u32 31, %v251_v29  ;;  %v253_v38 = vadd.s32 88, %v1073_v2  ;;  %v254_v42 = vadd.s32 96, %v1073_v2 }
  0x12   : > { %v811_v31 = vunpack.c.l.bf16 %v810_v26  ;;  %v812_v35 = vunpack.c.h.bf16 %v810_v26  ;;  %v815_v39 = vunpack.c.l.bf16 %v825_v30  ;;  %v826_v40 = vld [vmem:[%s1111_s22 + $0x10] sm:$0xff]   ;;  %v816_v41 = vunpack.c.h.bf16 %v825_v30  ;;  %vm942_vm12 = vmpackc.low %vm1156_vm11, %vm1151_vm10  ;;  %v827_v53 = vld [vmem:[%s1111_s22 + $0x18] sm:$0xff]  }
  0x13   : > { %vm1173_vm13 = vcmp.eq.s32.totalorder %v318_v34, %v1077_v7  ;;  %v255_v47 = vadd.s32 104, %v1073_v2  ;;  %v819_v48 = vunpack.c.l.bf16 %v826_v40  ;;  %vm1179_vm14 = vcmp.eq.s32.totalorder %v325_v36, %v1077_v7 }
  0x14   : > { %937 = vmatpush3.bf16.msk.msra.mxu0 %vm936_vm6, %v1037_v22  ;;  %961 = vmatpush3.bf16.msk.msra.mxu1 %vm936_vm6, %v1037_v22  ;;  %v200_v43 = vadd.f32 %v812_v35, %v811_v31  ;;  %v216_v44 = vmul.f32 %v811_v31, %v811_v31  ;;  %v217_v45 = vmul.f32 %v812_v35, %v812_v35  ;;  %v332_v51 = vand.u32 31, %v252_v37  ;;  %vm945_vm15 = vmpackc.low %vm1179_vm14, %vm1173_vm13 }
  0x15   : > { %938 = vmatprep.subr.bf16.mxu0 %v1034_v1  ;;  %962 = vmatprep.subr.bf16.mxu1 %v1034_v1  ;;  %v218_v49 = vmul.f32 %v815_v39, %v815_v39  ;;  %v339_v52 = vand.u32 31, %v253_v38  ;;  %v820_v55 = vunpack.c.h.bf16 %v826_v40  ;;  %v219_v56 = vmul.f32 %v816_v41, %v816_v41 }
  0x16   : > { %v201_v54 = vadd.f32 %v815_v39, %v200_v43  ;;  %v224_v57 = vadd.f32 %v217_v45, %v216_v44  ;;  %v256_v58 = vadd.s32 112, %v1073_v2  ;;  %v257_v59 = vadd.s32 120, %v1073_v2 }
  0x17   : > { %v346_v61 = vand.u32 31, %v254_v42  ;;  %v823_v62 = vunpack.c.l.bf16 %v827_v53  ;;  %v220_v63 = vmul.f32 %v819_v48, %v819_v48  ;;  %vm1195_vm0 = vcmp.eq.s32.totalorder %v332_v51, %v1077_v7  ;;  %v199_v32 = vld [vmem:[%s1083_s15] sm:$0x1] }
  0x18   : > { %940 = vmatpush3.bf16.msk.msra.mxu0 %vm939_vm9, %v1037_v22  ;;  %964 = vmatpush3.bf16.msk.msra.mxu1 %vm939_vm9, %v1037_v22  ;;  %v202_v60 = vadd.f32 %v816_v41, %v201_v54  ;;  %v225_v0 = vadd.f32 %v224_v57, %v218_v49  ;;  %vm1200_vm1 = vcmp.eq.s32.totalorder %v339_v52, %v1077_v7  ;;  %v353_v4 = vand.u32 31, %v255_v47  ;;  %v215_v36 = vld [vmem:[%s1091_s19] sm:$0x1] }
  0x19   : > { %941 = vmatprep.subr.bf16.mxu0 %v1034_v1  ;;  %965 = vmatprep.subr.bf16.mxu1 %v1034_v1  ;;  %v824_v6 = vunpack.c.h.bf16 %v827_v53  ;;  %v221_v8 = vmul.f32 %v820_v55, %v820_v55  ;;  %vm948_vm2 = vmpackc.low %vm1200_vm1, %vm1195_vm0  ;;  %v360_v11 = vand.u32 31, %v256_v58  ;;  %v222_v12 = vmul.f32 %v823_v62, %v823_v62 }
  0x1a   : > { %v203_v5 = vadd.f32 %v819_v48, %v202_v60  ;;  %v226_v9 = vadd.f32 %v225_v0, %v219_v56  ;;  %vm1213_vm3 = vcmp.eq.s32.totalorder %v346_v61, %v1077_v7  ;;  %vm1218_vm4 = vcmp.eq.s32.totalorder %v353_v4, %v1077_v7 }
  0x1b   : > { %v367_v16 = vand.u32 31, %v257_v59  ;;  %v223_v18 = vmul.f32 %v824_v6, %v824_v6  ;;  %vm951_vm5 = vmpackc.low %vm1218_vm4, %vm1213_vm3  ;;  %vm1231_vm6 = vcmp.eq.s32.totalorder %v360_v11, %v1077_v7 }
  0x1c   : > { %943 = vmatpush3.bf16.msk.msra.mxu0 %vm942_vm12, %v1037_v22  ;;  %967 = vmatpush3.bf16.msk.msra.mxu1 %vm942_vm12, %v1037_v22  ;;  %v204_v10 = vadd.f32 %v820_v55, %v203_v5  ;;  %v227_v13 = vadd.f32 %v226_v9, %v220_v63 }
  0x1d   : > { %944 = vmatprep.subr.bf16.mxu0 %v1034_v1  ;;  %968 = vmatprep.subr.bf16.mxu1 %v1034_v1  ;;  %vm479_vm7 = vcmp.eq.s32.totalorder %v367_v16, %v1077_v7 }
  0x1e   : > { %v205_v17 = vadd.f32 %v823_v62, %v204_v10  ;;  %v228_v19 = vadd.f32 %v227_v13, %v221_v8  ;;  %vm954_vm8 = vmpackc.low %vm479_vm7, %vm1231_vm6 }
  0x20   : > { %946 = vmatpush3.bf16.msk.msra.mxu0 %vm945_vm15, %v1037_v22  ;;  %970 = vmatpush3.bf16.msk.msra.mxu1 %vm945_vm15, %v1037_v22  ;;  %v206_v20 = vadd.f32 %v824_v6, %v205_v17  ;;  %v229_v21 = vadd.f32 %v228_v19, %v222_v12 }
  0x21   : > { %947 = vmatprep.subr.bf16.mxu0 %v1034_v1  ;;  %971 = vmatprep.subr.bf16.mxu1 %v1034_v1 }
  0x22   : > { %v207_v24 = vrot.slane %v206_v20, 4  ;;  %v230_v25 = vadd.f32 %v229_v21, %v223_v18 }
  0x24   : > { %949 = vmatpush3.bf16.msk.msra.mxu0 %vm948_vm2, %v1037_v22  ;;  %973 = vmatpush3.bf16.msk.msra.mxu1 %vm948_vm2, %v1037_v22  ;;  %v208_v26 = vadd.f32 %v207_v24, %v206_v20  ;;  %v231_v27 = vrot.slane %v230_v25, 4 }
  0x25   : > { %950 = vmatprep.subr.bf16.mxu0 %v1034_v1  ;;  %974 = vmatprep.subr.bf16.mxu1 %v1034_v1 }
  0x26   : > { %v209_v28 = vrot.slane %v208_v26, 2  ;;  %v232_v7 = vadd.f32 %v231_v27, %v230_v25 }
  0x28   : > { %952 = vmatpush3.bf16.msk.msra.mxu0 %vm951_vm5, %v1037_v22  ;;  %976 = vmatpush3.bf16.msk.msra.mxu1 %vm951_vm5, %v1037_v22  ;;  %v210_v29 = vadd.f32 %v209_v28, %v208_v26  ;;  %v233_v30 = vrot.slane %v232_v7, 2 }
  0x29   : > { %953 = vmatprep.subr.bf16.mxu0 %v1034_v1  ;;  %977 = vmatprep.subr.bf16.mxu1 %v1034_v1 }
  0x2a   : > { %v211_v31 = vrot.slane %v210_v29, 1  ;;  %v234_v33 = vadd.f32 %v233_v30, %v232_v7 }
  0x2c   : > { %955 = vmatpush3.bf16.msk.msra.mxu0 %vm954_vm8, %v1037_v22  ;;  %979 = vmatpush3.bf16.msk.msra.mxu1 %vm954_vm8, %v1037_v22  ;;  %v212_v34 = vadd.f32 %v211_v31, %v210_v29  ;;  %v235_v35 = vrot.slane %v234_v33, 1 }
  0x2e   : > { %v213_v1 = vadd.f32 %v212_v34, %v199_v32  ;;  %v236_v37 = vadd.f32 %v235_v35, %v234_v33 }
  0x30   : > { %214 = vst [vmem:[%s1083_s15] sm:$0x1] %v213_v1  ;;  %v237_v38 = vadd.f32 %v236_v37, %v215_v36 }
  0x32   : > { %238 = vst [vmem:[%s1091_s19] sm:$0x1] %v237_v38 }
  0x37   : > { %v239_v39 = vld [vmem:[%s1083_s15] sm:$0x1] }
  0x38   : > { %895 = vmatmul.mubr.f32.vlgmr.msra.gmra.mrb[0].mxu0 %v239_v39 }
  0x39   : > { %v240_v40 = vld [vmem:[%s1091_s19] sm:$0x1] }
  0x3a   : > { %930 = vmatmul.mubr.f32.vlgmr.msra.gmra.mrb[0].mxu1 %v240_v40 }
 0x10b   : > { %v578_v41 = vpop.f32.mrb[0].mxu0 }
 0x10c   : > { %v653_v22 = vmul.f32 0.00390625, %v578_v41  ;;  %v896_v42 = vpop.f32.mrb[1].mxu0 }
 0x10d   : > { %v648_v44 = vpop.f32.mrb[0].mxu1 }
 0x10e   : > { %v655_v43 = vmul.f32 %v653_v22, %v653_v22  ;;  %663 = vst [vmem:[%s1083_s15] sm:$0x1] %v653_v22  ;;  %v654_v45 = vmul.f32 0.00390625, %v648_v44  ;;  %v931_v46 = vpop.f32.mrb[1].mxu1 }
 0x110   : > { %v656_v47 = vsub.f32 %v654_v45, %v655_v43 }
 0x112   : > { %v657_v48 = vmax.f32 %v656_v47, 0.0 }
 0x114   : > { %v658_v49 = vadd.f32 1e-05, %v657_v48 }
 0x116   : > { %1008 = vrsqrt.f32 %v658_v49 }
 0x120   : > { %v1009_v50 = vpop.eup %1008 }
 0x121   : > { %664 = vst [vmem:[%s1091_s19] sm:$0x1] %v1009_v50 }
 0x122 PF: > { %s13_s11 = sadd.s32 1, %s1032_s11   ;;  %s1292_s9 = smov %s1028_s10 }
 0x123   : > { %p10_p5 = scmp.ge.s32.totalorder %s13_s11, 4   ;;  %s1293_s10 = smov %s1295_s12 }
 0x125   :  { %12 = sbr.rel (!%p10_p5) target bundleno = 2 (0x2), region = 74 }

// kernel: fast_style_network.68
= control target key start
LH: loop header
LB: loop body
LE: loop exit
PB: predicated region body
PF: predicated region fallthrough
CT: control target
= control target key end

     0   :  { %v1793_v0 = vmov 0   ;;  %vm498_vm0 = vcmask 941056   ;;  %vm595_vm1 = vcmask 1040384   ;;  %vm596_vm2 = vcmask 1041408   ;;  %s2284_s1 = inlined_call_operand.vmem [shape: bf16[243,128], index: 1, kind: input, shape index: {}]   ;;  %s2285_s0 = inlined_call_operand.vmem [shape: bf16[512,243], index: 0, kind: input, shape index: {}]   ;;  %s2286_s2 = inlined_call_operand.vmem [shape: f32[1,128], index: 2, kind: input, shape index: {}]   ;;  %s2287_s3 = inlined_call_operand.vmem [shape: bf16[512,128], index: 3, kind: output, shape index: {}]  }
   0x1   :  { %602 = vmatprep.subr.bf16.mxu0 %v1793_v0  ;;  %1647 = vmatprep.subr.bf16.mxu1 %v1793_v0  ;;  %v1681_v1 = vld [vmem:[%s2284_s1] sm:$0xff]   ;;  %v1682_v2 = vld [vmem:[%s2284_s1 + $0x8] sm:$0xff]   ;;  %v1683_v3 = vld [vmem:[%s2284_s1 + $0x10] sm:$0xff]   ;;  %v1794_v17 = vmov 65535  }
   0x2   :  { %603 = vmatpush1.bf16.msra.mxu0 %v1681_v1  ;;  %1663 = vmatpush1.bf16.msra.mxu1 %v1681_v1  ;;  %v1684_v4 = vld [vmem:[%s2284_s1 + $0x18] sm:$0xff]   ;;  %v1685_v5 = vld [vmem:[%s2284_s1 + $0x20] sm:$0xff]   ;;  %v1686_v7 = vld [vmem:[%s2284_s1 + $0x28] sm:$0xff]   ;;  %v597_v18 = vsel %vm595_vm1, 4294967295, %v1794_v17 }
   0x3   :  { %604 = vmatprep.subr.bf16.mxu0 %v1793_v0  ;;  %1648 = vmatprep.subr.bf16.mxu1 %v1793_v0  ;;  %v1699_v6 = vld [vmem:[%s2285_s0 + $0x4] ss:$8 sps:$4 sm:$0xff]   ;;  %v1687_v9 = vld [vmem:[%s2284_s1 + $0x30] sm:$0xff]   ;;  %v1688_v10 = vld [vmem:[%s2284_s1 + $0x38] sm:$0xff]   ;;  %v598_v21 = vsel %vm596_vm2, %v597_v18, 0 }
   0x4   :  { %v1702_v8 = vld [vmem:[%s2285_s0 + $0x104] ss:$8 sps:$4 sm:$0xff]   ;;  %1296 = vmatprep.mubr.msk.bf16.mxu0 %vm498_vm0, %v1699_v6  ;;  %v1691_v13 = vld [vmem:[%s2284_s1 + $0x50] sm:$0xff]   ;;  %v1692_v14 = vld [vmem:[%s2284_s1 + $0x58] sm:$0xff]  }
   0x5   :  { %1312 = vmatprep.mubr.msk.bf16.mxu1 %vm498_vm0, %v1702_v8  ;;  %v1689_v11 = vld [vmem:[%s2284_s1 + $0x40] sm:$0xff]   ;;  %v1690_v12 = vld [vmem:[%s2284_s1 + $0x48] sm:$0xff]   ;;  %v1695_v19 = vld [vmem:[%s2284_s1 + $0x70] sm:$0xff]  }
   0x6   :  { %605 = vmatpush1.bf16.msra.mxu0 %v1682_v2  ;;  %1664 = vmatpush1.bf16.msra.mxu1 %v1682_v2  ;;  %v1693_v15 = vld [vmem:[%s2284_s1 + $0x60] sm:$0xff]   ;;  %v1694_v16 = vld [vmem:[%s2284_s1 + $0x68] sm:$0xff]   ;;  %v1696_v20 = vld [vmem:[%s2284_s1 + $0x78] ss:$0 sps:$4 sm:$0x33]  }
   0x7   :  { %606 = vmatprep.subr.bf16.mxu0 %v1793_v0  ;;  %1649 = vmatprep.subr.bf16.mxu1 %v1793_v0  ;;  %v600_v22 = vand.u32 %v1696_v20, %v598_v21  ;;  %v1697_v23 = vld [vmem:[%s2285_s0] ss:$8 sps:$4 sm:$0xff]   ;;  %v1703_v25 = vld [vmem:[%s2285_s0 + $0x14] ss:$8 sps:$4 sm:$0xff]   ;;  %v1707_v27 = vld [vmem:[%s2285_s0 + $0x10] ss:$8 sps:$4 sm:$0xff]  }
   0x8   :  { %v1700_v24 = vld [vmem:[%s2285_s0 + $0x100] ss:$8 sps:$4 sm:$0xff]   ;;  %v1705_v26 = vld [vmem:[%s2285_s0 + $0x114] ss:$8 sps:$4 sm:$0xff]   ;;  %v1708_v28 = vld [vmem:[%s2285_s0 + $0x110] ss:$8 sps:$4 sm:$0xff]  }
   0x9   :  { %v1709_v29 = vld [vmem:[%s2285_s0 + $0x24] ss:$8 sps:$4 sm:$0xff]   ;;  %v1713_v31 = vld [vmem:[%s2285_s0 + $0x20] ss:$8 sps:$4 sm:$0xff]   ;;  %v1715_v33 = vld [vmem:[%s2285_s0 + $0x34] ss:$8 sps:$4 sm:$0xff]  }
   0xa   :  { %607 = vmatpush1.bf16.msra.mxu0 %v1683_v3  ;;  %1665 = vmatpush1.bf16.msra.mxu1 %v1683_v3  ;;  %v1711_v30 = vld [vmem:[%s2285_s0 + $0x124] ss:$8 sps:$4 sm:$0xff]   ;;  %v1714_v32 = vld [vmem:[%s2285_s0 + $0x120] ss:$8 sps:$4 sm:$0xff]   ;;  %v1717_v34 = vld [vmem:[%s2285_s0 + $0x134] ss:$8 sps:$4 sm:$0xff]  }
   0xb   :  { %608 = vmatprep.subr.bf16.mxu0 %v1793_v0  ;;  %1650 = vmatprep.subr.bf16.mxu1 %v1793_v0  ;;  %v1719_v35 = vld [vmem:[%s2285_s0 + $0x30] ss:$8 sps:$4 sm:$0xff]   ;;  %v1721_v37 = vld [vmem:[%s2285_s0 + $0x44] ss:$8 sps:$4 sm:$0xff]   ;;  %v1725_v39 = vld [vmem:[%s2285_s0 + $0x40] ss:$8 sps:$4 sm:$0xff]  }
   0xc   :  { %v1720_v36 = vld [vmem:[%s2285_s0 + $0x130] ss:$8 sps:$4 sm:$0xff]   ;;  %v1723_v38 = vld [vmem:[%s2285_s0 + $0x144] ss:$8 sps:$4 sm:$0xff]   ;;  %v1726_v40 = vld [vmem:[%s2285_s0 + $0x140] ss:$8 sps:$4 sm:$0xff]  }
   0xd   :  { %v1727_v41 = vld [vmem:[%s2285_s0 + $0x54] ss:$8 sps:$4 sm:$0xff]   ;;  %v1731_v43 = vld [vmem:[%s2285_s0 + $0x50] ss:$8 sps:$4 sm:$0xff]   ;;  %v1733_v45 = vld [vmem:[%s2285_s0 + $0x64] ss:$8 sps:$4 sm:$0xff]  }
   0xe   :  { %609 = vmatpush1.bf16.msra.mxu0 %v1684_v4  ;;  %1666 = vmatpush1.bf16.msra.mxu1 %v1684_v4  ;;  %v1729_v42 = vld [vmem:[%s2285_s0 + $0x154] ss:$8 sps:$4 sm:$0xff]   ;;  %v1732_v44 = vld [vmem:[%s2285_s0 + $0x150] ss:$8 sps:$4 sm:$0xff]   ;;  %v1735_v46 = vld [vmem:[%s2285_s0 + $0x164] ss:$8 sps:$4 sm:$0xff]  }
   0xf   :  { %610 = vmatprep.subr.bf16.mxu0 %v1793_v0  ;;  %1651 = vmatprep.subr.bf16.mxu1 %v1793_v0  ;;  %v1737_v47 = vld [vmem:[%s2285_s0 + $0x60] ss:$8 sps:$4 sm:$0xff]   ;;  %v1739_v49 = vld [vmem:[%s2285_s0 + $0x74] ss:$8 sps:$4 sm:$0xff]   ;;  %v1743_v51 = vld [vmem:[%s2285_s0 + $0x70] ss:$8 sps:$4 sm:$0xff]  }
  0x10   :  { %v1738_v48 = vld [vmem:[%s2285_s0 + $0x160] ss:$8 sps:$4 sm:$0xff]   ;;  %v1741_v50 = vld [vmem:[%s2285_s0 + $0x174] ss:$8 sps:$4 sm:$0xff]   ;;  %v1744_v52 = vld [vmem:[%s2285_s0 + $0x170] ss:$8 sps:$4 sm:$0xff]  }
  0x11   :  { %v1745_v53 = vld [vmem:[%s2285_s0 + $0x84] ss:$8 sps:$4 sm:$0xff]   ;;  %v1749_v55 = vld [vmem:[%s2285_s0 + $0x80] ss:$8 sps:$4 sm:$0xff]   ;;  %v1751_v57 = vld [vmem:[%s2285_s0 + $0x94] ss:$8 sps:$4 sm:$0xff]  }
  0x12   :  { %611 = vmatpush1.bf16.msra.mxu0 %v1685_v5  ;;  %1667 = vmatpush1.bf16.msra.mxu1 %v1685_v5  ;;  %v1747_v54 = vld [vmem:[%s2285_s0 + $0x184] ss:$8 sps:$4 sm:$0xff]   ;;  %v1750_v56 = vld [vmem:[%s2285_s0 + $0x180] ss:$8 sps:$4 sm:$0xff]   ;;  %v1753_v58 = vld [vmem:[%s2285_s0 + $0x194] ss:$8 sps:$4 sm:$0xff]  }
  0x13   :  { %612 = vmatprep.subr.bf16.mxu0 %v1793_v0  ;;  %1652 = vmatprep.subr.bf16.mxu1 %v1793_v0  ;;  %v1755_v59 = vld [vmem:[%s2285_s0 + $0x90] ss:$8 sps:$4 sm:$0xff]   ;;  %v1757_v61 = vld [vmem:[%s2285_s0 + $0xa4] ss:$8 sps:$4 sm:$0xff]   ;;  %v1761_v63 = vld [vmem:[%s2285_s0 + $0xa0] ss:$8 sps:$4 sm:$0xff]  }
  0x14   :  { %v1756_v60 = vld [vmem:[%s2285_s0 + $0x190] ss:$8 sps:$4 sm:$0xff]   ;;  %v1759_v62 = vld [vmem:[%s2285_s0 + $0x1a4] ss:$8 sps:$4 sm:$0xff]   ;;  %v1763_v1 = vld [vmem:[%s2285_s0 + $0xb4] ss:$8 sps:$4 sm:$0xff]  }
  0x15   :  { %v1765_v2 = vld [vmem:[%s2285_s0 + $0x1b4] ss:$8 sps:$4 sm:$0xff]   ;;  %v1767_v3 = vld [vmem:[%s2285_s0 + $0xb0] ss:$8 sps:$4 sm:$0xff]   ;;  %v1769_v5 = vld [vmem:[%s2285_s0 + $0xc4] ss:$8 sps:$4 sm:$0xff]  }
  0x16   :  { %613 = vmatpush1.bf16.msra.mxu0 %v1686_v7  ;;  %1668 = vmatpush1.bf16.msra.mxu1 %v1686_v7  ;;  %v1768_v4 = vld [vmem:[%s2285_s0 + $0x1b0] ss:$8 sps:$4 sm:$0xff]   ;;  %v1771_v6 = vld [vmem:[%s2285_s0 + $0x1c4] ss:$8 sps:$4 sm:$0xff]   ;;  %v1773_v7 = vld [vmem:[%s2285_s0 + $0xc0] ss:$8 sps:$4 sm:$0xff]  }
  0x17   :  { %614 = vmatprep.subr.bf16.mxu0 %v1793_v0  ;;  %1653 = vmatprep.subr.bf16.mxu1 %v1793_v0  ;;  %v1774_v8 = vld [vmem:[%s2285_s0 + $0x1c0] ss:$8 sps:$4 sm:$0xff]   ;;  %v1787_v17 = vld [vmem:[%s2285_s0 + $0xf4] ss:$8 sps:$4 sm:$0xff]   ;;  %v1792_v20 = vld [vmem:[%s2285_s0 + $0x1f0] ss:$8 sps:$4 sm:$0xff]  }
  0x18   :  { %v1789_v18 = vld [vmem:[%s2285_s0 + $0x1f4] ss:$8 sps:$4 sm:$0xff]   ;;  %v2122_v21 = vld [vmem:[%s2286_s2] ss:$0 sm:$0xff] }
  0x1a   :  { %615 = vmatpush1.bf16.msra.mxu0 %v1687_v9  ;;  %1669 = vmatpush1.bf16.msra.mxu1 %v1687_v9  ;;  %v1775_v9 = vld [vmem:[%s2285_s0 + $0xd4] ss:$8 sps:$4 sm:$0xff]  }
  0x1b   :  { %616 = vmatprep.subr.bf16.mxu0 %v1793_v0  ;;  %1654 = vmatprep.subr.bf16.mxu1 %v1793_v0 }
  0x1e   :  { %617 = vmatpush1.bf16.msra.mxu0 %v1688_v10  ;;  %1670 = vmatpush1.bf16.msra.mxu1 %v1688_v10  ;;  %v1777_v10 = vld [vmem:[%s2285_s0 + $0x1d4] ss:$8 sps:$4 sm:$0xff]  }
  0x1f   :  { %618 = vmatprep.subr.bf16.mxu0 %v1793_v0  ;;  %1655 = vmatprep.subr.bf16.mxu1 %v1793_v0 }
  0x22   :  { %619 = vmatpush1.bf16.msra.mxu0 %v1689_v11  ;;  %1671 = vmatpush1.bf16.msra.mxu1 %v1689_v11  ;;  %v1779_v11 = vld [vmem:[%s2285_s0 + $0xd0] ss:$8 sps:$4 sm:$0xff]  }
  0x23   :  { %620 = vmatprep.subr.bf16.mxu0 %v1793_v0  ;;  %1656 = vmatprep.subr.bf16.mxu1 %v1793_v0 }
  0x26   :  { %621 = vmatpush1.bf16.msra.mxu0 %v1690_v12  ;;  %1672 = vmatpush1.bf16.msra.mxu1 %v1690_v12  ;;  %v1780_v12 = vld [vmem:[%s2285_s0 + $0x1d0] ss:$8 sps:$4 sm:$0xff]  }
  0x27   :  { %622 = vmatprep.subr.bf16.mxu0 %v1793_v0  ;;  %1657 = vmatprep.subr.bf16.mxu1 %v1793_v0 }
  0x2a   :  { %623 = vmatpush1.bf16.msra.mxu0 %v1691_v13  ;;  %1673 = vmatpush1.bf16.msra.mxu1 %v1691_v13  ;;  %v1781_v13 = vld [vmem:[%s2285_s0 + $0xe4] ss:$8 sps:$4 sm:$0xff]  }
  0x2b   :  { %624 = vmatprep.subr.bf16.mxu0 %v1793_v0  ;;  %1658 = vmatprep.subr.bf16.mxu1 %v1793_v0 }
  0x2e   :  { %625 = vmatpush1.bf16.msra.mxu0 %v1692_v14  ;;  %1674 = vmatpush1.bf16.msra.mxu1 %v1692_v14  ;;  %v1783_v14 = vld [vmem:[%s2285_s0 + $0x1e4] ss:$8 sps:$4 sm:$0xff]  }
  0x2f   :  { %626 = vmatprep.subr.bf16.mxu0 %v1793_v0  ;;  %1659 = vmatprep.subr.bf16.mxu1 %v1793_v0 }
  0x32   :  { %627 = vmatpush1.bf16.msra.mxu0 %v1693_v15  ;;  %1675 = vmatpush1.bf16.msra.mxu1 %v1693_v15  ;;  %v1785_v15 = vld [vmem:[%s2285_s0 + $0xe0] ss:$8 sps:$4 sm:$0xff]  }
  0x33   :  { %628 = vmatprep.subr.bf16.mxu0 %v1793_v0  ;;  %1660 = vmatprep.subr.bf16.mxu1 %v1793_v0 }
  0x36   :  { %629 = vmatpush1.bf16.msra.mxu0 %v1694_v16  ;;  %1676 = vmatpush1.bf16.msra.mxu1 %v1694_v16  ;;  %v1786_v16 = vld [vmem:[%s2285_s0 + $0x1e0] ss:$8 sps:$4 sm:$0xff]  }
  0x37   :  { %630 = vmatprep.subr.bf16.mxu0 %v1793_v0  ;;  %1661 = vmatprep.subr.bf16.mxu1 %v1793_v0 }
  0x3a   :  { %631 = vmatpush1.bf16.msra.mxu0 %v1695_v19  ;;  %1677 = vmatpush1.bf16.msra.mxu1 %v1695_v19  ;;  %v1791_v19 = vld [vmem:[%s2285_s0 + $0xf0] ss:$8 sps:$4 sm:$0xff]  }
  0x3b   :  { %632 = vmatprep.subr.bf16.mxu0 %v1793_v0  ;;  %1662 = vmatprep.subr.bf16.mxu1 %v1793_v0  ;;  %v1762_v0 = vld [vmem:[%s2285_s0 + $0x1a0] ss:$8 sps:$4 sm:$0xff]  }
  0x3e   :  { %633 = vmatpush1.bf16.msra.mxu0 %v600_v22  ;;  %1678 = vmatpush1.bf16.msra.mxu1 %v600_v22 }
  0x41   :  { %635 = vmatmul.mubr.bf16.vlgmr.msra.gmra.mrb[0].mxu0 %v1697_v23  ;;  %763 = vmatmul.mubr.bf16.vlgmr.msra.gmra.mrb[0].mxu1 %v1700_v24 }
  0x42   :  { %1297 = vmatprep.mubr.msk.bf16.mxu0 %vm498_vm0, %v1703_v25  ;;  %1313 = vmatprep.mubr.msk.bf16.mxu1 %vm498_vm0, %v1705_v26 }
  0x49   :  { %643 = vmatmul.mubr.bf16.gmra.mrb[4].mxu0 %v1707_v27  ;;  %771 = vmatmul.mubr.bf16.gmra.mrb[4].mxu1 %v1708_v28 }
  0x4a   :  { %1298 = vmatprep.mubr.msk.bf16.mxu0 %vm498_vm0, %v1709_v29  ;;  %1314 = vmatprep.mubr.msk.bf16.mxu1 %vm498_vm0, %v1711_v30 }
  0x51   :  { %651 = vmatmul.mubr.bf16.gmra.mrb[8].mxu0 %v1713_v31  ;;  %779 = vmatmul.mubr.bf16.gmra.mrb[8].mxu1 %v1714_v32 }
  0x52   :  { %1299 = vmatprep.mubr.msk.bf16.mxu0 %vm498_vm0, %v1715_v33  ;;  %1315 = vmatprep.mubr.msk.bf16.mxu1 %vm498_vm0, %v1717_v34 }
  0x59   :  { %659 = vmatmul.mubr.bf16.gmra.mrb[12].mxu0 %v1719_v35  ;;  %787 = vmatmul.mubr.bf16.gmra.mrb[12].mxu1 %v1720_v36 }
  0x5a   :  { %1300 = vmatprep.mubr.msk.bf16.mxu0 %vm498_vm0, %v1721_v37  ;;  %1316 = vmatprep.mubr.msk.bf16.mxu1 %vm498_vm0, %v1723_v38 }
  0x61   :  { %667 = vmatmul.mubr.bf16.gmra.mrb[16].mxu0 %v1725_v39  ;;  %795 = vmatmul.mubr.bf16.gmra.mrb[16].mxu1 %v1726_v40 }
  0x62   :  { %1301 = vmatprep.mubr.msk.bf16.mxu0 %vm498_vm0, %v1727_v41  ;;  %1317 = vmatprep.mubr.msk.bf16.mxu1 %vm498_vm0, %v1729_v42 }
  0x69   :  { %675 = vmatmul.mubr.bf16.gmra.mrb[20].mxu0 %v1731_v43  ;;  %803 = vmatmul.mubr.bf16.gmra.mrb[20].mxu1 %v1732_v44 }
  0x6a   :  { %1302 = vmatprep.mubr.msk.bf16.mxu0 %vm498_vm0, %v1733_v45  ;;  %1318 = vmatprep.mubr.msk.bf16.mxu1 %vm498_vm0, %v1735_v46 }
  0x71   :  { %683 = vmatmul.mubr.bf16.gmra.mrb[24].mxu0 %v1737_v47  ;;  %811 = vmatmul.mubr.bf16.gmra.mrb[24].mxu1 %v1738_v48 }
  0x72   :  { %1303 = vmatprep.mubr.msk.bf16.mxu0 %vm498_vm0, %v1739_v49  ;;  %1319 = vmatprep.mubr.msk.bf16.mxu1 %vm498_vm0, %v1741_v50 }
  0x79   :  { %691 = vmatmul.mubr.bf16.gmra.mrb[28].mxu0 %v1743_v51  ;;  %819 = vmatmul.mubr.bf16.gmra.mrb[28].mxu1 %v1744_v52 }
  0x7a   :  { %1304 = vmatprep.mubr.msk.bf16.mxu0 %vm498_vm0, %v1745_v53  ;;  %1320 = vmatprep.mubr.msk.bf16.mxu1 %vm498_vm0, %v1747_v54 }
  0x81   :  { %699 = vmatmul.mubr.bf16.gmra.mrb[32].mxu0 %v1749_v55  ;;  %827 = vmatmul.mubr.bf16.gmra.mrb[32].mxu1 %v1750_v56 }
  0x82   :  { %1305 = vmatprep.mubr.msk.bf16.mxu0 %vm498_vm0, %v1751_v57  ;;  %1321 = vmatprep.mubr.msk.bf16.mxu1 %vm498_vm0, %v1753_v58 }
  0x89   :  { %707 = vmatmul.mubr.bf16.gmra.mrb[36].mxu0 %v1755_v59  ;;  %835 = vmatmul.mubr.bf16.gmra.mrb[36].mxu1 %v1756_v60 }
  0x8a   :  { %1306 = vmatprep.mubr.msk.bf16.mxu0 %vm498_vm0, %v1757_v61  ;;  %1322 = vmatprep.mubr.msk.bf16.mxu1 %vm498_vm0, %v1759_v62 }
  0x91   :  { %715 = vmatmul.mubr.bf16.gmra.mrb[40].mxu0 %v1761_v63  ;;  %843 = vmatmul.mubr.bf16.gmra.mrb[40].mxu1 %v1762_v0 }
  0x92   :  { %1307 = vmatprep.mubr.msk.bf16.mxu0 %vm498_vm0, %v1763_v1  ;;  %1323 = vmatprep.mubr.msk.bf16.mxu1 %vm498_vm0, %v1765_v2 }
  0x99   :  { %723 = vmatmul.mubr.bf16.gmra.mrb[44].mxu0 %v1767_v3  ;;  %851 = vmatmul.mubr.bf16.gmra.mrb[44].mxu1 %v1768_v4 }
  0x9a   :  { %1308 = vmatprep.mubr.msk.bf16.mxu0 %vm498_vm0, %v1769_v5  ;;  %1324 = vmatprep.mubr.msk.bf16.mxu1 %vm498_vm0, %v1771_v6 }
  0xa1   :  { %731 = vmatmul.mubr.bf16.gmra.mrb[48].mxu0 %v1773_v7  ;;  %859 = vmatmul.mubr.bf16.gmra.mrb[48].mxu1 %v1774_v8 }
  0xa2   :  { %1309 = vmatprep.mubr.msk.bf16.mxu0 %vm498_vm0, %v1775_v9  ;;  %1325 = vmatprep.mubr.msk.bf16.mxu1 %vm498_vm0, %v1777_v10 }
  0xa9   :  { %739 = vmatmul.mubr.bf16.gmra.mrb[52].mxu0 %v1779_v11  ;;  %867 = vmatmul.mubr.bf16.gmra.mrb[52].mxu1 %v1780_v12 }
  0xaa   :  { %1310 = vmatprep.mubr.msk.bf16.mxu0 %vm498_vm0, %v1781_v13  ;;  %1326 = vmatprep.mubr.msk.bf16.mxu1 %vm498_vm0, %v1783_v14 }
  0xb1   :  { %747 = vmatmul.mubr.bf16.gmra.mrb[56].mxu0 %v1785_v15  ;;  %875 = vmatmul.mubr.bf16.gmra.mrb[56].mxu1 %v1786_v16 }
  0xb2   :  { %1311 = vmatprep.mubr.msk.bf16.mxu0 %vm498_vm0, %v1787_v17  ;;  %1327 = vmatprep.mubr.msk.bf16.mxu1 %vm498_vm0, %v1789_v18 }
  0xb9   :  { %755 = vmatmul.mubr.bf16.gmra.mrb[60].mxu0 %v1791_v19  ;;  %883 = vmatmul.mubr.bf16.gmra.mrb[60].mxu1 %v1792_v20 }
 0x114   :  { %v636_v22 = vpop.f32.mrb[0].mxu0  ;;  %v764_v23 = vpop.f32.mrb[0].mxu1 }
 0x115   :  { %v638_v24 = vpop.f32.mrb[1].mxu0  ;;  %v766_v25 = vpop.f32.mrb[1].mxu1  ;;  %v637_v28 = vadd.f32 %v2122_v21, %v636_v22  ;;  %v765_v29 = vadd.f32 %v2122_v21, %v764_v23 }
 0x116   :  { %v639_v26 = vpop.f32.mrb[2].mxu0  ;;  %v767_v27 = vpop.f32.mrb[2].mxu1 }
 0x117   :  { %v640_v30 = vadd.f32 %v2122_v21, %v639_v26  ;;  %v768_v31 = vadd.f32 %v2122_v21, %v767_v27  ;;  %v641_v32 = vpop.f32.mrb[3].mxu0  ;;  %v769_v33 = vpop.f32.mrb[3].mxu1 }
 0x119   :  { %v1459_v34 = vpack.c.bf16 %v640_v30, %v637_v28  ;;  %v1539_v35 = vpack.c.bf16 %v768_v31, %v765_v29 }
 0x11b   :  { %1460 = vst [vmem:[%s2287_s3] sm:$0xff] %v1459_v34   ;;  %1631 = vst [vmem:[%s2287_s3 + $0x80] sm:$0xff] %v1539_v35  }
 0x11c   :  { %v644_v36 = vpop.f32.mrb[4].mxu0  ;;  %v772_v37 = vpop.f32.mrb[4].mxu1 }
 0x11d   :  { %v646_v38 = vpop.f32.mrb[5].mxu0  ;;  %v774_v39 = vpop.f32.mrb[5].mxu1  ;;  %v645_v42 = vadd.f32 %v2122_v21, %v644_v36  ;;  %v773_v43 = vadd.f32 %v2122_v21, %v772_v37 }
 0x11e   :  { %v647_v40 = vpop.f32.mrb[6].mxu0  ;;  %v775_v41 = vpop.f32.mrb[6].mxu1 }
 0x11f   :  { %v648_v44 = vadd.f32 %v2122_v21, %v647_v40  ;;  %v776_v45 = vadd.f32 %v2122_v21, %v775_v41  ;;  %v649_v46 = vpop.f32.mrb[7].mxu0  ;;  %v777_v47 = vpop.f32.mrb[7].mxu1 }
 0x121   :  { %v1464_v48 = vpack.c.bf16 %v648_v44, %v645_v42  ;;  %v1544_v49 = vpack.c.bf16 %v776_v45, %v773_v43 }
 0x123   :  { %1616 = vst [vmem:[%s2287_s3 + $0x8] sm:$0xff] %v1464_v48   ;;  %1632 = vst [vmem:[%s2287_s3 + $0x88] sm:$0xff] %v1544_v49  }
 0x124   :  { %v652_v50 = vpop.f32.mrb[8].mxu0  ;;  %v780_v51 = vpop.f32.mrb[8].mxu1 }
 0x125   :  { %v654_v52 = vpop.f32.mrb[9].mxu0  ;;  %v782_v53 = vpop.f32.mrb[9].mxu1  ;;  %v653_v56 = vadd.f32 %v2122_v21, %v652_v50  ;;  %v781_v57 = vadd.f32 %v2122_v21, %v780_v51 }
 0x126   :  { %v655_v54 = vpop.f32.mrb[10].mxu0  ;;  %v783_v55 = vpop.f32.mrb[10].mxu1 }
 0x127   :  { %v656_v58 = vadd.f32 %v2122_v21, %v655_v54  ;;  %v784_v59 = vadd.f32 %v2122_v21, %v783_v55  ;;  %v657_v60 = vpop.f32.mrb[11].mxu0  ;;  %v785_v61 = vpop.f32.mrb[11].mxu1 }
 0x129   :  { %v1469_v62 = vpack.c.bf16 %v656_v58, %v653_v56  ;;  %v1549_v63 = vpack.c.bf16 %v784_v59, %v781_v57 }
 0x12b   :  { %1617 = vst [vmem:[%s2287_s3 + $0x10] sm:$0xff] %v1469_v62   ;;  %1633 = vst [vmem:[%s2287_s3 + $0x90] sm:$0xff] %v1549_v63  }
 0x12c   :  { %v660_v0 = vpop.f32.mrb[12].mxu0  ;;  %v788_v1 = vpop.f32.mrb[12].mxu1 }
 0x12d   :  { %v662_v2 = vpop.f32.mrb[13].mxu0  ;;  %v790_v3 = vpop.f32.mrb[13].mxu1  ;;  %v661_v6 = vadd.f32 %v2122_v21, %v660_v0  ;;  %v789_v7 = vadd.f32 %v2122_v21, %v788_v1 }
 0x12e   :  { %v663_v4 = vpop.f32.mrb[14].mxu0  ;;  %v791_v5 = vpop.f32.mrb[14].mxu1 }
 0x12f   :  { %v664_v8 = vadd.f32 %v2122_v21, %v663_v4  ;;  %v792_v9 = vadd.f32 %v2122_v21, %v791_v5  ;;  %v665_v10 = vpop.f32.mrb[15].mxu0  ;;  %v793_v11 = vpop.f32.mrb[15].mxu1 }
 0x131   :  { %v1474_v12 = vpack.c.bf16 %v664_v8, %v661_v6  ;;  %v1554_v13 = vpack.c.bf16 %v792_v9, %v789_v7 }
 0x133   :  { %1618 = vst [vmem:[%s2287_s3 + $0x18] sm:$0xff] %v1474_v12   ;;  %1634 = vst [vmem:[%s2287_s3 + $0x98] sm:$0xff] %v1554_v13  }
 0x134   :  { %v668_v14 = vpop.f32.mrb[16].mxu0  ;;  %v796_v15 = vpop.f32.mrb[16].mxu1 }
 0x135   :  { %v670_v16 = vpop.f32.mrb[17].mxu0  ;;  %v798_v17 = vpop.f32.mrb[17].mxu1  ;;  %v669_v20 = vadd.f32 %v2122_v21, %v668_v14  ;;  %v797_v22 = vadd.f32 %v2122_v21, %v796_v15 }
 0x136   :  { %v671_v18 = vpop.f32.mrb[18].mxu0  ;;  %v799_v19 = vpop.f32.mrb[18].mxu1 }
 0x137   :  { %v672_v23 = vadd.f32 %v2122_v21, %v671_v18  ;;  %v800_v24 = vadd.f32 %v2122_v21, %v799_v19  ;;  %v673_v25 = vpop.f32.mrb[19].mxu0  ;;  %v801_v26 = vpop.f32.mrb[19].mxu1 }
 0x139   :  { %v1479_v27 = vpack.c.bf16 %v672_v23, %v669_v20  ;;  %v1559_v28 = vpack.c.bf16 %v800_v24, %v797_v22 }
 0x13b   :  { %1619 = vst [vmem:[%s2287_s3 + $0x20] sm:$0xff] %v1479_v27   ;;  %1635 = vst [vmem:[%s2287_s3 + $0xa0] sm:$0xff] %v1559_v28  }
 0x13c   :  { %v676_v29 = vpop.f32.mrb[20].mxu0  ;;  %v804_v30 = vpop.f32.mrb[20].mxu1 }
 0x13d   :  { %v678_v31 = vpop.f32.mrb[21].mxu0  ;;  %v806_v32 = vpop.f32.mrb[21].mxu1  ;;  %v677_v35 = vadd.f32 %v2122_v21, %v676_v29  ;;  %v805_v36 = vadd.f32 %v2122_v21, %v804_v30 }
 0x13e   :  { %v679_v33 = vpop.f32.mrb[22].mxu0  ;;  %v807_v34 = vpop.f32.mrb[22].mxu1 }
 0x13f   :  { %v680_v37 = vadd.f32 %v2122_v21, %v679_v33  ;;  %v808_v38 = vadd.f32 %v2122_v21, %v807_v34  ;;  %v681_v39 = vpop.f32.mrb[23].mxu0  ;;  %v809_v40 = vpop.f32.mrb[23].mxu1 }
 0x141   :  { %v1484_v41 = vpack.c.bf16 %v680_v37, %v677_v35  ;;  %v1564_v42 = vpack.c.bf16 %v808_v38, %v805_v36 }
 0x143   :  { %1620 = vst [vmem:[%s2287_s3 + $0x28] sm:$0xff] %v1484_v41   ;;  %1636 = vst [vmem:[%s2287_s3 + $0xa8] sm:$0xff] %v1564_v42  }
 0x144   :  { %v684_v43 = vpop.f32.mrb[24].mxu0  ;;  %v812_v44 = vpop.f32.mrb[24].mxu1 }
 0x145   :  { %v686_v45 = vpop.f32.mrb[25].mxu0  ;;  %v814_v46 = vpop.f32.mrb[25].mxu1  ;;  %v685_v49 = vadd.f32 %v2122_v21, %v684_v43  ;;  %v813_v50 = vadd.f32 %v2122_v21, %v812_v44 }
 0x146   :  { %v687_v47 = vpop.f32.mrb[26].mxu0  ;;  %v815_v48 = vpop.f32.mrb[26].mxu1 }
 0x147   :  { %v688_v51 = vadd.f32 %v2122_v21, %v687_v47  ;;  %v816_v52 = vadd.f32 %v2122_v21, %v815_v48  ;;  %v689_v53 = vpop.f32.mrb[27].mxu0  ;;  %v817_v54 = vpop.f32.mrb[27].mxu1 }
 0x149   :  { %v1489_v55 = vpack.c.bf16 %v688_v51, %v685_v49  ;;  %v1569_v56 = vpack.c.bf16 %v816_v52, %v813_v50 }
 0x14b   :  { %1621 = vst [vmem:[%s2287_s3 + $0x30] sm:$0xff] %v1489_v55   ;;  %1637 = vst [vmem:[%s2287_s3 + $0xb0] sm:$0xff] %v1569_v56  }
 0x14c   :  { %v692_v57 = vpop.f32.mrb[28].mxu0  ;;  %v820_v58 = vpop.f32.mrb[28].mxu1 }
 0x14d   :  { %v694_v59 = vpop.f32.mrb[29].mxu0  ;;  %v822_v60 = vpop.f32.mrb[29].mxu1  ;;  %v693_v63 = vadd.f32 %v2122_v21, %v692_v57  ;;  %v821_v0 = vadd.f32 %v2122_v21, %v820_v58 }
 0x14e   :  { %v695_v61 = vpop.f32.mrb[30].mxu0  ;;  %v823_v62 = vpop.f32.mrb[30].mxu1 }
 0x14f   :  { %v696_v1 = vadd.f32 %v2122_v21, %v695_v61  ;;  %v824_v2 = vadd.f32 %v2122_v21, %v823_v62  ;;  %v697_v3 = vpop.f32.mrb[31].mxu0  ;;  %v825_v4 = vpop.f32.mrb[31].mxu1 }
 0x151   :  { %v1494_v5 = vpack.c.bf16 %v696_v1, %v693_v63  ;;  %v1574_v6 = vpack.c.bf16 %v824_v2, %v821_v0 }
 0x153   :  { %1622 = vst [vmem:[%s2287_s3 + $0x38] sm:$0xff] %v1494_v5   ;;  %1638 = vst [vmem:[%s2287_s3 + $0xb8] sm:$0xff] %v1574_v6  }
 0x154   :  { %v700_v7 = vpop.f32.mrb[32].mxu0  ;;  %v828_v8 = vpop.f32.mrb[32].mxu1 }
 0x155   :  { %v702_v9 = vpop.f32.mrb[33].mxu0  ;;  %v830_v10 = vpop.f32.mrb[33].mxu1  ;;  %v701_v13 = vadd.f32 %v2122_v21, %v700_v7  ;;  %v829_v14 = vadd.f32 %v2122_v21, %v828_v8 }
 0x156   :  { %v703_v11 = vpop.f32.mrb[34].mxu0  ;;  %v831_v12 = vpop.f32.mrb[34].mxu1 }
 0x157   :  { %v704_v15 = vadd.f32 %v2122_v21, %v703_v11  ;;  %v832_v16 = vadd.f32 %v2122_v21, %v831_v12  ;;  %v705_v17 = vpop.f32.mrb[35].mxu0  ;;  %v833_v18 = vpop.f32.mrb[35].mxu1 }
 0x159   :  { %v1499_v19 = vpack.c.bf16 %v704_v15, %v701_v13  ;;  %v1579_v20 = vpack.c.bf16 %v832_v16, %v829_v14 }
 0x15b   :  { %1623 = vst [vmem:[%s2287_s3 + $0x40] sm:$0xff] %v1499_v19   ;;  %1639 = vst [vmem:[%s2287_s3 + $0xc0] sm:$0xff] %v1579_v20  }
 0x15c   :  { %v708_v22 = vpop.f32.mrb[36].mxu0  ;;  %v836_v23 = vpop.f32.mrb[36].mxu1 }
 0x15d   :  { %v710_v24 = vpop.f32.mrb[37].mxu0  ;;  %v838_v25 = vpop.f32.mrb[37].mxu1  ;;  %v709_v28 = vadd.f32 %v2122_v21, %v708_v22  ;;  %v837_v29 = vadd.f32 %v2122_v21, %v836_v23 }
 0x15e   :  { %v711_v26 = vpop.f32.mrb[38].mxu0  ;;  %v839_v27 = vpop.f32.mrb[38].mxu1 }
 0x15f   :  { %v712_v30 = vadd.f32 %v2122_v21, %v711_v26  ;;  %v840_v31 = vadd.f32 %v2122_v21, %v839_v27  ;;  %v713_v32 = vpop.f32.mrb[39].mxu0  ;;  %v841_v33 = vpop.f32.mrb[39].mxu1 }
 0x161   :  { %v1504_v34 = vpack.c.bf16 %v712_v30, %v709_v28  ;;  %v1584_v35 = vpack.c.bf16 %v840_v31, %v837_v29 }
 0x163   :  { %1624 = vst [vmem:[%s2287_s3 + $0x48] sm:$0xff] %v1504_v34   ;;  %1640 = vst [vmem:[%s2287_s3 + $0xc8] sm:$0xff] %v1584_v35  }
 0x164   :  { %v716_v36 = vpop.f32.mrb[40].mxu0  ;;  %v844_v37 = vpop.f32.mrb[40].mxu1 }
 0x165   :  { %v718_v38 = vpop.f32.mrb[41].mxu0  ;;  %v846_v39 = vpop.f32.mrb[41].mxu1  ;;  %v717_v42 = vadd.f32 %v2122_v21, %v716_v36  ;;  %v845_v43 = vadd.f32 %v2122_v21, %v844_v37 }
 0x166   :  { %v719_v40 = vpop.f32.mrb[42].mxu0  ;;  %v847_v41 = vpop.f32.mrb[42].mxu1 }
 0x167   :  { %v720_v44 = vadd.f32 %v2122_v21, %v719_v40  ;;  %v848_v45 = vadd.f32 %v2122_v21, %v847_v41  ;;  %v721_v46 = vpop.f32.mrb[43].mxu0  ;;  %v849_v47 = vpop.f32.mrb[43].mxu1 }
 0x169   :  { %v1509_v48 = vpack.c.bf16 %v720_v44, %v717_v42  ;;  %v1589_v49 = vpack.c.bf16 %v848_v45, %v845_v43 }
 0x16b   :  { %1625 = vst [vmem:[%s2287_s3 + $0x50] sm:$0xff] %v1509_v48   ;;  %1641 = vst [vmem:[%s2287_s3 + $0xd0] sm:$0xff] %v1589_v49  }
 0x16c   :  { %v724_v50 = vpop.f32.mrb[44].mxu0  ;;  %v852_v51 = vpop.f32.mrb[44].mxu1 }
 0x16d   :  { %v726_v52 = vpop.f32.mrb[45].mxu0  ;;  %v854_v53 = vpop.f32.mrb[45].mxu1  ;;  %v725_v56 = vadd.f32 %v2122_v21, %v724_v50  ;;  %v853_v57 = vadd.f32 %v2122_v21, %v852_v51 }
 0x16e   :  { %v727_v54 = vpop.f32.mrb[46].mxu0  ;;  %v855_v55 = vpop.f32.mrb[46].mxu1 }
 0x16f   :  { %v728_v58 = vadd.f32 %v2122_v21, %v727_v54  ;;  %v856_v59 = vadd.f32 %v2122_v21, %v855_v55  ;;  %v729_v60 = vpop.f32.mrb[47].mxu0  ;;  %v857_v61 = vpop.f32.mrb[47].mxu1 }
 0x171   :  { %v1514_v62 = vpack.c.bf16 %v728_v58, %v725_v56  ;;  %v1594_v63 = vpack.c.bf16 %v856_v59, %v853_v57 }
 0x173   :  { %1626 = vst [vmem:[%s2287_s3 + $0x58] sm:$0xff] %v1514_v62   ;;  %1642 = vst [vmem:[%s2287_s3 + $0xd8] sm:$0xff] %v1594_v63  }
 0x174   :  { %v732_v0 = vpop.f32.mrb[48].mxu0  ;;  %v860_v1 = vpop.f32.mrb[48].mxu1 }
 0x175   :  { %v734_v2 = vpop.f32.mrb[49].mxu0  ;;  %v862_v3 = vpop.f32.mrb[49].mxu1  ;;  %v733_v6 = vadd.f32 %v2122_v21, %v732_v0  ;;  %v861_v7 = vadd.f32 %v2122_v21, %v860_v1 }
 0x176   :  { %v735_v4 = vpop.f32.mrb[50].mxu0  ;;  %v863_v5 = vpop.f32.mrb[50].mxu1 }
 0x177   :  { %v736_v8 = vadd.f32 %v2122_v21, %v735_v4  ;;  %v864_v9 = vadd.f32 %v2122_v21, %v863_v5  ;;  %v737_v10 = vpop.f32.mrb[51].mxu0  ;;  %v865_v11 = vpop.f32.mrb[51].mxu1 }
 0x179   :  { %v1519_v12 = vpack.c.bf16 %v736_v8, %v733_v6  ;;  %v1599_v13 = vpack.c.bf16 %v864_v9, %v861_v7 }
 0x17b   :  { %1627 = vst [vmem:[%s2287_s3 + $0x60] sm:$0xff] %v1519_v12   ;;  %1643 = vst [vmem:[%s2287_s3 + $0xe0] sm:$0xff] %v1599_v13  }
 0x17c   :  { %v740_v14 = vpop.f32.mrb[52].mxu0  ;;  %v868_v15 = vpop.f32.mrb[52].mxu1 }
 0x17d   :  { %v742_v16 = vpop.f32.mrb[53].mxu0  ;;  %v870_v17 = vpop.f32.mrb[53].mxu1  ;;  %v741_v20 = vadd.f32 %v2122_v21, %v740_v14  ;;  %v869_v22 = vadd.f32 %v2122_v21, %v868_v15 }
 0x17e   :  { %v743_v18 = vpop.f32.mrb[54].mxu0  ;;  %v871_v19 = vpop.f32.mrb[54].mxu1 }
 0x17f   :  { %v744_v23 = vadd.f32 %v2122_v21, %v743_v18  ;;  %v872_v24 = vadd.f32 %v2122_v21, %v871_v19  ;;  %v745_v25 = vpop.f32.mrb[55].mxu0  ;;  %v873_v26 = vpop.f32.mrb[55].mxu1 }
 0x181   :  { %v1524_v27 = vpack.c.bf16 %v744_v23, %v741_v20  ;;  %v1604_v28 = vpack.c.bf16 %v872_v24, %v869_v22 }
 0x183   :  { %1628 = vst [vmem:[%s2287_s3 + $0x68] sm:$0xff] %v1524_v27   ;;  %1644 = vst [vmem:[%s2287_s3 + $0xe8] sm:$0xff] %v1604_v28  }
 0x184   :  { %v748_v29 = vpop.f32.mrb[56].mxu0  ;;  %v876_v30 = vpop.f32.mrb[56].mxu1 }
 0x185   :  { %v750_v31 = vpop.f32.mrb[57].mxu0  ;;  %v878_v32 = vpop.f32.mrb[57].mxu1  ;;  %v749_v35 = vadd.f32 %v2122_v21, %v748_v29  ;;  %v877_v36 = vadd.f32 %v2122_v21, %v876_v30 }
 0x186   :  { %v751_v33 = vpop.f32.mrb[58].mxu0  ;;  %v879_v34 = vpop.f32.mrb[58].mxu1 }
 0x187   :  { %v752_v37 = vadd.f32 %v2122_v21, %v751_v33  ;;  %v880_v38 = vadd.f32 %v2122_v21, %v879_v34  ;;  %v753_v39 = vpop.f32.mrb[59].mxu0  ;;  %v881_v40 = vpop.f32.mrb[59].mxu1 }
 0x189   :  { %v1529_v41 = vpack.c.bf16 %v752_v37, %v749_v35  ;;  %v1609_v42 = vpack.c.bf16 %v880_v38, %v877_v36 }
 0x18b   :  { %1629 = vst [vmem:[%s2287_s3 + $0x70] sm:$0xff] %v1529_v41   ;;  %1645 = vst [vmem:[%s2287_s3 + $0xf0] sm:$0xff] %v1609_v42  }
 0x18c   :  { %v756_v43 = vpop.f32.mrb[60].mxu0  ;;  %v884_v44 = vpop.f32.mrb[60].mxu1 }
 0x18d   :  { %v758_v45 = vpop.f32.mrb[61].mxu0  ;;  %v886_v46 = vpop.f32.mrb[61].mxu1  ;;  %v757_v49 = vadd.f32 %v2122_v21, %v756_v43  ;;  %v885_v50 = vadd.f32 %v2122_v21, %v884_v44 }
 0x18e   :  { %v759_v47 = vpop.f32.mrb[62].mxu0  ;;  %v887_v48 = vpop.f32.mrb[62].mxu1 }
 0x18f   :  { %v760_v51 = vadd.f32 %v2122_v21, %v759_v47  ;;  %v888_v52 = vadd.f32 %v2122_v21, %v887_v48  ;;  %v761_v53 = vpop.f32.mrb[63].mxu0  ;;  %v889_v54 = vpop.f32.mrb[63].mxu1 }
 0x191   :  { %v1534_v55 = vpack.c.bf16 %v760_v51, %v757_v49  ;;  %v1614_v56 = vpack.c.bf16 %v888_v52, %v885_v50 }
 0x193   :  { %1630 = vst [vmem:[%s2287_s3 + $0x78] sm:$0xff] %v1534_v55   ;;  %1646 = vst [vmem:[%s2287_s3 + $0xf8] sm:$0xff] %v1614_v56  }

// kernel: fast_style_network.72
= control target key start
LH: loop header
LB: loop body
LE: loop exit
PB: predicated region body
PF: predicated region fallthrough
CT: control target
= control target key end

     0   :  { %s1023_s9 = smov 0   ;;  %s1025_s10 = smov 0   ;;  %s1231_s0 = inlined_call_operand.vmem [shape: bf16[2,32,128], index: 0, kind: input, shape index: {}]   ;;  %s1232_s1 = inlined_call_operand.vmem [shape: f32[2,1,128], index: 1, kind: output, shape index: {0}]   ;;  %s1233_s2 = inlined_call_operand.vmem [shape: f32[2,1,128], index: 2, kind: output, shape index: {1}]  }
   0x1   :  { %s1027_s11 = smov 0  }
   0x2 LB: > { %s25_s12 = sadd.s32 1, %s998_s10  ;;  %p735_p0 = scmp.ge.s32.totalorder %s1002_s11, 1  ;;  %s1002_s11 = sphi %s1027_s11, %s13_s11   ;;  %s998_s10 = sphi %s1025_s10, %s1265_s10   ;;  %s994_s9 = sphi %s1023_s9, %s1264_s9  }
   0x3   : > { %p27_p1 = scmp.ge.s32.totalorder %s25_s12, 2  ;;  %p134_p2 = scmp.lt.s32.totalorder %s1002_s11, 3 }
   0x5   : > { %s1267_s12 = smov (%p27_p1, %s25_s12), 0  ;;  %p135_p3 = pnand %p735_p0, %p134_p2 }
   0x6   : > { %v221_v0 = vlaneseq (!%p135_p3)  ;;  %p162_p4 = scmp.lt.s32.totalorder (!%p135_p3), %s994_s9, 1  ;;  %v1004_v1 = vmov (!%p135_p3), 0.0|0.0   ;;  %vm1005_vm0 = vmmov (!%p135_p3), 0   ;;  %v1006_v4 = vmov (!%p135_p3), 0.0  }
   0x7   : > { %138 = sbr.rel (%p135_p3) target bundleno = 282 (0x11a), region = 24  ;;  %902 = vmatprep.subr.bf16.mxu0 (!%p135_p3), %v1004_v1  ;;  %926 = vmatprep.subr.bf16.mxu1 (!%p135_p3), %v1004_v1  ;;  %v1007_v22 = vmov (!%p135_p3), 1.0|1.0  }
   0x8   : > { %v1043_v2 = vshrl.u32 (!%p135_p3), %v221_v0, 7  ;;  %v431_v3 = vand.u32 (!%p135_p3), 127, %v221_v0  ;;  %864 = vmatprep.mubr.msk.f32.mxu0 (!%p135_p3), %vm1005_vm0, %v1006_v4  ;;  %899 = vmatprep.mubr.msk.f32.mxu1 (!%p135_p3), %vm1005_vm0, %v1006_v4 }
   0xa   : > { %v223_v5 = vadd.s32 (!%p135_p3), 8, %v1043_v2  ;;  %v242_v6 = vand.u32 (!%p135_p3), 63, %v1043_v2  ;;  %v1047_v7 = vand.u32 (!%p135_p3), 63, %v431_v3  ;;  %v224_v8 = vadd.s32 (!%p135_p3), 16, %v1043_v2 }
   0xb   : > { %v225_v9 = vadd.s32 (!%p135_p3), 24, %v1043_v2  ;;  %v226_v10 = vadd.s32 (!%p135_p3), 32, %v1043_v2  ;;  %v227_v11 = vadd.s32 (!%p135_p3), 40, %v1043_v2  ;;  %v228_v15 = vadd.s32 (!%p135_p3), 48, %v1043_v2 }
   0xc   : > { %v249_v12 = vand.u32 (!%p135_p3), 63, %v223_v5  ;;  %vm1065_vm1 = vcmp.eq.s32.totalorder (!%p135_p3), %v242_v6, %v1047_v7  ;;  %v256_v14 = vand.u32 (!%p135_p3), 63, %v224_v8  ;;  %v229_v17 = vadd.s32 (!%p135_p3), 56, %v1043_v2 }
   0xd   : > { %v263_v16 = vand.u32 (!%p135_p3), 63, %v225_v9  ;;  %v270_v19 = vand.u32 (!%p135_p3), 63, %v226_v10  ;;  %v277_v20 = vand.u32 (!%p135_p3), 63, %v227_v11  ;;  %v284_v23 = vand.u32 (!%p135_p3), 63, %v228_v15 }
   0xe   : > { %s1269_s9 = smov (!%p162_p4, %s994_s9), 1  ;;  %vm445_vm2 = vcmp.eq.s32.totalorder %v249_v12, %v1047_v7  ;;  %vm1074_vm3 = vcmp.eq.s32.totalorder %v256_v14, %v1047_v7  ;;  %v291_v24 = vand.u32 63, %v229_v17  ;;  %v230_v25 = vadd.s32 64, %v1043_v2 }
   0xf   : > { %s1053_s15 = scalar_lea.vmem %s1232_s1, %s1269_s9  ;;  %s788_s16 = sshll.u32 %s1269_s9, 4  ;;  %vm903_vm4 = vmpackc.low %vm445_vm2, %vm1065_vm1  ;;  %vm1084_vm5 = vcmp.eq.s32.totalorder %v263_v16, %v1047_v7  ;;  %vm1098_vm7 = vcmp.eq.s32.totalorder %v270_v19, %v1047_v7  ;;  %vm1103_vm8 = vcmp.eq.s32.totalorder %v277_v20, %v1047_v7  ;;  %v231_v29 = vadd.s32 72, %v1043_v2 }
  0x10   : > { %s1061_s19 = scalar_lea.vmem %s1233_s2, %s1269_s9  ;;  %181 = vst [vmem:[%s1053_s15] sm:$0x1] %v1006_v4  ;;  %s169_s22 = scalar_lea.vmem %s1231_s0, %s788_s16  ;;  %904 = vmatpush3.bf16.msk.msra.mxu0 %vm903_vm4, %v1007_v22  ;;  %928 = vmatpush3.bf16.msk.msra.mxu1 %vm903_vm4, %v1007_v22  ;;  %vm906_vm6 = vmpackc.low %vm1084_vm5, %vm1074_vm3  ;;  %vm1111_vm9 = vcmp.eq.s32.totalorder %v284_v23, %v1047_v7  ;;  %vm1122_vm11 = vcmp.eq.s32.totalorder %v291_v24, %v1047_v7  ;;  %v298_v34 = vand.u32 63, %v230_v25  ;;  %v232_v35 = vadd.s32 80, %v1043_v2 }
  0x11   : > { %182 = vst [vmem:[%s1061_s19] sm:$0x1] %v1006_v4  ;;  %905 = vmatprep.subr.bf16.mxu0 %v1004_v1  ;;  %929 = vmatprep.subr.bf16.mxu1 %v1004_v1  ;;  %v790_v26 = vld [vmem:[%s169_s22] sm:$0xff]   ;;  %v797_v30 = vld [vmem:[%s169_s22 + $0x8] sm:$0xff]   ;;  %vm909_vm10 = vmpackc.low %vm1103_vm8, %vm1098_vm7  ;;  %v305_v37 = vand.u32 63, %v231_v29  ;;  %v233_v38 = vadd.s32 88, %v1043_v2  ;;  %v234_v44 = vadd.s32 96, %v1043_v2 }
  0x12   : > { %v791_v32 = vunpack.c.l.bf16 %v790_v26  ;;  %v792_v36 = vunpack.c.h.bf16 %v790_v26  ;;  %v795_v39 = vunpack.c.l.bf16 %v797_v30  ;;  %v796_v40 = vunpack.c.h.bf16 %v797_v30  ;;  %vm912_vm12 = vmpackc.low %vm1122_vm11, %vm1111_vm9 }
  0x13   : > { %v235_v46 = vadd.s32 104, %v1043_v2  ;;  %vm1139_vm13 = vcmp.eq.s32.totalorder %v298_v34, %v1047_v7  ;;  %vm1144_vm14 = vcmp.eq.s32.totalorder %v305_v37, %v1047_v7  ;;  %v312_v52 = vand.u32 63, %v232_v35 }
  0x14   : > { %907 = vmatpush3.bf16.msk.msra.mxu0 %vm906_vm6, %v1007_v22  ;;  %931 = vmatpush3.bf16.msk.msra.mxu1 %vm906_vm6, %v1007_v22  ;;  %v192_v41 = vadd.f32 %v792_v36, %v791_v32  ;;  %v204_v42 = vmul.f32 %v791_v32, %v791_v32  ;;  %v205_v43 = vmul.f32 %v792_v36, %v792_v36  ;;  %v319_v53 = vand.u32 63, %v233_v38  ;;  %vm915_vm15 = vmpackc.low %vm1144_vm14, %vm1139_vm13 }
  0x15   : > { %908 = vmatprep.subr.bf16.mxu0 %v1004_v1  ;;  %932 = vmatprep.subr.bf16.mxu1 %v1004_v1  ;;  %v206_v45 = vmul.f32 %v795_v39, %v795_v39  ;;  %v207_v48 = vmul.f32 %v796_v40, %v796_v40  ;;  %v236_v56 = vadd.s32 112, %v1043_v2  ;;  %v237_v57 = vadd.s32 120, %v1043_v2 }
  0x16   : > { %v193_v47 = vadd.f32 %v795_v39, %v192_v41  ;;  %v208_v49 = vadd.f32 %v205_v43, %v204_v42  ;;  %vm1159_vm0 = vcmp.eq.s32.totalorder %v312_v52, %v1047_v7  ;;  %vm1164_vm1 = vcmp.eq.s32.totalorder %v319_v53, %v1047_v7 }
  0x17   : > { %v326_v62 = vand.u32 63, %v234_v44  ;;  %v333_v63 = vand.u32 63, %v235_v46  ;;  %vm918_vm2 = vmpackc.low %vm1164_vm1, %vm1159_vm0  ;;  %v340_v8 = vand.u32 63, %v236_v56  ;;  %v347_v9 = vand.u32 63, %v237_v57  ;;  %v191_v16 = vld [vmem:[%s1053_s15] sm:$0x1] }
  0x18   : > { %910 = vmatpush3.bf16.msk.msra.mxu0 %vm909_vm10, %v1007_v22  ;;  %934 = vmatpush3.bf16.msk.msra.mxu1 %vm909_vm10, %v1007_v22  ;;  %v194_v54 = vadd.f32 %v796_v40, %v193_v47  ;;  %v209_v55 = vadd.f32 %v208_v49, %v206_v45  ;;  %v203_v19 = vld [vmem:[%s1061_s19] sm:$0x1] }
  0x19   : > { %911 = vmatprep.subr.bf16.mxu0 %v1004_v1  ;;  %935 = vmatprep.subr.bf16.mxu1 %v1004_v1  ;;  %vm1177_vm3 = vcmp.eq.s32.totalorder %v326_v62, %v1047_v7  ;;  %vm1182_vm4 = vcmp.eq.s32.totalorder %v333_v63, %v1047_v7  ;;  %vm1195_vm6 = vcmp.eq.s32.totalorder %v340_v8, %v1047_v7 }
  0x1a   : > { %v195_v58 = vrot.slane %v194_v54, 4  ;;  %v210_v59 = vadd.f32 %v209_v55, %v207_v48  ;;  %vm921_vm5 = vmpackc.low %vm1182_vm4, %vm1177_vm3  ;;  %vm1200_vm7 = vcmp.eq.s32.totalorder %v347_v9, %v1047_v7 }
  0x1b   : > { %vm924_vm8 = vmpackc.low %vm1200_vm7, %vm1195_vm6 }
  0x1c   : > { %913 = vmatpush3.bf16.msk.msra.mxu0 %vm912_vm12, %v1007_v22  ;;  %937 = vmatpush3.bf16.msk.msra.mxu1 %vm912_vm12, %v1007_v22  ;;  %v196_v0 = vadd.f32 %v195_v58, %v194_v54  ;;  %v211_v3 = vrot.slane %v210_v59, 4 }
  0x1d   : > { %914 = vmatprep.subr.bf16.mxu0 %v1004_v1  ;;  %938 = vmatprep.subr.bf16.mxu1 %v1004_v1 }
  0x1e   : > { %v197_v2 = vrot.slane %v196_v0, 2  ;;  %v212_v4 = vadd.f32 %v211_v3, %v210_v59 }
  0x20   : > { %916 = vmatpush3.bf16.msk.msra.mxu0 %vm915_vm15, %v1007_v22  ;;  %940 = vmatpush3.bf16.msk.msra.mxu1 %vm915_vm15, %v1007_v22  ;;  %v198_v10 = vadd.f32 %v197_v2, %v196_v0  ;;  %v213_v11 = vrot.slane %v212_v4, 2 }
  0x21   : > { %917 = vmatprep.subr.bf16.mxu0 %v1004_v1  ;;  %941 = vmatprep.subr.bf16.mxu1 %v1004_v1 }
  0x22   : > { %v199_v12 = vrot.slane %v198_v10, 1  ;;  %v214_v13 = vadd.f32 %v213_v11, %v212_v4 }
  0x24   : > { %919 = vmatpush3.bf16.msk.msra.mxu0 %vm918_vm2, %v1007_v22  ;;  %943 = vmatpush3.bf16.msk.msra.mxu1 %vm918_vm2, %v1007_v22  ;;  %v200_v17 = vadd.f32 %v199_v12, %v198_v10  ;;  %v215_v18 = vrot.slane %v214_v13, 1 }
  0x25   : > { %920 = vmatprep.subr.bf16.mxu0 %v1004_v1  ;;  %944 = vmatprep.subr.bf16.mxu1 %v1004_v1 }
  0x26   : > { %v201_v7 = vadd.f32 %v200_v17, %v191_v16  ;;  %v216_v20 = vadd.f32 %v215_v18, %v214_v13 }
  0x28   : > { %922 = vmatpush3.bf16.msk.msra.mxu0 %vm921_vm5, %v1007_v22  ;;  %946 = vmatpush3.bf16.msk.msra.mxu1 %vm921_vm5, %v1007_v22  ;;  %202 = vst [vmem:[%s1053_s15] sm:$0x1] %v201_v7  ;;  %v217_v21 = vadd.f32 %v216_v20, %v203_v19 }
  0x29   : > { %923 = vmatprep.subr.bf16.mxu0 %v1004_v1  ;;  %947 = vmatprep.subr.bf16.mxu1 %v1004_v1 }
  0x2a   : > { %218 = vst [vmem:[%s1061_s19] sm:$0x1] %v217_v21 }
  0x2c   : > { %925 = vmatpush3.bf16.msk.msra.mxu0 %vm924_vm8, %v1007_v22  ;;  %949 = vmatpush3.bf16.msk.msra.mxu1 %vm924_vm8, %v1007_v22 }
  0x2f   : > { %v219_v23 = vld [vmem:[%s1053_s15] sm:$0x1] }
  0x30   : > { %865 = vmatmul.mubr.f32.vlgmr.msra.gmra.mrb[0].mxu0 %v219_v23 }
  0x31   : > { %v220_v24 = vld [vmem:[%s1061_s19] sm:$0x1] }
  0x32   : > { %900 = vmatmul.mubr.f32.vlgmr.msra.gmra.mrb[0].mxu1 %v220_v24 }
 0x103   : > { %v558_v25 = vpop.f32.mrb[0].mxu0 }
 0x104   : > { %v633_v26 = vmul.f32 0.015625, %v558_v25  ;;  %v866_v27 = vpop.f32.mrb[1].mxu0 }
 0x105   : > { %v628_v28 = vpop.f32.mrb[0].mxu1 }
 0x106   : > { %v635_v1 = vmul.f32 %v633_v26, %v633_v26  ;;  %643 = vst [vmem:[%s1053_s15] sm:$0x1] %v633_v26  ;;  %v634_v29 = vmul.f32 0.015625, %v628_v28  ;;  %v901_v30 = vpop.f32.mrb[1].mxu1 }
 0x108   : > { %v636_v31 = vsub.f32 %v634_v29, %v635_v1 }
 0x10a   : > { %v637_v32 = vmax.f32 %v636_v31, 0.0 }
 0x10c   : > { %v638_v33 = vadd.f32 1e-05, %v637_v32 }
 0x10e   : > { %978 = vrsqrt.f32 %v638_v33 }
 0x118   : > { %v979_v34 = vpop.eup %978 }
 0x119   : > { %644 = vst [vmem:[%s1061_s19] sm:$0x1] %v979_v34 }
 0x11a PF: > { %s13_s11 = sadd.s32 1, %s1002_s11   ;;  %s1264_s9 = smov %s998_s10 }
 0x11b   : > { %p10_p5 = scmp.ge.s32.totalorder %s13_s11, 4   ;;  %s1265_s10 = smov %s1267_s12 }
 0x11d   :  { %12 = sbr.rel (!%p10_p5) target bundleno = 2 (0x2), region = 74 }

// kernel: fast_style_network.71
= control target key start
LH: loop header
LB: loop body
LE: loop exit
PB: predicated region body
PF: predicated region fallthrough
CT: control target
= control target key end

     0   :  { %vm318_vm0 = vcmask 261120   ;;  %s1122_s1 = inlined_call_operand.vmem [shape: bf16[288,128], index: 1, kind: input, shape index: {}]   ;;  %s1123_s0 = inlined_call_operand.vmem [shape: bf16[128,288], index: 0, kind: input, shape index: {}]   ;;  %s1124_s2 = inlined_call_operand.vmem [shape: f32[1,128], index: 2, kind: input, shape index: {}]   ;;  %s1125_s3 = inlined_call_operand.vmem [shape: bf16[128,128], index: 3, kind: output, shape index: {}]  }
   0x1   :  { %v861_v0 = vld [vmem:[%s1122_s1 + $0x40] sm:$0xff]   ;;  %v863_v2 = vld [vmem:[%s1122_s1 + $0x48] sm:$0xff]   ;;  %v865_v4 = vld [vmem:[%s1122_s1 + $0x50] sm:$0xff]  }
   0x2   :  { %v862_v1 = vld [vmem:[%s1122_s1] sm:$0xff]   ;;  %751 = vmatprep.subr.bf16.mxu0 %v861_v0  ;;  %845 = vmatprep.subr.bf16.mxu1 %v861_v0  ;;  %v864_v3 = vld [vmem:[%s1122_s1 + $0x8] sm:$0xff]   ;;  %v866_v5 = vld [vmem:[%s1122_s1 + $0x10] sm:$0xff]  }
   0x3   :  { %752 = vmatpush3.bf16.msra.mxu0 %v862_v1  ;;  %853 = vmatpush3.bf16.msra.mxu1 %v862_v1  ;;  %v867_v6 = vld [vmem:[%s1122_s1 + $0x58] sm:$0xff]   ;;  %v869_v8 = vld [vmem:[%s1122_s1 + $0x60] sm:$0xff]   ;;  %v871_v10 = vld [vmem:[%s1122_s1 + $0x68] sm:$0xff]  }
   0x4   :  { %753 = vmatprep.subr.bf16.mxu0 %v863_v2  ;;  %846 = vmatprep.subr.bf16.mxu1 %v863_v2  ;;  %v868_v7 = vld [vmem:[%s1122_s1 + $0x18] sm:$0xff]   ;;  %v870_v9 = vld [vmem:[%s1122_s1 + $0x20] sm:$0xff]   ;;  %v872_v13 = vld [vmem:[%s1122_s1 + $0x28] sm:$0xff]  }
   0x5   :  { %v879_v11 = vld [vmem:[%s1123_s0 + $0x4] ss:$12 sps:$4 sm:$0xff]   ;;  %v882_v12 = vld [vmem:[%s1123_s0 + $0x94] ss:$12 sps:$4 sm:$0xff]   ;;  %v875_v16 = vld [vmem:[%s1122_s1 + $0x78] sm:$0xff]  }
   0x6   :  { %v873_v14 = vld [vmem:[%s1122_s1 + $0x70] sm:$0xff]   ;;  %375 = vmatprep.mubr.bf16.mxu0 %v879_v11  ;;  %423 = vmatprep.mubr.bf16.mxu1 %v882_v12  ;;  %v876_v17 = vld [vmem:[%s1122_s1 + $0x38] sm:$0xff]   ;;  %v877_v18 = vld [vmem:[%s1123_s0] ss:$12 sps:$4 sm:$0xff]  }
   0x7   :  { %754 = vmatpush3.bf16.msra.mxu0 %v864_v3  ;;  %854 = vmatpush3.bf16.msra.mxu1 %v864_v3  ;;  %v874_v15 = vld [vmem:[%s1122_s1 + $0x30] sm:$0xff]   ;;  %v883_v19 = vld [vmem:[%s1122_s1 + $0x80] sm:$0xff]   ;;  %v884_v21 = vld [vmem:[%s1123_s0 + $0x1c] ss:$12 sps:$4 sm:$0xff]  }
   0x8   :  { %755 = vmatprep.subr.bf16.mxu0 %v865_v4  ;;  %847 = vmatprep.subr.bf16.mxu1 %v865_v4  ;;  %v880_v20 = vld [vmem:[%s1123_s0 + $0x90] ss:$12 sps:$4 sm:$0xff]   ;;  %v886_v22 = vld [vmem:[%s1123_s0 + $0xac] ss:$12 sps:$4 sm:$0xff]   ;;  %v889_v25 = vld [vmem:[%s1123_s0 + $0xa8] ss:$12 sps:$4 sm:$0xff]  }
   0x9   :  { %v890_v23 = vld [vmem:[%s1122_s1 + $0x88] sm:$0xff]   ;;  %v888_v24 = vld [vmem:[%s1123_s0 + $0x18] ss:$12 sps:$4 sm:$0xff]   ;;  %v891_v26 = vld [vmem:[%s1123_s0 + $0x34] ss:$12 sps:$4 sm:$0xff]  }
   0xa   :  { %v893_v27 = vld [vmem:[%s1123_s0 + $0x8] ss:$12 sps:$4 sm:$0xff]   ;;  %v894_v28 = vld [vmem:[%s1123_s0 + $0x30] ss:$12 sps:$4 sm:$0xff]   ;;  %v895_v29 = vld [vmem:[%s1123_s0 + $0x20] ss:$12 sps:$4 sm:$0xff]  }
   0xb   :  { %756 = vmatpush3.bf16.msra.mxu0 %v866_v5  ;;  %855 = vmatpush3.bf16.msra.mxu1 %v866_v5  ;;  %v896_v30 = vld [vmem:[%s1123_s0 + $0x4c] ss:$12 sps:$4 sm:$0xff]   ;;  %v899_v32 = vld [vmem:[%s1123_s0 + $0x48] ss:$12 sps:$4 sm:$0xff]   ;;  %v900_v33 = vld [vmem:[%s1123_s0 + $0x50] ss:$12 sps:$4 sm:$0xff]  }
   0xc   :  { %757 = vmatprep.subr.bf16.mxu0 %v867_v6  ;;  %848 = vmatprep.subr.bf16.mxu1 %v867_v6  ;;  %v898_v31 = vld [vmem:[%s1123_s0 + $0x38] ss:$12 sps:$4 sm:$0xff]   ;;  %v903_v35 = vld [vmem:[%s1123_s0 + $0x68] ss:$12 sps:$4 sm:$0xff]   ;;  %v904_v36 = vld [vmem:[%s1123_s0 + $0x60] ss:$12 sps:$4 sm:$0xff]  }
   0xd   :  { %v901_v34 = vld [vmem:[%s1123_s0 + $0x64] ss:$12 sps:$4 sm:$0xff]   ;;  %v905_v37 = vld [vmem:[%s1123_s0 + $0x80] ss:$12 sps:$4 sm:$0xff]   ;;  %v906_v38 = vld [vmem:[%s1123_s0 + $0x7c] ss:$12 sps:$4 sm:$0xff]  }
   0xe   :  { %v908_v39 = vld [vmem:[%s1123_s0 + $0x98] ss:$12 sps:$4 sm:$0xff]   ;;  %v910_v41 = vld [vmem:[%s1123_s0 + $0xb0] ss:$12 sps:$4 sm:$0xff]   ;;  %v1076_v2 = vld [vmem:[%s1124_s2] ss:$0 sm:$0xff] }
   0xf   :  { %758 = vmatpush3.bf16.msra.mxu0 %v868_v7  ;;  %856 = vmatpush3.bf16.msra.mxu1 %v868_v7  ;;  %v909_v40 = vld [vmem:[%s1123_s0 + $0x78] ss:$12 sps:$4 sm:$0xff]  }
  0x10   :  { %759 = vmatprep.subr.bf16.mxu0 %v869_v8  ;;  %849 = vmatprep.subr.bf16.mxu1 %v869_v8 }
  0x13   :  { %760 = vmatpush3.bf16.msra.mxu0 %v870_v9  ;;  %857 = vmatpush3.bf16.msra.mxu1 %v870_v9 }
  0x14   :  { %761 = vmatprep.subr.bf16.mxu0 %v871_v10  ;;  %850 = vmatprep.subr.bf16.mxu1 %v871_v10 }
  0x17   :  { %762 = vmatpush3.bf16.msra.mxu0 %v872_v13  ;;  %858 = vmatpush3.bf16.msra.mxu1 %v872_v13 }
  0x18   :  { %763 = vmatprep.subr.bf16.mxu0 %v873_v14  ;;  %851 = vmatprep.subr.bf16.mxu1 %v873_v14 }
  0x1b   :  { %764 = vmatpush3.bf16.msra.mxu0 %v874_v15  ;;  %859 = vmatpush3.bf16.msra.mxu1 %v874_v15 }
  0x1c   :  { %765 = vmatprep.subr.bf16.mxu0 %v875_v16  ;;  %852 = vmatprep.subr.bf16.mxu1 %v875_v16 }
  0x1f   :  { %766 = vmatpush3.bf16.msra.mxu0 %v876_v17  ;;  %860 = vmatpush3.bf16.msra.mxu1 %v876_v17 }
  0x20   :  { %825 = vmatprep.subr.bf16.mxu1 %v883_v19 }
  0x22   :  { %376 = vmatmul.mubr.bf16.vlgmr.msra.gmra.mrb[0].mxu0 %v877_v18  ;;  %424 = vmatmul.mubr.bf16.vlgmr.msra.gmra.mrb[0].mxu1 %v880_v20 }
  0x23   :  { %826 = vmatpush3.bf16.msra.mxu1 %v883_v19  ;;  %383 = vmatprep.mubr.bf16.mxu0 %v884_v21 }
  0x24   :  { %431 = vmatprep.mubr.bf16.mxu1 %v886_v22  ;;  %827 = vmatprep.subr.bf16.mxu1 %v890_v23 }
  0x27   :  { %828 = vmatpush3.bf16.msra.mxu1 %v890_v23 }
  0x2a   :  { %384 = vmatmul.mubr.bf16.gmra.mrb[4].mxu0 %v888_v24  ;;  %432 = vmatmul.mubr.bf16.gmra.mrb[4].mxu1 %v889_v25 }
  0x2b   :  { %391 = vmatprep.mubr.bf16.mxu0 %v891_v26  ;;  %829 = vmatprep.mubr.msk.bf16.mxu1 %vm318_vm0, %v893_v27 }
  0x32   :  { %392 = vmatmul.mubr.bf16.gmra.mrb[8].mxu0 %v894_v28  ;;  %830 = vmatmul.mubr.msk.bf16.vlgmr.msra.gmra.mrb[8].mxu1 %vm318_vm0, %v895_v29 }
  0x33   :  { %399 = vmatprep.mubr.bf16.mxu0 %v896_v30  ;;  %833 = vmatprep.mubr.msk.bf16.mxu1 %vm318_vm0, %v898_v31 }
  0x3a   :  { %400 = vmatmul.mubr.bf16.gmra.mrb[12].mxu0 %v899_v32  ;;  %834 = vmatmul.mubr.msk.bf16.gmra.mrb[12].mxu1 %vm318_vm0, %v900_v33 }
  0x3b   :  { %407 = vmatprep.mubr.bf16.mxu0 %v901_v34  ;;  %837 = vmatprep.mubr.msk.bf16.mxu1 %vm318_vm0, %v903_v35 }
  0x42   :  { %408 = vmatmul.mubr.bf16.gmra.mrb[16].mxu0 %v904_v36  ;;  %838 = vmatmul.mubr.msk.bf16.gmra.mrb[16].mxu1 %vm318_vm0, %v905_v37 }
  0x43   :  { %415 = vmatprep.mubr.bf16.mxu0 %v906_v38  ;;  %841 = vmatprep.mubr.msk.bf16.mxu1 %vm318_vm0, %v908_v39 }
  0x4a   :  { %416 = vmatmul.mubr.bf16.gmra.mrb[20].mxu0 %v909_v40  ;;  %842 = vmatmul.mubr.msk.bf16.gmra.mrb[20].mxu1 %vm318_vm0, %v910_v41 }
  0xf5   :  { %v767_v42 = vpop.f32.mrb[0].mxu0  ;;  %v803_v43 = vpop.f32.mrb[0].mxu1 }
  0xf6   :  { %v768_v44 = vpop.f32.mrb[1].mxu0  ;;  %v804_v45 = vpop.f32.mrb[1].mxu1 }
  0xf7   :  { %v769_v46 = vadd.f32 %v768_v44, %v767_v42  ;;  %v770_v47 = vpop.f32.mrb[2].mxu0  ;;  %v1065_v48 = vadd.f32 %v804_v45, %v803_v43  ;;  %v806_v49 = vpop.f32.mrb[2].mxu1 }
  0xf8   :  { %v771_v50 = vpop.f32.mrb[3].mxu0  ;;  %v807_v51 = vpop.f32.mrb[3].mxu1 }
  0xf9   :  { %v772_v52 = vadd.f32 %v771_v50, %v770_v47  ;;  %v1067_v53 = vadd.f32 %v807_v51, %v806_v49  ;;  %v378_v6 = vadd.f32 %v769_v46, %v1076_v2 }
  0xfb   :  { %v381_v15 = vadd.f32 %v772_v52, %v1076_v2 }
  0xfd   :  { %v773_v54 = vpop.f32.mrb[4].mxu0  ;;  %v809_v55 = vpop.f32.mrb[4].mxu1 }
  0xfe   :  { %v774_v56 = vpop.f32.mrb[5].mxu0  ;;  %v810_v57 = vpop.f32.mrb[5].mxu1 }
  0xff   :  { %v775_v58 = vadd.f32 %v774_v56, %v773_v54  ;;  %v776_v59 = vpop.f32.mrb[6].mxu0  ;;  %v1069_v60 = vadd.f32 %v810_v57, %v809_v55  ;;  %v812_v61 = vpop.f32.mrb[6].mxu1 }
 0x100   :  { %v777_v62 = vpop.f32.mrb[7].mxu0  ;;  %v813_v63 = vpop.f32.mrb[7].mxu1 }
 0x101   :  { %v778_v0 = vadd.f32 %v777_v62, %v776_v59  ;;  %v1071_v1 = vadd.f32 %v813_v63, %v812_v61  ;;  %v386_v3 = vadd.f32 %v775_v58, %v1076_v2  ;;  %v434_v58 = vadd.f32 %v1069_v60, %v1076_v2 }
 0x102   :  { %v426_v63 = vadd.f32 %v1065_v48, %v1076_v2  ;;  %v429_v60 = vadd.f32 %v1067_v53, %v1076_v2 }
 0x103   :  { %v389_v10 = vadd.f32 %v778_v0, %v1076_v2 }
 0x105   :  { %v779_v4 = vpop.f32.mrb[8].mxu0  ;;  %v831_v5 = vpop.f32.mrb[8].mxu1 }
 0x106   :  { %v483_v7 = vadd.f32 %v831_v5, %v386_v3  ;;  %v780_v8 = vpop.f32.mrb[9].mxu0  ;;  %v474_v9 = vpop.f32.mrb[9].mxu1  ;;  %v437_v5 = vadd.f32 %v1071_v1, %v1076_v2 }
 0x107   :  { %v781_v11 = vadd.f32 %v780_v8, %v779_v4  ;;  %v475_v12 = vadd.f32 %v474_v9, %v378_v6  ;;  %v782_v13 = vpop.f32.mrb[10].mxu0  ;;  %v832_v14 = vpop.f32.mrb[10].mxu1 }
 0x108   :  { %v486_v16 = vadd.f32 %v832_v14, %v389_v10  ;;  %v783_v17 = vpop.f32.mrb[11].mxu0  ;;  %v477_v18 = vpop.f32.mrb[11].mxu1 }
 0x109   :  { %v784_v19 = vadd.f32 %v783_v17, %v782_v13  ;;  %v478_v20 = vadd.f32 %v477_v18, %v381_v15  ;;  %v394_v25 = vadd.f32 %v781_v11, %v1076_v2 }
 0x10a   :  { %v712_v21 = vpack.c.bf16 %v486_v16, %v483_v7 }
 0x10b   :  { %v707_v22 = vpack.c.bf16 %v478_v20, %v475_v12  ;;  %v397_v32 = vadd.f32 %v784_v19, %v1076_v2 }
 0x10c   :  { %744 = vst [vmem:[%s1125_s3 + $0x8] sm:$0xff] %v712_v21  }
 0x10d   :  { %708 = vst [vmem:[%s1125_s3] sm:$0xff] %v707_v22   ;;  %v785_v23 = vpop.f32.mrb[12].mxu0  ;;  %v835_v24 = vpop.f32.mrb[12].mxu1 }
 0x10e   :  { %v786_v26 = vpop.f32.mrb[13].mxu0  ;;  %v490_v27 = vpop.f32.mrb[13].mxu1 }
 0x10f   :  { %v787_v28 = vadd.f32 %v786_v26, %v785_v23  ;;  %v491_v29 = vadd.f32 %v490_v27, %v394_v25  ;;  %v788_v30 = vpop.f32.mrb[14].mxu0  ;;  %v836_v31 = vpop.f32.mrb[14].mxu1 }
 0x110   :  { %v789_v33 = vpop.f32.mrb[15].mxu0  ;;  %v493_v34 = vpop.f32.mrb[15].mxu1 }
 0x111   :  { %v402_v35 = vadd.f32 %v787_v28, %v1076_v2  ;;  %v790_v36 = vadd.f32 %v789_v33, %v788_v30  ;;  %v494_v37 = vadd.f32 %v493_v34, %v397_v32 }
 0x113   :  { %v499_v38 = vadd.f32 %v835_v24, %v402_v35  ;;  %v405_v39 = vadd.f32 %v790_v36, %v1076_v2  ;;  %v717_v40 = vpack.c.bf16 %v494_v37, %v491_v29 }
 0x115   :  { %v502_v41 = vadd.f32 %v836_v31, %v405_v39  ;;  %745 = vst [vmem:[%s1125_s3 + $0x10] sm:$0xff] %v717_v40   ;;  %v791_v42 = vpop.f32.mrb[16].mxu0  ;;  %v839_v43 = vpop.f32.mrb[16].mxu1 }
 0x116   :  { %v792_v44 = vpop.f32.mrb[17].mxu0  ;;  %v506_v45 = vpop.f32.mrb[17].mxu1 }
 0x117   :  { %v722_v46 = vpack.c.bf16 %v502_v41, %v499_v38  ;;  %v793_v47 = vadd.f32 %v792_v44, %v791_v42  ;;  %v794_v49 = vpop.f32.mrb[18].mxu0  ;;  %v840_v50 = vpop.f32.mrb[18].mxu1 }
 0x118   :  { %v795_v51 = vpop.f32.mrb[19].mxu0  ;;  %v509_v52 = vpop.f32.mrb[19].mxu1 }
 0x119   :  { %746 = vst [vmem:[%s1125_s3 + $0x18] sm:$0xff] %v722_v46   ;;  %v410_v54 = vadd.f32 %v793_v47, %v1076_v2  ;;  %v796_v55 = vadd.f32 %v795_v51, %v794_v49 }
 0x11b   :  { %v507_v56 = vadd.f32 %v506_v45, %v410_v54  ;;  %v413_v57 = vadd.f32 %v796_v55, %v1076_v2 }
 0x11d   :  { %v510_v59 = vadd.f32 %v509_v52, %v413_v57  ;;  %v797_v61 = vpop.f32.mrb[20].mxu0  ;;  %v843_v62 = vpop.f32.mrb[20].mxu1 }
 0x11e   :  { %v531_v0 = vadd.f32 %v843_v62, %v434_v58  ;;  %v798_v3 = vpop.f32.mrb[21].mxu0  ;;  %v522_v4 = vpop.f32.mrb[21].mxu1 }
 0x11f   :  { %v727_v6 = vpack.c.bf16 %v510_v59, %v507_v56  ;;  %v799_v7 = vadd.f32 %v798_v3, %v797_v61  ;;  %v523_v8 = vadd.f32 %v522_v4, %v426_v63  ;;  %v800_v9 = vpop.f32.mrb[22].mxu0  ;;  %v844_v10 = vpop.f32.mrb[22].mxu1 }
 0x120   :  { %v534_v11 = vadd.f32 %v844_v10, %v437_v5  ;;  %v801_v12 = vpop.f32.mrb[23].mxu0  ;;  %v525_v13 = vpop.f32.mrb[23].mxu1 }
 0x121   :  { %747 = vst [vmem:[%s1125_s3 + $0x20] sm:$0xff] %v727_v6   ;;  %v418_v48 = vadd.f32 %v799_v7, %v1076_v2  ;;  %v802_v14 = vadd.f32 %v801_v12, %v800_v9  ;;  %v526_v15 = vadd.f32 %v525_v13, %v429_v60 }
 0x122   :  { %v742_v1 = vpack.c.bf16 %v534_v11, %v531_v0 }
 0x123   :  { %v515_v16 = vadd.f32 %v839_v43, %v418_v48  ;;  %v421_v17 = vadd.f32 %v802_v14, %v1076_v2  ;;  %v737_v18 = vpack.c.bf16 %v526_v15, %v523_v8 }
 0x124   :  { %750 = vst [vmem:[%s1125_s3 + $0x38] sm:$0xff] %v742_v1  }
 0x125   :  { %v518_v53 = vadd.f32 %v840_v50, %v421_v17  ;;  %749 = vst [vmem:[%s1125_s3 + $0x30] sm:$0xff] %v737_v18  }
 0x127   :  { %v732_v19 = vpack.c.bf16 %v518_v53, %v515_v16 }
 0x129   :  { %748 = vst [vmem:[%s1125_s3 + $0x28] sm:$0xff] %v732_v19  }

// kernel: fast_style_network.73
= control target key start
LH: loop header
LB: loop body
LE: loop exit
PB: predicated region body
PF: predicated region fallthrough
CT: control target
= control target key end

     0   :  { %s508_s12 = smov 0   ;;  %s510_s13 = smov 0   ;;  %s547_s0 = inlined_call_operand.vmem [shape: bf16[2,32,128], index: 0, kind: input, shape index: {}]   ;;  %s548_s1 = inlined_call_operand.vmem [shape: f32[2,1,128], index: 1, kind: input, shape index: {}]   ;;  %s549_s2 = inlined_call_operand.vmem [shape: f32[2,1,128], index: 2, kind: input, shape index: {}]   ;;  %s550_s3 = inlined_call_operand.vmem [shape: bf16[2,32,128], index: 3, kind: output, shape index: {}]  }
   0x1   :  { %s512_s14 = smov 0  }
   0x2 LB: > { %s25_s15 = sadd.s32 1, %s482_s13  ;;  %p401_p0 = scmp.ge.s32.totalorder %s486_s14, 1  ;;  %s486_s14 = sphi %s512_s14, %s13_s14   ;;  %s482_s13 = sphi %s510_s13, %s552_s13   ;;  %s478_s12 = sphi %s508_s12, %s551_s12  }
   0x3   : > { %p27_p1 = scmp.ge.s32.totalorder %s25_s15, 2  ;;  %p174_p2 = scmp.lt.s32.totalorder %s486_s14, 3 }
   0x5   : > { %s554_s15 = smov (%p27_p1, %s25_s15), 0  ;;  %p175_p3 = pnand %p401_p0, %p174_p2 }
   0x6   : > { %p213_p4 = scmp.lt.s32.totalorder (!%p175_p3), %s478_s12, 1 }
   0x7   : > { %178 = sbr.rel (%p175_p3) target bundleno = 29 (0x1d), region = 32 }
   0xe   : > { %s556_s12 = smov (!%p213_p4, %s478_s12), 1 }
   0xf   : > { %s414_s16 = sshll.u32 %s556_s12, 4  ;;  %s224_s19 = scalar_lea.vmem %s548_s1, %s556_s12 }
  0x10   : > { %s220_s22 = scalar_lea.vmem %s547_s0, %s414_s16  ;;  %s227_s25 = scalar_lea.vmem %s549_s2, %s556_s12  ;;  %v406_v2 = vld [vmem:[%s224_s19] ss:$0 sm:$0xff] }
  0x11   : > { %v421_v0 = vld [vmem:[%s220_s22] sm:$0xff]   ;;  %v438_v1 = vld [vmem:[%s220_s22 + $0x8] sm:$0xff]   ;;  %s236_s28 = scalar_lea.vmem %s550_s3, %s414_s16 }
  0x12   : > { %v422_v3 = vunpack.c.l.bf16 %v421_v0  ;;  %v423_v4 = vunpack.c.h.bf16 %v421_v0  ;;  %v426_v5 = vunpack.c.l.bf16 %v438_v1  ;;  %v427_v6 = vunpack.c.h.bf16 %v438_v1  ;;  %v407_v7 = vld [vmem:[%s227_s25] ss:$0 sm:$0xff] }
  0x14   : > { %v253_v8 = vsub.f32 %v422_v3, %v406_v2  ;;  %v254_v9 = vsub.f32 %v423_v4, %v406_v2  ;;  %v255_v10 = vsub.f32 %v426_v5, %v406_v2  ;;  %v256_v11 = vsub.f32 %v427_v6, %v406_v2 }
  0x16   : > { %v264_v12 = vmul.f32 %v407_v7, %v253_v8  ;;  %v265_v13 = vmul.f32 %v407_v7, %v254_v9  ;;  %v266_v14 = vmul.f32 %v407_v7, %v255_v10  ;;  %v267_v15 = vmul.f32 %v407_v7, %v256_v11 }
  0x18   : > { %v268_v16 = vmax.f32 %v264_v12, 0.0  ;;  %v269_v17 = vmax.f32 %v265_v13, 0.0  ;;  %v270_v18 = vmax.f32 %v266_v14, 0.0  ;;  %v271_v19 = vmax.f32 %v267_v15, 0.0 }
  0x1a   : > { %v431_v20 = vpack.c.bf16 %v269_v17, %v268_v16  ;;  %v436_v21 = vpack.c.bf16 %v271_v19, %v270_v18 }
  0x1c   : > { %432 = vst [vmem:[%s236_s28] sm:$0xff] %v431_v20   ;;  %439 = vst [vmem:[%s236_s28 + $0x8] sm:$0xff] %v436_v21  }
  0x1d PF: > { %s13_s14 = sadd.s32 1, %s486_s14   ;;  %s551_s12 = smov %s482_s13 }
  0x1e   : > { %p10_p5 = scmp.ge.s32.totalorder %s13_s14, 4   ;;  %s552_s13 = smov %s554_s15 }
  0x20   :  { %12 = sbr.rel (!%p10_p5) target bundleno = 2 (0x2), region = 68 }

// kernel: fast_style_network.75
= control target key start
LH: loop header
LB: loop body
LE: loop exit
PB: predicated region body
PF: predicated region fallthrough
CT: control target
= control target key end

     0   :  { %s391_s9 = smov 0   ;;  %s393_s10 = smov 0   ;;  %s441_s0 = inlined_call_operand.vmem [shape: bf16[2,16,128], index: 0, kind: input, shape index: {}]   ;;  %s442_s1 = inlined_call_operand.vmem [shape: f32[2,1,128], index: 1, kind: output, shape index: {0}]   ;;  %s443_s2 = inlined_call_operand.vmem [shape: f32[2,1,128], index: 2, kind: output, shape index: {1}]  }
   0x1   :  { %s395_s11 = smov 0  }
   0x2 LB: > { %s25_s12 = sadd.s32 1, %s369_s10  ;;  %p314_p0 = scmp.ge.s32.totalorder %s373_s11, 1  ;;  %s373_s11 = sphi %s395_s11, %s13_s11   ;;  %s369_s10 = sphi %s393_s10, %s445_s10   ;;  %s365_s9 = sphi %s391_s9, %s444_s9  }
   0x3   : > { %p27_p1 = scmp.ge.s32.totalorder %s25_s12, 2  ;;  %p134_p2 = scmp.lt.s32.totalorder %s373_s11, 3 }
   0x5   : > { %s447_s12 = smov (%p27_p1, %s25_s12), 0  ;;  %p135_p3 = pnand %p314_p0, %p134_p2 }
   0x6   : > { %p162_p4 = scmp.lt.s32.totalorder (!%p135_p3), %s365_s9, 1  ;;  %v375_v0 = vmov (!%p135_p3), 0.0  }
   0x7   : > { %138 = sbr.rel (%p135_p3) target bundleno = 66 (0x42), region = 24 }
   0xe   : > { %s449_s9 = smov (!%p162_p4, %s365_s9), 1 }
   0xf   : > { %s319_s13 = sshll.u32 %s449_s9, 3  ;;  %s412_s16 = scalar_lea.vmem %s442_s1, %s449_s9 }
  0x10   : > { %s169_s19 = scalar_lea.vmem %s441_s0, %s319_s13  ;;  %181 = vst [vmem:[%s412_s16] sm:$0x1] %v375_v0  ;;  %s421_s22 = scalar_lea.vmem %s443_s2, %s449_s9 }
  0x11   : > { %v321_v1 = vld [vmem:[%s169_s19] sm:$0xff]   ;;  %182 = vst [vmem:[%s421_s22] sm:$0x1] %v375_v0 }
  0x12   : > { %v322_v2 = vunpack.c.l.bf16 %v321_v1  ;;  %v323_v3 = vunpack.c.h.bf16 %v321_v1 }
  0x14   : > { %v188_v4 = vadd.f32 %v323_v3, %v322_v2  ;;  %v198_v5 = vmul.f32 %v322_v2, %v322_v2  ;;  %v199_v6 = vmul.f32 %v323_v3, %v323_v3 }
  0x16   : > { %v189_v7 = vrot.slane %v188_v4, 4  ;;  %v200_v8 = vadd.f32 %v199_v6, %v198_v5 }
  0x17   : > { %v187_v17 = vld [vmem:[%s412_s16] sm:$0x1] }
  0x18   : > { %v190_v9 = vadd.f32 %v189_v7, %v188_v4  ;;  %v201_v10 = vrot.slane %v200_v8, 4  ;;  %v197_v20 = vld [vmem:[%s421_s22] sm:$0x1] }
  0x1a   : > { %v191_v11 = vrot.slane %v190_v9, 2  ;;  %v202_v12 = vadd.f32 %v201_v10, %v200_v8 }
  0x1c   : > { %v192_v13 = vadd.f32 %v191_v11, %v190_v9  ;;  %v203_v14 = vrot.slane %v202_v12, 2 }
  0x1e   : > { %v193_v15 = vrot.slane %v192_v13, 1  ;;  %v204_v16 = vadd.f32 %v203_v14, %v202_v12 }
  0x20   : > { %v194_v18 = vadd.f32 %v193_v15, %v192_v13  ;;  %v205_v19 = vrot.slane %v204_v16, 1 }
  0x22   : > { %v195_v21 = vadd.f32 %v194_v18, %v187_v17  ;;  %v206_v22 = vadd.f32 %v205_v19, %v204_v16 }
  0x24   : > { %196 = vst [vmem:[%s412_s16] sm:$0x1] %v195_v21  ;;  %v207_v23 = vadd.f32 %v206_v22, %v197_v20 }
  0x26   : > { %208 = vst [vmem:[%s421_s22] sm:$0x1] %v207_v23 }
  0x2b   : > { %v209_v24 = vld [vmem:[%s412_s16] sm:$0x1] }
  0x2c   : > { %v212_v25 = vmul.f32 0.0625, %v209_v24 }
  0x2d   : > { %v210_v26 = vld [vmem:[%s421_s22] sm:$0x1] }
  0x2e   : > { %v214_v27 = vmul.f32 %v212_v25, %v212_v25  ;;  %222 = vst [vmem:[%s412_s16] sm:$0x1] %v212_v25  ;;  %v213_v28 = vmul.f32 0.0625, %v210_v26 }
  0x30   : > { %v215_v29 = vsub.f32 %v213_v28, %v214_v27 }
  0x32   : > { %v216_v30 = vmax.f32 %v215_v29, 0.0 }
  0x34   : > { %v217_v31 = vadd.f32 1e-05, %v216_v30 }
  0x36   : > { %349 = vrsqrt.f32 %v217_v31 }
  0x40   : > { %v350_v32 = vpop.eup %349 }
  0x41   : > { %223 = vst [vmem:[%s421_s22] sm:$0x1] %v350_v32 }
  0x42 PF: > { %s13_s11 = sadd.s32 1, %s373_s11   ;;  %s444_s9 = smov %s369_s10 }
  0x43   : > { %p10_p5 = scmp.ge.s32.totalorder %s13_s11, 4   ;;  %s445_s10 = smov %s447_s12 }
  0x45   :  { %12 = sbr.rel (!%p10_p5) target bundleno = 2 (0x2), region = 74 }

// kernel: fast_style_network.76
= control target key start
LH: loop header
LB: loop body
LE: loop exit
PB: predicated region body
PF: predicated region fallthrough
CT: control target
= control target key end

     0   :  { %s473_s12 = smov 0   ;;  %s475_s13 = smov 0   ;;  %s509_s0 = inlined_call_operand.vmem [shape: bf16[2,16,128], index: 0, kind: input, shape index: {}]   ;;  %s510_s1 = inlined_call_operand.vmem [shape: f32[2,1,128], index: 1, kind: input, shape index: {}]   ;;  %s511_s2 = inlined_call_operand.vmem [shape: f32[2,1,128], index: 2, kind: input, shape index: {}]   ;;  %s512_s3 = inlined_call_operand.vmem [shape: bf16[2,16,128], index: 3, kind: output, shape index: {}]  }
   0x1   :  { %s477_s14 = smov 0  }
   0x2 LB: > { %s25_s15 = sadd.s32 1, %s447_s13  ;;  %p381_p0 = scmp.ge.s32.totalorder %s451_s14, 1  ;;  %s451_s14 = sphi %s477_s14, %s13_s14   ;;  %s447_s13 = sphi %s475_s13, %s514_s13   ;;  %s443_s12 = sphi %s473_s12, %s513_s12  }
   0x3   : > { %p27_p1 = scmp.ge.s32.totalorder %s25_s15, 2  ;;  %p174_p2 = scmp.lt.s32.totalorder %s451_s14, 3 }
   0x5   : > { %s516_s15 = smov (%p27_p1, %s25_s15), 0  ;;  %p175_p3 = pnand %p381_p0, %p174_p2 }
   0x6   : > { %p213_p4 = scmp.lt.s32.totalorder (!%p175_p3), %s443_s12, 1 }
   0x7   : > { %178 = sbr.rel (%p175_p3) target bundleno = 29 (0x1d), region = 32 }
   0xe   : > { %s518_s12 = smov (!%p213_p4, %s443_s12), 1 }
   0xf   : > { %s392_s16 = sshll.u32 %s518_s12, 3  ;;  %s224_s19 = scalar_lea.vmem %s510_s1, %s518_s12 }
  0x10   : > { %s220_s22 = scalar_lea.vmem %s509_s0, %s392_s16  ;;  %s227_s25 = scalar_lea.vmem %s511_s2, %s518_s12  ;;  %v386_v1 = vld [vmem:[%s224_s19] ss:$0 sm:$0xff] }
  0x11   : > { %v397_v0 = vld [vmem:[%s220_s22] sm:$0xff]   ;;  %s236_s28 = scalar_lea.vmem %s512_s3, %s392_s16 }
  0x12   : > { %v398_v2 = vunpack.c.l.bf16 %v397_v0  ;;  %v399_v3 = vunpack.c.h.bf16 %v397_v0  ;;  %v387_v4 = vld [vmem:[%s227_s25] ss:$0 sm:$0xff] }
  0x14   : > { %v249_v5 = vsub.f32 %v398_v2, %v386_v1  ;;  %v250_v6 = vsub.f32 %v399_v3, %v386_v1 }
  0x16   : > { %v258_v7 = vmul.f32 %v387_v4, %v249_v5  ;;  %v259_v8 = vmul.f32 %v387_v4, %v250_v6 }
  0x18   : > { %v260_v9 = vmax.f32 %v258_v7, 0.0  ;;  %v261_v10 = vmax.f32 %v259_v8, 0.0 }
  0x1a   : > { %v403_v11 = vpack.c.bf16 %v261_v10, %v260_v9 }
  0x1c   : > { %404 = vst [vmem:[%s236_s28] sm:$0xff] %v403_v11  }
  0x1d PF: > { %s13_s14 = sadd.s32 1, %s451_s14   ;;  %s513_s12 = smov %s447_s13 }
  0x1e   : > { %p10_p5 = scmp.ge.s32.totalorder %s13_s14, 4   ;;  %s514_s13 = smov %s516_s15 }
  0x20   :  { %12 = sbr.rel (!%p10_p5) target bundleno = 2 (0x2), region = 68 }

// kernel: fast_style_network.74
= control target key start
LH: loop header
LB: loop body
LE: loop exit
PB: predicated region body
PF: predicated region fallthrough
CT: control target
= control target key end

     0   :  { %vm372_vm0 = vcmask 523264   ;;  %s909_s1 = inlined_call_operand.vmem [shape: bf16[576,128], index: 1, kind: input, shape index: {}]   ;;  %s910_s0 = inlined_call_operand.vmem [shape: bf16[32,576], index: 0, kind: input, shape index: {}]   ;;  %s911_s2 = inlined_call_operand.vmem [shape: f32[1,128], index: 2, kind: input, shape index: {}]   ;;  %s912_s3 = inlined_call_operand.vmem [shape: bf16[32,128], index: 3, kind: output, shape index: {}]  }
   0x1   :  { %v692_v0 = vld [vmem:[%s909_s1 + $0x40] sm:$0xff]   ;;  %v696_v4 = vld [vmem:[%s909_s1 + $0x48] sm:$0xff]   ;;  %v700_v8 = vld [vmem:[%s909_s1 + $0x50] sm:$0xff]  }
   0x2   :  { %v693_v1 = vld [vmem:[%s909_s1] sm:$0xff]   ;;  %618 = vmatprep.subr.bf16.mxu0 %v692_v0  ;;  %v697_v5 = vld [vmem:[%s909_s1 + $0x8] sm:$0xff]   ;;  %v701_v9 = vld [vmem:[%s909_s1 + $0x10] sm:$0xff]  }
   0x3   :  { %v694_v2 = vld [vmem:[%s909_s1 + $0xc0] sm:$0xff]   ;;  %619 = vmatpush3.bf16.msra.mxu0 %v693_v1  ;;  %v698_v6 = vld [vmem:[%s909_s1 + $0xc8] sm:$0xff]   ;;  %v702_v10 = vld [vmem:[%s909_s1 + $0xd0] sm:$0xff]  }
   0x4   :  { %v695_v3 = vld [vmem:[%s909_s1 + $0x80] sm:$0xff]   ;;  %646 = vmatprep.subr.bf16.mxu1 %v694_v2  ;;  %620 = vmatprep.subr.bf16.mxu0 %v696_v4  ;;  %v699_v7 = vld [vmem:[%s909_s1 + $0x88] sm:$0xff]   ;;  %v703_v11 = vld [vmem:[%s909_s1 + $0x90] sm:$0xff]  }
   0x5   :  { %647 = vmatpush3.bf16.msra.mxu1 %v695_v3  ;;  %v704_v12 = vld [vmem:[%s909_s1 + $0x58] sm:$0xff]   ;;  %v708_v16 = vld [vmem:[%s909_s1 + $0x60] sm:$0xff]   ;;  %v712_v20 = vld [vmem:[%s909_s1 + $0x68] sm:$0xff]  }
   0x6   :  { %648 = vmatprep.subr.bf16.mxu1 %v698_v6  ;;  %v705_v13 = vld [vmem:[%s909_s1 + $0x18] sm:$0xff]   ;;  %v709_v17 = vld [vmem:[%s909_s1 + $0x20] sm:$0xff]   ;;  %v713_v21 = vld [vmem:[%s909_s1 + $0x28] sm:$0xff]  }
   0x7   :  { %621 = vmatpush3.bf16.msra.mxu0 %v697_v5  ;;  %v706_v14 = vld [vmem:[%s909_s1 + $0xd8] sm:$0xff]   ;;  %v710_v18 = vld [vmem:[%s909_s1 + $0xe0] sm:$0xff]   ;;  %v714_v22 = vld [vmem:[%s909_s1 + $0xe8] sm:$0xff]  }
   0x8   :  { %622 = vmatprep.subr.bf16.mxu0 %v700_v8  ;;  %v707_v15 = vld [vmem:[%s909_s1 + $0x98] sm:$0xff]   ;;  %v711_v19 = vld [vmem:[%s909_s1 + $0xa0] sm:$0xff]   ;;  %v715_v23 = vld [vmem:[%s909_s1 + $0xa8] sm:$0xff]  }
   0x9   :  { %649 = vmatpush3.bf16.msra.mxu1 %v699_v7  ;;  %v716_v24 = vld [vmem:[%s909_s1 + $0x70] sm:$0xff]   ;;  %v720_v28 = vld [vmem:[%s909_s1 + $0x78] sm:$0xff]   ;;  %v727_v34 = vld [vmem:[%s909_s1 + $0x100] sm:$0xff]  }
   0xa   :  { %650 = vmatprep.subr.bf16.mxu1 %v702_v10  ;;  %v717_v25 = vld [vmem:[%s909_s1 + $0x30] sm:$0xff]   ;;  %v721_v29 = vld [vmem:[%s909_s1 + $0x38] sm:$0xff]   ;;  %v730_v36 = vld [vmem:[%s910_s0 + $0xc] ss:$20 sps:$4 sm:$0xff]  }
   0xb   :  { %623 = vmatpush3.bf16.msra.mxu0 %v701_v9  ;;  %v718_v26 = vld [vmem:[%s909_s1 + $0xf0] sm:$0xff]   ;;  %v722_v30 = vld [vmem:[%s909_s1 + $0xf8] sm:$0xff]   ;;  %v731_v37 = vld [vmem:[%s909_s1 + $0x108] sm:$0xff]   ;;  %460 = vmatprep.mubr.bf16.mxu1 %v730_v36 }
   0xc   :  { %624 = vmatprep.subr.bf16.mxu0 %v704_v12  ;;  %v719_v27 = vld [vmem:[%s909_s1 + $0xb0] sm:$0xff]   ;;  %v725_v32 = vld [vmem:[%s910_s0 + $0x4] ss:$20 sps:$4 sm:$0xff]   ;;  %v728_v35 = vld [vmem:[%s910_s0 + $0x8] ss:$20 sps:$4 sm:$0xff]  }
   0xd   :  { %651 = vmatpush3.bf16.msra.mxu1 %v703_v11  ;;  %v723_v31 = vld [vmem:[%s910_s0] ss:$20 sps:$4 sm:$0xff]   ;;  %v726_v33 = vld [vmem:[%s909_s1 + $0xb8] sm:$0xff]   ;;  %411 = vmatprep.mubr.bf16.mxu0 %v725_v32  ;;  %v738_v42 = vld [vmem:[%s910_s0 + $0x30] ss:$20 sps:$4 sm:$0xff]  }
   0xe   :  { %652 = vmatprep.subr.bf16.mxu1 %v706_v14  ;;  %v732_v38 = vld [vmem:[%s910_s0 + $0x2c] ss:$20 sps:$4 sm:$0xff]   ;;  %v734_v39 = vld [vmem:[%s910_s0 + $0x28] ss:$20 sps:$4 sm:$0xff]   ;;  %v735_v40 = vld [vmem:[%s909_s1 + $0x110] sm:$0xff]  }
   0xf   :  { %625 = vmatpush3.bf16.msra.mxu0 %v705_v13  ;;  %v736_v41 = vld [vmem:[%s910_s0 + $0x34] ss:$20 sps:$4 sm:$0xff]   ;;  %v739_v43 = vld [vmem:[%s909_s1 + $0x118] sm:$0xff]   ;;  %v740_v44 = vld [vmem:[%s910_s0 + $0x10] ss:$20 sps:$4 sm:$0xff]  }
  0x10   :  { %626 = vmatprep.subr.bf16.mxu0 %v708_v16  ;;  %v741_v45 = vld [vmem:[%s910_s0 + $0x38] ss:$20 sps:$4 sm:$0xff]   ;;  %v550_v47 = vld [vmem:[%s911_s2] ss:$0 sm:$0xff] }
  0x11   :  { %653 = vmatpush3.bf16.msra.mxu1 %v707_v15 }
  0x12   :  { %654 = vmatprep.subr.bf16.mxu1 %v710_v18 }
  0x13   :  { %627 = vmatpush3.bf16.msra.mxu0 %v709_v17 }
  0x14   :  { %628 = vmatprep.subr.bf16.mxu0 %v712_v20 }
  0x15   :  { %655 = vmatpush3.bf16.msra.mxu1 %v711_v19 }
  0x16   :  { %656 = vmatprep.subr.bf16.mxu1 %v714_v22 }
  0x17   :  { %629 = vmatpush3.bf16.msra.mxu0 %v713_v21 }
  0x18   :  { %630 = vmatprep.subr.bf16.mxu0 %v716_v24 }
  0x19   :  { %657 = vmatpush3.bf16.msra.mxu1 %v715_v23 }
  0x1a   :  { %658 = vmatprep.subr.bf16.mxu1 %v718_v26 }
  0x1b   :  { %631 = vmatpush3.bf16.msra.mxu0 %v717_v25 }
  0x1c   :  { %632 = vmatprep.subr.bf16.mxu0 %v720_v28 }
  0x1d   :  { %659 = vmatpush3.bf16.msra.mxu1 %v719_v27 }
  0x1e   :  { %660 = vmatprep.subr.bf16.mxu1 %v722_v30 }
  0x1f   :  { %633 = vmatpush3.bf16.msra.mxu0 %v721_v29 }
  0x20   :  { %680 = vmatprep.subr.bf16.mxu0 %v727_v34 }
  0x21   :  { %661 = vmatpush3.bf16.msra.mxu1 %v726_v33 }
  0x22   :  { %412 = vmatmul.mubr.bf16.vlgmr.msra.gmra.mrb[0].mxu0 %v723_v31 }
  0x23   :  { %681 = vmatpush3.bf16.msra.mxu0 %v727_v34  ;;  %419 = vmatprep.mubr.bf16.mxu0 %v732_v38 }
  0x24   :  { %461 = vmatmul.mubr.bf16.vlgmr.msra.gmra.mrb[0].mxu1 %v728_v35  ;;  %682 = vmatprep.subr.bf16.mxu0 %v731_v37 }
  0x25   :  { %468 = vmatprep.mubr.bf16.mxu1 %v736_v41 }
  0x27   :  { %683 = vmatpush3.bf16.msra.mxu0 %v731_v37 }
  0x28   :  { %684 = vmatprep.subr.bf16.mxu0 %v735_v40 }
  0x2a   :  { %420 = vmatmul.mubr.bf16.gmra.mrb[4].mxu0 %v734_v39 }
  0x2b   :  { %688 = vmatprep.mubr.msk.bf16.mxu0 %vm372_vm0, %v740_v44  ;;  %685 = vmatpush3.bf16.msra.mxu0 %v735_v40 }
  0x2c   :  { %469 = vmatmul.mubr.bf16.gmra.mrb[4].mxu1 %v738_v42  ;;  %686 = vmatprep.subr.bf16.mxu0 %v739_v43 }
  0x2f   :  { %687 = vmatpush3.bf16.msra.mxu0 %v739_v43 }
  0x32   :  { %689 = vmatmul.mubr.msk.bf16.vlgmr.msra.gmra.mrb[8].mxu0 %vm372_vm0, %v741_v45 }
  0xf5   :  { %v634_v46 = vpop.f32.mrb[0].mxu0 }
  0xf6   :  { %v635_v48 = vpop.f32.mrb[1].mxu0 }
  0xf7   :  { %v636_v49 = vadd.f32 %v635_v48, %v634_v46  ;;  %v637_v50 = vpop.f32.mrb[2].mxu0  ;;  %v662_v51 = vpop.f32.mrb[0].mxu1 }
  0xf8   :  { %v638_v52 = vpop.f32.mrb[3].mxu0  ;;  %v663_v55 = vpop.f32.mrb[1].mxu1 }
  0xf9   :  { %v414_v53 = vadd.f32 %v636_v49, %v550_v47  ;;  %v639_v54 = vadd.f32 %v638_v52, %v637_v50  ;;  %v664_v56 = vadd.f32 %v663_v55, %v662_v51  ;;  %v665_v57 = vpop.f32.mrb[2].mxu1 }
  0xfa   :  { %v666_v59 = vpop.f32.mrb[3].mxu1 }
  0xfb   :  { %v417_v58 = vadd.f32 %v639_v54, %v550_v47  ;;  %v667_v60 = vadd.f32 %v666_v59, %v665_v57  ;;  %v463_v61 = vadd.f32 %v664_v56, %v414_v53 }
  0xfd   :  { %v640_v62 = vpop.f32.mrb[4].mxu0  ;;  %v466_v0 = vadd.f32 %v667_v60, %v417_v58 }
  0xfe   :  { %v641_v63 = vpop.f32.mrb[5].mxu0 }
  0xff   :  { %v642_v1 = vadd.f32 %v641_v63, %v640_v62  ;;  %v643_v2 = vpop.f32.mrb[6].mxu0  ;;  %v668_v3 = vpop.f32.mrb[4].mxu1 }
 0x100   :  { %v644_v4 = vpop.f32.mrb[7].mxu0  ;;  %v669_v7 = vpop.f32.mrb[5].mxu1 }
 0x101   :  { %v422_v5 = vadd.f32 %v642_v1, %v550_v47  ;;  %v645_v6 = vadd.f32 %v644_v4, %v643_v2  ;;  %v670_v8 = vadd.f32 %v669_v7, %v668_v3  ;;  %v671_v9 = vpop.f32.mrb[6].mxu1 }
 0x102   :  { %v672_v11 = vpop.f32.mrb[7].mxu1 }
 0x103   :  { %v425_v10 = vadd.f32 %v645_v6, %v550_v47  ;;  %v673_v12 = vadd.f32 %v672_v11, %v671_v9  ;;  %v471_v13 = vadd.f32 %v670_v8, %v422_v5 }
 0x105   :  { %v690_v14 = vpop.f32.mrb[8].mxu0  ;;  %v474_v15 = vadd.f32 %v673_v12, %v425_v10 }
 0x106   :  { %v520_v16 = vadd.f32 %v690_v14, %v471_v13  ;;  %v511_v17 = vpop.f32.mrb[9].mxu0 }
 0x107   :  { %v512_v18 = vadd.f32 %v511_v17, %v463_v61  ;;  %v691_v19 = vpop.f32.mrb[10].mxu0 }
 0x108   :  { %v523_v20 = vadd.f32 %v691_v19, %v474_v15  ;;  %v514_v21 = vpop.f32.mrb[11].mxu0 }
 0x109   :  { %v515_v22 = vadd.f32 %v514_v21, %v466_v0 }
 0x10a   :  { %v615_v23 = vpack.c.bf16 %v523_v20, %v520_v16 }
 0x10b   :  { %v610_v24 = vpack.c.bf16 %v515_v22, %v512_v18 }
 0x10c   :  { %617 = vst [vmem:[%s912_s3 + $0x8] sm:$0xff] %v615_v23  }
 0x10d   :  { %611 = vst [vmem:[%s912_s3] sm:$0xff] %v610_v24  }

// kernel: fast_style_network.77
= control target key start
LH: loop header
LB: loop body
LE: loop exit
PB: predicated region body
PF: predicated region fallthrough
CT: control target
= control target key end

     0   :  { %8 = vsyncpa [#allocation3], 0  ;;  %s636_s0 = inlined_call_operand.vmem [shape: bf16[2,16,128], index: 0, kind: input, shape index: {}]   ;;  %s637_s1 = inlined_call_operand.vmem [shape: f32[2,1,128], index: 1, kind: output, shape index: {0}]   ;;  %s638_s2 = inlined_call_operand.hbm [shape: f32[2,1,128], index: 2, kind: output, shape index: {1}]  }
   0x1   :  { %10 = vsyncpa [#allocation3 + $0x1], 0  ;;  %s502_s9 = smov 0   ;;  %s504_s10 = smov 0  }
   0x2   :  { %s506_s11 = smov 0   ;;  %s508_s12 = smov 0  }
   0x3   :  { %s510_s13 = smov 0   ;;  %s512_s14 = smov 0  }
   0x4 LB: > { %s332_s15 = sadd.s32 4294967295, %s483_s14   ;;  %s333_s16 = sadd.s32 4294967294, %s483_s14   ;;  %s483_s14 = sphi %s512_s14, %s16_s14   ;;  %s479_s13 = sphi %s510_s13, %s645_s13   ;;  %s475_s12 = sphi %s508_s12, %s644_s12   ;;  %s471_s11 = sphi %s506_s11, %s643_s11   ;;  %s467_s10 = sphi %s504_s10, %s642_s10   ;;  %s463_s9 = sphi %s502_s9, %s641_s9  }
   0x5   : > { %s28_s17 = sadd.s32 1, %s479_s13  ;;  %s89_s18 = sadd.s32 1, %s471_s11 }
   0x6   : > { %p30_p0 = scmp.ge.s32.totalorder %s28_s17, 2  ;;  %p99_p1 = scmp.ne.s32.totalorder %s471_s11, %s467_s10 }
   0x7   : > { %p100_p2 = scmp.eq.s32.totalorder %s332_s15, 1  ;;  %p105_p3 = scmp.ne.s32.totalorder %s467_s10, %s463_s9 }
   0x8   : > { %s647_s17 = smov (%p30_p0, %s28_s17), 0  ;;  %p106_p5 = scmp.eq.s32.totalorder %s333_s16, 1 }
   0x9   : > { %p542_p4 = por %p100_p2, %p99_p1  ;;  %s86_s20 = ssub.s32 %s479_s13, %s647_s17 }
   0xa   : > { %p336_p6 = scmp.ge.s32.totalorder %s483_s14, 1  ;;  %p87_p7 = scmp.eq.s32.totalorder %s86_s20, 0 }
   0xb   : > { %p549_p8 = por %p106_p5, %p105_p3  ;;  %p137_p9 = scmp.lt.s32.totalorder %s483_s14, 3 }
   0xc   : > { %s555_s22 = scalar_select %p87_p7, %s471_s11, %s89_s18  }
   0xd   : > { %p138_p10 = pnand %p336_p6, %p137_p9 }
   0xe   : > { %p166_p11 = scmp.lt.s32.totalorder (!%p138_p10), %s475_s12, 1  ;;  %s163_s23 = sand.u32 (!%p138_p10), 1, %s467_s10   ;;  %v485_v0 = vmov (!%p138_p10), 0.0  }
   0xf   : > { %141 = sbr.rel (%p138_p10) target bundleno = 88 (0x58), region = 24  ;;  %s562_s25 = scalar_lea.vmem (!%p138_p10), [#allocation2], %s163_s23 }
  0x10   : > { %183 = vst [vmem:[%s562_s25] sm:$0x1] (!%p138_p10), %v485_v0  ;;  %s339_s5 = sshll.u32 (!%p138_p10), %s475_s12, 4  ;;  %s244_s6 = sshll.u32 (!%p138_p10), %s562_s25, 4  ;;  %s588_s6 = int_to_ptr.vmem [resolvable:$true] %s244_s6 }
  0x11   : > { %s586_s15 = scalar_lea.hbm (!%p138_p10), %s638_s2, %s339_s5  ;;  %s229_s16 = scalar_lea.sflag (!%p138_p10), [#allocation3], %s163_s23 }
  0x12   : > { %s405_s18 = scalar_lea.vmem (!%p138_p10), %s588_s6, 16 }
  0x13   : > { %p406_p12 = scmp.ne.s32.totalorder (!%p138_p10), %s588_s6, %s405_s18 }
  0x15   : > { %p407_p13 = pnand (!%p138_p10), %p406_p12, %p542_p4 }
  0x16   : > { %s167_s24 = scalar_select %p166_p11, %s475_s12, 1 }
  0x17   : > { %v198_v20 = vld [vmem:[%s562_s25] sm:$0x1]  ;;  %p408_p0 = pneg %p407_p13  ;;  %s486_s12 = smov [#allocation2]  }
  0x18   : > { %s342_s26 = sshll.u32 %s167_s24, 3  ;;  %s568_s29 = scalar_lea.vmem %s637_s1, %s167_s24 }
  0x19   : > { %s173_s4 = scalar_lea.vmem %s636_s0, %s342_s26  ;;  %182 = vst [vmem:[%s568_s29] sm:$0x1] %v485_v0  ;;  %s409_s20 = sshll.u32 %s486_s12, 4  ;;  %s410_s20 = int_to_ptr.vmem [resolvable:$false] %s409_s20 }
  0x1a   : > { %v344_v1 = vld [vmem:[%s173_s4] sm:$0xff]   ;;  %s411_s24 = scalar_lea.vmem %s410_s20, 32  ;;  %p412_p1 = scmp.lt.s32.totalorder %s588_s6, %s410_s20 }
  0x1b   : > { %v345_v2 = vunpack.c.l.bf16 %v344_v1  ;;  %v346_v3 = vunpack.c.h.bf16 %v344_v1  ;;  %p413_p2 = scmp.lt.s32.totalorder %s411_s24, %s405_s18 }
  0x1d   : > { %v189_v4 = vadd.f32 %v346_v3, %v345_v2  ;;  %v199_v5 = vmul.f32 %v345_v2, %v345_v2  ;;  %v200_v6 = vmul.f32 %v346_v3, %v346_v3  ;;  %p414_p3 = por %p413_p2, %p412_p1 }
  0x1f   : > { %v190_v7 = vrot.slane %v189_v4, 4  ;;  %v201_v8 = vadd.f32 %v200_v6, %v199_v5  ;;  %p415_p5 = pnand %p414_p3, %p408_p0 }
  0x20   : > { %v188_v17 = vld [vmem:[%s568_s29] sm:$0x1] }
  0x21   : > { %v191_v9 = vadd.f32 %v190_v7, %v189_v4  ;;  %v202_v10 = vrot.slane %v201_v8, 4 }
  0x23   : > { %v192_v11 = vrot.slane %v191_v9, 2  ;;  %v203_v12 = vadd.f32 %v202_v10, %v201_v8 }
  0x25   : > { %v193_v13 = vadd.f32 %v192_v11, %v191_v9  ;;  %v204_v14 = vrot.slane %v203_v12, 2 }
  0x27   : > { %v194_v15 = vrot.slane %v193_v13, 1  ;;  %v205_v16 = vadd.f32 %v204_v14, %v203_v12 }
  0x29   : > { %v195_v18 = vadd.f32 %v194_v15, %v193_v13  ;;  %v206_v19 = vrot.slane %v205_v16, 1 }
  0x2b   : > { %v196_v21 = vadd.f32 %v195_v18, %v188_v17  ;;  %v207_v22 = vadd.f32 %v206_v19, %v205_v16 }
  0x2d   : > { %197 = vst [vmem:[%s568_s29] sm:$0x1] %v196_v21  ;;  %v208_v23 = vadd.f32 %v207_v22, %v198_v20 }
  0x2f   : > { %209 = vst [vmem:[%s562_s25] sm:$0x1] %v208_v23 }
  0x34   : > { %v210_v24 = vld [vmem:[%s568_s29] sm:$0x1] }
  0x35   : > { %v213_v25 = vmul.f32 0.0625, %v210_v24 }
  0x36   : > { %v211_v26 = vld [vmem:[%s562_s25] sm:$0x1] }
  0x37   : > { %v215_v27 = vmul.f32 %v213_v25, %v213_v25  ;;  %223 = vst [vmem:[%s568_s29] sm:$0x1] %v213_v25  ;;  %v214_v28 = vmul.f32 0.0625, %v211_v26 }
  0x39   : > { %v216_v29 = vsub.f32 %v214_v28, %v215_v27 }
  0x3b   : > { %v217_v30 = vmax.f32 %v216_v29, 0.0 }
  0x3d   : > { %v218_v31 = vadd.f32 1e-05, %v217_v30 }
  0x3f   : > { %403 = vrsqrt.f32 %v218_v31 }
  0x49   : > { %v404_v32 = vpop.eup %403 }
  0x4a   : > { %224 = vst [vmem:[%s562_s25] sm:$0x1] %v404_v32 }
  0x4b   : > { %418 = shalt.err (!%p415_p5)
}
  0x4c   : > { %s419_s23 = scalar_lea.hbm %s586_s15, 16  ;;  %s423_s27 = scalar_lea.hbm %s638_s2, 32 }
  0x4d   : > { %p420_p6 = scmp.ne.s32.totalorder %s586_s15, %s419_s23  ;;  %p424_p10 = scmp.lt.u32.totalorder %s586_s15, %s638_s2 }
  0x4e   : > { %p425_p11 = scmp.lt.u32.totalorder %s423_s27, %s419_s23  ;;  %p427_p13 = scmp.lt.u32.totalorder %s419_s23, %s586_s15 }
  0x4f   : > { %p421_p7 = pnand %p420_p6, %p542_p4 }
  0x50   : > { %p426_p12 = por %p425_p11, %p424_p10 }
  0x51   : > { %p422_p9 = pneg %p421_p7 }
  0x52   : > { %p428_p0 = por %p427_p13, %p426_p12 }
  0x54   : > { %p429_p1 = pnand %p428_p0, %p422_p9 }
  0x56   : > { %432 = shalt.err (!%p429_p1)
}
  0x57   : > { %347 = dma.vmem_to_hbm [thread:$0]  (%p542_p4), %s588_s6, 16, %s586_s15, %s229_s16  }
  0x58 PF: > { %p353_p2 = scmp.ge.s32.totalorder %s483_s14, 2  ;;  %s262_s30 = sand.u32 1, %s463_s9  }
  0x59   : > { %s263_s3 = scalar_lea.sflag [#allocation3], %s262_s30 }
  0x5a   : > { %p350_p3 = pnand %p353_p2, %p549_p8 }
  0x5c   : > { %458 = dma.done.wait (!%p350_p3), %s263_s3, 16  }
  0x5d   : > { %460 = vsyncadd (!%p350_p3), %s263_s3, 4294967280  ;;  %s16_s14 = sadd.s32 1, %s483_s14   ;;  %s641_s9 = smov %s467_s10 }
  0x5e   : > { %p13_p5 = scmp.ge.s32.totalorder %s16_s14, 4   ;;  %s642_s10 = smov %s471_s11 }
  0x5f   : > { %s643_s11 = smov %s555_s22  ;;  %s644_s12 = smov %s479_s13 }
  0x60   : > { %s645_s13 = smov %s647_s17  ;;  %15 = sbr.rel (!%p13_p5) target bundleno = 4 (0x4), region = 79 }
  0x67   :  { %267 = vsyncpa [#allocation3], 1 }
  0x68   :  { %269 = vsyncpa [#allocation3 + $0x1], 1 }

// kernel: fast_style_network.78
= control target key start
LH: loop header
LB: loop body
LE: loop exit
PB: predicated region body
PF: predicated region fallthrough
CT: control target
= control target key end

     0   :  { %v180_v0 = vmov 0.0   ;;  %vm181_vm0 = vmmov 0   ;;  %s235_s1 = inlined_call_operand.vmem [shape: bf16[128,128], index: 1, kind: input, shape index: {}]   ;;  %s236_s0 = inlined_call_operand.vmem [shape: bf16[8,128], index: 0, kind: input, shape index: {}]   ;;  %s237_s2 = inlined_call_operand.vmem [shape: f32[1,128], index: 2, kind: input, shape index: {}]   ;;  %s238_s3 = inlined_call_operand.vmem [shape: f32[8,128], index: 3, kind: output, shape index: {}]  }
   0x1   :  { %150 = vmatprep.subr.bf16.mxu0 %v180_v0  ;;  %v172_v1 = vld [vmem:[%s235_s1] sm:$0xff]   ;;  %166 = vmatprep.mubr.msk.bf16.mxu0 %vm181_vm0, %v180_v0  ;;  %v173_v2 = vld [vmem:[%s235_s1 + $0x8] sm:$0xff]   ;;  %v174_v3 = vld [vmem:[%s235_s1 + $0x10] sm:$0xff]  }
   0x2   :  { %151 = vmatpush3.bf16.msra.mxu0 %v172_v1  ;;  %v175_v4 = vld [vmem:[%s235_s1 + $0x18] sm:$0xff]   ;;  %v176_v5 = vld [vmem:[%s235_s1 + $0x20] sm:$0xff]   ;;  %v177_v6 = vld [vmem:[%s235_s1 + $0x28] sm:$0xff]  }
   0x3   :  { %152 = vmatprep.subr.bf16.mxu0 %v180_v0  ;;  %v178_v7 = vld [vmem:[%s235_s1 + $0x30] sm:$0xff]   ;;  %v179_v8 = vld [vmem:[%s235_s1 + $0x38] sm:$0xff]   ;;  %v15_v9 = vld [vmem:[%s236_s0] sm:$0xf] }
   0x4   :  { %v132_v10 = vld [vmem:[%s237_s2] ss:$0 sm:$0xff] }
   0x6   :  { %153 = vmatpush3.bf16.msra.mxu0 %v173_v2 }
   0x7   :  { %154 = vmatprep.subr.bf16.mxu0 %v180_v0 }
   0xa   :  { %155 = vmatpush3.bf16.msra.mxu0 %v174_v3 }
   0xb   :  { %156 = vmatprep.subr.bf16.mxu0 %v180_v0 }
   0xe   :  { %157 = vmatpush3.bf16.msra.mxu0 %v175_v4 }
   0xf   :  { %158 = vmatprep.subr.bf16.mxu0 %v180_v0 }
  0x12   :  { %159 = vmatpush3.bf16.msra.mxu0 %v176_v5 }
  0x13   :  { %160 = vmatprep.subr.bf16.mxu0 %v180_v0 }
  0x16   :  { %161 = vmatpush3.bf16.msra.mxu0 %v177_v6 }
  0x17   :  { %162 = vmatprep.subr.bf16.mxu0 %v180_v0 }
  0x1a   :  { %163 = vmatpush3.bf16.msra.mxu0 %v178_v7 }
  0x1b   :  { %164 = vmatprep.subr.bf16.mxu0 %v180_v0 }
  0x1e   :  { %165 = vmatpush3.bf16.msra.mxu0 %v179_v8 }
  0x21   :  { %167 = vmatmul.mubr.bf16.vlgmr.msra.gmra.mrb[0].mxu0 %v15_v9 }
  0xf4   :  { %v121_v11 = vpop.f32.mrb[0].mxu0 }
  0xf5   :  { %v122_v12 = vadd.f32 %v132_v10, %v121_v11  ;;  %v168_v13 = vpop.f32.mrb[1].mxu0 }
  0xf6   :  { %v124_v14 = vpop.f32.mrb[2].mxu0 }
  0xf7   :  { %127 = vst [vmem:[%s238_s3] sm:$0xff] %v122_v12  ;;  %v169_v15 = vpop.f32.mrb[3].mxu0 }

// kernel: fast_style_network.79
= control target key start
LH: loop header
LB: loop body
LE: loop exit
PB: predicated region body
PF: predicated region fallthrough
CT: control target
= control target key end

     0   :  { %s402_s9 = smov 0   ;;  %s404_s10 = smov 0   ;;  %s452_s0 = inlined_call_operand.vmem [shape: bf16[2,16,128], index: 0, kind: input, shape index: {}]   ;;  %s453_s1 = inlined_call_operand.vmem [shape: f32[2,1,128], index: 1, kind: output, shape index: {0}]   ;;  %s454_s2 = inlined_call_operand.vmem [shape: f32[2,1,128], index: 2, kind: output, shape index: {1}]  }
   0x1   :  { %s406_s11 = smov 0  }
   0x2 LB: > { %s25_s12 = sadd.s32 1, %s380_s10  ;;  %p323_p0 = scmp.ge.s32.totalorder %s384_s11, 1  ;;  %s384_s11 = sphi %s406_s11, %s13_s11   ;;  %s380_s10 = sphi %s404_s10, %s456_s10   ;;  %s376_s9 = sphi %s402_s9, %s455_s9  }
   0x3   : > { %p27_p1 = scmp.ge.s32.totalorder %s25_s12, 2  ;;  %p134_p2 = scmp.lt.s32.totalorder %s384_s11, 3 }
   0x5   : > { %s458_s12 = smov (%p27_p1, %s25_s12), 0  ;;  %p135_p3 = pnand %p323_p0, %p134_p2 }
   0x6   : > { %p162_p4 = scmp.lt.s32.totalorder (!%p135_p3), %s376_s9, 1  ;;  %v386_v0 = vmov (!%p135_p3), 0.0  }
   0x7   : > { %138 = sbr.rel (%p135_p3) target bundleno = 85 (0x55), region = 24 }
   0xe   : > { %s460_s9 = smov (!%p162_p4, %s376_s9), 1 }
   0xf   : > { %s328_s13 = sshll.u32 %s460_s9, 3  ;;  %s423_s16 = scalar_lea.vmem %s453_s1, %s460_s9 }
  0x10   : > { %s169_s19 = scalar_lea.vmem %s452_s0, %s328_s13  ;;  %181 = vst [vmem:[%s423_s16] sm:$0x1] %v386_v0  ;;  %s432_s22 = scalar_lea.vmem %s454_s2, %s460_s9 }
  0x11   : > { %v330_v1 = vld [vmem:[%s169_s19] sm:$0xff]   ;;  %182 = vst [vmem:[%s432_s22] sm:$0x1] %v386_v0 }
  0x12   : > { %v331_v2 = vunpack.c.l.bf16 %v330_v1  ;;  %v332_v3 = vunpack.c.h.bf16 %v330_v1 }
  0x14   : > { %v188_v4 = vadd.f32 %v332_v3, %v331_v2  ;;  %v198_v5 = vmul.f32 %v331_v2, %v331_v2  ;;  %v199_v6 = vmul.f32 %v332_v3, %v332_v3 }
  0x16   : > { %v189_v7 = vrot.slane %v188_v4, 4  ;;  %v200_v8 = vadd.f32 %v199_v6, %v198_v5 }
  0x17   : > { %v187_v17 = vld [vmem:[%s423_s16] sm:$0x1] }
  0x18   : > { %v190_v9 = vadd.f32 %v189_v7, %v188_v4  ;;  %v201_v10 = vrot.slane %v200_v8, 4  ;;  %v197_v20 = vld [vmem:[%s432_s22] sm:$0x1] }
  0x1a   : > { %v191_v11 = vrot.slane %v190_v9, 2  ;;  %v202_v12 = vadd.f32 %v201_v10, %v200_v8 }
  0x1c   : > { %v192_v13 = vadd.f32 %v191_v11, %v190_v9  ;;  %v203_v14 = vrot.slane %v202_v12, 2 }
  0x1e   : > { %v193_v15 = vrot.slane %v192_v13, 1  ;;  %v204_v16 = vadd.f32 %v203_v14, %v202_v12 }
  0x20   : > { %v194_v18 = vadd.f32 %v193_v15, %v192_v13  ;;  %v205_v19 = vrot.slane %v204_v16, 1 }
  0x22   : > { %v195_v21 = vadd.f32 %v194_v18, %v187_v17  ;;  %v206_v22 = vadd.f32 %v205_v19, %v204_v16 }
  0x24   : > { %196 = vst [vmem:[%s423_s16] sm:$0x1] %v195_v21  ;;  %v207_v23 = vadd.f32 %v206_v22, %v197_v20 }
  0x26   : > { %208 = vst [vmem:[%s432_s22] sm:$0x1] %v207_v23 }
  0x2b   : > { %v209_v24 = vld [vmem:[%s423_s16] sm:$0x1] }
  0x2c   : > { %v212_v25 = vmul.f32 0.0625, %v209_v24 }
  0x2d   : > { %v210_v27 = vld [vmem:[%s432_s22] sm:$0x1] }
  0x2e   : > { %231 = vst [vmem:[%s423_s16] sm:$0x1] %v212_v25  ;;  %v213_v26 = vmul.f32 16.0, %v212_v25 }
  0x30   : > { %v214_v28 = vmul.f32 %v213_v26, %v212_v25 }
  0x32   : > { %v215_v29 = vsub.f32 %v210_v27, %v214_v28 }
  0x34   : > { %v217_v30 = vmul.f32 0.06666667, %v215_v29 }
  0x36   : > { %v218_v31 = vmax.f32 %v217_v30, 0.0 }
  0x38   : > { %358 = vrsqrt.f32 %v218_v31  ;;  %vm221_vm0 = vcmp.eq.f32.partialorder %v218_v31, inf  ;;  %v224_v34 = vand.u32 2147483648, %v218_v31  ;;  %vm223_vm1 = vcmp.eq.f32.partialorder %v218_v31, 0.0 }
  0x42   : > { %v359_v32 = vpop.eup %358 }
  0x43   : > { %v220_v33 = vmul.f32 %v359_v32, %v218_v31 }
  0x45   : > { %v222_v35 = vsel %vm221_vm0, %v218_v31, %v220_v33 }
  0x46   : > { %v225_v36 = vsel %vm223_vm1, %v224_v34, %v222_v35 }
  0x47   : > { %v226_v37 = vadd.f32 1e-08, %v225_v36 }
  0x49   : > { %360 = vrcp.f32 %v226_v37 }
  0x53   : > { %v361_v38 = vpop.eup %360 }
  0x54   : > { %232 = vst [vmem:[%s432_s22] sm:$0x1] %v361_v38 }
  0x55 PF: > { %s13_s11 = sadd.s32 1, %s384_s11   ;;  %s455_s9 = smov %s380_s10 }
  0x56   : > { %p10_p5 = scmp.ge.s32.totalorder %s13_s11, 4   ;;  %s456_s10 = smov %s458_s12 }
  0x58   :  { %12 = sbr.rel (!%p10_p5) target bundleno = 2 (0x2), region = 74 }

// kernel: fast_style_network.80
= control target key start
LH: loop header
LB: loop body
LE: loop exit
PB: predicated region body
PF: predicated region fallthrough
CT: control target
= control target key end

     0   :  { %s536_s15 = smov 0   ;;  %s538_s16 = smov 0   ;;  %s578_s0 = inlined_call_operand.vmem [shape: bf16[2,16,128], index: 0, kind: input, shape index: {}]   ;;  %s579_s1 = inlined_call_operand.vmem [shape: f32[2,1,128], index: 1, kind: input, shape index: {}]   ;;  %s580_s2 = inlined_call_operand.vmem [shape: f32[2,1,128], index: 2, kind: input, shape index: {}]   ;;  %s581_s3 = inlined_call_operand.vmem [shape: f32[2,1,128], index: 3, kind: input, shape index: {}]   ;;  %s582_s4 = inlined_call_operand.vmem [shape: bf16[2,16,128], index: 4, kind: output, shape index: {}]  }
   0x1   :  { %s540_s17 = smov 0  }
   0x2 LB: > { %s26_s18 = sadd.s32 1, %s505_s16  ;;  %p439_p0 = scmp.ge.s32.totalorder %s509_s17, 1  ;;  %s509_s17 = sphi %s540_s17, %s14_s17   ;;  %s505_s16 = sphi %s538_s16, %s584_s16   ;;  %s501_s15 = sphi %s536_s15, %s583_s15  }
   0x3   : > { %p28_p1 = scmp.ge.s32.totalorder %s26_s18, 2  ;;  %p207_p2 = scmp.lt.s32.totalorder %s509_s17, 3 }
   0x5   : > { %s586_s18 = smov (%p28_p1, %s26_s18), 0  ;;  %p208_p3 = pnand %p439_p0, %p207_p2 }
   0x6   : > { %p251_p4 = scmp.lt.s32.totalorder (!%p208_p3), %s501_s15, 1  ;;  %v295_v0 = vlaneseq (!%p208_p3) }
   0x7   : > { %211 = sbr.rel (%p208_p3) target bundleno = 30 (0x1e), region = 36 }
   0x8   : > { %v296_v1 = vshrl.u32 (!%p208_p3), %v295_v0, 7 }
   0xa   : > { %v297_v2 = vsub.s32 (!%p208_p3), 0, %v296_v1 }
   0xe   : > { %s588_s15 = smov (!%p251_p4, %s501_s15), 1 }
   0xf   : > { %s450_s19 = sshll.u32 %s588_s15, 3  ;;  %s262_s22 = scalar_lea.vmem %s579_s1, %s588_s15 }
  0x10   : > { %s258_s25 = scalar_lea.vmem %s578_s0, %s450_s19  ;;  %s265_s28 = scalar_lea.vmem %s580_s2, %s588_s15  ;;  %v444_v4 = vld [vmem:[%s262_s22] ss:$0 sm:$0xff] }
  0x11   : > { %v455_v3 = vld [vmem:[%s258_s25] sm:$0xff]   ;;  %s268_s5 = scalar_lea.vmem %s581_s3, %s588_s15  ;;  %s277_s8 = scalar_lea.vmem %s582_s4, %s450_s19 }
  0x12   : > { %v292_v5 = vld [vmem:[%s265_s28] sm:$0x1]  ;;  %v456_v6 = vunpack.c.l.bf16 %v455_v3  ;;  %v457_v7 = vunpack.c.h.bf16 %v455_v3 }
  0x13   : > { %v293_v8 = vmul.f32 1e-08, %v292_v5  ;;  %v445_v12 = vld [vmem:[%s268_s5] ss:$0 sm:$0xff] }
  0x14   : > { %v290_v9 = vsub.f32 %v456_v6, %v444_v4  ;;  %v291_v10 = vsub.f32 %v457_v7, %v444_v4 }
  0x15   : > { %v298_v11 = vrot.slane %v293_v8, %v297_v2 }
  0x17   : > { %v300_v13 = vmul.f32 %v298_v11, %v290_v9  ;;  %v301_v14 = vmul.f32 %v298_v11, %v291_v10 }
  0x19   : > { %v309_v15 = vadd.f32 %v445_v12, %v300_v13  ;;  %v310_v16 = vadd.f32 %v445_v12, %v301_v14 }
  0x1b   : > { %v461_v17 = vpack.c.bf16 %v310_v16, %v309_v15 }
  0x1d   : > { %462 = vst [vmem:[%s277_s8] sm:$0xff] %v461_v17  }
  0x1e PF: > { %s14_s17 = sadd.s32 1, %s509_s17   ;;  %s583_s15 = smov %s505_s16 }
  0x1f   : > { %p11_p5 = scmp.ge.s32.totalorder %s14_s17, 4   ;;  %s584_s16 = smov %s586_s18 }
  0x21   :  { %13 = sbr.rel (!%p11_p5) target bundleno = 2 (0x2), region = 75 }

// kernel: fast_style_network.86
= control target key start
LH: loop header
LB: loop body
LE: loop exit
PB: predicated region body
PF: predicated region fallthrough
CT: control target
= control target key end

     0   :  { %s570_s15 = smov 0   ;;  %s572_s16 = smov 0   ;;  %s612_s0 = inlined_call_operand.vmem [shape: bf16[2,16,128], index: 0, kind: input, shape index: {}]   ;;  %s613_s1 = inlined_call_operand.vmem [shape: f32[2,1,128], index: 1, kind: input, shape index: {}]   ;;  %s614_s2 = inlined_call_operand.vmem [shape: f32[2,1,128], index: 2, kind: input, shape index: {}]   ;;  %s615_s3 = inlined_call_operand.vmem [shape: bf16[2,16,128], index: 3, kind: input, shape index: {}]   ;;  %s616_s4 = inlined_call_operand.vmem [shape: bf16[2,16,128], index: 4, kind: output, shape index: {}]  }
   0x1   :  { %s574_s17 = smov 0  }
   0x2 LB: > { %s26_s18 = sadd.s32 1, %s539_s16  ;;  %p466_p0 = scmp.ge.s32.totalorder %s543_s17, 1  ;;  %s543_s17 = sphi %s574_s17, %s14_s17   ;;  %s539_s16 = sphi %s572_s16, %s618_s16   ;;  %s535_s15 = sphi %s570_s15, %s617_s15  }
   0x3   : > { %p28_p1 = scmp.ge.s32.totalorder %s26_s18, 2  ;;  %p216_p2 = scmp.lt.s32.totalorder %s543_s17, 3 }
   0x5   : > { %s620_s18 = smov (%p28_p1, %s26_s18), 0  ;;  %p217_p3 = pnand %p466_p0, %p216_p2 }
   0x6   : > { %p266_p4 = scmp.lt.s32.totalorder (!%p217_p3), %s535_s15, 1 }
   0x7   : > { %220 = sbr.rel (%p217_p3) target bundleno = 29 (0x1d), region = 36 }
   0xe   : > { %s622_s15 = smov (!%p266_p4, %s535_s15), 1 }
   0xf   : > { %s479_s19 = sshll.u32 %s622_s15, 3  ;;  %s277_s22 = scalar_lea.vmem %s613_s1, %s622_s15 }
  0x10   : > { %s273_s25 = scalar_lea.vmem %s612_s0, %s479_s19  ;;  %s280_s28 = scalar_lea.vmem %s614_s2, %s622_s15  ;;  %v473_v1 = vld [vmem:[%s277_s22] ss:$0 sm:$0xff] }
  0x11   : > { %s289_s5 = scalar_lea.vmem %s615_s3, %s479_s19  ;;  %v485_v0 = vld [vmem:[%s273_s25] sm:$0xff]   ;;  %s299_s8 = scalar_lea.vmem %s616_s4, %s479_s19 }
  0x12   : > { %v486_v2 = vunpack.c.l.bf16 %v485_v0  ;;  %v487_v3 = vunpack.c.h.bf16 %v485_v0  ;;  %v489_v4 = vld [vmem:[%s289_s5] sm:$0xff]  }
  0x13   : > { %v474_v5 = vld [vmem:[%s280_s28] ss:$0 sm:$0xff]  ;;  %v490_v8 = vunpack.c.l.bf16 %v489_v4  ;;  %v491_v9 = vunpack.c.h.bf16 %v489_v4 }
  0x14   : > { %v312_v6 = vsub.f32 %v486_v2, %v473_v1  ;;  %v313_v7 = vsub.f32 %v487_v3, %v473_v1 }
  0x16   : > { %v321_v10 = vmul.f32 %v474_v5, %v312_v6  ;;  %v322_v11 = vmul.f32 %v474_v5, %v313_v7 }
  0x18   : > { %v327_v12 = vadd.f32 %v490_v8, %v321_v10  ;;  %v328_v13 = vadd.f32 %v491_v9, %v322_v11 }
  0x1a   : > { %v495_v14 = vpack.c.bf16 %v328_v13, %v327_v12 }
  0x1c   : > { %496 = vst [vmem:[%s299_s8] sm:$0xff] %v495_v14  }
  0x1d PF: > { %s14_s17 = sadd.s32 1, %s543_s17   ;;  %s617_s15 = smov %s539_s16 }
  0x1e   : > { %p11_p5 = scmp.ge.s32.totalorder %s14_s17, 4   ;;  %s618_s16 = smov %s620_s18 }
  0x20   :  { %13 = sbr.rel (!%p11_p5) target bundleno = 2 (0x2), region = 75 }

// kernel: fast_style_network.111
= control target key start
LH: loop header
LB: loop body
LE: loop exit
PB: predicated region body
PF: predicated region fallthrough
CT: control target
= control target key end

     0   :  { %s1051_s1 = inlined_call_operand.vmem [shape: bf16[512,256], index: 1, kind: input, shape index: {}]   ;;  %s1052_s0 = inlined_call_operand.vmem [shape: bf16[32,512], index: 0, kind: input, shape index: {}]   ;;  %s1053_s2 = inlined_call_operand.vmem [shape: f32[1,256], index: 2, kind: input, shape index: {}]   ;;  %s1054_s3 = inlined_call_operand.vmem [shape: bf16[32,256], index: 3, kind: output, shape index: {}]  }
   0x1   :  { %v692_v0 = vld [vmem:[%s1051_s1 + $0x4] ss:$8 sps:$4 sm:$0xff]   ;;  %v696_v2 = vld [vmem:[%s1051_s1] ss:$8 sps:$4 sm:$0xff]   ;;  %v698_v4 = vld [vmem:[%s1051_s1 + $0x14] ss:$8 sps:$4 sm:$0xff]  }
   0x2   :  { %v694_v1 = vld [vmem:[%s1051_s1 + $0x104] ss:$8 sps:$4 sm:$0xff]   ;;  %458 = vmatprep.subr.bf16.mxu1 %v692_v0  ;;  %v697_v3 = vld [vmem:[%s1051_s1 + $0x100] ss:$8 sps:$4 sm:$0xff]   ;;  %v700_v5 = vld [vmem:[%s1051_s1 + $0x114] ss:$8 sps:$4 sm:$0xff]  }
   0x3   :  { %511 = vmatprep.subr.bf16.mxu0 %v694_v1  ;;  %459 = vmatpush1.bf16.msra.mxu1 %v696_v2  ;;  %v702_v6 = vld [vmem:[%s1051_s1 + $0x10] ss:$8 sps:$4 sm:$0xff]   ;;  %v704_v8 = vld [vmem:[%s1051_s1 + $0x24] ss:$8 sps:$4 sm:$0xff]   ;;  %v708_v10 = vld [vmem:[%s1051_s1 + $0x20] ss:$8 sps:$4 sm:$0xff]  }
   0x4   :  { %512 = vmatpush1.bf16.msra.mxu0 %v697_v3  ;;  %460 = vmatprep.subr.bf16.mxu1 %v698_v4  ;;  %v703_v7 = vld [vmem:[%s1051_s1 + $0x110] ss:$8 sps:$4 sm:$0xff]   ;;  %v706_v9 = vld [vmem:[%s1051_s1 + $0x124] ss:$8 sps:$4 sm:$0xff]   ;;  %v709_v11 = vld [vmem:[%s1051_s1 + $0x120] ss:$8 sps:$4 sm:$0xff]  }
   0x5   :  { %513 = vmatprep.subr.bf16.mxu0 %v700_v5  ;;  %v710_v12 = vld [vmem:[%s1051_s1 + $0x34] ss:$8 sps:$4 sm:$0xff]   ;;  %v714_v14 = vld [vmem:[%s1051_s1 + $0x30] ss:$8 sps:$4 sm:$0xff]   ;;  %v716_v16 = vld [vmem:[%s1051_s1 + $0x44] ss:$8 sps:$4 sm:$0xff]  }
   0x6   :  { %v712_v13 = vld [vmem:[%s1051_s1 + $0x134] ss:$8 sps:$4 sm:$0xff]   ;;  %v715_v15 = vld [vmem:[%s1051_s1 + $0x130] ss:$8 sps:$4 sm:$0xff]   ;;  %v718_v17 = vld [vmem:[%s1051_s1 + $0x144] ss:$8 sps:$4 sm:$0xff]  }
   0x7   :  { %461 = vmatpush1.bf16.msra.mxu1 %v702_v6  ;;  %v720_v18 = vld [vmem:[%s1051_s1 + $0x40] ss:$8 sps:$4 sm:$0xff]   ;;  %v722_v20 = vld [vmem:[%s1051_s1 + $0x54] ss:$8 sps:$4 sm:$0xff]   ;;  %v726_v22 = vld [vmem:[%s1051_s1 + $0x50] ss:$8 sps:$4 sm:$0xff]  }
   0x8   :  { %514 = vmatpush1.bf16.msra.mxu0 %v703_v7  ;;  %462 = vmatprep.subr.bf16.mxu1 %v704_v8  ;;  %v721_v19 = vld [vmem:[%s1051_s1 + $0x140] ss:$8 sps:$4 sm:$0xff]   ;;  %v724_v21 = vld [vmem:[%s1051_s1 + $0x154] ss:$8 sps:$4 sm:$0xff]   ;;  %v727_v23 = vld [vmem:[%s1051_s1 + $0x150] ss:$8 sps:$4 sm:$0xff]   ;;  %v88_v8 = vlaneseq }
   0x9   :  { %515 = vmatprep.subr.bf16.mxu0 %v706_v9  ;;  %v728_v24 = vld [vmem:[%s1051_s1 + $0x64] ss:$8 sps:$4 sm:$0xff]   ;;  %v732_v26 = vld [vmem:[%s1051_s1 + $0x60] ss:$8 sps:$4 sm:$0xff]   ;;  %v734_v28 = vld [vmem:[%s1051_s1 + $0x74] ss:$8 sps:$4 sm:$0xff]  }
   0xa   :  { %v730_v25 = vld [vmem:[%s1051_s1 + $0x164] ss:$8 sps:$4 sm:$0xff]   ;;  %v733_v27 = vld [vmem:[%s1051_s1 + $0x160] ss:$8 sps:$4 sm:$0xff]   ;;  %v736_v29 = vld [vmem:[%s1051_s1 + $0x174] ss:$8 sps:$4 sm:$0xff]  }
   0xb   :  { %463 = vmatpush1.bf16.msra.mxu1 %v708_v10  ;;  %v738_v30 = vld [vmem:[%s1051_s1 + $0x70] ss:$8 sps:$4 sm:$0xff]   ;;  %v740_v32 = vld [vmem:[%s1051_s1 + $0x84] ss:$8 sps:$4 sm:$0xff]   ;;  %v744_v34 = vld [vmem:[%s1051_s1 + $0x80] ss:$8 sps:$4 sm:$0xff]  }
   0xc   :  { %516 = vmatpush1.bf16.msra.mxu0 %v709_v11  ;;  %464 = vmatprep.subr.bf16.mxu1 %v710_v12  ;;  %v739_v31 = vld [vmem:[%s1051_s1 + $0x170] ss:$8 sps:$4 sm:$0xff]   ;;  %v742_v33 = vld [vmem:[%s1051_s1 + $0x184] ss:$8 sps:$4 sm:$0xff]   ;;  %v745_v35 = vld [vmem:[%s1051_s1 + $0x180] ss:$8 sps:$4 sm:$0xff]  }
   0xd   :  { %517 = vmatprep.subr.bf16.mxu0 %v712_v13  ;;  %v746_v36 = vld [vmem:[%s1051_s1 + $0x94] ss:$8 sps:$4 sm:$0xff]   ;;  %v750_v38 = vld [vmem:[%s1051_s1 + $0x90] ss:$8 sps:$4 sm:$0xff]   ;;  %v752_v40 = vld [vmem:[%s1051_s1 + $0xa4] ss:$8 sps:$4 sm:$0xff]  }
   0xe   :  { %v748_v37 = vld [vmem:[%s1051_s1 + $0x194] ss:$8 sps:$4 sm:$0xff]   ;;  %v751_v39 = vld [vmem:[%s1051_s1 + $0x190] ss:$8 sps:$4 sm:$0xff]   ;;  %v754_v41 = vld [vmem:[%s1051_s1 + $0x1a4] ss:$8 sps:$4 sm:$0xff]  }
   0xf   :  { %465 = vmatpush1.bf16.msra.mxu1 %v714_v14  ;;  %v756_v42 = vld [vmem:[%s1051_s1 + $0xa0] ss:$8 sps:$4 sm:$0xff]   ;;  %v758_v44 = vld [vmem:[%s1051_s1 + $0xb4] ss:$8 sps:$4 sm:$0xff]   ;;  %v762_v46 = vld [vmem:[%s1051_s1 + $0xb0] ss:$8 sps:$4 sm:$0xff]  }
  0x10   :  { %518 = vmatpush1.bf16.msra.mxu0 %v715_v15  ;;  %466 = vmatprep.subr.bf16.mxu1 %v716_v16  ;;  %v757_v43 = vld [vmem:[%s1051_s1 + $0x1a0] ss:$8 sps:$4 sm:$0xff]   ;;  %v760_v45 = vld [vmem:[%s1051_s1 + $0x1b4] ss:$8 sps:$4 sm:$0xff]   ;;  %v763_v47 = vld [vmem:[%s1051_s1 + $0x1b0] ss:$8 sps:$4 sm:$0xff]  }
  0x11   :  { %519 = vmatprep.subr.bf16.mxu0 %v718_v17  ;;  %v764_v48 = vld [vmem:[%s1051_s1 + $0xc4] ss:$8 sps:$4 sm:$0xff]   ;;  %v768_v52 = vld [vmem:[%s1051_s1 + $0xc0] ss:$8 sps:$4 sm:$0xff]   ;;  %v770_v54 = vld [vmem:[%s1051_s1 + $0xd4] ss:$8 sps:$4 sm:$0xff]  }
  0x12   :  { %v790_v49 = vld [vmem:[%s1052_s0 + $0x4] ss:$16 sps:$4 sm:$0xff]   ;;  %v793_v51 = vld [vmem:[%s1052_s0 + $0xc] ss:$16 sps:$4 sm:$0xff]   ;;  %v769_v53 = vld [vmem:[%s1051_s1 + $0x1c0] ss:$8 sps:$4 sm:$0xff]  }
  0x13   :  { %467 = vmatpush1.bf16.msra.mxu1 %v720_v18  ;;  %v766_v50 = vld [vmem:[%s1051_s1 + $0x1c4] ss:$8 sps:$4 sm:$0xff]   ;;  %490 = vmatprep.mubr.bf16.mxu1 %v790_v49  ;;  %v772_v55 = vld [vmem:[%s1051_s1 + $0x1d4] ss:$8 sps:$4 sm:$0xff]   ;;  %v774_v56 = vld [vmem:[%s1051_s1 + $0xd0] ss:$8 sps:$4 sm:$0xff]  }
  0x14   :  { %520 = vmatpush1.bf16.msra.mxu0 %v721_v19  ;;  %468 = vmatprep.subr.bf16.mxu1 %v722_v20  ;;  %v775_v57 = vld [vmem:[%s1051_s1 + $0x1d0] ss:$8 sps:$4 sm:$0xff]   ;;  %v776_v58 = vld [vmem:[%s1051_s1 + $0xe4] ss:$8 sps:$4 sm:$0xff]   ;;  %v780_v60 = vld [vmem:[%s1051_s1 + $0xe0] ss:$8 sps:$4 sm:$0xff]  }
  0x15   :  { %521 = vmatprep.subr.bf16.mxu0 %v724_v21  ;;  %543 = vmatprep.mubr.bf16.mxu0 %v793_v51  ;;  %v778_v59 = vld [vmem:[%s1051_s1 + $0x1e4] ss:$8 sps:$4 sm:$0xff]   ;;  %v781_v61 = vld [vmem:[%s1051_s1 + $0x1e0] ss:$8 sps:$4 sm:$0xff]   ;;  %v782_v62 = vld [vmem:[%s1051_s1 + $0xf4] ss:$8 sps:$4 sm:$0xff]  }
  0x16   :  { %v784_v63 = vld [vmem:[%s1051_s1 + $0x1f4] ss:$8 sps:$4 sm:$0xff]   ;;  %v786_v0 = vld [vmem:[%s1051_s1 + $0xf0] ss:$8 sps:$4 sm:$0xff]   ;;  %v89_v9 = vshrl.u32 %v88_v8, 7 }
  0x17   :  { %469 = vmatpush1.bf16.msra.mxu1 %v726_v22  ;;  %v787_v1 = vld [vmem:[%s1051_s1 + $0x1f0] ss:$8 sps:$4 sm:$0xff]   ;;  %v794_v4 = vld [vmem:[%s1052_s0 + $0x24] ss:$16 sps:$4 sm:$0xff]   ;;  %v796_v5 = vld [vmem:[%s1052_s0 + $0x2c] ss:$16 sps:$4 sm:$0xff]  }
  0x18   :  { %522 = vmatpush1.bf16.msra.mxu0 %v727_v23  ;;  %470 = vmatprep.subr.bf16.mxu1 %v728_v24  ;;  %v788_v2 = vld [vmem:[%s1052_s0] ss:$16 sps:$4 sm:$0xff]   ;;  %v791_v3 = vld [vmem:[%s1052_s0 + $0x8] ss:$16 sps:$4 sm:$0xff]   ;;  %v90_v10 = vsub.s32 0, %v89_v9  ;;  %v94_v12 = vsub.s32 1, %v89_v9 }
  0x19   :  { %523 = vmatprep.subr.bf16.mxu0 %v730_v25  ;;  %v798_v6 = vld [vmem:[%s1052_s0 + $0x20] ss:$16 sps:$4 sm:$0xff]   ;;  %v799_v7 = vld [vmem:[%s1052_s0 + $0x28] ss:$16 sps:$4 sm:$0xff]  }
  0x1a   :  { %v86_v11 = vld [vmem:[%s1053_s2] sm:$0x3] }
  0x1b   :  { %471 = vmatpush1.bf16.msra.mxu1 %v732_v26  ;;  %v91_v13 = vrot.slane %v86_v11, %v90_v10  ;;  %v95_v14 = vrot.slane %v86_v11, %v94_v12 }
  0x1c   :  { %524 = vmatpush1.bf16.msra.mxu0 %v733_v27  ;;  %472 = vmatprep.subr.bf16.mxu1 %v734_v28 }
  0x1d   :  { %525 = vmatprep.subr.bf16.mxu0 %v736_v29 }
  0x1f   :  { %473 = vmatpush1.bf16.msra.mxu1 %v738_v30 }
  0x20   :  { %526 = vmatpush1.bf16.msra.mxu0 %v739_v31  ;;  %474 = vmatprep.subr.bf16.mxu1 %v740_v32 }
  0x21   :  { %527 = vmatprep.subr.bf16.mxu0 %v742_v33 }
  0x23   :  { %475 = vmatpush1.bf16.msra.mxu1 %v744_v34 }
  0x24   :  { %528 = vmatpush1.bf16.msra.mxu0 %v745_v35  ;;  %476 = vmatprep.subr.bf16.mxu1 %v746_v36 }
  0x25   :  { %529 = vmatprep.subr.bf16.mxu0 %v748_v37 }
  0x27   :  { %477 = vmatpush1.bf16.msra.mxu1 %v750_v38 }
  0x28   :  { %530 = vmatpush1.bf16.msra.mxu0 %v751_v39  ;;  %478 = vmatprep.subr.bf16.mxu1 %v752_v40 }
  0x29   :  { %531 = vmatprep.subr.bf16.mxu0 %v754_v41 }
  0x2b   :  { %479 = vmatpush1.bf16.msra.mxu1 %v756_v42 }
  0x2c   :  { %532 = vmatpush1.bf16.msra.mxu0 %v757_v43  ;;  %480 = vmatprep.subr.bf16.mxu1 %v758_v44 }
  0x2d   :  { %533 = vmatprep.subr.bf16.mxu0 %v760_v45 }
  0x2f   :  { %481 = vmatpush1.bf16.msra.mxu1 %v762_v46 }
  0x30   :  { %534 = vmatpush1.bf16.msra.mxu0 %v763_v47  ;;  %482 = vmatprep.subr.bf16.mxu1 %v764_v48 }
  0x31   :  { %535 = vmatprep.subr.bf16.mxu0 %v766_v50 }
  0x33   :  { %483 = vmatpush1.bf16.msra.mxu1 %v768_v52 }
  0x34   :  { %536 = vmatpush1.bf16.msra.mxu0 %v769_v53  ;;  %484 = vmatprep.subr.bf16.mxu1 %v770_v54 }
  0x35   :  { %537 = vmatprep.subr.bf16.mxu0 %v772_v55 }
  0x37   :  { %485 = vmatpush1.bf16.msra.mxu1 %v774_v56 }
  0x38   :  { %538 = vmatpush1.bf16.msra.mxu0 %v775_v57  ;;  %486 = vmatprep.subr.bf16.mxu1 %v776_v58 }
  0x39   :  { %539 = vmatprep.subr.bf16.mxu0 %v778_v59 }
  0x3b   :  { %487 = vmatpush1.bf16.msra.mxu1 %v780_v60 }
  0x3c   :  { %540 = vmatpush1.bf16.msra.mxu0 %v781_v61  ;;  %488 = vmatprep.subr.bf16.mxu1 %v782_v62 }
  0x3d   :  { %541 = vmatprep.subr.bf16.mxu0 %v784_v63 }
  0x3f   :  { %489 = vmatpush1.bf16.msra.mxu1 %v786_v0 }
  0x40   :  { %542 = vmatpush1.bf16.msra.mxu0 %v787_v1 }
  0x42   :  { %491 = vmatmul.mubr.bf16.vlgmr.msra.gmra.mrb[0].mxu1 %v788_v2 }
  0x43   :  { %544 = vmatmul.mubr.bf16.vlgmr.msra.gmra.mrb[0].mxu0 %v791_v3  ;;  %500 = vmatprep.mubr.bf16.mxu1 %v794_v4 }
  0x44   :  { %553 = vmatprep.mubr.bf16.mxu0 %v796_v5 }
  0x4a   :  { %501 = vmatmul.mubr.bf16.gmra.mrb[4].mxu1 %v798_v6 }
  0x4b   :  { %554 = vmatmul.mubr.bf16.gmra.mrb[4].mxu0 %v799_v7 }
 0x115   :  { %v492_v15 = vpop.f32.mrb[0].mxu1 }
 0x116   :  { %v545_v16 = vpop.f32.mrb[0].mxu0  ;;  %v493_v17 = vadd.f32 %v492_v15, %v91_v13  ;;  %v494_v18 = vpop.f32.mrb[1].mxu1 }
 0x117   :  { %v547_v19 = vpop.f32.mrb[1].mxu0  ;;  %v495_v20 = vadd.f32 %v494_v18, %v95_v14  ;;  %v496_v21 = vpop.f32.mrb[2].mxu1 }
 0x118   :  { %v549_v22 = vpop.f32.mrb[2].mxu0  ;;  %v546_v23 = vadd.f32 %v545_v16, %v493_v17  ;;  %v497_v24 = vadd.f32 %v496_v21, %v91_v13  ;;  %v498_v25 = vpop.f32.mrb[3].mxu1 }
 0x119   :  { %v551_v26 = vpop.f32.mrb[3].mxu0  ;;  %v548_v27 = vadd.f32 %v547_v19, %v495_v20  ;;  %v499_v28 = vadd.f32 %v498_v25, %v95_v14 }
 0x11a   :  { %v550_v29 = vadd.f32 %v549_v22, %v497_v24 }
 0x11b   :  { %v672_v30 = vpack.c.bf16 %v548_v27, %v546_v23  ;;  %v552_v31 = vadd.f32 %v551_v26, %v499_v28 }
 0x11d   :  { %588 = vst [vmem:[%s1054_s3] sm:$0xff] %v672_v30  ;;  %v673_v32 = vpack.c.bf16 %v552_v31, %v550_v29  ;;  %v502_v33 = vpop.f32.mrb[4].mxu1 }
 0x11e   :  { %v555_v34 = vpop.f32.mrb[4].mxu0  ;;  %v503_v35 = vadd.f32 %v502_v33, %v91_v13  ;;  %v504_v36 = vpop.f32.mrb[5].mxu1 }
 0x11f   :  { %v557_v37 = vpop.f32.mrb[5].mxu0  ;;  %589 = vst [vmem:[%s1054_s3 + $0x8] sm:$0xff] %v673_v32  ;;  %v505_v38 = vadd.f32 %v504_v36, %v95_v14  ;;  %v506_v39 = vpop.f32.mrb[6].mxu1 }
 0x120   :  { %v559_v40 = vpop.f32.mrb[6].mxu0  ;;  %v556_v41 = vadd.f32 %v555_v34, %v503_v35  ;;  %v507_v42 = vadd.f32 %v506_v39, %v91_v13  ;;  %v508_v43 = vpop.f32.mrb[7].mxu1 }
 0x121   :  { %v561_v44 = vpop.f32.mrb[7].mxu0  ;;  %v558_v45 = vadd.f32 %v557_v37, %v505_v38  ;;  %v509_v46 = vadd.f32 %v508_v43, %v95_v14 }
 0x122   :  { %v560_v47 = vadd.f32 %v559_v40, %v507_v42 }
 0x123   :  { %v674_v48 = vpack.c.bf16 %v558_v45, %v556_v41  ;;  %v562_v49 = vadd.f32 %v561_v44, %v509_v46 }
 0x125   :  { %590 = vst [vmem:[%s1054_s3 + $0x10] sm:$0xff] %v674_v48  ;;  %v675_v50 = vpack.c.bf16 %v562_v49, %v560_v47 }
 0x127   :  { %591 = vst [vmem:[%s1054_s3 + $0x18] sm:$0xff] %v675_v50 }

// kernel: fast_style_network.81
= control target key start
LH: loop header
LB: loop body
LE: loop exit
PB: predicated region body
PF: predicated region fallthrough
CT: control target
= control target key end

     0   :  { %s1628_s1 = inlined_call_operand.vmem [shape: bf16[1152,128], index: 1, kind: input, shape index: {}]   ;;  %s1629_s0 = inlined_call_operand.vmem [shape: bf16[32,1152], index: 0, kind: input, shape index: {}]   ;;  %s1630_s2 = inlined_call_operand.vmem [shape: f32[1,128], index: 2, kind: input, shape index: {}]   ;;  %s1631_s3 = inlined_call_operand.vmem [shape: bf16[32,128], index: 3, kind: output, shape index: {}]  }
   0x1   :  { %v1231_v0 = vld [vmem:[%s1628_s1 + $0x40] sm:$0xff]   ;;  %v1235_v4 = vld [vmem:[%s1628_s1 + $0x48] sm:$0xff]   ;;  %v1239_v8 = vld [vmem:[%s1628_s1 + $0x50] sm:$0xff]  }
   0x2   :  { %v1232_v1 = vld [vmem:[%s1628_s1] sm:$0xff]   ;;  %1089 = vmatprep.subr.bf16.mxu0 %v1231_v0  ;;  %v1236_v5 = vld [vmem:[%s1628_s1 + $0x8] sm:$0xff]   ;;  %v1240_v9 = vld [vmem:[%s1628_s1 + $0x10] sm:$0xff]  }
   0x3   :  { %v1233_v2 = vld [vmem:[%s1628_s1 + $0xc0] sm:$0xff]   ;;  %1090 = vmatpush3.bf16.msra.mxu0 %v1232_v1  ;;  %v1237_v6 = vld [vmem:[%s1628_s1 + $0xc8] sm:$0xff]   ;;  %v1241_v10 = vld [vmem:[%s1628_s1 + $0xd0] sm:$0xff]  }
   0x4   :  { %v1234_v3 = vld [vmem:[%s1628_s1 + $0x80] sm:$0xff]   ;;  %1117 = vmatprep.subr.bf16.mxu1 %v1233_v2  ;;  %1091 = vmatprep.subr.bf16.mxu0 %v1235_v4  ;;  %v1238_v7 = vld [vmem:[%s1628_s1 + $0x88] sm:$0xff]   ;;  %v1242_v11 = vld [vmem:[%s1628_s1 + $0x90] sm:$0xff]  }
   0x5   :  { %1118 = vmatpush3.bf16.msra.mxu1 %v1234_v3  ;;  %v1243_v12 = vld [vmem:[%s1628_s1 + $0x58] sm:$0xff]   ;;  %v1247_v16 = vld [vmem:[%s1628_s1 + $0x60] sm:$0xff]   ;;  %v1251_v20 = vld [vmem:[%s1628_s1 + $0x68] sm:$0xff]  }
   0x6   :  { %1119 = vmatprep.subr.bf16.mxu1 %v1237_v6  ;;  %v1244_v13 = vld [vmem:[%s1628_s1 + $0x18] sm:$0xff]   ;;  %v1248_v17 = vld [vmem:[%s1628_s1 + $0x20] sm:$0xff]   ;;  %v1252_v21 = vld [vmem:[%s1628_s1 + $0x28] sm:$0xff]  }
   0x7   :  { %1092 = vmatpush3.bf16.msra.mxu0 %v1236_v5  ;;  %v1245_v14 = vld [vmem:[%s1628_s1 + $0xd8] sm:$0xff]   ;;  %v1249_v18 = vld [vmem:[%s1628_s1 + $0xe0] sm:$0xff]   ;;  %v1253_v22 = vld [vmem:[%s1628_s1 + $0xe8] sm:$0xff]  }
   0x8   :  { %1093 = vmatprep.subr.bf16.mxu0 %v1239_v8  ;;  %v1246_v15 = vld [vmem:[%s1628_s1 + $0x98] sm:$0xff]   ;;  %v1250_v19 = vld [vmem:[%s1628_s1 + $0xa0] sm:$0xff]   ;;  %v1254_v23 = vld [vmem:[%s1628_s1 + $0xa8] sm:$0xff]  }
   0x9   :  { %1120 = vmatpush3.bf16.msra.mxu1 %v1238_v7  ;;  %v1255_v24 = vld [vmem:[%s1628_s1 + $0x70] sm:$0xff]   ;;  %v1259_v28 = vld [vmem:[%s1628_s1 + $0x78] sm:$0xff]   ;;  %v1262_v31 = vld [vmem:[%s1629_s0] ss:$36 sps:$4 sm:$0xff]  }
   0xa   :  { %1121 = vmatprep.subr.bf16.mxu1 %v1241_v10  ;;  %v1256_v25 = vld [vmem:[%s1628_s1 + $0x30] sm:$0xff]   ;;  %v1260_v29 = vld [vmem:[%s1628_s1 + $0x38] sm:$0xff]   ;;  %v1264_v32 = vld [vmem:[%s1629_s0 + $0x4] ss:$36 sps:$4 sm:$0xff]  }
   0xb   :  { %1094 = vmatpush3.bf16.msra.mxu0 %v1240_v9  ;;  %v1257_v26 = vld [vmem:[%s1628_s1 + $0xf0] sm:$0xff]   ;;  %v1261_v30 = vld [vmem:[%s1628_s1 + $0xf8] sm:$0xff]   ;;  %742 = vmatprep.mubr.bf16.mxu0 %v1264_v32  ;;  %v1266_v34 = vld [vmem:[%s1628_s1 + $0x140] sm:$0xff]  }
   0xc   :  { %1095 = vmatprep.subr.bf16.mxu0 %v1243_v12  ;;  %v1258_v27 = vld [vmem:[%s1628_s1 + $0xb0] sm:$0xff]   ;;  %v1265_v33 = vld [vmem:[%s1628_s1 + $0xb8] sm:$0xff]   ;;  %v1267_v35 = vld [vmem:[%s1629_s0 + $0x8] ss:$36 sps:$4 sm:$0xff]  }
   0xd   :  { %1122 = vmatpush3.bf16.msra.mxu1 %v1242_v11  ;;  %v1269_v36 = vld [vmem:[%s1629_s0 + $0xc] ss:$36 sps:$4 sm:$0xff]   ;;  %v1270_v37 = vld [vmem:[%s1628_s1 + $0x100] sm:$0xff]   ;;  %v1281_v48 = vld [vmem:[%s1628_s1 + $0x158] sm:$0xff]  }
   0xe   :  { %1123 = vmatprep.subr.bf16.mxu1 %v1245_v14  ;;  %791 = vmatprep.mubr.bf16.mxu1 %v1269_v36  ;;  %v1271_v38 = vld [vmem:[%s1628_s1 + $0x1c0] sm:$0xff]   ;;  %v1273_v40 = vld [vmem:[%s1628_s1 + $0x148] sm:$0xff]   ;;  %v1277_v44 = vld [vmem:[%s1628_s1 + $0x150] sm:$0xff]  }
   0xf   :  { %1096 = vmatpush3.bf16.msra.mxu0 %v1244_v13  ;;  %v1272_v39 = vld [vmem:[%s1628_s1 + $0x180] sm:$0xff]   ;;  %v1274_v41 = vld [vmem:[%s1628_s1 + $0x108] sm:$0xff]   ;;  %v1278_v45 = vld [vmem:[%s1628_s1 + $0x110] sm:$0xff]  }
  0x10   :  { %1097 = vmatprep.subr.bf16.mxu0 %v1247_v16  ;;  %v1275_v42 = vld [vmem:[%s1628_s1 + $0x1c8] sm:$0xff]   ;;  %v1279_v46 = vld [vmem:[%s1628_s1 + $0x1d0] sm:$0xff]   ;;  %v1282_v49 = vld [vmem:[%s1628_s1 + $0x118] sm:$0xff]  }
  0x11   :  { %1124 = vmatpush3.bf16.msra.mxu1 %v1246_v15  ;;  %v1276_v43 = vld [vmem:[%s1628_s1 + $0x188] sm:$0xff]   ;;  %v1280_v47 = vld [vmem:[%s1628_s1 + $0x190] sm:$0xff]   ;;  %v1283_v50 = vld [vmem:[%s1628_s1 + $0x1d8] sm:$0xff]  }
  0x12   :  { %1125 = vmatprep.subr.bf16.mxu1 %v1249_v18  ;;  %v1284_v51 = vld [vmem:[%s1628_s1 + $0x198] sm:$0xff]   ;;  %v1285_v52 = vld [vmem:[%s1628_s1 + $0x160] sm:$0xff]   ;;  %v1289_v56 = vld [vmem:[%s1628_s1 + $0x168] sm:$0xff]  }
  0x13   :  { %1098 = vmatpush3.bf16.msra.mxu0 %v1248_v17  ;;  %v1286_v53 = vld [vmem:[%s1628_s1 + $0x120] sm:$0xff]   ;;  %v1290_v57 = vld [vmem:[%s1629_s0 + $0x4c] ss:$36 sps:$4 sm:$0xff]   ;;  %v1295_v61 = vld [vmem:[%s1629_s0 + $0x54] ss:$36 sps:$4 sm:$0xff]  }
  0x14   :  { %1099 = vmatprep.subr.bf16.mxu0 %v1251_v20  ;;  %v1287_v54 = vld [vmem:[%s1628_s1 + $0x1e0] sm:$0xff]   ;;  %v1292_v58 = vld [vmem:[%s1628_s1 + $0x128] sm:$0xff]   ;;  %v1298_v63 = vld [vmem:[%s1629_s0 + $0x50] ss:$36 sps:$4 sm:$0xff]  }
  0x15   :  { %1126 = vmatpush3.bf16.msra.mxu1 %v1250_v19  ;;  %v1288_v55 = vld [vmem:[%s1628_s1 + $0x1a0] sm:$0xff]   ;;  %v1293_v59 = vld [vmem:[%s1629_s0 + $0x48] ss:$36 sps:$4 sm:$0xff]   ;;  %v1299_v0 = vld [vmem:[%s1628_s1 + $0x170] sm:$0xff]  }
  0x16   :  { %1127 = vmatprep.subr.bf16.mxu1 %v1253_v22  ;;  %v1294_v60 = vld [vmem:[%s1628_s1 + $0x1e8] sm:$0xff]   ;;  %v1300_v1 = vld [vmem:[%s1628_s1 + $0x130] sm:$0xff]   ;;  %v1303_v4 = vld [vmem:[%s1628_s1 + $0x178] sm:$0xff]  }
  0x17   :  { %1100 = vmatpush3.bf16.msra.mxu0 %v1252_v21  ;;  %v1297_v62 = vld [vmem:[%s1628_s1 + $0x1a8] sm:$0xff]   ;;  %v1301_v2 = vld [vmem:[%s1628_s1 + $0x1f0] sm:$0xff]   ;;  %v1304_v5 = vld [vmem:[%s1628_s1 + $0x138] sm:$0xff]  }
  0x18   :  { %1101 = vmatprep.subr.bf16.mxu0 %v1255_v24  ;;  %v1302_v3 = vld [vmem:[%s1628_s1 + $0x1b0] sm:$0xff]   ;;  %v1305_v6 = vld [vmem:[%s1628_s1 + $0x1f8] sm:$0xff]   ;;  %v1310_v10 = vld [vmem:[%s1628_s1 + $0x200] sm:$0xff]  }
  0x19   :  { %1128 = vmatpush3.bf16.msra.mxu1 %v1254_v23  ;;  %v1306_v7 = vld [vmem:[%s1629_s0 + $0x10] ss:$36 sps:$4 sm:$0xff]   ;;  %v1309_v9 = vld [vmem:[%s1628_s1 + $0x1b8] sm:$0xff]   ;;  %v1314_v13 = vld [vmem:[%s1628_s1 + $0x208] sm:$0xff]  }
  0x1a   :  { %1129 = vmatprep.subr.bf16.mxu1 %v1257_v26  ;;  %v1308_v8 = vld [vmem:[%s1629_s0 + $0x14] ss:$36 sps:$4 sm:$0xff]   ;;  %v1313_v12 = vld [vmem:[%s1629_s0 + $0x1c] ss:$36 sps:$4 sm:$0xff]   ;;  %v1319_v17 = vld [vmem:[%s1629_s0 + $0x64] ss:$36 sps:$4 sm:$0xff]  }
  0x1b   :  { %1102 = vmatpush3.bf16.msra.mxu0 %v1256_v25  ;;  %v1311_v11 = vld [vmem:[%s1629_s0 + $0x18] ss:$36 sps:$4 sm:$0xff]   ;;  %v1318_v16 = vld [vmem:[%s1628_s1 + $0x210] sm:$0xff]   ;;  %v1321_v18 = vld [vmem:[%s1629_s0 + $0x60] ss:$36 sps:$4 sm:$0xff]  }
  0x1c   :  { %1103 = vmatprep.subr.bf16.mxu0 %v1259_v28  ;;  %v1315_v14 = vld [vmem:[%s1629_s0 + $0x5c] ss:$36 sps:$4 sm:$0xff]   ;;  %v1324_v22 = vld [vmem:[%s1628_s1 + $0x228] sm:$0xff]   ;;  %v1325_v23 = vld [vmem:[%s1628_s1 + $0x230] sm:$0xff]  }
  0x1d   :  { %1130 = vmatpush3.bf16.msra.mxu1 %v1258_v27  ;;  %v1317_v15 = vld [vmem:[%s1629_s0 + $0x58] ss:$36 sps:$4 sm:$0xff]   ;;  %v1323_v20 = vld [vmem:[%s1628_s1 + $0x220] sm:$0xff]   ;;  %v1328_v25 = vld [vmem:[%s1629_s0 + $0x68] ss:$36 sps:$4 sm:$0xff]  }
  0x1e   :  { %1131 = vmatprep.subr.bf16.mxu1 %v1261_v30  ;;  %v1322_v19 = vld [vmem:[%s1628_s1 + $0x218] sm:$0xff]   ;;  %v1327_v21 = vld [vmem:[%s1629_s0 + $0x20] ss:$36 sps:$4 sm:$0xff]  }
  0x1f   :  { %1104 = vmatpush3.bf16.msra.mxu0 %v1260_v29  ;;  %v1326_v24 = vld [vmem:[%s1628_s1 + $0x238] sm:$0xff]   ;;  %v979_v27 = vld [vmem:[%s1630_s2] ss:$0 sm:$0xff] }
  0x20   :  { %1145 = vmatprep.subr.bf16.mxu0 %v1266_v34 }
  0x21   :  { %1132 = vmatpush3.bf16.msra.mxu1 %v1265_v33 }
  0x22   :  { %743 = vmatmul.mubr.bf16.vlgmr.msra.gmra.mrb[0].mxu0 %v1262_v31  ;;  %1173 = vmatprep.subr.bf16.mxu1 %v1271_v38 }
  0x23   :  { %1146 = vmatpush3.bf16.msra.mxu0 %v1270_v37  ;;  %750 = vmatprep.mubr.bf16.mxu0 %v1290_v57 }
  0x24   :  { %792 = vmatmul.mubr.bf16.vlgmr.msra.gmra.mrb[0].mxu1 %v1267_v35  ;;  %1147 = vmatprep.subr.bf16.mxu0 %v1273_v40 }
  0x25   :  { %1174 = vmatpush3.bf16.msra.mxu1 %v1272_v39  ;;  %799 = vmatprep.mubr.bf16.mxu1 %v1295_v61 }
  0x26   :  { %1175 = vmatprep.subr.bf16.mxu1 %v1275_v42 }
  0x27   :  { %1148 = vmatpush3.bf16.msra.mxu0 %v1274_v41 }
  0x28   :  { %1149 = vmatprep.subr.bf16.mxu0 %v1277_v44 }
  0x29   :  { %1176 = vmatpush3.bf16.msra.mxu1 %v1276_v43 }
  0x2a   :  { %1177 = vmatprep.subr.bf16.mxu1 %v1279_v46  ;;  %751 = vmatmul.mubr.bf16.gmra.mrb[4].mxu0 %v1293_v59 }
  0x2b   :  { %1150 = vmatpush3.bf16.msra.mxu0 %v1278_v45  ;;  %840 = vmatprep.mubr.bf16.mxu0 %v1308_v8 }
  0x2c   :  { %1151 = vmatprep.subr.bf16.mxu0 %v1281_v48  ;;  %800 = vmatmul.mubr.bf16.gmra.mrb[4].mxu1 %v1298_v63 }
  0x2d   :  { %1178 = vmatpush3.bf16.msra.mxu1 %v1280_v47  ;;  %889 = vmatprep.mubr.bf16.mxu1 %v1313_v12 }
  0x2e   :  { %1179 = vmatprep.subr.bf16.mxu1 %v1283_v50 }
  0x2f   :  { %1152 = vmatpush3.bf16.msra.mxu0 %v1282_v49 }
  0x30   :  { %1153 = vmatprep.subr.bf16.mxu0 %v1285_v52 }
  0x31   :  { %1180 = vmatpush3.bf16.msra.mxu1 %v1284_v51 }
  0x32   :  { %1181 = vmatprep.subr.bf16.mxu1 %v1287_v54 }
  0x33   :  { %1154 = vmatpush3.bf16.msra.mxu0 %v1286_v53 }
  0x34   :  { %1155 = vmatprep.subr.bf16.mxu0 %v1289_v56 }
  0x35   :  { %1182 = vmatpush3.bf16.msra.mxu1 %v1288_v55 }
  0x36   :  { %1183 = vmatprep.subr.bf16.mxu1 %v1294_v60 }
  0x37   :  { %1156 = vmatpush3.bf16.msra.mxu0 %v1292_v58 }
  0x38   :  { %1157 = vmatprep.subr.bf16.mxu0 %v1299_v0 }
  0x39   :  { %1184 = vmatpush3.bf16.msra.mxu1 %v1297_v62 }
  0x3a   :  { %1185 = vmatprep.subr.bf16.mxu1 %v1301_v2 }
  0x3b   :  { %1158 = vmatpush3.bf16.msra.mxu0 %v1300_v1 }
  0x3c   :  { %1159 = vmatprep.subr.bf16.mxu0 %v1303_v4 }
  0x3d   :  { %1186 = vmatpush3.bf16.msra.mxu1 %v1302_v3 }
  0x3e   :  { %1187 = vmatprep.subr.bf16.mxu1 %v1305_v6 }
  0x3f   :  { %1160 = vmatpush3.bf16.msra.mxu0 %v1304_v5 }
  0x40   :  { %1211 = vmatprep.subr.bf16.mxu0 %v1310_v10 }
  0x41   :  { %1188 = vmatpush3.bf16.msra.mxu1 %v1309_v9 }
  0x42   :  { %841 = vmatmul.mubr.bf16.vlgmr.msra.gmra.mrb[8].mxu0 %v1306_v7 }
  0x43   :  { %1212 = vmatpush3.bf16.msra.mxu0 %v1310_v10  ;;  %848 = vmatprep.mubr.bf16.mxu0 %v1315_v14 }
  0x44   :  { %890 = vmatmul.mubr.bf16.vlgmr.msra.gmra.mrb[8].mxu1 %v1311_v11  ;;  %1213 = vmatprep.subr.bf16.mxu0 %v1314_v13 }
  0x45   :  { %897 = vmatprep.mubr.bf16.mxu1 %v1319_v17 }
  0x47   :  { %1214 = vmatpush3.bf16.msra.mxu0 %v1314_v13 }
  0x48   :  { %1215 = vmatprep.subr.bf16.mxu0 %v1318_v16 }
  0x4a   :  { %849 = vmatmul.mubr.bf16.gmra.mrb[12].mxu0 %v1317_v15 }
  0x4b   :  { %1216 = vmatpush3.bf16.msra.mxu0 %v1318_v16  ;;  %1227 = vmatprep.mubr.bf16.mxu0 %v1327_v21 }
  0x4c   :  { %898 = vmatmul.mubr.bf16.gmra.mrb[12].mxu1 %v1321_v18  ;;  %1217 = vmatprep.subr.bf16.mxu0 %v1322_v19 }
  0x4f   :  { %1218 = vmatpush3.bf16.msra.mxu0 %v1322_v19 }
  0x50   :  { %1219 = vmatprep.subr.bf16.mxu0 %v1323_v20 }
  0x53   :  { %1220 = vmatpush3.bf16.msra.mxu0 %v1323_v20 }
  0x54   :  { %1221 = vmatprep.subr.bf16.mxu0 %v1324_v22 }
  0x57   :  { %1222 = vmatpush3.bf16.msra.mxu0 %v1324_v22 }
  0x58   :  { %1223 = vmatprep.subr.bf16.mxu0 %v1325_v23 }
  0x5b   :  { %1224 = vmatpush3.bf16.msra.mxu0 %v1325_v23 }
  0x5c   :  { %1225 = vmatprep.subr.bf16.mxu0 %v1326_v24 }
  0x5f   :  { %1226 = vmatpush3.bf16.msra.mxu0 %v1326_v24 }
  0x62   :  { %1228 = vmatmul.mubr.bf16.vlgmr.msra.gmra.mrb[16].mxu0 %v1328_v25 }
  0xf5   :  { %v1105_v26 = vpop.f32.mrb[0].mxu0 }
  0xf6   :  { %v1106_v28 = vpop.f32.mrb[1].mxu0 }
  0xf7   :  { %v1107_v29 = vadd.f32 %v1106_v28, %v1105_v26  ;;  %v1108_v30 = vpop.f32.mrb[2].mxu0  ;;  %v1133_v31 = vpop.f32.mrb[0].mxu1 }
  0xf8   :  { %v1109_v32 = vpop.f32.mrb[3].mxu0  ;;  %v1134_v35 = vpop.f32.mrb[1].mxu1 }
  0xf9   :  { %v745_v33 = vadd.f32 %v1107_v29, %v979_v27  ;;  %v1110_v34 = vadd.f32 %v1109_v32, %v1108_v30  ;;  %v1135_v36 = vadd.f32 %v1134_v35, %v1133_v31  ;;  %v1136_v37 = vpop.f32.mrb[2].mxu1 }
  0xfa   :  { %v1137_v39 = vpop.f32.mrb[3].mxu1 }
  0xfb   :  { %v748_v38 = vadd.f32 %v1110_v34, %v979_v27  ;;  %v794_v40 = vadd.f32 %v1135_v36, %v745_v33  ;;  %v1138_v41 = vadd.f32 %v1137_v39, %v1136_v37 }
  0xfd   :  { %v797_v42 = vadd.f32 %v1138_v41, %v748_v38  ;;  %v1111_v43 = vpop.f32.mrb[4].mxu0 }
  0xfe   :  { %v1112_v44 = vpop.f32.mrb[5].mxu0 }
  0xff   :  { %v1113_v45 = vadd.f32 %v1112_v44, %v1111_v43  ;;  %v1114_v46 = vpop.f32.mrb[6].mxu0  ;;  %v1139_v47 = vpop.f32.mrb[4].mxu1 }
 0x100   :  { %v1115_v48 = vpop.f32.mrb[7].mxu0  ;;  %v1140_v51 = vpop.f32.mrb[5].mxu1 }
 0x101   :  { %v753_v49 = vadd.f32 %v1113_v45, %v979_v27  ;;  %v1116_v50 = vadd.f32 %v1115_v48, %v1114_v46  ;;  %v1141_v52 = vadd.f32 %v1140_v51, %v1139_v47  ;;  %v1142_v53 = vpop.f32.mrb[6].mxu1 }
 0x102   :  { %v1143_v55 = vpop.f32.mrb[7].mxu1 }
 0x103   :  { %v756_v54 = vadd.f32 %v1116_v50, %v979_v27  ;;  %v802_v56 = vadd.f32 %v1141_v52, %v753_v49  ;;  %v1144_v57 = vadd.f32 %v1143_v55, %v1142_v53 }
 0x105   :  { %v805_v58 = vadd.f32 %v1144_v57, %v756_v54 }
 0x115   :  { %v1161_v59 = vpop.f32.mrb[8].mxu0 }
 0x116   :  { %v1162_v60 = vpop.f32.mrb[9].mxu0 }
 0x117   :  { %v1163_v61 = vadd.f32 %v1162_v60, %v1161_v59  ;;  %v1164_v62 = vpop.f32.mrb[10].mxu0  ;;  %v1189_v63 = vpop.f32.mrb[8].mxu1 }
 0x118   :  { %v1165_v0 = vpop.f32.mrb[11].mxu0  ;;  %v1190_v3 = vpop.f32.mrb[9].mxu1 }
 0x119   :  { %v843_v1 = vadd.f32 %v1163_v61, %v794_v40  ;;  %v1166_v2 = vadd.f32 %v1165_v0, %v1164_v62  ;;  %v1191_v4 = vadd.f32 %v1190_v3, %v1189_v63  ;;  %v1192_v5 = vpop.f32.mrb[10].mxu1 }
 0x11a   :  { %v1193_v7 = vpop.f32.mrb[11].mxu1 }
 0x11b   :  { %v846_v6 = vadd.f32 %v1166_v2, %v797_v42  ;;  %v1194_v8 = vadd.f32 %v1193_v7, %v1192_v5  ;;  %v892_v9 = vadd.f32 %v1191_v4, %v843_v1 }
 0x11d   :  { %v1167_v10 = vpop.f32.mrb[12].mxu0  ;;  %v895_v12 = vadd.f32 %v1194_v8, %v846_v6 }
 0x11e   :  { %v1168_v11 = vpop.f32.mrb[13].mxu0 }
 0x11f   :  { %v1169_v13 = vadd.f32 %v1168_v11, %v1167_v10  ;;  %v1170_v14 = vpop.f32.mrb[14].mxu0  ;;  %v1195_v15 = vpop.f32.mrb[12].mxu1 }
 0x120   :  { %v1171_v16 = vpop.f32.mrb[15].mxu0  ;;  %v1196_v19 = vpop.f32.mrb[13].mxu1 }
 0x121   :  { %v851_v17 = vadd.f32 %v1169_v13, %v802_v56  ;;  %v1172_v18 = vadd.f32 %v1171_v16, %v1170_v14  ;;  %v1197_v20 = vadd.f32 %v1196_v19, %v1195_v15  ;;  %v1198_v21 = vpop.f32.mrb[14].mxu1 }
 0x122   :  { %v1199_v23 = vpop.f32.mrb[15].mxu1 }
 0x123   :  { %v854_v22 = vadd.f32 %v1172_v18, %v805_v58  ;;  %v1200_v24 = vadd.f32 %v1199_v23, %v1198_v21  ;;  %v900_v25 = vadd.f32 %v1197_v20, %v851_v17 }
 0x125   :  { %v903_v26 = vadd.f32 %v1200_v24, %v854_v22 }
 0x135   :  { %v1229_v27 = vpop.f32.mrb[16].mxu0 }
 0x136   :  { %v949_v28 = vadd.f32 %v1229_v27, %v900_v25  ;;  %v940_v29 = vpop.f32.mrb[17].mxu0 }
 0x137   :  { %v941_v30 = vadd.f32 %v940_v29, %v892_v9  ;;  %v1230_v31 = vpop.f32.mrb[18].mxu0 }
 0x138   :  { %v952_v32 = vadd.f32 %v1230_v31, %v903_v26  ;;  %v943_v33 = vpop.f32.mrb[19].mxu0 }
 0x139   :  { %v944_v34 = vadd.f32 %v943_v33, %v895_v12 }
 0x13a   :  { %v1086_v35 = vpack.c.bf16 %v952_v32, %v949_v28 }
 0x13b   :  { %v1081_v36 = vpack.c.bf16 %v944_v34, %v941_v30 }
 0x13c   :  { %1088 = vst [vmem:[%s1631_s3 + $0x8] sm:$0xff] %v1086_v35  }
 0x13d   :  { %1082 = vst [vmem:[%s1631_s3] sm:$0xff] %v1081_v36  }

// kernel: fast_style_network.114
= control target key start
LH: loop header
LB: loop body
LE: loop exit
PB: predicated region body
PF: predicated region fallthrough
CT: control target
= control target key end

     0   :  { %s820_s1 = inlined_call_operand.vmem [shape: bf16[256,128], index: 1, kind: input, shape index: {}]   ;;  %s821_s0 = inlined_call_operand.vmem [shape: bf16[128,256], index: 0, kind: input, shape index: {}]   ;;  %s822_s2 = inlined_call_operand.vmem [shape: f32[1,128], index: 2, kind: input, shape index: {}]   ;;  %s823_s3 = inlined_call_operand.vmem [shape: bf16[128,128], index: 3, kind: output, shape index: {}]  }
   0x1   :  { %v619_v0 = vld [vmem:[%s820_s1 + $0x40] sm:$0xff]   ;;  %v621_v2 = vld [vmem:[%s820_s1 + $0x48] sm:$0xff]   ;;  %v623_v4 = vld [vmem:[%s820_s1 + $0x50] sm:$0xff]  }
   0x2   :  { %v620_v1 = vld [vmem:[%s820_s1] sm:$0xff]   ;;  %539 = vmatprep.subr.bf16.mxu0 %v619_v0  ;;  %603 = vmatprep.subr.bf16.mxu1 %v619_v0  ;;  %v622_v3 = vld [vmem:[%s820_s1 + $0x8] sm:$0xff]   ;;  %v624_v5 = vld [vmem:[%s820_s1 + $0x10] sm:$0xff]  }
   0x3   :  { %540 = vmatpush3.bf16.msra.mxu0 %v620_v1  ;;  %611 = vmatpush3.bf16.msra.mxu1 %v620_v1  ;;  %v625_v6 = vld [vmem:[%s820_s1 + $0x58] sm:$0xff]   ;;  %v627_v8 = vld [vmem:[%s820_s1 + $0x60] sm:$0xff]   ;;  %v629_v10 = vld [vmem:[%s820_s1 + $0x68] sm:$0xff]  }
   0x4   :  { %541 = vmatprep.subr.bf16.mxu0 %v621_v2  ;;  %604 = vmatprep.subr.bf16.mxu1 %v621_v2  ;;  %v626_v7 = vld [vmem:[%s820_s1 + $0x18] sm:$0xff]   ;;  %v628_v9 = vld [vmem:[%s820_s1 + $0x20] sm:$0xff]   ;;  %v630_v13 = vld [vmem:[%s820_s1 + $0x28] sm:$0xff]  }
   0x5   :  { %v637_v11 = vld [vmem:[%s821_s0 + $0x4] ss:$8 sps:$4 sm:$0xff]   ;;  %v631_v14 = vld [vmem:[%s820_s1 + $0x70] sm:$0xff]   ;;  %v633_v16 = vld [vmem:[%s820_s1 + $0x78] sm:$0xff]  }
   0x6   :  { %v640_v12 = vld [vmem:[%s821_s0 + $0x44] ss:$8 sps:$4 sm:$0xff]   ;;  %278 = vmatprep.mubr.bf16.mxu0 %v637_v11  ;;  %v632_v15 = vld [vmem:[%s820_s1 + $0x30] sm:$0xff]   ;;  %v634_v17 = vld [vmem:[%s820_s1 + $0x38] sm:$0xff]  }
   0x7   :  { %542 = vmatpush3.bf16.msra.mxu0 %v622_v3  ;;  %612 = vmatpush3.bf16.msra.mxu1 %v622_v3  ;;  %v635_v18 = vld [vmem:[%s821_s0] ss:$8 sps:$4 sm:$0xff]   ;;  %v641_v20 = vld [vmem:[%s821_s0 + $0x14] ss:$8 sps:$4 sm:$0xff]   ;;  %v645_v22 = vld [vmem:[%s821_s0 + $0x10] ss:$8 sps:$4 sm:$0xff]  }
   0x8   :  { %543 = vmatprep.subr.bf16.mxu0 %v623_v4  ;;  %605 = vmatprep.subr.bf16.mxu1 %v623_v4  ;;  %v638_v19 = vld [vmem:[%s821_s0 + $0x40] ss:$8 sps:$4 sm:$0xff]   ;;  %v643_v21 = vld [vmem:[%s821_s0 + $0x54] ss:$8 sps:$4 sm:$0xff]   ;;  %v646_v23 = vld [vmem:[%s821_s0 + $0x50] ss:$8 sps:$4 sm:$0xff]  }
   0x9   :  { %310 = vmatprep.mubr.bf16.mxu1 %v640_v12  ;;  %v647_v24 = vld [vmem:[%s821_s0 + $0x24] ss:$8 sps:$4 sm:$0xff]   ;;  %v651_v26 = vld [vmem:[%s821_s0 + $0x20] ss:$8 sps:$4 sm:$0xff]   ;;  %v653_v28 = vld [vmem:[%s821_s0 + $0x34] ss:$8 sps:$4 sm:$0xff]  }
   0xa   :  { %v649_v25 = vld [vmem:[%s821_s0 + $0x64] ss:$8 sps:$4 sm:$0xff]   ;;  %v652_v27 = vld [vmem:[%s821_s0 + $0x60] ss:$8 sps:$4 sm:$0xff]   ;;  %v655_v29 = vld [vmem:[%s821_s0 + $0x74] ss:$8 sps:$4 sm:$0xff]  }
   0xb   :  { %544 = vmatpush3.bf16.msra.mxu0 %v624_v5  ;;  %613 = vmatpush3.bf16.msra.mxu1 %v624_v5  ;;  %v657_v30 = vld [vmem:[%s821_s0 + $0x30] ss:$8 sps:$4 sm:$0xff]   ;;  %v778_v40 = vld [vmem:[%s822_s2] ss:$0 sm:$0xff] }
   0xc   :  { %545 = vmatprep.subr.bf16.mxu0 %v625_v6  ;;  %606 = vmatprep.subr.bf16.mxu1 %v625_v6  ;;  %v658_v31 = vld [vmem:[%s821_s0 + $0x70] ss:$8 sps:$4 sm:$0xff]  }
   0xf   :  { %546 = vmatpush3.bf16.msra.mxu0 %v626_v7  ;;  %614 = vmatpush3.bf16.msra.mxu1 %v626_v7 }
  0x10   :  { %547 = vmatprep.subr.bf16.mxu0 %v627_v8  ;;  %607 = vmatprep.subr.bf16.mxu1 %v627_v8 }
  0x13   :  { %548 = vmatpush3.bf16.msra.mxu0 %v628_v9  ;;  %615 = vmatpush3.bf16.msra.mxu1 %v628_v9 }
  0x14   :  { %549 = vmatprep.subr.bf16.mxu0 %v629_v10  ;;  %608 = vmatprep.subr.bf16.mxu1 %v629_v10 }
  0x17   :  { %550 = vmatpush3.bf16.msra.mxu0 %v630_v13  ;;  %616 = vmatpush3.bf16.msra.mxu1 %v630_v13 }
  0x18   :  { %551 = vmatprep.subr.bf16.mxu0 %v631_v14  ;;  %609 = vmatprep.subr.bf16.mxu1 %v631_v14 }
  0x1b   :  { %552 = vmatpush3.bf16.msra.mxu0 %v632_v15  ;;  %617 = vmatpush3.bf16.msra.mxu1 %v632_v15 }
  0x1c   :  { %553 = vmatprep.subr.bf16.mxu0 %v633_v16  ;;  %610 = vmatprep.subr.bf16.mxu1 %v633_v16 }
  0x1f   :  { %554 = vmatpush3.bf16.msra.mxu0 %v634_v17  ;;  %618 = vmatpush3.bf16.msra.mxu1 %v634_v17 }
  0x22   :  { %279 = vmatmul.mubr.bf16.vlgmr.msra.gmra.mrb[0].mxu0 %v635_v18  ;;  %311 = vmatmul.mubr.bf16.vlgmr.msra.gmra.mrb[0].mxu1 %v638_v19 }
  0x23   :  { %286 = vmatprep.mubr.bf16.mxu0 %v641_v20  ;;  %318 = vmatprep.mubr.bf16.mxu1 %v643_v21 }
  0x2a   :  { %287 = vmatmul.mubr.bf16.gmra.mrb[4].mxu0 %v645_v22  ;;  %319 = vmatmul.mubr.bf16.gmra.mrb[4].mxu1 %v646_v23 }
  0x2b   :  { %294 = vmatprep.mubr.bf16.mxu0 %v647_v24  ;;  %326 = vmatprep.mubr.bf16.mxu1 %v649_v25 }
  0x32   :  { %295 = vmatmul.mubr.bf16.gmra.mrb[8].mxu0 %v651_v26  ;;  %327 = vmatmul.mubr.bf16.gmra.mrb[8].mxu1 %v652_v27 }
  0x33   :  { %302 = vmatprep.mubr.bf16.mxu0 %v653_v28  ;;  %334 = vmatprep.mubr.bf16.mxu1 %v655_v29 }
  0x3a   :  { %303 = vmatmul.mubr.bf16.gmra.mrb[12].mxu0 %v657_v30  ;;  %335 = vmatmul.mubr.bf16.gmra.mrb[12].mxu1 %v658_v31 }
  0xf5   :  { %v555_v32 = vpop.f32.mrb[0].mxu0  ;;  %v579_v33 = vpop.f32.mrb[0].mxu1 }
  0xf6   :  { %v556_v34 = vpop.f32.mrb[1].mxu0  ;;  %v580_v35 = vpop.f32.mrb[1].mxu1 }
  0xf7   :  { %v557_v36 = vadd.f32 %v556_v34, %v555_v32  ;;  %v581_v37 = vadd.f32 %v580_v35, %v579_v33  ;;  %v558_v38 = vpop.f32.mrb[2].mxu0  ;;  %v582_v39 = vpop.f32.mrb[2].mxu1 }
  0xf8   :  { %v559_v41 = vpop.f32.mrb[3].mxu0  ;;  %v583_v42 = vpop.f32.mrb[3].mxu1 }
  0xf9   :  { %v560_v43 = vadd.f32 %v559_v41, %v558_v38  ;;  %v584_v44 = vadd.f32 %v583_v42, %v582_v39  ;;  %v281_v45 = vadd.f32 %v557_v36, %v778_v40  ;;  %v313_v46 = vadd.f32 %v581_v37, %v778_v40 }
  0xfb   :  { %v284_v47 = vadd.f32 %v560_v43, %v778_v40  ;;  %v316_v48 = vadd.f32 %v584_v44, %v778_v40 }
  0xfd   :  { %v495_v49 = vpack.c.bf16 %v284_v47, %v281_v45  ;;  %v515_v50 = vpack.c.bf16 %v316_v48, %v313_v46  ;;  %v561_v51 = vpop.f32.mrb[4].mxu0  ;;  %v585_v52 = vpop.f32.mrb[4].mxu1 }
  0xfe   :  { %v562_v53 = vpop.f32.mrb[5].mxu0  ;;  %v586_v54 = vpop.f32.mrb[5].mxu1 }
  0xff   :  { %496 = vst [vmem:[%s823_s3] sm:$0xff] %v495_v49   ;;  %535 = vst [vmem:[%s823_s3 + $0x20] sm:$0xff] %v515_v50   ;;  %v563_v55 = vadd.f32 %v562_v53, %v561_v51  ;;  %v587_v56 = vadd.f32 %v586_v54, %v585_v52  ;;  %v564_v57 = vpop.f32.mrb[6].mxu0  ;;  %v588_v58 = vpop.f32.mrb[6].mxu1 }
 0x100   :  { %v565_v59 = vpop.f32.mrb[7].mxu0  ;;  %v589_v60 = vpop.f32.mrb[7].mxu1 }
 0x101   :  { %v566_v61 = vadd.f32 %v565_v59, %v564_v57  ;;  %v590_v62 = vadd.f32 %v589_v60, %v588_v58  ;;  %v289_v63 = vadd.f32 %v563_v55, %v778_v40  ;;  %v321_v0 = vadd.f32 %v587_v56, %v778_v40 }
 0x103   :  { %v292_v1 = vadd.f32 %v566_v61, %v778_v40  ;;  %v324_v2 = vadd.f32 %v590_v62, %v778_v40 }
 0x105   :  { %v500_v3 = vpack.c.bf16 %v292_v1, %v289_v63  ;;  %v520_v4 = vpack.c.bf16 %v324_v2, %v321_v0  ;;  %v567_v5 = vpop.f32.mrb[8].mxu0  ;;  %v591_v6 = vpop.f32.mrb[8].mxu1 }
 0x106   :  { %v568_v7 = vpop.f32.mrb[9].mxu0  ;;  %v592_v8 = vpop.f32.mrb[9].mxu1 }
 0x107   :  { %532 = vst [vmem:[%s823_s3 + $0x8] sm:$0xff] %v500_v3   ;;  %536 = vst [vmem:[%s823_s3 + $0x28] sm:$0xff] %v520_v4   ;;  %v569_v9 = vadd.f32 %v568_v7, %v567_v5  ;;  %v593_v10 = vadd.f32 %v592_v8, %v591_v6  ;;  %v570_v11 = vpop.f32.mrb[10].mxu0  ;;  %v594_v12 = vpop.f32.mrb[10].mxu1 }
 0x108   :  { %v571_v13 = vpop.f32.mrb[11].mxu0  ;;  %v595_v14 = vpop.f32.mrb[11].mxu1 }
 0x109   :  { %v572_v15 = vadd.f32 %v571_v13, %v570_v11  ;;  %v596_v16 = vadd.f32 %v595_v14, %v594_v12  ;;  %v297_v17 = vadd.f32 %v569_v9, %v778_v40  ;;  %v329_v18 = vadd.f32 %v593_v10, %v778_v40 }
 0x10b   :  { %v300_v19 = vadd.f32 %v572_v15, %v778_v40  ;;  %v332_v20 = vadd.f32 %v596_v16, %v778_v40 }
 0x10d   :  { %v505_v21 = vpack.c.bf16 %v300_v19, %v297_v17  ;;  %v525_v22 = vpack.c.bf16 %v332_v20, %v329_v18  ;;  %v573_v23 = vpop.f32.mrb[12].mxu0  ;;  %v597_v24 = vpop.f32.mrb[12].mxu1 }
 0x10e   :  { %v574_v25 = vpop.f32.mrb[13].mxu0  ;;  %v598_v26 = vpop.f32.mrb[13].mxu1 }
 0x10f   :  { %533 = vst [vmem:[%s823_s3 + $0x10] sm:$0xff] %v505_v21   ;;  %537 = vst [vmem:[%s823_s3 + $0x30] sm:$0xff] %v525_v22   ;;  %v575_v27 = vadd.f32 %v574_v25, %v573_v23  ;;  %v599_v28 = vadd.f32 %v598_v26, %v597_v24  ;;  %v576_v29 = vpop.f32.mrb[14].mxu0  ;;  %v600_v30 = vpop.f32.mrb[14].mxu1 }
 0x110   :  { %v577_v31 = vpop.f32.mrb[15].mxu0  ;;  %v601_v32 = vpop.f32.mrb[15].mxu1 }
 0x111   :  { %v578_v33 = vadd.f32 %v577_v31, %v576_v29  ;;  %v602_v34 = vadd.f32 %v601_v32, %v600_v30  ;;  %v305_v35 = vadd.f32 %v575_v27, %v778_v40  ;;  %v337_v36 = vadd.f32 %v599_v28, %v778_v40 }
 0x113   :  { %v308_v37 = vadd.f32 %v578_v33, %v778_v40  ;;  %v340_v38 = vadd.f32 %v602_v34, %v778_v40 }
 0x115   :  { %v510_v39 = vpack.c.bf16 %v308_v37, %v305_v35  ;;  %v530_v41 = vpack.c.bf16 %v340_v38, %v337_v36 }
 0x117   :  { %534 = vst [vmem:[%s823_s3 + $0x18] sm:$0xff] %v510_v39   ;;  %538 = vst [vmem:[%s823_s3 + $0x38] sm:$0xff] %v530_v41  }

// kernel: fast_style_network.117
= control target key start
LH: loop header
LB: loop body
LE: loop exit
PB: predicated region body
PF: predicated region fallthrough
CT: control target
= control target key end

     0   :  { %v12243_v0 = vmov 0   ;;  %vm5382_vm0 = vcmask 261120   ;;  %s15646_s1 = inlined_call_operand.vmem [shape: bf16[2592,128], index: 1, kind: input, shape index: {}]   ;;  %s15647_s0 = inlined_call_operand.vmem [shape: bf16[512,2592], index: 0, kind: input, shape index: {}]   ;;  %s15648_s2 = inlined_call_operand.vmem [shape: f32[1,128], index: 2, kind: input, shape index: {}]   ;;  %s15649_s3 = inlined_call_operand.vmem [shape: f32[512,128], index: 3, kind: output, shape index: {}]  }
   0x1   :  { %5479 = vmatprep.subr.bf16.mxu1 %v12243_v0  ;;  %6635 = vmatprep.subr.bf16.mxu0 %v12243_v0  ;;  %v10944_v1 = vld [vmem:[%s15646_s1] sm:$0xff]   ;;  %v10946_v3 = vld [vmem:[%s15646_s1 + $0x8] sm:$0xff]   ;;  %v10948_v5 = vld [vmem:[%s15646_s1 + $0x10] sm:$0xff]  }
   0x2   :  { %v10945_v2 = vld [vmem:[%s15646_s1 + $0x200] sm:$0xff]   ;;  %5480 = vmatpush1.bf16.msra.mxu1 %v10944_v1  ;;  %v10947_v4 = vld [vmem:[%s15646_s1 + $0x208] sm:$0xff]   ;;  %v10949_v6 = vld [vmem:[%s15646_s1 + $0x210] sm:$0xff]  }
   0x3   :  { %6636 = vmatpush1.bf16.msra.mxu0 %v10945_v2  ;;  %5481 = vmatprep.subr.bf16.mxu1 %v12243_v0  ;;  %v10950_v7 = vld [vmem:[%s15646_s1 + $0x18] sm:$0xff]   ;;  %v10952_v9 = vld [vmem:[%s15646_s1 + $0x20] sm:$0xff]   ;;  %v10954_v11 = vld [vmem:[%s15646_s1 + $0x28] sm:$0xff]  }
   0x4   :  { %6637 = vmatprep.subr.bf16.mxu0 %v12243_v0  ;;  %v10951_v8 = vld [vmem:[%s15646_s1 + $0x218] sm:$0xff]   ;;  %v10953_v10 = vld [vmem:[%s15646_s1 + $0x220] sm:$0xff]   ;;  %v10955_v12 = vld [vmem:[%s15646_s1 + $0x228] sm:$0xff]  }
   0x5   :  { %v10956_v13 = vld [vmem:[%s15646_s1 + $0x30] sm:$0xff]   ;;  %v10958_v15 = vld [vmem:[%s15646_s1 + $0x38] sm:$0xff]   ;;  %v10960_v17 = vld [vmem:[%s15646_s1 + $0x40] sm:$0xff]  }
   0x6   :  { %5482 = vmatpush1.bf16.msra.mxu1 %v10946_v3  ;;  %v10957_v14 = vld [vmem:[%s15646_s1 + $0x230] sm:$0xff]   ;;  %v10959_v16 = vld [vmem:[%s15646_s1 + $0x238] sm:$0xff]   ;;  %v10961_v18 = vld [vmem:[%s15646_s1 + $0x240] sm:$0xff]  }
   0x7   :  { %6638 = vmatpush1.bf16.msra.mxu0 %v10947_v4  ;;  %5483 = vmatprep.subr.bf16.mxu1 %v12243_v0  ;;  %v10978_v19 = vld [vmem:[%s15647_s0 + $0x4] ss:$84 sps:$4 sm:$0xff]   ;;  %v10962_v20 = vld [vmem:[%s15646_s1 + $0x48] sm:$0xff]   ;;  %v10964_v23 = vld [vmem:[%s15646_s1 + $0x50] sm:$0xff]  }
   0x8   :  { %6639 = vmatprep.subr.bf16.mxu0 %v12243_v0  ;;  %v10981_v21 = vld [vmem:[%s15647_s0 + $0x24] ss:$84 sps:$4 sm:$0xff]   ;;  %v10963_v22 = vld [vmem:[%s15646_s1 + $0x248] sm:$0xff]   ;;  %5511 = vmatprep.mubr.bf16.mxu1 %v10978_v19  ;;  %v10965_v24 = vld [vmem:[%s15646_s1 + $0x250] sm:$0xff]  }
   0x9   :  { %6667 = vmatprep.mubr.bf16.mxu0 %v10981_v21  ;;  %v10966_v25 = vld [vmem:[%s15646_s1 + $0x58] sm:$0xff]   ;;  %v10968_v27 = vld [vmem:[%s15646_s1 + $0x60] sm:$0xff]   ;;  %v10970_v29 = vld [vmem:[%s15646_s1 + $0x68] sm:$0xff]  }
   0xa   :  { %5484 = vmatpush1.bf16.msra.mxu1 %v10948_v5  ;;  %v10967_v26 = vld [vmem:[%s15646_s1 + $0x258] sm:$0xff]   ;;  %v10969_v28 = vld [vmem:[%s15646_s1 + $0x260] sm:$0xff]   ;;  %v10971_v30 = vld [vmem:[%s15646_s1 + $0x268] sm:$0xff]  }
   0xb   :  { %6640 = vmatpush1.bf16.msra.mxu0 %v10949_v6  ;;  %5485 = vmatprep.subr.bf16.mxu1 %v12243_v0  ;;  %v10972_v31 = vld [vmem:[%s15646_s1 + $0x70] sm:$0xff]   ;;  %v10974_v33 = vld [vmem:[%s15646_s1 + $0x78] sm:$0xff]   ;;  %v10982_v37 = vld [vmem:[%s15646_s1 + $0x280] sm:$0xff]  }
   0xc   :  { %6641 = vmatprep.subr.bf16.mxu0 %v12243_v0  ;;  %v10973_v32 = vld [vmem:[%s15646_s1 + $0x270] sm:$0xff]   ;;  %v10975_v34 = vld [vmem:[%s15646_s1 + $0x278] sm:$0xff]   ;;  %v10983_v38 = vld [vmem:[%s15646_s1 + $0x80] sm:$0xff]  }
   0xd   :  { %v10976_v35 = vld [vmem:[%s15647_s0] ss:$84 sps:$4 sm:$0xff]   ;;  %v11000_v41 = vld [vmem:[%s15646_s1 + $0x88] sm:$0xff]   ;;  %v10992_v49 = vld [vmem:[%s15646_s1 + $0x298] sm:$0xff]  }
   0xe   :  { %5486 = vmatpush1.bf16.msra.mxu1 %v10950_v7  ;;  %v10979_v36 = vld [vmem:[%s15647_s0 + $0x20] ss:$84 sps:$4 sm:$0xff]   ;;  %v10984_v42 = vld [vmem:[%s15646_s1 + $0x288] sm:$0xff]   ;;  %v10997_v50 = vld [vmem:[%s15647_s0 + $0x150] ss:$84 sps:$4 sm:$0xff]  }
   0xf   :  { %6642 = vmatpush1.bf16.msra.mxu0 %v10951_v8  ;;  %5487 = vmatprep.subr.bf16.mxu1 %v12243_v0  ;;  %v10985_v39 = vld [vmem:[%s15647_s0 + $0xac] ss:$84 sps:$4 sm:$0xff]   ;;  %v10989_v43 = vld [vmem:[%s15647_s0 + $0xa8] ss:$84 sps:$4 sm:$0xff]   ;;  %v10991_v45 = vld [vmem:[%s15646_s1 + $0x290] sm:$0xff]  }
  0x10   :  { %6643 = vmatprep.subr.bf16.mxu0 %v12243_v0  ;;  %v10987_v40 = vld [vmem:[%s15647_s0 + $0xcc] ss:$84 sps:$4 sm:$0xff]   ;;  %v10990_v44 = vld [vmem:[%s15647_s0 + $0xc8] ss:$84 sps:$4 sm:$0xff]   ;;  %v11017_v48 = vld [vmem:[%s15646_s1 + $0x90] sm:$0xff]  }
  0x11   :  { %v10993_v46 = vld [vmem:[%s15647_s0 + $0x154] ss:$84 sps:$4 sm:$0xff]   ;;  %v10998_v51 = vld [vmem:[%s15647_s0 + $0x170] ss:$84 sps:$4 sm:$0xff]   ;;  %v11034_v52 = vld [vmem:[%s15646_s1 + $0x98] sm:$0xff]  }
  0x12   :  { %5488 = vmatpush1.bf16.msra.mxu1 %v10952_v9  ;;  %v10995_v47 = vld [vmem:[%s15647_s0 + $0x174] ss:$84 sps:$4 sm:$0xff]   ;;  %v10999_v53 = vld [vmem:[%s15646_s1 + $0x2a0] sm:$0xff]   ;;  %v11002_v54 = vld [vmem:[%s15647_s0 + $0x1fc] ss:$84 sps:$4 sm:$0xff]  }
  0x13   :  { %6644 = vmatpush1.bf16.msra.mxu0 %v10953_v10  ;;  %5489 = vmatprep.subr.bf16.mxu1 %v12243_v0  ;;  %v11004_v55 = vld [vmem:[%s15647_s0 + $0x21c] ss:$84 sps:$4 sm:$0xff]   ;;  %v11051_v56 = vld [vmem:[%s15646_s1 + $0xa0] sm:$0xff]   ;;  %v11001_v57 = vld [vmem:[%s15646_s1 + $0x2a8] sm:$0xff]  }
  0x14   :  { %6645 = vmatprep.subr.bf16.mxu0 %v12243_v0  ;;  %v11006_v58 = vld [vmem:[%s15647_s0 + $0x1f8] ss:$84 sps:$4 sm:$0xff]   ;;  %v11008_v62 = vld [vmem:[%s15646_s1 + $0x2b0] sm:$0xff]   ;;  %v11016_v5 = vld [vmem:[%s15646_s1 + $0x2c0] sm:$0xff]  }
  0x15   :  { %v11007_v59 = vld [vmem:[%s15647_s0 + $0x218] ss:$84 sps:$4 sm:$0xff]   ;;  %v11014_v2 = vld [vmem:[%s15647_s0 + $0x2a0] ss:$84 sps:$4 sm:$0xff]   ;;  %v11023_v10 = vld [vmem:[%s15647_s0 + $0x348] ss:$84 sps:$4 sm:$0xff]  }
  0x16   :  { %5490 = vmatpush1.bf16.msra.mxu1 %v10954_v11  ;;  %v11065_v60 = vld [vmem:[%s15646_s1 + $0xa8] sm:$0xff]   ;;  %v11010_v61 = vld [vmem:[%s15647_s0 + $0x2a4] ss:$84 sps:$4 sm:$0xff]   ;;  %v11079_v3 = vld [vmem:[%s15646_s1 + $0xb0] sm:$0xff]  }
  0x17   :  { %6646 = vmatpush1.bf16.msra.mxu0 %v10955_v12  ;;  %5491 = vmatprep.subr.bf16.mxu1 %v12243_v0  ;;  %v11012_v63 = vld [vmem:[%s15647_s0 + $0x2c4] ss:$84 sps:$4 sm:$0xff]   ;;  %v11015_v4 = vld [vmem:[%s15647_s0 + $0x2c0] ss:$84 sps:$4 sm:$0xff]   ;;  %v11018_v8 = vld [vmem:[%s15646_s1 + $0x2c8] sm:$0xff]  }
  0x18   :  { %6647 = vmatprep.subr.bf16.mxu0 %v12243_v0  ;;  %v11009_v1 = vld [vmem:[%s15646_s1 + $0x2b8] sm:$0xff]   ;;  %v11019_v6 = vld [vmem:[%s15647_s0 + $0x34c] ss:$84 sps:$4 sm:$0xff]   ;;  %v11025_v12 = vld [vmem:[%s15646_s1 + $0x2d0] sm:$0xff]  }
  0x19   :  { %v11021_v7 = vld [vmem:[%s15647_s0 + $0x36c] ss:$84 sps:$4 sm:$0xff]   ;;  %v11093_v9 = vld [vmem:[%s15646_s1 + $0xb8] sm:$0xff]  }
  0x1a   :  { %5492 = vmatpush1.bf16.msra.mxu1 %v10956_v13  ;;  %v11024_v11 = vld [vmem:[%s15647_s0 + $0x368] ss:$84 sps:$4 sm:$0xff]   ;;  %v11033_v19 = vld [vmem:[%s15646_s1 + $0x2e0] sm:$0xff]  }
  0x1b   :  { %6648 = vmatpush1.bf16.msra.mxu0 %v10957_v14  ;;  %5493 = vmatprep.subr.bf16.mxu1 %v12243_v0  ;;  %v11027_v13 = vld [vmem:[%s15647_s0 + $0x3f4] ss:$84 sps:$4 sm:$0xff]   ;;  %v11038_v21 = vld [vmem:[%s15647_s0 + $0x4bc] ss:$84 sps:$4 sm:$0xff]  }
  0x1c   :  { %6649 = vmatprep.subr.bf16.mxu0 %v12243_v0  ;;  %v11029_v14 = vld [vmem:[%s15647_s0 + $0x414] ss:$84 sps:$4 sm:$0xff]  }
  0x1e   :  { %5494 = vmatpush1.bf16.msra.mxu1 %v10958_v15  ;;  %v11026_v15 = vld [vmem:[%s15646_s1 + $0x2d8] sm:$0xff]  }
  0x1f   :  { %6650 = vmatpush1.bf16.msra.mxu0 %v10959_v16  ;;  %5495 = vmatprep.subr.bf16.mxu1 %v12243_v0  ;;  %v11107_v16 = vld [vmem:[%s15646_s1 + $0xc0] sm:$0xff]  }
  0x20   :  { %6651 = vmatprep.subr.bf16.mxu0 %v12243_v0 }
  0x22   :  { %5496 = vmatpush1.bf16.msra.mxu1 %v10960_v17  ;;  %v11031_v17 = vld [vmem:[%s15647_s0 + $0x3f0] ss:$84 sps:$4 sm:$0xff]  }
  0x23   :  { %6652 = vmatpush1.bf16.msra.mxu0 %v10961_v18  ;;  %5497 = vmatprep.subr.bf16.mxu1 %v12243_v0  ;;  %v11032_v18 = vld [vmem:[%s15647_s0 + $0x410] ss:$84 sps:$4 sm:$0xff]  }
  0x24   :  { %6653 = vmatprep.subr.bf16.mxu0 %v12243_v0 }
  0x26   :  { %5498 = vmatpush1.bf16.msra.mxu1 %v10962_v20  ;;  %v11036_v20 = vld [vmem:[%s15647_s0 + $0x49c] ss:$84 sps:$4 sm:$0xff]  }
  0x27   :  { %6654 = vmatpush1.bf16.msra.mxu0 %v10963_v22  ;;  %5499 = vmatprep.subr.bf16.mxu1 %v12243_v0  ;;  %v11121_v22 = vld [vmem:[%s15646_s1 + $0xc8] sm:$0xff]  }
  0x28   :  { %6655 = vmatprep.subr.bf16.mxu0 %v12243_v0 }
  0x2a   :  { %5500 = vmatpush1.bf16.msra.mxu1 %v10964_v23  ;;  %v11035_v23 = vld [vmem:[%s15646_s1 + $0x2e8] sm:$0xff]  }
  0x2b   :  { %6656 = vmatpush1.bf16.msra.mxu0 %v10965_v24  ;;  %5501 = vmatprep.subr.bf16.mxu1 %v12243_v0  ;;  %v11040_v24 = vld [vmem:[%s15647_s0 + $0x498] ss:$84 sps:$4 sm:$0xff]  }
  0x2c   :  { %6657 = vmatprep.subr.bf16.mxu0 %v12243_v0 }
  0x2e   :  { %5502 = vmatpush1.bf16.msra.mxu1 %v10966_v25  ;;  %v11041_v25 = vld [vmem:[%s15647_s0 + $0x4b8] ss:$84 sps:$4 sm:$0xff]  }
  0x2f   :  { %6658 = vmatpush1.bf16.msra.mxu0 %v10967_v26  ;;  %5503 = vmatprep.subr.bf16.mxu1 %v12243_v0  ;;  %v11044_v26 = vld [vmem:[%s15647_s0 + $0x544] ss:$84 sps:$4 sm:$0xff]  }
  0x30   :  { %6659 = vmatprep.subr.bf16.mxu0 %v12243_v0 }
  0x32   :  { %5504 = vmatpush1.bf16.msra.mxu1 %v10968_v27  ;;  %v11042_v27 = vld [vmem:[%s15646_s1 + $0x2f0] sm:$0xff]  }
  0x33   :  { %6660 = vmatpush1.bf16.msra.mxu0 %v10969_v28  ;;  %5505 = vmatprep.subr.bf16.mxu1 %v12243_v0  ;;  %v11048_v28 = vld [vmem:[%s15647_s0 + $0x2c] ss:$84 sps:$4 sm:$0xff]  }
  0x34   :  { %6661 = vmatprep.subr.bf16.mxu0 %v12243_v0 }
  0x36   :  { %5506 = vmatpush1.bf16.msra.mxu1 %v10970_v29  ;;  %v11135_v29 = vld [vmem:[%s15646_s1 + $0xd0] sm:$0xff]  }
  0x37   :  { %6662 = vmatpush1.bf16.msra.mxu0 %v10971_v30  ;;  %5507 = vmatprep.subr.bf16.mxu1 %v12243_v0  ;;  %v11043_v30 = vld [vmem:[%s15646_s1 + $0x2f8] sm:$0xff]  }
  0x38   :  { %6663 = vmatprep.subr.bf16.mxu0 %v12243_v0 }
  0x3a   :  { %5508 = vmatpush1.bf16.msra.mxu1 %v10972_v31  ;;  %v11046_v31 = vld [vmem:[%s15647_s0 + $0x28] ss:$84 sps:$4 sm:$0xff]  }
  0x3b   :  { %6664 = vmatpush1.bf16.msra.mxu0 %v10973_v32  ;;  %5509 = vmatprep.subr.bf16.mxu1 %v12243_v0  ;;  %v11049_v32 = vld [vmem:[%s15647_s0 + $0x540] ss:$84 sps:$4 sm:$0xff]  }
  0x3c   :  { %6665 = vmatprep.subr.bf16.mxu0 %v12243_v0 }
  0x3e   :  { %5510 = vmatpush1.bf16.msra.mxu1 %v10974_v33  ;;  %v11050_v33 = vld [vmem:[%s15646_s1 + $0x300] sm:$0xff]  }
  0x3f   :  { %6666 = vmatpush1.bf16.msra.mxu0 %v10975_v34  ;;  %5768 = vmatprep.subr.bf16.mxu1 %v12243_v0  ;;  %v11052_v34 = vld [vmem:[%s15647_s0 + $0x5ec] ss:$84 sps:$4 sm:$0xff]  }
  0x40   :  { %6924 = vmatprep.subr.bf16.mxu0 %v12243_v0 }
  0x41   :  { %5512 = vmatmul.mubr.bf16.vlgmr.msra.gmra.mrb[0].mxu1 %v10976_v35  ;;  %v11054_v35 = vld [vmem:[%s15647_s0 + $0xd4] ss:$84 sps:$4 sm:$0xff]  }
  0x42   :  { %6668 = vmatmul.mubr.bf16.vlgmr.msra.gmra.mrb[0].mxu0 %v10979_v36  ;;  %5769 = vmatpush1.bf16.msra.mxu1 %v10983_v38  ;;  %v11149_v36 = vld [vmem:[%s15646_s1 + $0xd8] sm:$0xff]  }
  0x43   :  { %6925 = vmatpush1.bf16.msra.mxu0 %v10982_v37  ;;  %5519 = vmatprep.mubr.bf16.mxu1 %v10985_v39  ;;  %v11064_v37 = vld [vmem:[%s15646_s1 + $0x308] sm:$0xff]   ;;  %v11057_v39 = vld [vmem:[%s15647_s0 + $0xd0] ss:$84 sps:$4 sm:$0xff]  }
  0x44   :  { %6926 = vmatprep.subr.bf16.mxu0 %v12243_v0  ;;  %6675 = vmatprep.mubr.bf16.mxu0 %v10987_v40  ;;  %v11056_v38 = vld [vmem:[%s15647_s0 + $0x5e8] ss:$84 sps:$4 sm:$0xff]  }
  0x45   :  { %5770 = vmatprep.subr.bf16.mxu1 %v12243_v0  ;;  %v11058_v40 = vld [vmem:[%s15647_s0 + $0x694] ss:$84 sps:$4 sm:$0xff]  }
  0x46   :  { %5771 = vmatpush1.bf16.msra.mxu1 %v11000_v41  ;;  %v11060_v41 = vld [vmem:[%s15647_s0 + $0x17c] ss:$84 sps:$4 sm:$0xff]  }
  0x47   :  { %6927 = vmatpush1.bf16.msra.mxu0 %v10984_v42  ;;  %5772 = vmatprep.subr.bf16.mxu1 %v12243_v0  ;;  %v11078_v42 = vld [vmem:[%s15646_s1 + $0x310] sm:$0xff]  }
  0x48   :  { %6928 = vmatprep.subr.bf16.mxu0 %v12243_v0 }
  0x49   :  { %5520 = vmatmul.mubr.bf16.gmra.mrb[4].mxu1 %v10989_v43  ;;  %v11163_v43 = vld [vmem:[%s15646_s1 + $0xe0] sm:$0xff]  }
  0x4a   :  { %6676 = vmatmul.mubr.bf16.gmra.mrb[4].mxu0 %v10990_v44  ;;  %5527 = vmatprep.mubr.bf16.mxu1 %v10993_v46  ;;  %v11062_v44 = vld [vmem:[%s15647_s0 + $0x690] ss:$84 sps:$4 sm:$0xff]   ;;  %v11063_v46 = vld [vmem:[%s15647_s0 + $0x178] ss:$84 sps:$4 sm:$0xff]  }
  0x4b   :  { %6929 = vmatpush1.bf16.msra.mxu0 %v10991_v45  ;;  %6683 = vmatprep.mubr.bf16.mxu0 %v10995_v47  ;;  %v11092_v45 = vld [vmem:[%s15646_s1 + $0x318] sm:$0xff]  }
  0x4c   :  { %6930 = vmatprep.subr.bf16.mxu0 %v12243_v0  ;;  %5773 = vmatpush1.bf16.msra.mxu1 %v11017_v48  ;;  %v11066_v47 = vld [vmem:[%s15647_s0 + $0x73c] ss:$84 sps:$4 sm:$0xff]   ;;  %v11068_v48 = vld [vmem:[%s15647_s0 + $0x224] ss:$84 sps:$4 sm:$0xff]  }
  0x4d   :  { %5774 = vmatprep.subr.bf16.mxu1 %v12243_v0 }
  0x4f   :  { %6931 = vmatpush1.bf16.msra.mxu0 %v10992_v49  ;;  %v11106_v49 = vld [vmem:[%s15646_s1 + $0x320] sm:$0xff]  }
  0x50   :  { %6932 = vmatprep.subr.bf16.mxu0 %v12243_v0  ;;  %5775 = vmatpush1.bf16.msra.mxu1 %v11034_v52  ;;  %v11120_v52 = vld [vmem:[%s15646_s1 + $0x328] sm:$0xff]  }
  0x51   :  { %5528 = vmatmul.mubr.bf16.gmra.mrb[8].mxu1 %v10997_v50  ;;  %5776 = vmatprep.subr.bf16.mxu1 %v12243_v0  ;;  %v11177_v50 = vld [vmem:[%s15646_s1 + $0xe8] sm:$0xff]  }
  0x52   :  { %6684 = vmatmul.mubr.bf16.gmra.mrb[8].mxu0 %v10998_v51  ;;  %5535 = vmatprep.mubr.bf16.mxu1 %v11002_v54  ;;  %v11070_v51 = vld [vmem:[%s15647_s0 + $0x738] ss:$84 sps:$4 sm:$0xff]  }
  0x53   :  { %6933 = vmatpush1.bf16.msra.mxu0 %v10999_v53  ;;  %6691 = vmatprep.mubr.bf16.mxu0 %v11004_v55  ;;  %v11071_v53 = vld [vmem:[%s15647_s0 + $0x220] ss:$84 sps:$4 sm:$0xff]   ;;  %v11072_v54 = vld [vmem:[%s15647_s0 + $0x7e4] ss:$84 sps:$4 sm:$0xff]  }
  0x54   :  { %6934 = vmatprep.subr.bf16.mxu0 %v12243_v0  ;;  %5777 = vmatpush1.bf16.msra.mxu1 %v11051_v56  ;;  %v11074_v55 = vld [vmem:[%s15647_s0 + $0x2cc] ss:$84 sps:$4 sm:$0xff]   ;;  %v11134_v56 = vld [vmem:[%s15646_s1 + $0x330] sm:$0xff]  }
  0x55   :  { %5778 = vmatprep.subr.bf16.mxu1 %v12243_v0 }
  0x57   :  { %6935 = vmatpush1.bf16.msra.mxu0 %v11001_v57  ;;  %v11076_v57 = vld [vmem:[%s15647_s0 + $0x7e0] ss:$84 sps:$4 sm:$0xff]  }
  0x58   :  { %6936 = vmatprep.subr.bf16.mxu0 %v12243_v0  ;;  %5779 = vmatpush1.bf16.msra.mxu1 %v11065_v60  ;;  %v11080_v60 = vld [vmem:[%s15647_s0 + $0x88c] ss:$84 sps:$4 sm:$0xff]  }
  0x59   :  { %5536 = vmatmul.mubr.bf16.gmra.mrb[12].mxu1 %v11006_v58  ;;  %5780 = vmatprep.subr.bf16.mxu1 %v12243_v0  ;;  %v11148_v58 = vld [vmem:[%s15646_s1 + $0x338] sm:$0xff]  }
  0x5a   :  { %6692 = vmatmul.mubr.bf16.gmra.mrb[12].mxu0 %v11007_v59  ;;  %5543 = vmatprep.mubr.bf16.mxu1 %v11010_v61  ;;  %v11077_v59 = vld [vmem:[%s15647_s0 + $0x2c8] ss:$84 sps:$4 sm:$0xff]  }
  0x5b   :  { %6937 = vmatpush1.bf16.msra.mxu0 %v11008_v62  ;;  %6699 = vmatprep.mubr.bf16.mxu0 %v11012_v63  ;;  %v11082_v61 = vld [vmem:[%s15647_s0 + $0x374] ss:$84 sps:$4 sm:$0xff]   ;;  %v11162_v62 = vld [vmem:[%s15646_s1 + $0x340] sm:$0xff]  }
  0x5c   :  { %6938 = vmatprep.subr.bf16.mxu0 %v12243_v0  ;;  %5781 = vmatpush1.bf16.msra.mxu1 %v11079_v3  ;;  %v11191_v63 = vld [vmem:[%s15646_s1 + $0xf0] sm:$0xff]  }
  0x5d   :  { %5782 = vmatprep.subr.bf16.mxu1 %v12243_v0  ;;  %v11085_v3 = vld [vmem:[%s15647_s0 + $0x370] ss:$84 sps:$4 sm:$0xff]  }
  0x5f   :  { %6939 = vmatpush1.bf16.msra.mxu0 %v11009_v1  ;;  %v11084_v1 = vld [vmem:[%s15647_s0 + $0x888] ss:$84 sps:$4 sm:$0xff]  }
  0x60   :  { %6940 = vmatprep.subr.bf16.mxu0 %v12243_v0  ;;  %5783 = vmatpush1.bf16.msra.mxu1 %v11093_v9  ;;  %v11094_v9 = vld [vmem:[%s15647_s0 + $0x9dc] ss:$84 sps:$4 sm:$0xff]  }
  0x61   :  { %5544 = vmatmul.mubr.bf16.gmra.mrb[16].mxu1 %v11014_v2  ;;  %5784 = vmatprep.subr.bf16.mxu1 %v12243_v0  ;;  %v11176_v2 = vld [vmem:[%s15646_s1 + $0x348] sm:$0xff]  }
  0x62   :  { %6700 = vmatmul.mubr.bf16.gmra.mrb[16].mxu0 %v11015_v4  ;;  %5551 = vmatprep.mubr.bf16.mxu1 %v11019_v6  ;;  %v11086_v4 = vld [vmem:[%s15647_s0 + $0x934] ss:$84 sps:$4 sm:$0xff]  }
  0x63   :  { %6941 = vmatpush1.bf16.msra.mxu0 %v11016_v5  ;;  %6707 = vmatprep.mubr.bf16.mxu0 %v11021_v7  ;;  %v11088_v5 = vld [vmem:[%s15647_s0 + $0x41c] ss:$84 sps:$4 sm:$0xff]  }
  0x64   :  { %6942 = vmatprep.subr.bf16.mxu0 %v12243_v0  ;;  %5785 = vmatpush1.bf16.msra.mxu1 %v11107_v16  ;;  %v11190_v6 = vld [vmem:[%s15646_s1 + $0x350] sm:$0xff]   ;;  %v11102_v16 = vld [vmem:[%s15647_s0 + $0x56c] ss:$84 sps:$4 sm:$0xff]  }
  0x65   :  { %5786 = vmatprep.subr.bf16.mxu1 %v12243_v0  ;;  %v11090_v7 = vld [vmem:[%s15647_s0 + $0x930] ss:$84 sps:$4 sm:$0xff]  }
  0x67   :  { %6943 = vmatpush1.bf16.msra.mxu0 %v11018_v8  ;;  %v11091_v8 = vld [vmem:[%s15647_s0 + $0x418] ss:$84 sps:$4 sm:$0xff]  }
  0x68   :  { %6944 = vmatprep.subr.bf16.mxu0 %v12243_v0  ;;  %5787 = vmatpush1.bf16.msra.mxu1 %v11121_v22  ;;  %v11112_v22 = vld [vmem:[%s15647_s0 + $0xb28] ss:$84 sps:$4 sm:$0xff]  }
  0x69   :  { %5552 = vmatmul.mubr.bf16.gmra.mrb[20].mxu1 %v11023_v10  ;;  %5788 = vmatprep.subr.bf16.mxu1 %v12243_v0  ;;  %v11096_v10 = vld [vmem:[%s15647_s0 + $0x4c4] ss:$84 sps:$4 sm:$0xff]  }
  0x6a   :  { %6708 = vmatmul.mubr.bf16.gmra.mrb[20].mxu0 %v11024_v11  ;;  %5559 = vmatprep.mubr.bf16.mxu1 %v11027_v13  ;;  %v11204_v11 = vld [vmem:[%s15646_s1 + $0x358] sm:$0xff]  }
  0x6b   :  { %6945 = vmatpush1.bf16.msra.mxu0 %v11025_v12  ;;  %6715 = vmatprep.mubr.bf16.mxu0 %v11029_v14  ;;  %v11205_v12 = vld [vmem:[%s15646_s1 + $0xf8] sm:$0xff]   ;;  %v11099_v14 = vld [vmem:[%s15647_s0 + $0x4c0] ss:$84 sps:$4 sm:$0xff]  }
  0x6c   :  { %6946 = vmatprep.subr.bf16.mxu0 %v12243_v0  ;;  %5789 = vmatpush1.bf16.msra.mxu1 %v11135_v29  ;;  %v11098_v13 = vld [vmem:[%s15647_s0 + $0x9d8] ss:$84 sps:$4 sm:$0xff]  }
  0x6d   :  { %5790 = vmatprep.subr.bf16.mxu1 %v12243_v0  ;;  %v11124_v29 = vld [vmem:[%s15647_s0 + $0x764] ss:$84 sps:$4 sm:$0xff]  }
  0x6f   :  { %6947 = vmatpush1.bf16.msra.mxu0 %v11026_v15  ;;  %v11100_v15 = vld [vmem:[%s15647_s0 + $0xa84] ss:$84 sps:$4 sm:$0xff]  }
  0x70   :  { %6948 = vmatprep.subr.bf16.mxu0 %v12243_v0  ;;  %5791 = vmatpush1.bf16.msra.mxu1 %v11149_v36  ;;  %v11133_v36 = vld [vmem:[%s15647_s0 + $0x808] ss:$84 sps:$4 sm:$0xff]  }
  0x71   :  { %5560 = vmatmul.mubr.bf16.gmra.mrb[24].mxu1 %v11031_v17  ;;  %5792 = vmatprep.subr.bf16.mxu1 %v12243_v0  ;;  %v11104_v17 = vld [vmem:[%s15647_s0 + $0xa80] ss:$84 sps:$4 sm:$0xff]  }
  0x72   :  { %6716 = vmatmul.mubr.bf16.gmra.mrb[24].mxu0 %v11032_v18  ;;  %5567 = vmatprep.mubr.bf16.mxu1 %v11036_v20  ;;  %v11105_v18 = vld [vmem:[%s15647_s0 + $0x568] ss:$84 sps:$4 sm:$0xff]  }
  0x73   :  { %6949 = vmatpush1.bf16.msra.mxu0 %v11033_v19  ;;  %6723 = vmatprep.mubr.bf16.mxu0 %v11038_v21  ;;  %v11108_v19 = vld [vmem:[%s15647_s0 + $0xb2c] ss:$84 sps:$4 sm:$0xff]   ;;  %v11110_v20 = vld [vmem:[%s15647_s0 + $0x614] ss:$84 sps:$4 sm:$0xff]  }
  0x74   :  { %6950 = vmatprep.subr.bf16.mxu0 %v12243_v0  ;;  %5793 = vmatpush1.bf16.msra.mxu1 %v11163_v43  ;;  %v11218_v21 = vld [vmem:[%s15646_s1 + $0x360] sm:$0xff]   ;;  %v11144_v43 = vld [vmem:[%s15647_s0 + $0x95c] ss:$84 sps:$4 sm:$0xff]  }
  0x75   :  { %5794 = vmatprep.subr.bf16.mxu1 %v12243_v0 }
  0x77   :  { %6951 = vmatpush1.bf16.msra.mxu0 %v11035_v23  ;;  %v11113_v23 = vld [vmem:[%s15647_s0 + $0x610] ss:$84 sps:$4 sm:$0xff]  }
  0x78   :  { %6952 = vmatprep.subr.bf16.mxu0 %v12243_v0  ;;  %5795 = vmatpush1.bf16.msra.mxu1 %v11177_v50  ;;  %v11155_v50 = vld [vmem:[%s15647_s0 + $0xa00] ss:$84 sps:$4 sm:$0xff]  }
  0x79   :  { %5568 = vmatmul.mubr.bf16.gmra.mrb[28].mxu1 %v11040_v24  ;;  %5796 = vmatprep.subr.bf16.mxu1 %v12243_v0  ;;  %v11114_v24 = vld [vmem:[%s15647_s0 + $0xbd4] ss:$84 sps:$4 sm:$0xff]  }
  0x7a   :  { %6724 = vmatmul.mubr.bf16.gmra.mrb[28].mxu0 %v11041_v25  ;;  %5575 = vmatprep.mubr.bf16.mxu1 %v11044_v26  ;;  %v11116_v25 = vld [vmem:[%s15647_s0 + $0x6bc] ss:$84 sps:$4 sm:$0xff]  }
  0x7b   :  { %6953 = vmatpush1.bf16.msra.mxu0 %v11042_v27  ;;  %6956 = vmatprep.mubr.bf16.mxu0 %v11048_v28  ;;  %v11118_v26 = vld [vmem:[%s15647_s0 + $0xbd0] ss:$84 sps:$4 sm:$0xff]   ;;  %v11119_v27 = vld [vmem:[%s15647_s0 + $0x6b8] ss:$84 sps:$4 sm:$0xff]  }
  0x7c   :  { %6954 = vmatprep.subr.bf16.mxu0 %v12243_v0  ;;  %5797 = vmatpush1.bf16.msra.mxu1 %v11191_v63  ;;  %v11122_v28 = vld [vmem:[%s15647_s0 + $0xc7c] ss:$84 sps:$4 sm:$0xff]  }
  0x7d   :  { %5798 = vmatprep.subr.bf16.mxu1 %v12243_v0  ;;  %v11178_v63 = vld [vmem:[%s15647_s0 + $0x11bc] ss:$84 sps:$4 sm:$0xff]  }
  0x7f   :  { %6955 = vmatpush1.bf16.msra.mxu0 %v11043_v30  ;;  %v11232_v30 = vld [vmem:[%s15646_s1 + $0x368] sm:$0xff]  }
  0x80   :  { %7213 = vmatprep.subr.bf16.mxu0 %v12243_v0  ;;  %5799 = vmatpush1.bf16.msra.mxu1 %v11205_v12  ;;  %v11198_v12 = vld [vmem:[%s15647_s0 + $0x13b4] ss:$84 sps:$4 sm:$0xff]  }
  0x81   :  { %5576 = vmatmul.mubr.bf16.gmra.mrb[32].mxu1 %v11049_v32  ;;  %6057 = vmatprep.subr.bf16.mxu1 %v12243_v0  ;;  %v11127_v32 = vld [vmem:[%s15647_s0 + $0x760] ss:$84 sps:$4 sm:$0xff]  }
  0x82   :  { %6957 = vmatmul.mubr.bf16.vlgmr.msra.gmra.mrb[0].mxu0 %v11046_v31  ;;  %5583 = vmatprep.mubr.bf16.mxu1 %v11052_v34  ;;  %v11126_v31 = vld [vmem:[%s15647_s0 + $0xc78] ss:$84 sps:$4 sm:$0xff]  }
  0x83   :  { %7214 = vmatpush1.bf16.msra.mxu0 %v11050_v33  ;;  %6964 = vmatprep.mubr.bf16.mxu0 %v11054_v35  ;;  %v11128_v33 = vld [vmem:[%s15647_s0 + $0xd24] ss:$84 sps:$4 sm:$0xff]   ;;  %v11130_v34 = vld [vmem:[%s15647_s0 + $0x80c] ss:$84 sps:$4 sm:$0xff]  }
  0x84   :  { %7215 = vmatprep.subr.bf16.mxu0 %v12243_v0  ;;  %v11132_v35 = vld [vmem:[%s15647_s0 + $0xd20] ss:$84 sps:$4 sm:$0xff]  }
  0x87   :  { %7216 = vmatpush1.bf16.msra.mxu0 %v11064_v37  ;;  %v11136_v37 = vld [vmem:[%s15647_s0 + $0xdcc] ss:$84 sps:$4 sm:$0xff]  }
  0x88   :  { %7217 = vmatprep.subr.bf16.mxu0 %v12243_v0 }
  0x89   :  { %5584 = vmatmul.mubr.bf16.gmra.mrb[36].mxu1 %v11056_v38  ;;  %v11138_v38 = vld [vmem:[%s15647_s0 + $0x8b4] ss:$84 sps:$4 sm:$0xff]  }
  0x8a   :  { %6965 = vmatmul.mubr.bf16.gmra.mrb[4].mxu0 %v11057_v39  ;;  %5591 = vmatprep.mubr.bf16.mxu1 %v11058_v40  ;;  %v11246_v39 = vld [vmem:[%s15646_s1 + $0x370] sm:$0xff]   ;;  %v11140_v40 = vld [vmem:[%s15647_s0 + $0xdc8] ss:$84 sps:$4 sm:$0xff]  }
  0x8b   :  { %6972 = vmatprep.mubr.bf16.mxu0 %v11060_v41  ;;  %7218 = vmatpush1.bf16.msra.mxu0 %v11078_v42  ;;  %v11141_v41 = vld [vmem:[%s15647_s0 + $0x8b0] ss:$84 sps:$4 sm:$0xff]   ;;  %v11142_v42 = vld [vmem:[%s15647_s0 + $0xe74] ss:$84 sps:$4 sm:$0xff]  }
  0x8c   :  { %7219 = vmatprep.subr.bf16.mxu0 %v12243_v0 }
  0x8f   :  { %7220 = vmatpush1.bf16.msra.mxu0 %v11092_v45  ;;  %v11147_v45 = vld [vmem:[%s15647_s0 + $0x958] ss:$84 sps:$4 sm:$0xff]  }
  0x90   :  { %7221 = vmatprep.subr.bf16.mxu0 %v12243_v0 }
  0x91   :  { %5592 = vmatmul.mubr.bf16.gmra.mrb[40].mxu1 %v11062_v44  ;;  %v11146_v44 = vld [vmem:[%s15647_s0 + $0xe70] ss:$84 sps:$4 sm:$0xff]  }
  0x92   :  { %6973 = vmatmul.mubr.bf16.gmra.mrb[8].mxu0 %v11063_v46  ;;  %5599 = vmatprep.mubr.bf16.mxu1 %v11066_v47  ;;  %v11150_v46 = vld [vmem:[%s15647_s0 + $0xf1c] ss:$84 sps:$4 sm:$0xff]   ;;  %v11152_v47 = vld [vmem:[%s15647_s0 + $0xa04] ss:$84 sps:$4 sm:$0xff]  }
  0x93   :  { %6980 = vmatprep.mubr.bf16.mxu0 %v11068_v48  ;;  %7222 = vmatpush1.bf16.msra.mxu0 %v11106_v49  ;;  %v11260_v48 = vld [vmem:[%s15646_s1 + $0x378] sm:$0xff]  }
  0x94   :  { %7223 = vmatprep.subr.bf16.mxu0 %v12243_v0  ;;  %v11154_v49 = vld [vmem:[%s15647_s0 + $0xf18] ss:$84 sps:$4 sm:$0xff]  }
  0x97   :  { %7224 = vmatpush1.bf16.msra.mxu0 %v11120_v52  ;;  %v11158_v52 = vld [vmem:[%s15647_s0 + $0xaac] ss:$84 sps:$4 sm:$0xff]  }
  0x98   :  { %7225 = vmatprep.subr.bf16.mxu0 %v12243_v0 }
  0x99   :  { %5600 = vmatmul.mubr.bf16.gmra.mrb[44].mxu1 %v11070_v51  ;;  %v11156_v51 = vld [vmem:[%s15647_s0 + $0xfc4] ss:$84 sps:$4 sm:$0xff]  }
  0x9a   :  { %6981 = vmatmul.mubr.bf16.gmra.mrb[12].mxu0 %v11071_v53  ;;  %5607 = vmatprep.mubr.bf16.mxu1 %v11072_v54  ;;  %v11160_v53 = vld [vmem:[%s15647_s0 + $0xfc0] ss:$84 sps:$4 sm:$0xff]   ;;  %v11161_v54 = vld [vmem:[%s15647_s0 + $0xaa8] ss:$84 sps:$4 sm:$0xff]  }
  0x9b   :  { %6988 = vmatprep.mubr.bf16.mxu0 %v11074_v55  ;;  %7226 = vmatpush1.bf16.msra.mxu0 %v11134_v56  ;;  %v11164_v55 = vld [vmem:[%s15647_s0 + $0x106c] ss:$84 sps:$4 sm:$0xff]   ;;  %v11166_v56 = vld [vmem:[%s15647_s0 + $0xb54] ss:$84 sps:$4 sm:$0xff]  }
  0x9c   :  { %7227 = vmatprep.subr.bf16.mxu0 %v12243_v0 }
  0x9f   :  { %7228 = vmatpush1.bf16.msra.mxu0 %v11148_v58  ;;  %v11169_v58 = vld [vmem:[%s15647_s0 + $0xb50] ss:$84 sps:$4 sm:$0xff]  }
  0xa0   :  { %7229 = vmatprep.subr.bf16.mxu0 %v12243_v0 }
  0xa1   :  { %5608 = vmatmul.mubr.bf16.gmra.mrb[48].mxu1 %v11076_v57  ;;  %v11168_v57 = vld [vmem:[%s15647_s0 + $0x1068] ss:$84 sps:$4 sm:$0xff]  }
  0xa2   :  { %6989 = vmatmul.mubr.bf16.gmra.mrb[16].mxu0 %v11077_v59  ;;  %5615 = vmatprep.mubr.bf16.mxu1 %v11080_v60  ;;  %v11170_v59 = vld [vmem:[%s15647_s0 + $0x1114] ss:$84 sps:$4 sm:$0xff]   ;;  %v11172_v60 = vld [vmem:[%s15647_s0 + $0xbfc] ss:$84 sps:$4 sm:$0xff]  }
  0xa3   :  { %6996 = vmatprep.mubr.bf16.mxu0 %v11082_v61  ;;  %7230 = vmatpush1.bf16.msra.mxu0 %v11162_v62  ;;  %v11174_v61 = vld [vmem:[%s15647_s0 + $0x1110] ss:$84 sps:$4 sm:$0xff]   ;;  %v11175_v62 = vld [vmem:[%s15647_s0 + $0xbf8] ss:$84 sps:$4 sm:$0xff]  }
  0xa4   :  { %7231 = vmatprep.subr.bf16.mxu0 %v12243_v0 }
  0xa7   :  { %7232 = vmatpush1.bf16.msra.mxu0 %v11176_v2  ;;  %v11182_v2 = vld [vmem:[%s15647_s0 + $0x11b8] ss:$84 sps:$4 sm:$0xff]  }
  0xa8   :  { %7233 = vmatprep.subr.bf16.mxu0 %v12243_v0 }
  0xa9   :  { %5616 = vmatmul.mubr.bf16.gmra.mrb[52].mxu1 %v11084_v1  ;;  %v11180_v1 = vld [vmem:[%s15647_s0 + $0xca4] ss:$84 sps:$4 sm:$0xff]  }
  0xaa   :  { %6997 = vmatmul.mubr.bf16.gmra.mrb[20].mxu0 %v11085_v3  ;;  %5623 = vmatprep.mubr.bf16.mxu1 %v11086_v4  ;;  %v11183_v3 = vld [vmem:[%s15647_s0 + $0xca0] ss:$84 sps:$4 sm:$0xff]   ;;  %v11184_v4 = vld [vmem:[%s15647_s0 + $0x1264] ss:$84 sps:$4 sm:$0xff]  }
  0xab   :  { %7004 = vmatprep.mubr.bf16.mxu0 %v11088_v5  ;;  %7234 = vmatpush1.bf16.msra.mxu0 %v11190_v6  ;;  %v11186_v5 = vld [vmem:[%s15647_s0 + $0xd4c] ss:$84 sps:$4 sm:$0xff]  }
  0xac   :  { %7235 = vmatprep.subr.bf16.mxu0 %v12243_v0  ;;  %v11188_v6 = vld [vmem:[%s15647_s0 + $0x1260] ss:$84 sps:$4 sm:$0xff]  }
  0xaf   :  { %7236 = vmatpush1.bf16.msra.mxu0 %v11204_v11  ;;  %v11197_v11 = vld [vmem:[%s15647_s0 + $0xdf0] ss:$84 sps:$4 sm:$0xff]  }
  0xb0   :  { %7237 = vmatprep.subr.bf16.mxu0 %v12243_v0 }
  0xb1   :  { %5624 = vmatmul.mubr.bf16.gmra.mrb[56].mxu1 %v11090_v7  ;;  %v11189_v7 = vld [vmem:[%s15647_s0 + $0xd48] ss:$84 sps:$4 sm:$0xff]  }
  0xb2   :  { %7005 = vmatmul.mubr.bf16.gmra.mrb[24].mxu0 %v11091_v8  ;;  %5631 = vmatprep.mubr.bf16.mxu1 %v11094_v9  ;;  %v11192_v8 = vld [vmem:[%s15647_s0 + $0x130c] ss:$84 sps:$4 sm:$0xff]   ;;  %v11194_v9 = vld [vmem:[%s15647_s0 + $0xdf4] ss:$84 sps:$4 sm:$0xff]  }
  0xb3   :  { %7012 = vmatprep.mubr.bf16.mxu0 %v11096_v10  ;;  %7238 = vmatpush1.bf16.msra.mxu0 %v11218_v21  ;;  %v11196_v10 = vld [vmem:[%s15647_s0 + $0x1308] ss:$84 sps:$4 sm:$0xff]   ;;  %v11215_v21 = vld [vmem:[%s15647_s0 + $0xfec] ss:$84 sps:$4 sm:$0xff]  }
  0xb4   :  { %7239 = vmatprep.subr.bf16.mxu0 %v12243_v0 }
  0xb7   :  { %7240 = vmatpush1.bf16.msra.mxu0 %v11232_v30  ;;  %v11226_v30 = vld [vmem:[%s15647_s0 + $0x15c] ss:$84 sps:$4 sm:$0xff]  }
  0xb8   :  { %7241 = vmatprep.subr.bf16.mxu0 %v12243_v0 }
  0xb9   :  { %5632 = vmatmul.mubr.bf16.gmra.mrb[60].mxu1 %v11098_v13  ;;  %v11200_v13 = vld [vmem:[%s15647_s0 + $0xe9c] ss:$84 sps:$4 sm:$0xff]  }
  0xba   :  { %7013 = vmatmul.mubr.bf16.gmra.mrb[28].mxu0 %v11099_v14  ;;  %5639 = vmatprep.mubr.bf16.mxu1 %v11100_v15  ;;  %v11202_v14 = vld [vmem:[%s15647_s0 + $0x13b0] ss:$84 sps:$4 sm:$0xff]   ;;  %v11203_v15 = vld [vmem:[%s15647_s0 + $0xe98] ss:$84 sps:$4 sm:$0xff]  }
  0xbb   :  { %7020 = vmatprep.mubr.bf16.mxu0 %v11102_v16  ;;  %7242 = vmatpush1.bf16.msra.mxu0 %v11246_v39  ;;  %v11206_v16 = vld [vmem:[%s15647_s0 + $0x145c] ss:$84 sps:$4 sm:$0xff]   ;;  %v11238_v39 = vld [vmem:[%s15647_s0 + $0x200] ss:$84 sps:$4 sm:$0xff]  }
  0xbc   :  { %7243 = vmatprep.subr.bf16.mxu0 %v12243_v0 }
  0xbf   :  { %7244 = vmatpush1.bf16.msra.mxu0 %v11260_v48  ;;  %v11248_v48 = vld [vmem:[%s15647_s0 + $0x354] ss:$84 sps:$4 sm:$0xff]  }
  0xc0   :  { %7502 = vmatprep.subr.bf16.mxu0 %v12243_v0 }
  0xc1   :  { %5640 = vmatmul.mubr.bf16.gmra.mrb[64].mxu1 %v11104_v17  ;;  %v11208_v17 = vld [vmem:[%s15647_s0 + $0xf44] ss:$84 sps:$4 sm:$0xff]  }
  0xc2   :  { %7021 = vmatmul.mubr.bf16.gmra.mrb[32].mxu0 %v11105_v18  ;;  %5647 = vmatprep.mubr.bf16.mxu1 %v11108_v19  ;;  %v11210_v18 = vld [vmem:[%s15647_s0 + $0x1458] ss:$84 sps:$4 sm:$0xff]   ;;  %v11211_v19 = vld [vmem:[%s15647_s0 + $0xf40] ss:$84 sps:$4 sm:$0xff]  }
  0xc3   :  { %7028 = vmatprep.mubr.bf16.mxu0 %v11110_v20  ;;  %v11214_v20 = vld [vmem:[%s15647_s0 + $0xc] ss:$84 sps:$4 sm:$0xff]  }
  0xc9   :  { %5648 = vmatmul.mubr.bf16.gmra.mrb[68].mxu1 %v11112_v22  ;;  %v11212_v22 = vld [vmem:[%s15647_s0 + $0x8] ss:$84 sps:$4 sm:$0xff]  }
  0xca   :  { %7029 = vmatmul.mubr.bf16.gmra.mrb[36].mxu0 %v11113_v23  ;;  %5655 = vmatprep.mubr.bf16.mxu1 %v11114_v24  ;;  %v11217_v23 = vld [vmem:[%s15647_s0 + $0xfe8] ss:$84 sps:$4 sm:$0xff]   ;;  %v11219_v24 = vld [vmem:[%s15646_s1 + $0x100] sm:$0xff]  }
  0xcb   :  { %7036 = vmatprep.mubr.bf16.mxu0 %v11116_v25  ;;  %v11220_v25 = vld [vmem:[%s15647_s0 + $0xb4] ss:$84 sps:$4 sm:$0xff]  }
  0xd1   :  { %5656 = vmatmul.mubr.bf16.gmra.mrb[72].mxu1 %v11118_v26  ;;  %v11222_v26 = vld [vmem:[%s15647_s0 + $0x1094] ss:$84 sps:$4 sm:$0xff]  }
  0xd2   :  { %7037 = vmatmul.mubr.bf16.gmra.mrb[40].mxu0 %v11119_v27  ;;  %5663 = vmatprep.mubr.bf16.mxu1 %v11122_v28  ;;  %v11233_v27 = vld [vmem:[%s15646_s1 + $0x108] sm:$0xff]   ;;  %v11224_v28 = vld [vmem:[%s15647_s0 + $0xb0] ss:$84 sps:$4 sm:$0xff]  }
  0xd3   :  { %7044 = vmatprep.mubr.bf16.mxu0 %v11124_v29  ;;  %v11225_v29 = vld [vmem:[%s15647_s0 + $0x1090] ss:$84 sps:$4 sm:$0xff]  }
  0xd9   :  { %5664 = vmatmul.mubr.bf16.gmra.mrb[76].mxu1 %v11126_v31  ;;  %v11228_v31 = vld [vmem:[%s15647_s0 + $0x113c] ss:$84 sps:$4 sm:$0xff]  }
  0xda   :  { %7045 = vmatmul.mubr.bf16.gmra.mrb[44].mxu0 %v11127_v32  ;;  %5671 = vmatprep.mubr.bf16.mxu1 %v11128_v33  ;;  %v11247_v32 = vld [vmem:[%s15646_s1 + $0x110] sm:$0xff]   ;;  %v11230_v33 = vld [vmem:[%s15647_s0 + $0x158] ss:$84 sps:$4 sm:$0xff]  }
  0xdb   :  { %7052 = vmatprep.mubr.bf16.mxu0 %v11130_v34  ;;  %v11261_v34 = vld [vmem:[%s15646_s1 + $0x118] sm:$0xff]  }
  0xe1   :  { %5672 = vmatmul.mubr.bf16.gmra.mrb[80].mxu1 %v11132_v35  ;;  %v11231_v35 = vld [vmem:[%s15647_s0 + $0x1138] ss:$84 sps:$4 sm:$0xff]  }
  0xe2   :  { %7053 = vmatmul.mubr.bf16.gmra.mrb[48].mxu0 %v11133_v36  ;;  %5679 = vmatprep.mubr.bf16.mxu1 %v11136_v37  ;;  %v11234_v36 = vld [vmem:[%s15647_s0 + $0x204] ss:$84 sps:$4 sm:$0xff]  }
  0xe3   :  { %7060 = vmatprep.mubr.bf16.mxu0 %v11138_v38  ;;  %v11236_v37 = vld [vmem:[%s15647_s0 + $0x11e4] ss:$84 sps:$4 sm:$0xff]  }
  0xe4   :  { %v11275_v38 = vld [vmem:[%s15646_s1 + $0x120] sm:$0xff]  }
  0xe9   :  { %5680 = vmatmul.mubr.bf16.gmra.mrb[84].mxu1 %v11140_v40  ;;  %v11289_v40 = vld [vmem:[%s15646_s1 + $0x128] sm:$0xff]  }
  0xea   :  { %7061 = vmatmul.mubr.bf16.gmra.mrb[52].mxu0 %v11141_v41  ;;  %5687 = vmatprep.mubr.bf16.mxu1 %v11142_v42  ;;  %v11239_v41 = vld [vmem:[%s15647_s0 + $0x11e0] ss:$84 sps:$4 sm:$0xff]  }
  0xeb   :  { %7068 = vmatprep.mubr.bf16.mxu0 %v11144_v43  ;;  %v11240_v42 = vld [vmem:[%s15647_s0 + $0x2ac] ss:$84 sps:$4 sm:$0xff]  }
  0xec   :  { %v11242_v43 = vld [vmem:[%s15647_s0 + $0x128c] ss:$84 sps:$4 sm:$0xff]  }
  0xf1   :  { %5688 = vmatmul.mubr.bf16.gmra.mrb[88].mxu1 %v11146_v44  ;;  %v11303_v44 = vld [vmem:[%s15646_s1 + $0x130] sm:$0xff]  }
  0xf2   :  { %7069 = vmatmul.mubr.bf16.gmra.mrb[56].mxu0 %v11147_v45  ;;  %5695 = vmatprep.mubr.bf16.mxu1 %v11150_v46  ;;  %v11244_v45 = vld [vmem:[%s15647_s0 + $0x2a8] ss:$84 sps:$4 sm:$0xff]  }
  0xf3   :  { %7076 = vmatprep.mubr.bf16.mxu0 %v11152_v47  ;;  %v11317_v46 = vld [vmem:[%s15646_s1 + $0x138] sm:$0xff]  }
  0xf4   :  { %v11245_v47 = vld [vmem:[%s15647_s0 + $0x1288] ss:$84 sps:$4 sm:$0xff]  }
  0xf9   :  { %5696 = vmatmul.mubr.bf16.gmra.mrb[92].mxu1 %v11154_v49  ;;  %v11250_v49 = vld [vmem:[%s15647_s0 + $0x1334] ss:$84 sps:$4 sm:$0xff]  }
  0xfa   :  { %7077 = vmatmul.mubr.bf16.gmra.mrb[60].mxu0 %v11155_v50  ;;  %5703 = vmatprep.mubr.bf16.mxu1 %v11156_v51  ;;  %v11331_v50 = vld [vmem:[%s15646_s1 + $0x140] sm:$0xff]  }
  0xfb   :  { %7084 = vmatprep.mubr.bf16.mxu0 %v11158_v52  ;;  %v11252_v51 = vld [vmem:[%s15647_s0 + $0x350] ss:$84 sps:$4 sm:$0xff]   ;;  %v11345_v52 = vld [vmem:[%s15646_s1 + $0x148] sm:$0xff]  }
 0x101   :  { %5704 = vmatmul.mubr.bf16.gmra.mrb[96].mxu1 %v11160_v53  ;;  %v11253_v53 = vld [vmem:[%s15647_s0 + $0x1330] ss:$84 sps:$4 sm:$0xff]  }
 0x102   :  { %7085 = vmatmul.mubr.bf16.gmra.mrb[64].mxu0 %v11161_v54  ;;  %5711 = vmatprep.mubr.bf16.mxu1 %v11164_v55  ;;  %v11254_v54 = vld [vmem:[%s15647_s0 + $0x3fc] ss:$84 sps:$4 sm:$0xff]  }
 0x103   :  { %7092 = vmatprep.mubr.bf16.mxu0 %v11166_v56  ;;  %v11256_v55 = vld [vmem:[%s15647_s0 + $0x13dc] ss:$84 sps:$4 sm:$0xff]  }
 0x104   :  { %v11359_v56 = vld [vmem:[%s15646_s1 + $0x150] sm:$0xff]  }
 0x109   :  { %5712 = vmatmul.mubr.bf16.gmra.mrb[100].mxu1 %v11168_v57  ;;  %v11258_v57 = vld [vmem:[%s15647_s0 + $0x3f8] ss:$84 sps:$4 sm:$0xff]  }
 0x10a   :  { %7093 = vmatmul.mubr.bf16.gmra.mrb[68].mxu0 %v11169_v58  ;;  %5719 = vmatprep.mubr.bf16.mxu1 %v11170_v59  ;;  %v11259_v58 = vld [vmem:[%s15647_s0 + $0x13d8] ss:$84 sps:$4 sm:$0xff]  }
 0x10b   :  { %7100 = vmatprep.mubr.bf16.mxu0 %v11172_v60  ;;  %v11262_v59 = vld [vmem:[%s15647_s0 + $0x4a4] ss:$84 sps:$4 sm:$0xff]  }
 0x10c   :  { %v11264_v60 = vld [vmem:[%s15647_s0 + $0x1484] ss:$84 sps:$4 sm:$0xff]  }
 0x111   :  { %5720 = vmatmul.mubr.bf16.gmra.mrb[104].mxu1 %v11174_v61  ;;  %v11373_v61 = vld [vmem:[%s15646_s1 + $0x158] sm:$0xff]  }
 0x112   :  { %7101 = vmatmul.mubr.bf16.gmra.mrb[72].mxu0 %v11175_v62  ;;  %5727 = vmatprep.mubr.bf16.mxu1 %v11178_v63  ;;  %v11266_v62 = vld [vmem:[%s15647_s0 + $0x4a0] ss:$84 sps:$4 sm:$0xff]  }
 0x113   :  { %7108 = vmatprep.mubr.bf16.mxu0 %v11180_v1  ;;  %v11267_v63 = vld [vmem:[%s15647_s0 + $0x1480] ss:$84 sps:$4 sm:$0xff]  }
 0x114   :  { %v11268_v1 = vld [vmem:[%s15647_s0 + $0x54c] ss:$84 sps:$4 sm:$0xff]  }
 0x119   :  { %5728 = vmatmul.mubr.bf16.gmra.mrb[108].mxu1 %v11182_v2  ;;  %v11272_v2 = vld [vmem:[%s15647_s0 + $0x34] ss:$84 sps:$4 sm:$0xff]  }
 0x11a   :  { %7109 = vmatmul.mubr.bf16.gmra.mrb[76].mxu0 %v11183_v3  ;;  %5735 = vmatprep.mubr.bf16.mxu1 %v11184_v4  ;;  %v11273_v3 = vld [vmem:[%s15647_s0 + $0x548] ss:$84 sps:$4 sm:$0xff]   ;;  %v11270_v4 = vld [vmem:[%s15647_s0 + $0x30] ss:$84 sps:$4 sm:$0xff]  }
 0x11b   :  { %7116 = vmatprep.mubr.bf16.mxu0 %v11186_v5  ;;  %v11276_v5 = vld [vmem:[%s15647_s0 + $0x5f4] ss:$84 sps:$4 sm:$0xff]  }
 0x121   :  { %5736 = vmatmul.mubr.bf16.gmra.mrb[112].mxu1 %v11188_v6  ;;  %v11274_v6 = vld [vmem:[%s15646_s1 + $0x380] sm:$0xff]  }
 0x122   :  { %7117 = vmatmul.mubr.bf16.gmra.mrb[80].mxu0 %v11189_v7  ;;  %5743 = vmatprep.mubr.bf16.mxu1 %v11192_v8  ;;  %v11278_v7 = vld [vmem:[%s15647_s0 + $0xdc] ss:$84 sps:$4 sm:$0xff]   ;;  %v11387_v8 = vld [vmem:[%s15646_s1 + $0x160] sm:$0xff]  }
 0x123   :  { %7124 = vmatprep.mubr.bf16.mxu0 %v11194_v9  ;;  %v11280_v9 = vld [vmem:[%s15647_s0 + $0x5f0] ss:$84 sps:$4 sm:$0xff]  }
 0x129   :  { %5744 = vmatmul.mubr.bf16.gmra.mrb[116].mxu1 %v11196_v10  ;;  %v11288_v10 = vld [vmem:[%s15646_s1 + $0x388] sm:$0xff]  }
 0x12a   :  { %7125 = vmatmul.mubr.bf16.gmra.mrb[84].mxu0 %v11197_v11  ;;  %5751 = vmatprep.mubr.bf16.mxu1 %v11198_v12  ;;  %v11281_v11 = vld [vmem:[%s15647_s0 + $0xd8] ss:$84 sps:$4 sm:$0xff]   ;;  %v11282_v12 = vld [vmem:[%s15647_s0 + $0x69c] ss:$84 sps:$4 sm:$0xff]  }
 0x12b   :  { %7132 = vmatprep.mubr.bf16.mxu0 %v11200_v13  ;;  %v11284_v13 = vld [vmem:[%s15647_s0 + $0x184] ss:$84 sps:$4 sm:$0xff]  }
 0x131   :  { %5752 = vmatmul.mubr.bf16.gmra.mrb[120].mxu1 %v11202_v14  ;;  %v11302_v14 = vld [vmem:[%s15646_s1 + $0x390] sm:$0xff]  }
 0x132   :  { %7133 = vmatmul.mubr.bf16.gmra.mrb[88].mxu0 %v11203_v15  ;;  %5759 = vmatprep.mubr.bf16.mxu1 %v11206_v16  ;;  %v11286_v15 = vld [vmem:[%s15647_s0 + $0x698] ss:$84 sps:$4 sm:$0xff]  }
 0x133   :  { %7140 = vmatprep.mubr.bf16.mxu0 %v11208_v17  ;;  %v11316_v16 = vld [vmem:[%s15646_s1 + $0x398] sm:$0xff]   ;;  %v11287_v17 = vld [vmem:[%s15647_s0 + $0x180] ss:$84 sps:$4 sm:$0xff]  }
 0x139   :  { %5760 = vmatmul.mubr.bf16.gmra.mrb[124].mxu1 %v11210_v18  ;;  %v11290_v18 = vld [vmem:[%s15647_s0 + $0x744] ss:$84 sps:$4 sm:$0xff]  }
 0x13a   :  { %7141 = vmatmul.mubr.bf16.gmra.mrb[92].mxu0 %v11211_v19  ;;  %5800 = vmatprep.mubr.bf16.mxu1 %v11214_v20  ;;  %v11292_v19 = vld [vmem:[%s15647_s0 + $0x22c] ss:$84 sps:$4 sm:$0xff]  }
 0x13b   :  { %7148 = vmatprep.mubr.bf16.mxu0 %v11215_v21  ;;  %v11330_v20 = vld [vmem:[%s15646_s1 + $0x3a0] sm:$0xff]   ;;  %v11401_v21 = vld [vmem:[%s15646_s1 + $0x168] sm:$0xff]  }
 0x141   :  { %5801 = vmatmul.mubr.bf16.vlgmr.msra.gmra.mrb[0].mxu1 %v11212_v22  ;;  %v11294_v22 = vld [vmem:[%s15647_s0 + $0x740] ss:$84 sps:$4 sm:$0xff]  }
 0x142   :  { %7149 = vmatmul.mubr.bf16.gmra.mrb[96].mxu0 %v11217_v23  ;;  %6058 = vmatpush1.bf16.msra.mxu1 %v11219_v24  ;;  %v11344_v23 = vld [vmem:[%s15646_s1 + $0x3a8] sm:$0xff]  }
 0x143   :  { %5808 = vmatprep.mubr.bf16.mxu1 %v11220_v25  ;;  %7156 = vmatprep.mubr.bf16.mxu0 %v11222_v26  ;;  %v11295_v24 = vld [vmem:[%s15647_s0 + $0x228] ss:$84 sps:$4 sm:$0xff]   ;;  %v11296_v25 = vld [vmem:[%s15647_s0 + $0x7ec] ss:$84 sps:$4 sm:$0xff]  }
 0x144   :  { %6059 = vmatprep.subr.bf16.mxu1 %v12243_v0  ;;  %v11298_v26 = vld [vmem:[%s15647_s0 + $0x2d4] ss:$84 sps:$4 sm:$0xff]  }
 0x146   :  { %6060 = vmatpush1.bf16.msra.mxu1 %v11233_v27  ;;  %v11358_v27 = vld [vmem:[%s15646_s1 + $0x3b0] sm:$0xff]  }
 0x147   :  { %6061 = vmatprep.subr.bf16.mxu1 %v12243_v0 }
 0x149   :  { %5809 = vmatmul.mubr.bf16.gmra.mrb[4].mxu1 %v11224_v28  ;;  %v11300_v28 = vld [vmem:[%s15647_s0 + $0x7e8] ss:$84 sps:$4 sm:$0xff]  }
 0x14a   :  { %7157 = vmatmul.mubr.bf16.gmra.mrb[100].mxu0 %v11225_v29  ;;  %5816 = vmatprep.mubr.bf16.mxu1 %v11226_v30  ;;  %v11372_v29 = vld [vmem:[%s15646_s1 + $0x3b8] sm:$0xff]   ;;  %v11301_v30 = vld [vmem:[%s15647_s0 + $0x2d0] ss:$84 sps:$4 sm:$0xff]  }
 0x14b   :  { %7164 = vmatprep.mubr.bf16.mxu0 %v11228_v31  ;;  %6062 = vmatpush1.bf16.msra.mxu1 %v11247_v32  ;;  %v11304_v31 = vld [vmem:[%s15647_s0 + $0x894] ss:$84 sps:$4 sm:$0xff]   ;;  %v11306_v32 = vld [vmem:[%s15647_s0 + $0x37c] ss:$84 sps:$4 sm:$0xff]  }
 0x14c   :  { %6063 = vmatprep.subr.bf16.mxu1 %v12243_v0 }
 0x14f   :  { %6064 = vmatpush1.bf16.msra.mxu1 %v11261_v34  ;;  %v11415_v34 = vld [vmem:[%s15646_s1 + $0x170] sm:$0xff]  }
 0x150   :  { %6065 = vmatprep.subr.bf16.mxu1 %v12243_v0 }
 0x151   :  { %5817 = vmatmul.mubr.bf16.gmra.mrb[8].mxu1 %v11230_v33  ;;  %v11386_v33 = vld [vmem:[%s15646_s1 + $0x3c0] sm:$0xff]  }
 0x152   :  { %7165 = vmatmul.mubr.bf16.gmra.mrb[104].mxu0 %v11231_v35  ;;  %5824 = vmatprep.mubr.bf16.mxu1 %v11234_v36  ;;  %v11308_v35 = vld [vmem:[%s15647_s0 + $0x890] ss:$84 sps:$4 sm:$0xff]   ;;  %v11400_v36 = vld [vmem:[%s15646_s1 + $0x3c8] sm:$0xff]  }
 0x153   :  { %7172 = vmatprep.mubr.bf16.mxu0 %v11236_v37  ;;  %6066 = vmatpush1.bf16.msra.mxu1 %v11275_v38  ;;  %v11309_v37 = vld [vmem:[%s15647_s0 + $0x378] ss:$84 sps:$4 sm:$0xff]   ;;  %v11310_v38 = vld [vmem:[%s15647_s0 + $0x93c] ss:$84 sps:$4 sm:$0xff]  }
 0x154   :  { %6067 = vmatprep.subr.bf16.mxu1 %v12243_v0 }
 0x157   :  { %6068 = vmatpush1.bf16.msra.mxu1 %v11289_v40  ;;  %v11414_v40 = vld [vmem:[%s15646_s1 + $0x3d0] sm:$0xff]  }
 0x158   :  { %6069 = vmatprep.subr.bf16.mxu1 %v12243_v0 }
 0x159   :  { %5825 = vmatmul.mubr.bf16.gmra.mrb[12].mxu1 %v11238_v39  ;;  %v11312_v39 = vld [vmem:[%s15647_s0 + $0x424] ss:$84 sps:$4 sm:$0xff]  }
 0x15a   :  { %7173 = vmatmul.mubr.bf16.gmra.mrb[108].mxu0 %v11239_v41  ;;  %5832 = vmatprep.mubr.bf16.mxu1 %v11240_v42  ;;  %v11314_v41 = vld [vmem:[%s15647_s0 + $0x938] ss:$84 sps:$4 sm:$0xff]   ;;  %v11315_v42 = vld [vmem:[%s15647_s0 + $0x420] ss:$84 sps:$4 sm:$0xff]  }
 0x15b   :  { %7180 = vmatprep.mubr.bf16.mxu0 %v11242_v43  ;;  %6070 = vmatpush1.bf16.msra.mxu1 %v11303_v44  ;;  %v11318_v43 = vld [vmem:[%s15647_s0 + $0x9e4] ss:$84 sps:$4 sm:$0xff]   ;;  %v11320_v44 = vld [vmem:[%s15647_s0 + $0x4cc] ss:$84 sps:$4 sm:$0xff]  }
 0x15c   :  { %6071 = vmatprep.subr.bf16.mxu1 %v12243_v0 }
 0x15f   :  { %6072 = vmatpush1.bf16.msra.mxu1 %v11317_v46  ;;  %v11429_v46 = vld [vmem:[%s15646_s1 + $0x178] sm:$0xff]  }
 0x160   :  { %6073 = vmatprep.subr.bf16.mxu1 %v12243_v0 }
 0x161   :  { %5833 = vmatmul.mubr.bf16.gmra.mrb[16].mxu1 %v11244_v45  ;;  %v11428_v45 = vld [vmem:[%s15646_s1 + $0x3d8] sm:$0xff]  }
 0x162   :  { %7181 = vmatmul.mubr.bf16.gmra.mrb[112].mxu0 %v11245_v47  ;;  %5840 = vmatprep.mubr.bf16.mxu1 %v11248_v48  ;;  %v11322_v47 = vld [vmem:[%s15647_s0 + $0x9e0] ss:$84 sps:$4 sm:$0xff]   ;;  %v11323_v48 = vld [vmem:[%s15647_s0 + $0x4c8] ss:$84 sps:$4 sm:$0xff]  }
 0x163   :  { %7188 = vmatprep.mubr.bf16.mxu0 %v11250_v49  ;;  %6074 = vmatpush1.bf16.msra.mxu1 %v11331_v50  ;;  %v11324_v49 = vld [vmem:[%s15647_s0 + $0xa8c] ss:$84 sps:$4 sm:$0xff]   ;;  %v11326_v50 = vld [vmem:[%s15647_s0 + $0x574] ss:$84 sps:$4 sm:$0xff]  }
 0x164   :  { %6075 = vmatprep.subr.bf16.mxu1 %v12243_v0 }
 0x167   :  { %6076 = vmatpush1.bf16.msra.mxu1 %v11345_v52  ;;  %v11329_v52 = vld [vmem:[%s15647_s0 + $0x570] ss:$84 sps:$4 sm:$0xff]  }
 0x168   :  { %6077 = vmatprep.subr.bf16.mxu1 %v12243_v0 }
 0x169   :  { %5841 = vmatmul.mubr.bf16.gmra.mrb[20].mxu1 %v11252_v51  ;;  %v11328_v51 = vld [vmem:[%s15647_s0 + $0xa88] ss:$84 sps:$4 sm:$0xff]  }
 0x16a   :  { %7189 = vmatmul.mubr.bf16.gmra.mrb[116].mxu0 %v11253_v53  ;;  %5848 = vmatprep.mubr.bf16.mxu1 %v11254_v54  ;;  %v11332_v53 = vld [vmem:[%s15647_s0 + $0xb34] ss:$84 sps:$4 sm:$0xff]   ;;  %v11334_v54 = vld [vmem:[%s15647_s0 + $0x61c] ss:$84 sps:$4 sm:$0xff]  }
 0x16b   :  { %7196 = vmatprep.mubr.bf16.mxu0 %v11256_v55  ;;  %6078 = vmatpush1.bf16.msra.mxu1 %v11359_v56  ;;  %v11442_v55 = vld [vmem:[%s15646_s1 + $0x3e0] sm:$0xff]  }
 0x16c   :  { %6079 = vmatprep.subr.bf16.mxu1 %v12243_v0  ;;  %v11336_v56 = vld [vmem:[%s15647_s0 + $0xb30] ss:$84 sps:$4 sm:$0xff]  }
 0x16f   :  { %6080 = vmatpush1.bf16.msra.mxu1 %v11373_v61  ;;  %v11343_v61 = vld [vmem:[%s15647_s0 + $0x6c0] ss:$84 sps:$4 sm:$0xff]  }
 0x170   :  { %6081 = vmatprep.subr.bf16.mxu1 %v12243_v0 }
 0x171   :  { %5849 = vmatmul.mubr.bf16.gmra.mrb[24].mxu1 %v11258_v57  ;;  %v11337_v57 = vld [vmem:[%s15647_s0 + $0x618] ss:$84 sps:$4 sm:$0xff]  }
 0x172   :  { %7197 = vmatmul.mubr.bf16.gmra.mrb[120].mxu0 %v11259_v58  ;;  %5856 = vmatprep.mubr.bf16.mxu1 %v11262_v59  ;;  %v11338_v58 = vld [vmem:[%s15647_s0 + $0xbdc] ss:$84 sps:$4 sm:$0xff]   ;;  %v11340_v59 = vld [vmem:[%s15647_s0 + $0x6c4] ss:$84 sps:$4 sm:$0xff]  }
 0x173   :  { %7204 = vmatprep.mubr.bf16.mxu0 %v11264_v60  ;;  %6082 = vmatpush1.bf16.msra.mxu1 %v11387_v8  ;;  %v11342_v60 = vld [vmem:[%s15647_s0 + $0xbd8] ss:$84 sps:$4 sm:$0xff]   ;;  %v11360_v8 = vld [vmem:[%s15647_s0 + $0xdd4] ss:$84 sps:$4 sm:$0xff]  }
 0x174   :  { %6083 = vmatprep.subr.bf16.mxu1 %v12243_v0 }
 0x177   :  { %6084 = vmatpush1.bf16.msra.mxu1 %v11401_v21  ;;  %v11379_v21 = vld [vmem:[%s15647_s0 + $0xa08] ss:$84 sps:$4 sm:$0xff]  }
 0x178   :  { %6085 = vmatprep.subr.bf16.mxu1 %v12243_v0 }
 0x179   :  { %5857 = vmatmul.mubr.bf16.gmra.mrb[28].mxu1 %v11266_v62  ;;  %v11346_v62 = vld [vmem:[%s15647_s0 + $0xc84] ss:$84 sps:$4 sm:$0xff]  }
 0x17a   :  { %7205 = vmatmul.mubr.bf16.gmra.mrb[124].mxu0 %v11267_v63  ;;  %5864 = vmatprep.mubr.bf16.mxu1 %v11268_v1  ;;  %v11348_v63 = vld [vmem:[%s15647_s0 + $0x76c] ss:$84 sps:$4 sm:$0xff]  }
 0x17b   :  { %7245 = vmatprep.mubr.bf16.mxu0 %v11272_v2  ;;  %6086 = vmatpush1.bf16.msra.mxu1 %v11415_v34  ;;  %v11456_v1 = vld [vmem:[%s15646_s1 + $0x3e8] sm:$0xff]   ;;  %v11350_v2 = vld [vmem:[%s15647_s0 + $0xc80] ss:$84 sps:$4 sm:$0xff]   ;;  %v11402_v34 = vld [vmem:[%s15647_s0 + $0x11c4] ss:$84 sps:$4 sm:$0xff]  }
 0x17c   :  { %6087 = vmatprep.subr.bf16.mxu1 %v12243_v0 }
 0x17f   :  { %6088 = vmatpush1.bf16.msra.mxu1 %v11429_v46  ;;  %v11422_v46 = vld [vmem:[%s15647_s0 + $0x13bc] ss:$84 sps:$4 sm:$0xff]  }
 0x180   :  { %6346 = vmatprep.subr.bf16.mxu1 %v12243_v0 }
 0x181   :  { %5865 = vmatmul.mubr.bf16.gmra.mrb[32].mxu1 %v11273_v3  ;;  %v11351_v3 = vld [vmem:[%s15647_s0 + $0x768] ss:$84 sps:$4 sm:$0xff]  }
 0x182   :  { %7246 = vmatmul.mubr.bf16.vlgmr.msra.gmra.mrb[0].mxu0 %v11270_v4  ;;  %5872 = vmatprep.mubr.bf16.mxu1 %v11276_v5  ;;  %v11352_v4 = vld [vmem:[%s15647_s0 + $0xd2c] ss:$84 sps:$4 sm:$0xff]   ;;  %v11354_v5 = vld [vmem:[%s15647_s0 + $0x814] ss:$84 sps:$4 sm:$0xff]  }
 0x183   :  { %7503 = vmatpush1.bf16.msra.mxu0 %v11274_v6  ;;  %7253 = vmatprep.mubr.bf16.mxu0 %v11278_v7  ;;  %v11356_v6 = vld [vmem:[%s15647_s0 + $0xd28] ss:$84 sps:$4 sm:$0xff]   ;;  %v11357_v7 = vld [vmem:[%s15647_s0 + $0x810] ss:$84 sps:$4 sm:$0xff]  }
 0x184   :  { %7504 = vmatprep.subr.bf16.mxu0 %v12243_v0 }
 0x187   :  { %7505 = vmatpush1.bf16.msra.mxu0 %v11288_v10  ;;  %v11470_v10 = vld [vmem:[%s15646_s1 + $0x3f0] sm:$0xff]  }
 0x188   :  { %7506 = vmatprep.subr.bf16.mxu0 %v12243_v0 }
 0x189   :  { %5873 = vmatmul.mubr.bf16.gmra.mrb[36].mxu1 %v11280_v9  ;;  %v11362_v9 = vld [vmem:[%s15647_s0 + $0x8bc] ss:$84 sps:$4 sm:$0xff]  }
 0x18a   :  { %7254 = vmatmul.mubr.bf16.gmra.mrb[4].mxu0 %v11281_v11  ;;  %5880 = vmatprep.mubr.bf16.mxu1 %v11282_v12  ;;  %v11364_v11 = vld [vmem:[%s15647_s0 + $0xdd0] ss:$84 sps:$4 sm:$0xff]   ;;  %v11365_v12 = vld [vmem:[%s15647_s0 + $0x8b8] ss:$84 sps:$4 sm:$0xff]  }
 0x18b   :  { %7261 = vmatprep.mubr.bf16.mxu0 %v11284_v13  ;;  %7507 = vmatpush1.bf16.msra.mxu0 %v11302_v14  ;;  %v11366_v13 = vld [vmem:[%s15647_s0 + $0xe7c] ss:$84 sps:$4 sm:$0xff]   ;;  %v11368_v14 = vld [vmem:[%s15647_s0 + $0x964] ss:$84 sps:$4 sm:$0xff]  }
 0x18c   :  { %7508 = vmatprep.subr.bf16.mxu0 %v12243_v0 }
 0x18f   :  { %7509 = vmatpush1.bf16.msra.mxu0 %v11316_v16  ;;  %v11371_v16 = vld [vmem:[%s15647_s0 + $0x960] ss:$84 sps:$4 sm:$0xff]  }
 0x190   :  { %7510 = vmatprep.subr.bf16.mxu0 %v12243_v0 }
 0x191   :  { %5881 = vmatmul.mubr.bf16.gmra.mrb[40].mxu1 %v11286_v15  ;;  %v11370_v15 = vld [vmem:[%s15647_s0 + $0xe78] ss:$84 sps:$4 sm:$0xff]  }
 0x192   :  { %7262 = vmatmul.mubr.bf16.gmra.mrb[8].mxu0 %v11287_v17  ;;  %5888 = vmatprep.mubr.bf16.mxu1 %v11290_v18  ;;  %v11374_v17 = vld [vmem:[%s15647_s0 + $0xf24] ss:$84 sps:$4 sm:$0xff]   ;;  %v11376_v18 = vld [vmem:[%s15647_s0 + $0xa0c] ss:$84 sps:$4 sm:$0xff]  }
 0x193   :  { %7269 = vmatprep.mubr.bf16.mxu0 %v11292_v19  ;;  %7511 = vmatpush1.bf16.msra.mxu0 %v11330_v20  ;;  %v11484_v19 = vld [vmem:[%s15646_s1 + $0x3f8] sm:$0xff]   ;;  %v11378_v20 = vld [vmem:[%s15647_s0 + $0xf20] ss:$84 sps:$4 sm:$0xff]  }
 0x194   :  { %7512 = vmatprep.subr.bf16.mxu0 %v12243_v0 }
 0x197   :  { %7513 = vmatpush1.bf16.msra.mxu0 %v11344_v23  ;;  %v11382_v23 = vld [vmem:[%s15647_s0 + $0xab4] ss:$84 sps:$4 sm:$0xff]  }
 0x198   :  { %7514 = vmatprep.subr.bf16.mxu0 %v12243_v0 }
 0x199   :  { %5889 = vmatmul.mubr.bf16.gmra.mrb[44].mxu1 %v11294_v22  ;;  %v11380_v22 = vld [vmem:[%s15647_s0 + $0xfcc] ss:$84 sps:$4 sm:$0xff]  }
 0x19a   :  { %7270 = vmatmul.mubr.bf16.gmra.mrb[12].mxu0 %v11295_v24  ;;  %5896 = vmatprep.mubr.bf16.mxu1 %v11296_v25  ;;  %v11384_v24 = vld [vmem:[%s15647_s0 + $0xfc8] ss:$84 sps:$4 sm:$0xff]   ;;  %v11385_v25 = vld [vmem:[%s15647_s0 + $0xab0] ss:$84 sps:$4 sm:$0xff]  }
 0x19b   :  { %7277 = vmatprep.mubr.bf16.mxu0 %v11298_v26  ;;  %7515 = vmatpush1.bf16.msra.mxu0 %v11358_v27  ;;  %v11388_v26 = vld [vmem:[%s15647_s0 + $0x1074] ss:$84 sps:$4 sm:$0xff]   ;;  %v11390_v27 = vld [vmem:[%s15647_s0 + $0xb5c] ss:$84 sps:$4 sm:$0xff]  }
 0x19c   :  { %7516 = vmatprep.subr.bf16.mxu0 %v12243_v0 }
 0x19f   :  { %7517 = vmatpush1.bf16.msra.mxu0 %v11372_v29  ;;  %v11393_v29 = vld [vmem:[%s15647_s0 + $0xb58] ss:$84 sps:$4 sm:$0xff]  }
 0x1a0   :  { %7518 = vmatprep.subr.bf16.mxu0 %v12243_v0 }
 0x1a1   :  { %5897 = vmatmul.mubr.bf16.gmra.mrb[48].mxu1 %v11300_v28  ;;  %v11392_v28 = vld [vmem:[%s15647_s0 + $0x1070] ss:$84 sps:$4 sm:$0xff]  }
 0x1a2   :  { %7278 = vmatmul.mubr.bf16.gmra.mrb[16].mxu0 %v11301_v30  ;;  %5904 = vmatprep.mubr.bf16.mxu1 %v11304_v31  ;;  %v11394_v30 = vld [vmem:[%s15647_s0 + $0x111c] ss:$84 sps:$4 sm:$0xff]   ;;  %v11396_v31 = vld [vmem:[%s15647_s0 + $0xc04] ss:$84 sps:$4 sm:$0xff]  }
 0x1a3   :  { %7285 = vmatprep.mubr.bf16.mxu0 %v11306_v32  ;;  %7519 = vmatpush1.bf16.msra.mxu0 %v11386_v33  ;;  %v11398_v32 = vld [vmem:[%s15647_s0 + $0x1118] ss:$84 sps:$4 sm:$0xff]   ;;  %v11399_v33 = vld [vmem:[%s15647_s0 + $0xc00] ss:$84 sps:$4 sm:$0xff]  }
 0x1a4   :  { %7520 = vmatprep.subr.bf16.mxu0 %v12243_v0 }
 0x1a7   :  { %7521 = vmatpush1.bf16.msra.mxu0 %v11400_v36  ;;  %v11406_v36 = vld [vmem:[%s15647_s0 + $0x11c0] ss:$84 sps:$4 sm:$0xff]  }
 0x1a8   :  { %7522 = vmatprep.subr.bf16.mxu0 %v12243_v0 }
 0x1a9   :  { %5905 = vmatmul.mubr.bf16.gmra.mrb[52].mxu1 %v11308_v35  ;;  %v11404_v35 = vld [vmem:[%s15647_s0 + $0xcac] ss:$84 sps:$4 sm:$0xff]  }
 0x1aa   :  { %7286 = vmatmul.mubr.bf16.gmra.mrb[20].mxu0 %v11309_v37  ;;  %5912 = vmatprep.mubr.bf16.mxu1 %v11310_v38  ;;  %v11407_v37 = vld [vmem:[%s15647_s0 + $0xca8] ss:$84 sps:$4 sm:$0xff]   ;;  %v11408_v38 = vld [vmem:[%s15647_s0 + $0x126c] ss:$84 sps:$4 sm:$0xff]  }
 0x1ab   :  { %7293 = vmatprep.mubr.bf16.mxu0 %v11312_v39  ;;  %7523 = vmatpush1.bf16.msra.mxu0 %v11414_v40  ;;  %v11410_v39 = vld [vmem:[%s15647_s0 + $0xd54] ss:$84 sps:$4 sm:$0xff]  }
 0x1ac   :  { %7524 = vmatprep.subr.bf16.mxu0 %v12243_v0  ;;  %v11412_v40 = vld [vmem:[%s15647_s0 + $0x1268] ss:$84 sps:$4 sm:$0xff]  }
 0x1af   :  { %7525 = vmatpush1.bf16.msra.mxu0 %v11428_v45  ;;  %v11421_v45 = vld [vmem:[%s15647_s0 + $0xdf8] ss:$84 sps:$4 sm:$0xff]  }
 0x1b0   :  { %7526 = vmatprep.subr.bf16.mxu0 %v12243_v0 }
 0x1b1   :  { %5913 = vmatmul.mubr.bf16.gmra.mrb[56].mxu1 %v11314_v41  ;;  %v11413_v41 = vld [vmem:[%s15647_s0 + $0xd50] ss:$84 sps:$4 sm:$0xff]  }
 0x1b2   :  { %7294 = vmatmul.mubr.bf16.gmra.mrb[24].mxu0 %v11315_v42  ;;  %5920 = vmatprep.mubr.bf16.mxu1 %v11318_v43  ;;  %v11416_v42 = vld [vmem:[%s15647_s0 + $0x1314] ss:$84 sps:$4 sm:$0xff]   ;;  %v11418_v43 = vld [vmem:[%s15647_s0 + $0xdfc] ss:$84 sps:$4 sm:$0xff]  }
 0x1b3   :  { %7301 = vmatprep.mubr.bf16.mxu0 %v11320_v44  ;;  %7527 = vmatpush1.bf16.msra.mxu0 %v11442_v55  ;;  %v11420_v44 = vld [vmem:[%s15647_s0 + $0x1310] ss:$84 sps:$4 sm:$0xff]   ;;  %v11439_v55 = vld [vmem:[%s15647_s0 + $0xff4] ss:$84 sps:$4 sm:$0xff]  }
 0x1b4   :  { %7528 = vmatprep.subr.bf16.mxu0 %v12243_v0 }
 0x1b7   :  { %7529 = vmatpush1.bf16.msra.mxu0 %v11456_v1  ;;  %v11450_v1 = vld [vmem:[%s15647_s0 + $0x164] ss:$84 sps:$4 sm:$0xff]  }
 0x1b8   :  { %7530 = vmatprep.subr.bf16.mxu0 %v12243_v0 }
 0x1b9   :  { %5921 = vmatmul.mubr.bf16.gmra.mrb[60].mxu1 %v11322_v47  ;;  %v11424_v47 = vld [vmem:[%s15647_s0 + $0xea4] ss:$84 sps:$4 sm:$0xff]  }
 0x1ba   :  { %7302 = vmatmul.mubr.bf16.gmra.mrb[28].mxu0 %v11323_v48  ;;  %5928 = vmatprep.mubr.bf16.mxu1 %v11324_v49  ;;  %v11426_v48 = vld [vmem:[%s15647_s0 + $0x13b8] ss:$84 sps:$4 sm:$0xff]   ;;  %v11427_v49 = vld [vmem:[%s15647_s0 + $0xea0] ss:$84 sps:$4 sm:$0xff]  }
 0x1bb   :  { %7309 = vmatprep.mubr.bf16.mxu0 %v11326_v50  ;;  %7531 = vmatpush1.bf16.msra.mxu0 %v11470_v10  ;;  %v11430_v50 = vld [vmem:[%s15647_s0 + $0x1464] ss:$84 sps:$4 sm:$0xff]   ;;  %v11513_v10 = vld [vmem:[%s15646_s1 + $0x1a8] sm:$0xff]  }
 0x1bc   :  { %7532 = vmatprep.subr.bf16.mxu0 %v12243_v0 }
 0x1bf   :  { %7533 = vmatpush1.bf16.msra.mxu0 %v11484_v19  ;;  %v11472_v19 = vld [vmem:[%s15647_s0 + $0x35c] ss:$84 sps:$4 sm:$0xff]  }
 0x1c0   :  { %7791 = vmatprep.subr.bf16.mxu0 %v12243_v0 }
 0x1c1   :  { %5929 = vmatmul.mubr.bf16.gmra.mrb[64].mxu1 %v11328_v51  ;;  %v11432_v51 = vld [vmem:[%s15647_s0 + $0xf4c] ss:$84 sps:$4 sm:$0xff]  }
 0x1c2   :  { %7310 = vmatmul.mubr.bf16.gmra.mrb[32].mxu0 %v11329_v52  ;;  %5936 = vmatprep.mubr.bf16.mxu1 %v11332_v53  ;;  %v11434_v52 = vld [vmem:[%s15647_s0 + $0x1460] ss:$84 sps:$4 sm:$0xff]   ;;  %v11435_v53 = vld [vmem:[%s15647_s0 + $0xf48] ss:$84 sps:$4 sm:$0xff]  }
 0x1c3   :  { %7317 = vmatprep.mubr.bf16.mxu0 %v11334_v54  ;;  %v11438_v54 = vld [vmem:[%s15647_s0 + $0x14] ss:$84 sps:$4 sm:$0xff]  }
 0x1c9   :  { %5937 = vmatmul.mubr.bf16.gmra.mrb[68].mxu1 %v11336_v56  ;;  %v11436_v56 = vld [vmem:[%s15647_s0 + $0x10] ss:$84 sps:$4 sm:$0xff]  }
 0x1ca   :  { %7318 = vmatmul.mubr.bf16.gmra.mrb[36].mxu0 %v11337_v57  ;;  %5944 = vmatprep.mubr.bf16.mxu1 %v11338_v58  ;;  %v11441_v57 = vld [vmem:[%s15647_s0 + $0xff0] ss:$84 sps:$4 sm:$0xff]  }
 0x1cb   :  { %7325 = vmatprep.mubr.bf16.mxu0 %v11340_v59  ;;  %v11443_v58 = vld [vmem:[%s15646_s1 + $0x180] sm:$0xff]   ;;  %v11444_v59 = vld [vmem:[%s15647_s0 + $0xbc] ss:$84 sps:$4 sm:$0xff]  }
 0x1d1   :  { %5945 = vmatmul.mubr.bf16.gmra.mrb[72].mxu1 %v11342_v60  ;;  %v11446_v60 = vld [vmem:[%s15647_s0 + $0x109c] ss:$84 sps:$4 sm:$0xff]  }
 0x1d2   :  { %7326 = vmatmul.mubr.bf16.gmra.mrb[40].mxu0 %v11343_v61  ;;  %5952 = vmatprep.mubr.bf16.mxu1 %v11346_v62  ;;  %v11457_v61 = vld [vmem:[%s15646_s1 + $0x188] sm:$0xff]  }
 0x1d3   :  { %7333 = vmatprep.mubr.bf16.mxu0 %v11348_v63  ;;  %v11448_v62 = vld [vmem:[%s15647_s0 + $0xb8] ss:$84 sps:$4 sm:$0xff]  }
 0x1d4   :  { %v11449_v63 = vld [vmem:[%s15647_s0 + $0x1098] ss:$84 sps:$4 sm:$0xff]  }
 0x1d9   :  { %5953 = vmatmul.mubr.bf16.gmra.mrb[76].mxu1 %v11350_v2  ;;  %v11452_v2 = vld [vmem:[%s15647_s0 + $0x1144] ss:$84 sps:$4 sm:$0xff]  }
 0x1da   :  { %7334 = vmatmul.mubr.bf16.gmra.mrb[44].mxu0 %v11351_v3  ;;  %5960 = vmatprep.mubr.bf16.mxu1 %v11352_v4  ;;  %v11471_v3 = vld [vmem:[%s15646_s1 + $0x190] sm:$0xff]   ;;  %v11485_v4 = vld [vmem:[%s15646_s1 + $0x198] sm:$0xff]  }
 0x1db   :  { %7341 = vmatprep.mubr.bf16.mxu0 %v11354_v5  ;;  %v11454_v5 = vld [vmem:[%s15647_s0 + $0x160] ss:$84 sps:$4 sm:$0xff]  }
 0x1e1   :  { %5961 = vmatmul.mubr.bf16.gmra.mrb[80].mxu1 %v11356_v6  ;;  %v11455_v6 = vld [vmem:[%s15647_s0 + $0x1140] ss:$84 sps:$4 sm:$0xff]  }
 0x1e2   :  { %7342 = vmatmul.mubr.bf16.gmra.mrb[48].mxu0 %v11357_v7  ;;  %5968 = vmatprep.mubr.bf16.mxu1 %v11360_v8  ;;  %v11458_v7 = vld [vmem:[%s15647_s0 + $0x20c] ss:$84 sps:$4 sm:$0xff]  }
 0x1e3   :  { %7349 = vmatprep.mubr.bf16.mxu0 %v11362_v9  ;;  %v11460_v8 = vld [vmem:[%s15647_s0 + $0x11ec] ss:$84 sps:$4 sm:$0xff]  }
 0x1e4   :  { %v11499_v9 = vld [vmem:[%s15646_s1 + $0x1a0] sm:$0xff]  }
 0x1e9   :  { %5969 = vmatmul.mubr.bf16.gmra.mrb[84].mxu1 %v11364_v11  ;;  %v11462_v11 = vld [vmem:[%s15647_s0 + $0x208] ss:$84 sps:$4 sm:$0xff]  }
 0x1ea   :  { %7350 = vmatmul.mubr.bf16.gmra.mrb[52].mxu0 %v11365_v12  ;;  %5976 = vmatprep.mubr.bf16.mxu1 %v11366_v13  ;;  %v11463_v12 = vld [vmem:[%s15647_s0 + $0x11e8] ss:$84 sps:$4 sm:$0xff]  }
 0x1eb   :  { %7357 = vmatprep.mubr.bf16.mxu0 %v11368_v14  ;;  %v11464_v13 = vld [vmem:[%s15647_s0 + $0x2b4] ss:$84 sps:$4 sm:$0xff]  }
 0x1ec   :  { %v11466_v14 = vld [vmem:[%s15647_s0 + $0x1294] ss:$84 sps:$4 sm:$0xff]  }
 0x1f1   :  { %5977 = vmatmul.mubr.bf16.gmra.mrb[88].mxu1 %v11370_v15  ;;  %v11527_v15 = vld [vmem:[%s15646_s1 + $0x1b0] sm:$0xff]  }
 0x1f2   :  { %7358 = vmatmul.mubr.bf16.gmra.mrb[56].mxu0 %v11371_v16  ;;  %5984 = vmatprep.mubr.bf16.mxu1 %v11374_v17  ;;  %v11541_v16 = vld [vmem:[%s15646_s1 + $0x1b8] sm:$0xff]   ;;  %v11468_v17 = vld [vmem:[%s15647_s0 + $0x2b0] ss:$84 sps:$4 sm:$0xff]  }
 0x1f3   :  { %7365 = vmatprep.mubr.bf16.mxu0 %v11376_v18  ;;  %v11469_v18 = vld [vmem:[%s15647_s0 + $0x1290] ss:$84 sps:$4 sm:$0xff]  }
 0x1f9   :  { %5985 = vmatmul.mubr.bf16.gmra.mrb[92].mxu1 %v11378_v20  ;;  %v11474_v20 = vld [vmem:[%s15647_s0 + $0x133c] ss:$84 sps:$4 sm:$0xff]  }
 0x1fa   :  { %7366 = vmatmul.mubr.bf16.gmra.mrb[60].mxu0 %v11379_v21  ;;  %5992 = vmatprep.mubr.bf16.mxu1 %v11380_v22  ;;  %v11555_v21 = vld [vmem:[%s15646_s1 + $0x1c0] sm:$0xff]   ;;  %v11569_v22 = vld [vmem:[%s15646_s1 + $0x1c8] sm:$0xff]  }
 0x1fb   :  { %7373 = vmatprep.mubr.bf16.mxu0 %v11382_v23  ;;  %v11476_v23 = vld [vmem:[%s15647_s0 + $0x358] ss:$84 sps:$4 sm:$0xff]  }
 0x201   :  { %5993 = vmatmul.mubr.bf16.gmra.mrb[96].mxu1 %v11384_v24  ;;  %v11477_v24 = vld [vmem:[%s15647_s0 + $0x1338] ss:$84 sps:$4 sm:$0xff]  }
 0x202   :  { %7374 = vmatmul.mubr.bf16.gmra.mrb[64].mxu0 %v11385_v25  ;;  %6000 = vmatprep.mubr.bf16.mxu1 %v11388_v26  ;;  %v11478_v25 = vld [vmem:[%s15647_s0 + $0x404] ss:$84 sps:$4 sm:$0xff]  }
 0x203   :  { %7381 = vmatprep.mubr.bf16.mxu0 %v11390_v27  ;;  %v11480_v26 = vld [vmem:[%s15647_s0 + $0x13e4] ss:$84 sps:$4 sm:$0xff]   ;;  %v11583_v27 = vld [vmem:[%s15646_s1 + $0x1d0] sm:$0xff]  }
 0x209   :  { %6001 = vmatmul.mubr.bf16.gmra.mrb[100].mxu1 %v11392_v28  ;;  %v11482_v28 = vld [vmem:[%s15647_s0 + $0x400] ss:$84 sps:$4 sm:$0xff]  }
 0x20a   :  { %7382 = vmatmul.mubr.bf16.gmra.mrb[68].mxu0 %v11393_v29  ;;  %6008 = vmatprep.mubr.bf16.mxu1 %v11394_v30  ;;  %v11483_v29 = vld [vmem:[%s15647_s0 + $0x13e0] ss:$84 sps:$4 sm:$0xff]  }
 0x20b   :  { %7389 = vmatprep.mubr.bf16.mxu0 %v11396_v31  ;;  %v11486_v30 = vld [vmem:[%s15647_s0 + $0x4ac] ss:$84 sps:$4 sm:$0xff]  }
 0x20c   :  { %v11488_v31 = vld [vmem:[%s15647_s0 + $0x148c] ss:$84 sps:$4 sm:$0xff]  }
 0x211   :  { %6009 = vmatmul.mubr.bf16.gmra.mrb[104].mxu1 %v11398_v32  ;;  %v11597_v32 = vld [vmem:[%s15646_s1 + $0x1d8] sm:$0xff]  }
 0x212   :  { %7390 = vmatmul.mubr.bf16.gmra.mrb[72].mxu0 %v11399_v33  ;;  %6016 = vmatprep.mubr.bf16.mxu1 %v11402_v34  ;;  %v11490_v33 = vld [vmem:[%s15647_s0 + $0x4a8] ss:$84 sps:$4 sm:$0xff]  }
 0x213   :  { %7397 = vmatprep.mubr.bf16.mxu0 %v11404_v35  ;;  %v11491_v34 = vld [vmem:[%s15647_s0 + $0x1488] ss:$84 sps:$4 sm:$0xff]  }
 0x214   :  { %v11492_v35 = vld [vmem:[%s15647_s0 + $0x554] ss:$84 sps:$4 sm:$0xff]  }
 0x219   :  { %6017 = vmatmul.mubr.bf16.gmra.mrb[108].mxu1 %v11406_v36  ;;  %v11496_v36 = vld [vmem:[%s15647_s0 + $0x3c] ss:$84 sps:$4 sm:$0xff]  }
 0x21a   :  { %7398 = vmatmul.mubr.bf16.gmra.mrb[76].mxu0 %v11407_v37  ;;  %6024 = vmatprep.mubr.bf16.mxu1 %v11408_v38  ;;  %v11497_v37 = vld [vmem:[%s15647_s0 + $0x550] ss:$84 sps:$4 sm:$0xff]   ;;  %v11494_v38 = vld [vmem:[%s15647_s0 + $0x38] ss:$84 sps:$4 sm:$0xff]  }
 0x21b   :  { %7405 = vmatprep.mubr.bf16.mxu0 %v11410_v39  ;;  %v11500_v39 = vld [vmem:[%s15647_s0 + $0x5fc] ss:$84 sps:$4 sm:$0xff]  }
 0x221   :  { %6025 = vmatmul.mubr.bf16.gmra.mrb[112].mxu1 %v11412_v40  ;;  %v11498_v40 = vld [vmem:[%s15646_s1 + $0x400] sm:$0xff]  }
 0x222   :  { %7406 = vmatmul.mubr.bf16.gmra.mrb[80].mxu0 %v11413_v41  ;;  %6032 = vmatprep.mubr.bf16.mxu1 %v11416_v42  ;;  %v11502_v41 = vld [vmem:[%s15647_s0 + $0xe4] ss:$84 sps:$4 sm:$0xff]  }
 0x223   :  { %7413 = vmatprep.mubr.bf16.mxu0 %v11418_v43  ;;  %v11611_v42 = vld [vmem:[%s15646_s1 + $0x1e0] sm:$0xff]   ;;  %v11512_v43 = vld [vmem:[%s15646_s1 + $0x408] sm:$0xff]  }
 0x229   :  { %6033 = vmatmul.mubr.bf16.gmra.mrb[116].mxu1 %v11420_v44  ;;  %v11504_v44 = vld [vmem:[%s15647_s0 + $0x5f8] ss:$84 sps:$4 sm:$0xff]  }
 0x22a   :  { %7414 = vmatmul.mubr.bf16.gmra.mrb[84].mxu0 %v11421_v45  ;;  %6040 = vmatprep.mubr.bf16.mxu1 %v11422_v46  ;;  %v11505_v45 = vld [vmem:[%s15647_s0 + $0xe0] ss:$84 sps:$4 sm:$0xff]   ;;  %v11506_v46 = vld [vmem:[%s15647_s0 + $0x6a4] ss:$84 sps:$4 sm:$0xff]  }
 0x22b   :  { %7421 = vmatprep.mubr.bf16.mxu0 %v11424_v47  ;;  %v11508_v47 = vld [vmem:[%s15647_s0 + $0x18c] ss:$84 sps:$4 sm:$0xff]  }
 0x231   :  { %6041 = vmatmul.mubr.bf16.gmra.mrb[120].mxu1 %v11426_v48  ;;  %v11526_v48 = vld [vmem:[%s15646_s1 + $0x410] sm:$0xff]  }
 0x232   :  { %7422 = vmatmul.mubr.bf16.gmra.mrb[88].mxu0 %v11427_v49  ;;  %6048 = vmatprep.mubr.bf16.mxu1 %v11430_v50  ;;  %v11540_v49 = vld [vmem:[%s15646_s1 + $0x418] sm:$0xff]   ;;  %v11510_v50 = vld [vmem:[%s15647_s0 + $0x6a0] ss:$84 sps:$4 sm:$0xff]  }
 0x233   :  { %7429 = vmatprep.mubr.bf16.mxu0 %v11432_v51  ;;  %v11511_v51 = vld [vmem:[%s15647_s0 + $0x188] ss:$84 sps:$4 sm:$0xff]  }
 0x239   :  { %6049 = vmatmul.mubr.bf16.gmra.mrb[124].mxu1 %v11434_v52  ;;  %v11514_v52 = vld [vmem:[%s15647_s0 + $0x74c] ss:$84 sps:$4 sm:$0xff]  }
 0x23a   :  { %7430 = vmatmul.mubr.bf16.gmra.mrb[92].mxu0 %v11435_v53  ;;  %6089 = vmatprep.mubr.bf16.mxu1 %v11438_v54  ;;  %v11516_v53 = vld [vmem:[%s15647_s0 + $0x234] ss:$84 sps:$4 sm:$0xff]   ;;  %v11554_v54 = vld [vmem:[%s15646_s1 + $0x420] sm:$0xff]  }
 0x23b   :  { %7437 = vmatprep.mubr.bf16.mxu0 %v11439_v55  ;;  %v11625_v55 = vld [vmem:[%s15646_s1 + $0x1e8] sm:$0xff]  }
 0x241   :  { %6090 = vmatmul.mubr.bf16.vlgmr.msra.gmra.mrb[0].mxu1 %v11436_v56  ;;  %v11568_v56 = vld [vmem:[%s15646_s1 + $0x428] sm:$0xff]  }
 0x242   :  { %7438 = vmatmul.mubr.bf16.gmra.mrb[96].mxu0 %v11441_v57  ;;  %6347 = vmatpush1.bf16.msra.mxu1 %v11443_v58  ;;  %v11518_v57 = vld [vmem:[%s15647_s0 + $0x748] ss:$84 sps:$4 sm:$0xff]   ;;  %v11519_v58 = vld [vmem:[%s15647_s0 + $0x230] ss:$84 sps:$4 sm:$0xff]  }
 0x243   :  { %6097 = vmatprep.mubr.bf16.mxu1 %v11444_v59  ;;  %7445 = vmatprep.mubr.bf16.mxu0 %v11446_v60  ;;  %v11520_v59 = vld [vmem:[%s15647_s0 + $0x7f4] ss:$84 sps:$4 sm:$0xff]   ;;  %v11522_v60 = vld [vmem:[%s15647_s0 + $0x2dc] ss:$84 sps:$4 sm:$0xff]  }
 0x244   :  { %6348 = vmatprep.subr.bf16.mxu1 %v12243_v0 }
 0x246   :  { %6349 = vmatpush1.bf16.msra.mxu1 %v11457_v61  ;;  %v11582_v61 = vld [vmem:[%s15646_s1 + $0x430] sm:$0xff]  }
 0x247   :  { %6350 = vmatprep.subr.bf16.mxu1 %v12243_v0 }
 0x249   :  { %6098 = vmatmul.mubr.bf16.gmra.mrb[4].mxu1 %v11448_v62  ;;  %v11596_v62 = vld [vmem:[%s15646_s1 + $0x438] sm:$0xff]  }
 0x24a   :  { %7446 = vmatmul.mubr.bf16.gmra.mrb[100].mxu0 %v11449_v63  ;;  %6105 = vmatprep.mubr.bf16.mxu1 %v11450_v1  ;;  %v11524_v63 = vld [vmem:[%s15647_s0 + $0x7f0] ss:$84 sps:$4 sm:$0xff]   ;;  %v11525_v1 = vld [vmem:[%s15647_s0 + $0x2d8] ss:$84 sps:$4 sm:$0xff]  }
 0x24b   :  { %7453 = vmatprep.mubr.bf16.mxu0 %v11452_v2  ;;  %6351 = vmatpush1.bf16.msra.mxu1 %v11471_v3  ;;  %v11528_v2 = vld [vmem:[%s15647_s0 + $0x89c] ss:$84 sps:$4 sm:$0xff]   ;;  %v11530_v3 = vld [vmem:[%s15647_s0 + $0x384] ss:$84 sps:$4 sm:$0xff]  }
 0x24c   :  { %6352 = vmatprep.subr.bf16.mxu1 %v12243_v0 }
 0x24f   :  { %6353 = vmatpush1.bf16.msra.mxu1 %v11485_v4  ;;  %v11610_v4 = vld [vmem:[%s15646_s1 + $0x440] sm:$0xff]  }
 0x250   :  { %6354 = vmatprep.subr.bf16.mxu1 %v12243_v0 }
 0x251   :  { %6106 = vmatmul.mubr.bf16.gmra.mrb[8].mxu1 %v11454_v5  ;;  %v11639_v5 = vld [vmem:[%s15646_s1 + $0x1f0] sm:$0xff]  }
 0x252   :  { %7454 = vmatmul.mubr.bf16.gmra.mrb[104].mxu0 %v11455_v6  ;;  %6113 = vmatprep.mubr.bf16.mxu1 %v11458_v7  ;;  %v11624_v6 = vld [vmem:[%s15646_s1 + $0x448] sm:$0xff]  }
 0x253   :  { %7461 = vmatprep.mubr.bf16.mxu0 %v11460_v8  ;;  %6355 = vmatpush1.bf16.msra.mxu1 %v11499_v9  ;;  %v11532_v7 = vld [vmem:[%s15647_s0 + $0x898] ss:$84 sps:$4 sm:$0xff]   ;;  %v11533_v8 = vld [vmem:[%s15647_s0 + $0x380] ss:$84 sps:$4 sm:$0xff]  }
 0x254   :  { %6356 = vmatprep.subr.bf16.mxu1 %v12243_v0  ;;  %v11534_v9 = vld [vmem:[%s15647_s0 + $0x944] ss:$84 sps:$4 sm:$0xff]  }
 0x257   :  { %6357 = vmatpush1.bf16.msra.mxu1 %v11513_v10  ;;  %v11536_v10 = vld [vmem:[%s15647_s0 + $0x42c] ss:$84 sps:$4 sm:$0xff]  }
 0x258   :  { %6358 = vmatprep.subr.bf16.mxu1 %v12243_v0 }
 0x259   :  { %6114 = vmatmul.mubr.bf16.gmra.mrb[12].mxu1 %v11462_v11  ;;  %v11638_v11 = vld [vmem:[%s15646_s1 + $0x450] sm:$0xff]  }
 0x25a   :  { %7462 = vmatmul.mubr.bf16.gmra.mrb[108].mxu0 %v11463_v12  ;;  %6121 = vmatprep.mubr.bf16.mxu1 %v11464_v13  ;;  %v11538_v12 = vld [vmem:[%s15647_s0 + $0x940] ss:$84 sps:$4 sm:$0xff]   ;;  %v11539_v13 = vld [vmem:[%s15647_s0 + $0x428] ss:$84 sps:$4 sm:$0xff]  }
 0x25b   :  { %7469 = vmatprep.mubr.bf16.mxu0 %v11466_v14  ;;  %6359 = vmatpush1.bf16.msra.mxu1 %v11527_v15  ;;  %v11542_v14 = vld [vmem:[%s15647_s0 + $0x9ec] ss:$84 sps:$4 sm:$0xff]   ;;  %v11544_v15 = vld [vmem:[%s15647_s0 + $0x4d4] ss:$84 sps:$4 sm:$0xff]  }
 0x25c   :  { %6360 = vmatprep.subr.bf16.mxu1 %v12243_v0 }
 0x25f   :  { %6361 = vmatpush1.bf16.msra.mxu1 %v11541_v16  ;;  %v11652_v16 = vld [vmem:[%s15646_s1 + $0x458] sm:$0xff]  }
 0x260   :  { %6362 = vmatprep.subr.bf16.mxu1 %v12243_v0 }
 0x261   :  { %6122 = vmatmul.mubr.bf16.gmra.mrb[16].mxu1 %v11468_v17  ;;  %v11653_v17 = vld [vmem:[%s15646_s1 + $0x1f8] sm:$0xff]  }
 0x262   :  { %7470 = vmatmul.mubr.bf16.gmra.mrb[112].mxu0 %v11469_v18  ;;  %6129 = vmatprep.mubr.bf16.mxu1 %v11472_v19  ;;  %v11546_v18 = vld [vmem:[%s15647_s0 + $0x9e8] ss:$84 sps:$4 sm:$0xff]   ;;  %v11547_v19 = vld [vmem:[%s15647_s0 + $0x4d0] ss:$84 sps:$4 sm:$0xff]  }
 0x263   :  { %7477 = vmatprep.mubr.bf16.mxu0 %v11474_v20  ;;  %6363 = vmatpush1.bf16.msra.mxu1 %v11555_v21  ;;  %v11548_v20 = vld [vmem:[%s15647_s0 + $0xa94] ss:$84 sps:$4 sm:$0xff]   ;;  %v11550_v21 = vld [vmem:[%s15647_s0 + $0x57c] ss:$84 sps:$4 sm:$0xff]  }
 0x264   :  { %6364 = vmatprep.subr.bf16.mxu1 %v12243_v0 }
 0x267   :  { %6365 = vmatpush1.bf16.msra.mxu1 %v11569_v22  ;;  %v11552_v22 = vld [vmem:[%s15647_s0 + $0xa90] ss:$84 sps:$4 sm:$0xff]  }
 0x268   :  { %6366 = vmatprep.subr.bf16.mxu1 %v12243_v0 }
 0x269   :  { %6130 = vmatmul.mubr.bf16.gmra.mrb[20].mxu1 %v11476_v23  ;;  %v11553_v23 = vld [vmem:[%s15647_s0 + $0x578] ss:$84 sps:$4 sm:$0xff]  }
 0x26a   :  { %7478 = vmatmul.mubr.bf16.gmra.mrb[116].mxu0 %v11477_v24  ;;  %6137 = vmatprep.mubr.bf16.mxu1 %v11478_v25  ;;  %v11556_v24 = vld [vmem:[%s15647_s0 + $0xb3c] ss:$84 sps:$4 sm:$0xff]   ;;  %v11558_v25 = vld [vmem:[%s15647_s0 + $0x624] ss:$84 sps:$4 sm:$0xff]  }
 0x26b   :  { %7485 = vmatprep.mubr.bf16.mxu0 %v11480_v26  ;;  %6367 = vmatpush1.bf16.msra.mxu1 %v11583_v27  ;;  %v11666_v26 = vld [vmem:[%s15646_s1 + $0x460] sm:$0xff]   ;;  %v11560_v27 = vld [vmem:[%s15647_s0 + $0xb38] ss:$84 sps:$4 sm:$0xff]  }
 0x26c   :  { %6368 = vmatprep.subr.bf16.mxu1 %v12243_v0 }
 0x26f   :  { %6369 = vmatpush1.bf16.msra.mxu1 %v11597_v32  ;;  %v11567_v32 = vld [vmem:[%s15647_s0 + $0x6c8] ss:$84 sps:$4 sm:$0xff]  }
 0x270   :  { %6370 = vmatprep.subr.bf16.mxu1 %v12243_v0 }
 0x271   :  { %6138 = vmatmul.mubr.bf16.gmra.mrb[24].mxu1 %v11482_v28  ;;  %v11561_v28 = vld [vmem:[%s15647_s0 + $0x620] ss:$84 sps:$4 sm:$0xff]  }
 0x272   :  { %7486 = vmatmul.mubr.bf16.gmra.mrb[120].mxu0 %v11483_v29  ;;  %6145 = vmatprep.mubr.bf16.mxu1 %v11486_v30  ;;  %v11562_v29 = vld [vmem:[%s15647_s0 + $0xbe4] ss:$84 sps:$4 sm:$0xff]   ;;  %v11564_v30 = vld [vmem:[%s15647_s0 + $0x6cc] ss:$84 sps:$4 sm:$0xff]  }
 0x273   :  { %7493 = vmatprep.mubr.bf16.mxu0 %v11488_v31  ;;  %6371 = vmatpush1.bf16.msra.mxu1 %v11611_v42  ;;  %v11566_v31 = vld [vmem:[%s15647_s0 + $0xbe0] ss:$84 sps:$4 sm:$0xff]   ;;  %v11584_v42 = vld [vmem:[%s15647_s0 + $0xddc] ss:$84 sps:$4 sm:$0xff]  }
 0x274   :  { %6372 = vmatprep.subr.bf16.mxu1 %v12243_v0 }
 0x277   :  { %6373 = vmatpush1.bf16.msra.mxu1 %v11625_v55  ;;  %v11603_v55 = vld [vmem:[%s15647_s0 + $0xa10] ss:$84 sps:$4 sm:$0xff]  }
 0x278   :  { %6374 = vmatprep.subr.bf16.mxu1 %v12243_v0 }
 0x279   :  { %6146 = vmatmul.mubr.bf16.gmra.mrb[28].mxu1 %v11490_v33  ;;  %v11570_v33 = vld [vmem:[%s15647_s0 + $0xc8c] ss:$84 sps:$4 sm:$0xff]  }
 0x27a   :  { %7494 = vmatmul.mubr.bf16.gmra.mrb[124].mxu0 %v11491_v34  ;;  %6153 = vmatprep.mubr.bf16.mxu1 %v11492_v35  ;;  %v11572_v34 = vld [vmem:[%s15647_s0 + $0x774] ss:$84 sps:$4 sm:$0xff]  }
 0x27b   :  { %7534 = vmatprep.mubr.bf16.mxu0 %v11496_v36  ;;  %6375 = vmatpush1.bf16.msra.mxu1 %v11639_v5  ;;  %v11679_v35 = vld [vmem:[%s15646_s1 + $0x468] sm:$0xff]  }
 0x27c   :  { %6376 = vmatprep.subr.bf16.mxu1 %v12243_v0  ;;  %v11574_v36 = vld [vmem:[%s15647_s0 + $0xc88] ss:$84 sps:$4 sm:$0xff]   ;;  %v11626_v5 = vld [vmem:[%s15647_s0 + $0x11cc] ss:$84 sps:$4 sm:$0xff]  }
 0x27f   :  { %6377 = vmatpush1.bf16.msra.mxu1 %v11653_v17  ;;  %v11646_v17 = vld [vmem:[%s15647_s0 + $0x13c4] ss:$84 sps:$4 sm:$0xff]  }
 0x280   :  { %9759 = vmatprep.subr.bf16.mxu1 %v12243_v0 }
 0x281   :  { %6154 = vmatmul.mubr.bf16.gmra.mrb[32].mxu1 %v11497_v37  ;;  %v11575_v37 = vld [vmem:[%s15647_s0 + $0x770] ss:$84 sps:$4 sm:$0xff]  }
 0x282   :  { %7535 = vmatmul.mubr.bf16.vlgmr.msra.gmra.mrb[0].mxu0 %v11494_v38  ;;  %6161 = vmatprep.mubr.bf16.mxu1 %v11500_v39  ;;  %v11576_v38 = vld [vmem:[%s15647_s0 + $0xd34] ss:$84 sps:$4 sm:$0xff]   ;;  %v11578_v39 = vld [vmem:[%s15647_s0 + $0x81c] ss:$84 sps:$4 sm:$0xff]  }
 0x283   :  { %7792 = vmatpush1.bf16.msra.mxu0 %v11498_v40  ;;  %7542 = vmatprep.mubr.bf16.mxu0 %v11502_v41  ;;  %v11580_v40 = vld [vmem:[%s15647_s0 + $0xd30] ss:$84 sps:$4 sm:$0xff]   ;;  %v11581_v41 = vld [vmem:[%s15647_s0 + $0x818] ss:$84 sps:$4 sm:$0xff]  }
 0x284   :  { %7793 = vmatprep.subr.bf16.mxu0 %v12243_v0 }
 0x287   :  { %7794 = vmatpush1.bf16.msra.mxu0 %v11512_v43  ;;  %v11586_v43 = vld [vmem:[%s15647_s0 + $0x8c4] ss:$84 sps:$4 sm:$0xff]  }
 0x288   :  { %7795 = vmatprep.subr.bf16.mxu0 %v12243_v0 }
 0x289   :  { %6162 = vmatmul.mubr.bf16.gmra.mrb[36].mxu1 %v11504_v44  ;;  %v11692_v44 = vld [vmem:[%s15646_s1 + $0x470] sm:$0xff]  }
 0x28a   :  { %7543 = vmatmul.mubr.bf16.gmra.mrb[4].mxu0 %v11505_v45  ;;  %6169 = vmatprep.mubr.bf16.mxu1 %v11506_v46  ;;  %v11588_v45 = vld [vmem:[%s15647_s0 + $0xdd8] ss:$84 sps:$4 sm:$0xff]   ;;  %v11589_v46 = vld [vmem:[%s15647_s0 + $0x8c0] ss:$84 sps:$4 sm:$0xff]  }
 0x28b   :  { %7550 = vmatprep.mubr.bf16.mxu0 %v11508_v47  ;;  %7796 = vmatpush1.bf16.msra.mxu0 %v11526_v48  ;;  %v11590_v47 = vld [vmem:[%s15647_s0 + $0xe84] ss:$84 sps:$4 sm:$0xff]   ;;  %v11592_v48 = vld [vmem:[%s15647_s0 + $0x96c] ss:$84 sps:$4 sm:$0xff]  }
 0x28c   :  { %7797 = vmatprep.subr.bf16.mxu0 %v12243_v0 }
 0x28f   :  { %7798 = vmatpush1.bf16.msra.mxu0 %v11540_v49  ;;  %v11594_v49 = vld [vmem:[%s15647_s0 + $0xe80] ss:$84 sps:$4 sm:$0xff]  }
 0x290   :  { %7799 = vmatprep.subr.bf16.mxu0 %v12243_v0 }
 0x291   :  { %6170 = vmatmul.mubr.bf16.gmra.mrb[40].mxu1 %v11510_v50  ;;  %v11595_v50 = vld [vmem:[%s15647_s0 + $0x968] ss:$84 sps:$4 sm:$0xff]  }
 0x292   :  { %7551 = vmatmul.mubr.bf16.gmra.mrb[8].mxu0 %v11511_v51  ;;  %6177 = vmatprep.mubr.bf16.mxu1 %v11514_v52  ;;  %v11598_v51 = vld [vmem:[%s15647_s0 + $0xf2c] ss:$84 sps:$4 sm:$0xff]   ;;  %v11600_v52 = vld [vmem:[%s15647_s0 + $0xa14] ss:$84 sps:$4 sm:$0xff]  }
 0x293   :  { %7558 = vmatprep.mubr.bf16.mxu0 %v11516_v53  ;;  %7800 = vmatpush1.bf16.msra.mxu0 %v11554_v54  ;;  %v11705_v53 = vld [vmem:[%s15646_s1 + $0x478] sm:$0xff]  }
 0x294   :  { %7801 = vmatprep.subr.bf16.mxu0 %v12243_v0  ;;  %v11602_v54 = vld [vmem:[%s15647_s0 + $0xf28] ss:$84 sps:$4 sm:$0xff]  }
 0x297   :  { %7802 = vmatpush1.bf16.msra.mxu0 %v11568_v56  ;;  %v11604_v56 = vld [vmem:[%s15647_s0 + $0xfd4] ss:$84 sps:$4 sm:$0xff]  }
 0x298   :  { %7803 = vmatprep.subr.bf16.mxu0 %v12243_v0 }
 0x299   :  { %6178 = vmatmul.mubr.bf16.gmra.mrb[44].mxu1 %v11518_v57  ;;  %v11606_v57 = vld [vmem:[%s15647_s0 + $0xabc] ss:$84 sps:$4 sm:$0xff]  }
 0x29a   :  { %7559 = vmatmul.mubr.bf16.gmra.mrb[12].mxu0 %v11519_v58  ;;  %6185 = vmatprep.mubr.bf16.mxu1 %v11520_v59  ;;  %v11608_v58 = vld [vmem:[%s15647_s0 + $0xfd0] ss:$84 sps:$4 sm:$0xff]   ;;  %v11609_v59 = vld [vmem:[%s15647_s0 + $0xab8] ss:$84 sps:$4 sm:$0xff]  }
 0x29b   :  { %7566 = vmatprep.mubr.bf16.mxu0 %v11522_v60  ;;  %7804 = vmatpush1.bf16.msra.mxu0 %v11582_v61  ;;  %v11612_v60 = vld [vmem:[%s15647_s0 + $0x107c] ss:$84 sps:$4 sm:$0xff]   ;;  %v11614_v61 = vld [vmem:[%s15647_s0 + $0xb64] ss:$84 sps:$4 sm:$0xff]  }
 0x29c   :  { %7805 = vmatprep.subr.bf16.mxu0 %v12243_v0 }
 0x29f   :  { %7806 = vmatpush1.bf16.msra.mxu0 %v11596_v62  ;;  %v11616_v62 = vld [vmem:[%s15647_s0 + $0x1078] ss:$84 sps:$4 sm:$0xff]  }
 0x2a0   :  { %7807 = vmatprep.subr.bf16.mxu0 %v12243_v0 }
 0x2a1   :  { %6186 = vmatmul.mubr.bf16.gmra.mrb[48].mxu1 %v11524_v63  ;;  %v11617_v63 = vld [vmem:[%s15647_s0 + $0xb60] ss:$84 sps:$4 sm:$0xff]  }
 0x2a2   :  { %7567 = vmatmul.mubr.bf16.gmra.mrb[16].mxu0 %v11525_v1  ;;  %6193 = vmatprep.mubr.bf16.mxu1 %v11528_v2  ;;  %v11618_v1 = vld [vmem:[%s15647_s0 + $0x1124] ss:$84 sps:$4 sm:$0xff]   ;;  %v11620_v2 = vld [vmem:[%s15647_s0 + $0xc0c] ss:$84 sps:$4 sm:$0xff]  }
 0x2a3   :  { %7574 = vmatprep.mubr.bf16.mxu0 %v11530_v3  ;;  %7808 = vmatpush1.bf16.msra.mxu0 %v11610_v4  ;;  %v11622_v3 = vld [vmem:[%s15647_s0 + $0x1120] ss:$84 sps:$4 sm:$0xff]   ;;  %v11623_v4 = vld [vmem:[%s15647_s0 + $0xc08] ss:$84 sps:$4 sm:$0xff]  }
 0x2a4   :  { %7809 = vmatprep.subr.bf16.mxu0 %v12243_v0 }
 0x2a7   :  { %7810 = vmatpush1.bf16.msra.mxu0 %v11624_v6  ;;  %v11628_v6 = vld [vmem:[%s15647_s0 + $0xcb4] ss:$84 sps:$4 sm:$0xff]  }
 0x2a8   :  { %7811 = vmatprep.subr.bf16.mxu0 %v12243_v0 }
 0x2a9   :  { %6194 = vmatmul.mubr.bf16.gmra.mrb[52].mxu1 %v11532_v7  ;;  %v11630_v7 = vld [vmem:[%s15647_s0 + $0x11c8] ss:$84 sps:$4 sm:$0xff]  }
 0x2aa   :  { %7575 = vmatmul.mubr.bf16.gmra.mrb[20].mxu0 %v11533_v8  ;;  %6201 = vmatprep.mubr.bf16.mxu1 %v11534_v9  ;;  %v11631_v8 = vld [vmem:[%s15647_s0 + $0xcb0] ss:$84 sps:$4 sm:$0xff]   ;;  %v11632_v9 = vld [vmem:[%s15647_s0 + $0x1274] ss:$84 sps:$4 sm:$0xff]  }
 0x2ab   :  { %7582 = vmatprep.mubr.bf16.mxu0 %v11536_v10  ;;  %7812 = vmatpush1.bf16.msra.mxu0 %v11638_v11  ;;  %v11634_v10 = vld [vmem:[%s15647_s0 + $0xd5c] ss:$84 sps:$4 sm:$0xff]  }
 0x2ac   :  { %7813 = vmatprep.subr.bf16.mxu0 %v12243_v0  ;;  %v11636_v11 = vld [vmem:[%s15647_s0 + $0x1270] ss:$84 sps:$4 sm:$0xff]  }
 0x2af   :  { %7814 = vmatpush1.bf16.msra.mxu0 %v11652_v16  ;;  %v11645_v16 = vld [vmem:[%s15647_s0 + $0xe00] ss:$84 sps:$4 sm:$0xff]  }
 0x2b0   :  { %7815 = vmatprep.subr.bf16.mxu0 %v12243_v0 }
 0x2b1   :  { %6202 = vmatmul.mubr.bf16.gmra.mrb[56].mxu1 %v11538_v12  ;;  %v11637_v12 = vld [vmem:[%s15647_s0 + $0xd58] ss:$84 sps:$4 sm:$0xff]  }
 0x2b2   :  { %7583 = vmatmul.mubr.bf16.gmra.mrb[24].mxu0 %v11539_v13  ;;  %6209 = vmatprep.mubr.bf16.mxu1 %v11542_v14  ;;  %v11640_v13 = vld [vmem:[%s15647_s0 + $0x131c] ss:$84 sps:$4 sm:$0xff]   ;;  %v11642_v14 = vld [vmem:[%s15647_s0 + $0xe04] ss:$84 sps:$4 sm:$0xff]  }
 0x2b3   :  { %7590 = vmatprep.mubr.bf16.mxu0 %v11544_v15  ;;  %7816 = vmatpush1.bf16.msra.mxu0 %v11666_v26  ;;  %v11644_v15 = vld [vmem:[%s15647_s0 + $0x1318] ss:$84 sps:$4 sm:$0xff]   ;;  %v11663_v26 = vld [vmem:[%s15647_s0 + $0xffc] ss:$84 sps:$4 sm:$0xff]  }
 0x2b4   :  { %7817 = vmatprep.subr.bf16.mxu0 %v12243_v0 }
 0x2b7   :  { %7818 = vmatpush1.bf16.msra.mxu0 %v11679_v35  ;;  %v12227_v35 = vld [vmem:[%s15646_s1 + $0x208] sm:$0xff]  }
 0x2b8   :  { %7819 = vmatprep.subr.bf16.mxu0 %v12243_v0 }
 0x2b9   :  { %6210 = vmatmul.mubr.bf16.gmra.mrb[60].mxu1 %v11546_v18  ;;  %v11648_v18 = vld [vmem:[%s15647_s0 + $0xeac] ss:$84 sps:$4 sm:$0xff]  }
 0x2ba   :  { %7591 = vmatmul.mubr.bf16.gmra.mrb[28].mxu0 %v11547_v19  ;;  %6217 = vmatprep.mubr.bf16.mxu1 %v11548_v20  ;;  %v11650_v19 = vld [vmem:[%s15647_s0 + $0x13c0] ss:$84 sps:$4 sm:$0xff]   ;;  %v11651_v20 = vld [vmem:[%s15647_s0 + $0xea8] ss:$84 sps:$4 sm:$0xff]  }
 0x2bb   :  { %7598 = vmatprep.mubr.bf16.mxu0 %v11550_v21  ;;  %7820 = vmatpush1.bf16.msra.mxu0 %v11692_v44  ;;  %v11654_v21 = vld [vmem:[%s15647_s0 + $0x146c] ss:$84 sps:$4 sm:$0xff]   ;;  %v11684_v44 = vld [vmem:[%s15647_s0 + $0x210] ss:$84 sps:$4 sm:$0xff]  }
 0x2bc   :  { %7821 = vmatprep.subr.bf16.mxu0 %v12243_v0 }
 0x2bf   :  { %7822 = vmatpush1.bf16.msra.mxu0 %v11705_v53  ;;  %v11695_v53 = vld [vmem:[%s15647_s0 + $0x1344] ss:$84 sps:$4 sm:$0xff]  }
 0x2c0   :  { %8080 = vmatprep.subr.bf16.mxu0 %v12243_v0 }
 0x2c1   :  { %6218 = vmatmul.mubr.bf16.gmra.mrb[64].mxu1 %v11552_v22  ;;  %v11656_v22 = vld [vmem:[%s15647_s0 + $0xf54] ss:$84 sps:$4 sm:$0xff]  }
 0x2c2   :  { %7599 = vmatmul.mubr.bf16.gmra.mrb[32].mxu0 %v11553_v23  ;;  %6225 = vmatprep.mubr.bf16.mxu1 %v11556_v24  ;;  %v11658_v23 = vld [vmem:[%s15647_s0 + $0x1468] ss:$84 sps:$4 sm:$0xff]   ;;  %v11659_v24 = vld [vmem:[%s15647_s0 + $0xf50] ss:$84 sps:$4 sm:$0xff]  }
 0x2c3   :  { %7606 = vmatprep.mubr.bf16.mxu0 %v11558_v25  ;;  %v11662_v25 = vld [vmem:[%s15647_s0 + $0x1c] ss:$84 sps:$4 sm:$0xff]  }
 0x2c9   :  { %6226 = vmatmul.mubr.bf16.gmra.mrb[68].mxu1 %v11560_v27  ;;  %v11660_v27 = vld [vmem:[%s15647_s0 + $0x18] ss:$84 sps:$4 sm:$0xff]  }
 0x2ca   :  { %7607 = vmatmul.mubr.bf16.gmra.mrb[36].mxu0 %v11561_v28  ;;  %6233 = vmatprep.mubr.bf16.mxu1 %v11562_v29  ;;  %v11665_v28 = vld [vmem:[%s15647_s0 + $0xff8] ss:$84 sps:$4 sm:$0xff]  }
 0x2cb   :  { %7614 = vmatprep.mubr.bf16.mxu0 %v11564_v30  ;;  %v11667_v29 = vld [vmem:[%s15647_s0 + $0xc4] ss:$84 sps:$4 sm:$0xff]  }
 0x2cc   :  { %v11669_v30 = vld [vmem:[%s15647_s0 + $0x10a4] ss:$84 sps:$4 sm:$0xff]  }
 0x2d1   :  { %6234 = vmatmul.mubr.bf16.gmra.mrb[72].mxu1 %v11566_v31  ;;  %v12226_v31 = vld [vmem:[%s15646_s1 + $0x200] sm:$0xff]  }
 0x2d2   :  { %7615 = vmatmul.mubr.bf16.gmra.mrb[40].mxu0 %v11567_v32  ;;  %6241 = vmatprep.mubr.bf16.mxu1 %v11570_v33  ;;  %v11671_v32 = vld [vmem:[%s15647_s0 + $0xc0] ss:$84 sps:$4 sm:$0xff]  }
 0x2d3   :  { %7622 = vmatprep.mubr.bf16.mxu0 %v11572_v34  ;;  %v11672_v33 = vld [vmem:[%s15647_s0 + $0x10a0] ss:$84 sps:$4 sm:$0xff]  }
 0x2d4   :  { %v11673_v34 = vld [vmem:[%s15647_s0 + $0x16c] ss:$84 sps:$4 sm:$0xff]  }
 0x2d9   :  { %6242 = vmatmul.mubr.bf16.gmra.mrb[76].mxu1 %v11574_v36  ;;  %v11675_v36 = vld [vmem:[%s15647_s0 + $0x114c] ss:$84 sps:$4 sm:$0xff]  }
 0x2da   :  { %7623 = vmatmul.mubr.bf16.gmra.mrb[44].mxu0 %v11575_v37  ;;  %6249 = vmatprep.mubr.bf16.mxu1 %v11576_v38  ;;  %v12228_v37 = vld [vmem:[%s15646_s1 + $0x210] sm:$0xff]   ;;  %v11677_v38 = vld [vmem:[%s15647_s0 + $0x168] ss:$84 sps:$4 sm:$0xff]  }
 0x2db   :  { %7630 = vmatprep.mubr.bf16.mxu0 %v11578_v39  ;;  %v11678_v39 = vld [vmem:[%s15647_s0 + $0x1148] ss:$84 sps:$4 sm:$0xff]  }
 0x2e1   :  { %6250 = vmatmul.mubr.bf16.gmra.mrb[80].mxu1 %v11580_v40  ;;  %v11680_v40 = vld [vmem:[%s15647_s0 + $0x214] ss:$84 sps:$4 sm:$0xff]  }
 0x2e2   :  { %7631 = vmatmul.mubr.bf16.gmra.mrb[48].mxu0 %v11581_v41  ;;  %6257 = vmatprep.mubr.bf16.mxu1 %v11584_v42  ;;  %v11682_v41 = vld [vmem:[%s15647_s0 + $0x11f4] ss:$84 sps:$4 sm:$0xff]   ;;  %v12229_v42 = vld [vmem:[%s15646_s1 + $0x218] sm:$0xff]  }
 0x2e3   :  { %7638 = vmatprep.mubr.bf16.mxu0 %v11586_v43  ;;  %v12230_v43 = vld [vmem:[%s15646_s1 + $0x220] sm:$0xff]  }
 0x2e9   :  { %6258 = vmatmul.mubr.bf16.gmra.mrb[84].mxu1 %v11588_v45  ;;  %v11685_v45 = vld [vmem:[%s15647_s0 + $0x11f0] ss:$84 sps:$4 sm:$0xff]  }
 0x2ea   :  { %7639 = vmatmul.mubr.bf16.gmra.mrb[52].mxu0 %v11589_v46  ;;  %6265 = vmatprep.mubr.bf16.mxu1 %v11590_v47  ;;  %v11686_v46 = vld [vmem:[%s15647_s0 + $0x2bc] ss:$84 sps:$4 sm:$0xff]  }
 0x2eb   :  { %7646 = vmatprep.mubr.bf16.mxu0 %v11592_v48  ;;  %v11688_v47 = vld [vmem:[%s15647_s0 + $0x129c] ss:$84 sps:$4 sm:$0xff]   ;;  %v12231_v48 = vld [vmem:[%s15646_s1 + $0x228] sm:$0xff]  }
 0x2f1   :  { %6266 = vmatmul.mubr.bf16.gmra.mrb[88].mxu1 %v11594_v49  ;;  %v12232_v49 = vld [vmem:[%s15646_s1 + $0x230] sm:$0xff]  }
 0x2f2   :  { %7647 = vmatmul.mubr.bf16.gmra.mrb[56].mxu0 %v11595_v50  ;;  %6273 = vmatprep.mubr.bf16.mxu1 %v11598_v51  ;;  %v11690_v50 = vld [vmem:[%s15647_s0 + $0x2b8] ss:$84 sps:$4 sm:$0xff]  }
 0x2f3   :  { %7654 = vmatprep.mubr.bf16.mxu0 %v11600_v52  ;;  %v11691_v51 = vld [vmem:[%s15647_s0 + $0x1298] ss:$84 sps:$4 sm:$0xff]  }
 0x2f4   :  { %v11693_v52 = vld [vmem:[%s15647_s0 + $0x364] ss:$84 sps:$4 sm:$0xff]  }
 0x2f9   :  { %6274 = vmatmul.mubr.bf16.gmra.mrb[92].mxu1 %v11602_v54  ;;  %v12233_v54 = vld [vmem:[%s15646_s1 + $0x238] sm:$0xff]  }
 0x2fa   :  { %7655 = vmatmul.mubr.bf16.gmra.mrb[60].mxu0 %v11603_v55  ;;  %6281 = vmatprep.mubr.bf16.mxu1 %v11604_v56  ;;  %v12234_v55 = vld [vmem:[%s15646_s1 + $0x240] sm:$0xff]  }
 0x2fb   :  { %7662 = vmatprep.mubr.bf16.mxu0 %v11606_v57  ;;  %v11697_v56 = vld [vmem:[%s15647_s0 + $0x360] ss:$84 sps:$4 sm:$0xff]  }
 0x2fc   :  { %v11698_v57 = vld [vmem:[%s15647_s0 + $0x1340] ss:$84 sps:$4 sm:$0xff]  }
 0x301   :  { %6282 = vmatmul.mubr.bf16.gmra.mrb[96].mxu1 %v11608_v58  ;;  %v11699_v58 = vld [vmem:[%s15647_s0 + $0x40c] ss:$84 sps:$4 sm:$0xff]  }
 0x302   :  { %7663 = vmatmul.mubr.bf16.gmra.mrb[64].mxu0 %v11609_v59  ;;  %6289 = vmatprep.mubr.bf16.mxu1 %v11612_v60  ;;  %v11701_v59 = vld [vmem:[%s15647_s0 + $0x13ec] ss:$84 sps:$4 sm:$0xff]  }
 0x303   :  { %7670 = vmatprep.mubr.bf16.mxu0 %v11614_v61  ;;  %v12235_v60 = vld [vmem:[%s15646_s1 + $0x248] sm:$0xff]   ;;  %v12236_v61 = vld [vmem:[%s15646_s1 + $0x250] sm:$0xff]  }
 0x309   :  { %6290 = vmatmul.mubr.bf16.gmra.mrb[100].mxu1 %v11616_v62  ;;  %v11703_v62 = vld [vmem:[%s15647_s0 + $0x408] ss:$84 sps:$4 sm:$0xff]  }
 0x30a   :  { %7671 = vmatmul.mubr.bf16.gmra.mrb[68].mxu0 %v11617_v63  ;;  %6297 = vmatprep.mubr.bf16.mxu1 %v11618_v1  ;;  %v11704_v63 = vld [vmem:[%s15647_s0 + $0x13e8] ss:$84 sps:$4 sm:$0xff]  }
 0x30b   :  { %7678 = vmatprep.mubr.bf16.mxu0 %v11620_v2  ;;  %v11706_v1 = vld [vmem:[%s15647_s0 + $0x4b4] ss:$84 sps:$4 sm:$0xff]  }
 0x30c   :  { %v11708_v2 = vld [vmem:[%s15647_s0 + $0x1494] ss:$84 sps:$4 sm:$0xff]  }
 0x311   :  { %6298 = vmatmul.mubr.bf16.gmra.mrb[104].mxu1 %v11622_v3  ;;  %v12237_v3 = vld [vmem:[%s15646_s1 + $0x258] sm:$0xff]  }
 0x312   :  { %7679 = vmatmul.mubr.bf16.gmra.mrb[72].mxu0 %v11623_v4  ;;  %6305 = vmatprep.mubr.bf16.mxu1 %v11626_v5  ;;  %v12238_v4 = vld [vmem:[%s15646_s1 + $0x260] sm:$0xff]  }
 0x313   :  { %7686 = vmatprep.mubr.bf16.mxu0 %v11628_v6  ;;  %v11710_v5 = vld [vmem:[%s15647_s0 + $0x4b0] ss:$84 sps:$4 sm:$0xff]  }
 0x314   :  { %v11711_v6 = vld [vmem:[%s15647_s0 + $0x1490] ss:$84 sps:$4 sm:$0xff]  }
 0x319   :  { %6306 = vmatmul.mubr.bf16.gmra.mrb[108].mxu1 %v11630_v7  ;;  %v11712_v7 = vld [vmem:[%s15647_s0 + $0x55c] ss:$84 sps:$4 sm:$0xff]  }
 0x31a   :  { %7687 = vmatmul.mubr.bf16.gmra.mrb[76].mxu0 %v11631_v8  ;;  %6313 = vmatprep.mubr.bf16.mxu1 %v11632_v9  ;;  %v11716_v8 = vld [vmem:[%s15647_s0 + $0x44] ss:$84 sps:$4 sm:$0xff]   ;;  %v12239_v9 = vld [vmem:[%s15646_s1 + $0x268] sm:$0xff]  }
 0x31b   :  { %7694 = vmatprep.mubr.bf16.mxu0 %v11634_v10  ;;  %v12240_v10 = vld [vmem:[%s15646_s1 + $0x270] sm:$0xff]  }
 0x321   :  { %6314 = vmatmul.mubr.bf16.gmra.mrb[112].mxu1 %v11636_v11  ;;  %v11717_v11 = vld [vmem:[%s15647_s0 + $0x558] ss:$84 sps:$4 sm:$0xff]  }
 0x322   :  { %7695 = vmatmul.mubr.bf16.gmra.mrb[80].mxu0 %v11637_v12  ;;  %6321 = vmatprep.mubr.bf16.mxu1 %v11640_v13  ;;  %v11714_v12 = vld [vmem:[%s15647_s0 + $0x40] ss:$84 sps:$4 sm:$0xff]   ;;  %v11719_v13 = vld [vmem:[%s15647_s0 + $0x604] ss:$84 sps:$4 sm:$0xff]  }
 0x323   :  { %7702 = vmatprep.mubr.bf16.mxu0 %v11642_v14  ;;  %v11718_v14 = vld [vmem:[%s15646_s1 + $0x480] sm:$0xff]  }
 0x329   :  { %6322 = vmatmul.mubr.bf16.gmra.mrb[116].mxu1 %v11644_v15  ;;  %v11721_v15 = vld [vmem:[%s15647_s0 + $0xec] ss:$84 sps:$4 sm:$0xff]  }
 0x32a   :  { %7703 = vmatmul.mubr.bf16.gmra.mrb[84].mxu0 %v11645_v16  ;;  %6329 = vmatprep.mubr.bf16.mxu1 %v11646_v17  ;;  %v12241_v16 = vld [vmem:[%s15646_s1 + $0x278] sm:$0xff]   ;;  %v11731_v17 = vld [vmem:[%s15646_s1 + $0x488] sm:$0xff]  }
 0x32b   :  { %7710 = vmatprep.mubr.bf16.mxu0 %v11648_v18  ;;  %v11723_v18 = vld [vmem:[%s15647_s0 + $0x600] ss:$84 sps:$4 sm:$0xff]  }
 0x331   :  { %6330 = vmatmul.mubr.bf16.gmra.mrb[120].mxu1 %v11650_v19  ;;  %v11724_v19 = vld [vmem:[%s15647_s0 + $0xe8] ss:$84 sps:$4 sm:$0xff]  }
 0x332   :  { %7711 = vmatmul.mubr.bf16.gmra.mrb[88].mxu0 %v11651_v20  ;;  %6337 = vmatprep.mubr.bf16.mxu1 %v11654_v21  ;;  %v11725_v20 = vld [vmem:[%s15647_s0 + $0x6ac] ss:$84 sps:$4 sm:$0xff]   ;;  %v11727_v21 = vld [vmem:[%s15647_s0 + $0x194] ss:$84 sps:$4 sm:$0xff]  }
 0x333   :  { %7718 = vmatprep.mubr.bf16.mxu0 %v11656_v22  ;;  %v11744_v22 = vld [vmem:[%s15646_s1 + $0x490] sm:$0xff]  }
 0x339   :  { %6338 = vmatmul.mubr.bf16.gmra.mrb[124].mxu1 %v11658_v23  ;;  %v11757_v23 = vld [vmem:[%s15646_s1 + $0x498] sm:$0xff]  }
 0x33a   :  { %7719 = vmatmul.mubr.bf16.gmra.mrb[92].mxu0 %v11659_v24  ;;  %6378 = vmatprep.mubr.bf16.mxu1 %v11662_v25  ;;  %v11729_v24 = vld [vmem:[%s15647_s0 + $0x6a8] ss:$84 sps:$4 sm:$0xff]   ;;  %v11730_v25 = vld [vmem:[%s15647_s0 + $0x190] ss:$84 sps:$4 sm:$0xff]  }
 0x33b   :  { %7726 = vmatprep.mubr.bf16.mxu0 %v11663_v26  ;;  %v11732_v26 = vld [vmem:[%s15647_s0 + $0x754] ss:$84 sps:$4 sm:$0xff]  }
 0x341   :  { %6379 = vmatmul.mubr.bf16.vlgmr.msra.gmra.mrb[0].mxu1 %v11660_v27  ;;  %v11734_v27 = vld [vmem:[%s15647_s0 + $0x23c] ss:$84 sps:$4 sm:$0xff]  }
 0x342   :  { %7727 = vmatmul.mubr.bf16.gmra.mrb[96].mxu0 %v11665_v28  ;;  %9775 = vmatpush1.bf16.msra.mxu1 %v12226_v31  ;;  %v11770_v28 = vld [vmem:[%s15646_s1 + $0x4a0] sm:$0xff]   ;;  %v11737_v31 = vld [vmem:[%s15647_s0 + $0x238] ss:$84 sps:$4 sm:$0xff]  }
 0x343   :  { %6386 = vmatprep.mubr.bf16.mxu1 %v11667_v29  ;;  %7734 = vmatprep.mubr.bf16.mxu0 %v11669_v30  ;;  %v11783_v29 = vld [vmem:[%s15646_s1 + $0x4a8] sm:$0xff]   ;;  %v11736_v30 = vld [vmem:[%s15647_s0 + $0x750] ss:$84 sps:$4 sm:$0xff]  }
 0x344   :  { %9760 = vmatprep.subr.bf16.mxu1 %v12243_v0 }
 0x346   :  { %9776 = vmatpush1.bf16.msra.mxu1 %v12227_v35  ;;  %v11809_v35 = vld [vmem:[%s15646_s1 + $0x4b8] sm:$0xff]  }
 0x347   :  { %9761 = vmatprep.subr.bf16.mxu1 %v12243_v0 }
 0x349   :  { %6387 = vmatmul.mubr.bf16.gmra.mrb[4].mxu1 %v11671_v32  ;;  %v11738_v32 = vld [vmem:[%s15647_s0 + $0x7fc] ss:$84 sps:$4 sm:$0xff]  }
 0x34a   :  { %7735 = vmatmul.mubr.bf16.gmra.mrb[100].mxu0 %v11672_v33  ;;  %6394 = vmatprep.mubr.bf16.mxu1 %v11673_v34  ;;  %v11740_v33 = vld [vmem:[%s15647_s0 + $0x2e4] ss:$84 sps:$4 sm:$0xff]   ;;  %v11796_v34 = vld [vmem:[%s15646_s1 + $0x4b0] sm:$0xff]  }
 0x34b   :  { %7742 = vmatprep.mubr.bf16.mxu0 %v11675_v36  ;;  %9777 = vmatpush1.bf16.msra.mxu1 %v12228_v37  ;;  %v11742_v36 = vld [vmem:[%s15647_s0 + $0x7f8] ss:$84 sps:$4 sm:$0xff]   ;;  %v11743_v37 = vld [vmem:[%s15647_s0 + $0x2e0] ss:$84 sps:$4 sm:$0xff]  }
 0x34c   :  { %9762 = vmatprep.subr.bf16.mxu1 %v12243_v0 }
 0x34f   :  { %9778 = vmatpush1.bf16.msra.mxu1 %v12229_v42  ;;  %v11749_v42 = vld [vmem:[%s15647_s0 + $0x8a0] ss:$84 sps:$4 sm:$0xff]  }
 0x350   :  { %9763 = vmatprep.subr.bf16.mxu1 %v12243_v0 }
 0x351   :  { %6395 = vmatmul.mubr.bf16.gmra.mrb[8].mxu1 %v11677_v38  ;;  %v11745_v38 = vld [vmem:[%s15647_s0 + $0x8a4] ss:$84 sps:$4 sm:$0xff]  }
 0x352   :  { %7743 = vmatmul.mubr.bf16.gmra.mrb[104].mxu0 %v11678_v39  ;;  %6402 = vmatprep.mubr.bf16.mxu1 %v11680_v40  ;;  %v11747_v39 = vld [vmem:[%s15647_s0 + $0x38c] ss:$84 sps:$4 sm:$0xff]  }
 0x353   :  { %7750 = vmatprep.mubr.bf16.mxu0 %v11682_v41  ;;  %9779 = vmatpush1.bf16.msra.mxu1 %v12230_v43  ;;  %v11822_v40 = vld [vmem:[%s15646_s1 + $0x4c0] sm:$0xff]   ;;  %v11835_v41 = vld [vmem:[%s15646_s1 + $0x4c8] sm:$0xff]  }
 0x354   :  { %9764 = vmatprep.subr.bf16.mxu1 %v12243_v0  ;;  %v11750_v43 = vld [vmem:[%s15647_s0 + $0x388] ss:$84 sps:$4 sm:$0xff]  }
 0x357   :  { %9780 = vmatpush1.bf16.msra.mxu1 %v12231_v48  ;;  %v11756_v48 = vld [vmem:[%s15647_s0 + $0x430] ss:$84 sps:$4 sm:$0xff]  }
 0x358   :  { %9765 = vmatprep.subr.bf16.mxu1 %v12243_v0 }
 0x359   :  { %6403 = vmatmul.mubr.bf16.gmra.mrb[12].mxu1 %v11684_v44  ;;  %v11751_v44 = vld [vmem:[%s15647_s0 + $0x94c] ss:$84 sps:$4 sm:$0xff]  }
 0x35a   :  { %7751 = vmatmul.mubr.bf16.gmra.mrb[108].mxu0 %v11685_v45  ;;  %6410 = vmatprep.mubr.bf16.mxu1 %v11686_v46  ;;  %v11753_v45 = vld [vmem:[%s15647_s0 + $0x434] ss:$84 sps:$4 sm:$0xff]  }
 0x35b   :  { %7758 = vmatprep.mubr.bf16.mxu0 %v11688_v47  ;;  %9781 = vmatpush1.bf16.msra.mxu1 %v12232_v49  ;;  %v11848_v46 = vld [vmem:[%s15646_s1 + $0x4d0] sm:$0xff]   ;;  %v11755_v47 = vld [vmem:[%s15647_s0 + $0x948] ss:$84 sps:$4 sm:$0xff]  }
 0x35c   :  { %9766 = vmatprep.subr.bf16.mxu1 %v12243_v0  ;;  %v11758_v49 = vld [vmem:[%s15647_s0 + $0x9f4] ss:$84 sps:$4 sm:$0xff]  }
 0x35f   :  { %9782 = vmatpush1.bf16.msra.mxu1 %v12233_v54  ;;  %v11764_v54 = vld [vmem:[%s15647_s0 + $0xa9c] ss:$84 sps:$4 sm:$0xff]  }
 0x360   :  { %9767 = vmatprep.subr.bf16.mxu1 %v12243_v0 }
 0x361   :  { %6411 = vmatmul.mubr.bf16.gmra.mrb[16].mxu1 %v11690_v50  ;;  %v11760_v50 = vld [vmem:[%s15647_s0 + $0x4dc] ss:$84 sps:$4 sm:$0xff]  }
 0x362   :  { %7759 = vmatmul.mubr.bf16.gmra.mrb[112].mxu0 %v11691_v51  ;;  %6418 = vmatprep.mubr.bf16.mxu1 %v11693_v52  ;;  %v11861_v51 = vld [vmem:[%s15646_s1 + $0x4d8] sm:$0xff]   ;;  %v11762_v52 = vld [vmem:[%s15647_s0 + $0x9f0] ss:$84 sps:$4 sm:$0xff]  }
 0x363   :  { %7766 = vmatprep.mubr.bf16.mxu0 %v11695_v53  ;;  %9783 = vmatpush1.bf16.msra.mxu1 %v12234_v55  ;;  %v11763_v53 = vld [vmem:[%s15647_s0 + $0x4d8] ss:$84 sps:$4 sm:$0xff]  }
 0x364   :  { %9768 = vmatprep.subr.bf16.mxu1 %v12243_v0  ;;  %v11766_v55 = vld [vmem:[%s15647_s0 + $0x584] ss:$84 sps:$4 sm:$0xff]  }
 0x367   :  { %9784 = vmatpush1.bf16.msra.mxu1 %v12235_v60  ;;  %v11874_v60 = vld [vmem:[%s15646_s1 + $0x4e0] sm:$0xff]  }
 0x368   :  { %9769 = vmatprep.subr.bf16.mxu1 %v12243_v0 }
 0x369   :  { %6419 = vmatmul.mubr.bf16.gmra.mrb[20].mxu1 %v11697_v56  ;;  %v11768_v56 = vld [vmem:[%s15647_s0 + $0xa98] ss:$84 sps:$4 sm:$0xff]  }
 0x36a   :  { %7767 = vmatmul.mubr.bf16.gmra.mrb[116].mxu0 %v11698_v57  ;;  %6426 = vmatprep.mubr.bf16.mxu1 %v11699_v58  ;;  %v11769_v57 = vld [vmem:[%s15647_s0 + $0x580] ss:$84 sps:$4 sm:$0xff]   ;;  %v11771_v58 = vld [vmem:[%s15647_s0 + $0xb44] ss:$84 sps:$4 sm:$0xff]  }
 0x36b   :  { %7774 = vmatprep.mubr.bf16.mxu0 %v11701_v59  ;;  %9785 = vmatpush1.bf16.msra.mxu1 %v12236_v61  ;;  %v11773_v59 = vld [vmem:[%s15647_s0 + $0x62c] ss:$84 sps:$4 sm:$0xff]  }
 0x36c   :  { %9770 = vmatprep.subr.bf16.mxu1 %v12243_v0  ;;  %v14321_v61 = vld [vmem:[%s15646_s1 + $0x500] sm:$0xff]  }
 0x36f   :  { %9786 = vmatpush1.bf16.msra.mxu1 %v12237_v3  ;;  %v11781_v3 = vld [vmem:[%s15647_s0 + $0xbe8] ss:$84 sps:$4 sm:$0xff]  }
 0x370   :  { %9771 = vmatprep.subr.bf16.mxu1 %v12243_v0 }
 0x371   :  { %6427 = vmatmul.mubr.bf16.gmra.mrb[24].mxu1 %v11703_v62  ;;  %v11775_v62 = vld [vmem:[%s15647_s0 + $0xb40] ss:$84 sps:$4 sm:$0xff]  }
 0x372   :  { %7775 = vmatmul.mubr.bf16.gmra.mrb[120].mxu0 %v11704_v63  ;;  %6434 = vmatprep.mubr.bf16.mxu1 %v11706_v1  ;;  %v11776_v63 = vld [vmem:[%s15647_s0 + $0x628] ss:$84 sps:$4 sm:$0xff]   ;;  %v11777_v1 = vld [vmem:[%s15647_s0 + $0xbec] ss:$84 sps:$4 sm:$0xff]  }
 0x373   :  { %7782 = vmatprep.mubr.bf16.mxu0 %v11708_v2  ;;  %9787 = vmatpush1.bf16.msra.mxu1 %v12238_v4  ;;  %v11779_v2 = vld [vmem:[%s15647_s0 + $0x6d4] ss:$84 sps:$4 sm:$0xff]   ;;  %v11782_v4 = vld [vmem:[%s15647_s0 + $0x6d0] ss:$84 sps:$4 sm:$0xff]  }
 0x374   :  { %9772 = vmatprep.subr.bf16.mxu1 %v12243_v0 }
 0x377   :  { %9788 = vmatpush1.bf16.msra.mxu1 %v12239_v9  ;;  %v11789_v9 = vld [vmem:[%s15647_s0 + $0x778] ss:$84 sps:$4 sm:$0xff]  }
 0x378   :  { %9773 = vmatprep.subr.bf16.mxu1 %v12243_v0 }
 0x379   :  { %6435 = vmatmul.mubr.bf16.gmra.mrb[28].mxu1 %v11710_v5  ;;  %v11784_v5 = vld [vmem:[%s15647_s0 + $0xc94] ss:$84 sps:$4 sm:$0xff]  }
 0x37a   :  { %7783 = vmatmul.mubr.bf16.gmra.mrb[124].mxu0 %v11711_v6  ;;  %6442 = vmatprep.mubr.bf16.mxu1 %v11712_v7  ;;  %v11786_v6 = vld [vmem:[%s15647_s0 + $0x77c] ss:$84 sps:$4 sm:$0xff]   ;;  %v11888_v7 = vld [vmem:[%s15646_s1 + $0x4e8] sm:$0xff]  }
 0x37b   :  { %7823 = vmatprep.mubr.bf16.mxu0 %v11716_v8  ;;  %9789 = vmatpush1.bf16.msra.mxu1 %v12240_v10  ;;  %v11788_v8 = vld [vmem:[%s15647_s0 + $0xc90] ss:$84 sps:$4 sm:$0xff]  }
 0x37c   :  { %9774 = vmatprep.subr.bf16.mxu1 %v12243_v0  ;;  %v11790_v10 = vld [vmem:[%s15647_s0 + $0xd3c] ss:$84 sps:$4 sm:$0xff]  }
 0x37f   :  { %9790 = vmatpush1.bf16.msra.mxu1 %v12241_v16  ;;  %v11901_v16 = vld [vmem:[%s15646_s1 + $0x4f0] sm:$0xff]  }
 0x380   :  { %9691 = vmatprep.subr.bf16.mxu1 %v14321_v61 }
 0x381   :  { %6443 = vmatmul.mubr.bf16.gmra.mrb[32].mxu1 %v11717_v11  ;;  %v11792_v11 = vld [vmem:[%s15647_s0 + $0x824] ss:$84 sps:$4 sm:$0xff]  }
 0x382   :  { %7824 = vmatmul.mubr.bf16.vlgmr.msra.gmra.mrb[0].mxu0 %v11714_v12  ;;  %6450 = vmatprep.mubr.bf16.mxu1 %v11719_v13  ;;  %v11794_v12 = vld [vmem:[%s15647_s0 + $0xd38] ss:$84 sps:$4 sm:$0xff]   ;;  %v11795_v13 = vld [vmem:[%s15647_s0 + $0x820] ss:$84 sps:$4 sm:$0xff]  }
 0x383   :  { %8081 = vmatpush1.bf16.msra.mxu0 %v11718_v14  ;;  %7831 = vmatprep.mubr.bf16.mxu0 %v11721_v15  ;;  %v11797_v14 = vld [vmem:[%s15647_s0 + $0xde4] ss:$84 sps:$4 sm:$0xff]   ;;  %v11799_v15 = vld [vmem:[%s15647_s0 + $0x8cc] ss:$84 sps:$4 sm:$0xff]  }
 0x384   :  { %8082 = vmatprep.subr.bf16.mxu0 %v12243_v0 }
 0x387   :  { %8083 = vmatpush1.bf16.msra.mxu0 %v11731_v17  ;;  %v11801_v17 = vld [vmem:[%s15647_s0 + $0xde0] ss:$84 sps:$4 sm:$0xff]  }
 0x388   :  { %8084 = vmatprep.subr.bf16.mxu0 %v12243_v0 }
 0x389   :  { %6451 = vmatmul.mubr.bf16.gmra.mrb[36].mxu1 %v11723_v18  ;;  %v11802_v18 = vld [vmem:[%s15647_s0 + $0x8c8] ss:$84 sps:$4 sm:$0xff]  }
 0x38a   :  { %7832 = vmatmul.mubr.bf16.gmra.mrb[4].mxu0 %v11724_v19  ;;  %6458 = vmatprep.mubr.bf16.mxu1 %v11725_v20  ;;  %v11803_v19 = vld [vmem:[%s15647_s0 + $0xe8c] ss:$84 sps:$4 sm:$0xff]   ;;  %v11805_v20 = vld [vmem:[%s15647_s0 + $0x974] ss:$84 sps:$4 sm:$0xff]  }
 0x38b   :  { %7839 = vmatprep.mubr.bf16.mxu0 %v11727_v21  ;;  %8085 = vmatpush1.bf16.msra.mxu0 %v11744_v22  ;;  %v11808_v21 = vld [vmem:[%s15647_s0 + $0x970] ss:$84 sps:$4 sm:$0xff]   ;;  %v11810_v22 = vld [vmem:[%s15647_s0 + $0xf34] ss:$84 sps:$4 sm:$0xff]  }
 0x38c   :  { %8086 = vmatprep.subr.bf16.mxu0 %v12243_v0 }
 0x38f   :  { %8087 = vmatpush1.bf16.msra.mxu0 %v11757_v23  ;;  %v11812_v23 = vld [vmem:[%s15647_s0 + $0xa1c] ss:$84 sps:$4 sm:$0xff]  }
 0x390   :  { %8088 = vmatprep.subr.bf16.mxu0 %v12243_v0 }
 0x391   :  { %6459 = vmatmul.mubr.bf16.gmra.mrb[40].mxu1 %v11729_v24  ;;  %v11914_v24 = vld [vmem:[%s15646_s1 + $0x4f8] sm:$0xff]  }
 0x392   :  { %7840 = vmatmul.mubr.bf16.gmra.mrb[8].mxu0 %v11730_v25  ;;  %6466 = vmatprep.mubr.bf16.mxu1 %v11732_v26  ;;  %v11814_v25 = vld [vmem:[%s15647_s0 + $0xf30] ss:$84 sps:$4 sm:$0xff]   ;;  %v11815_v26 = vld [vmem:[%s15647_s0 + $0xa18] ss:$84 sps:$4 sm:$0xff]  }
 0x393   :  { %7847 = vmatprep.mubr.bf16.mxu0 %v11734_v27  ;;  %8089 = vmatpush1.bf16.msra.mxu0 %v11770_v28  ;;  %v11816_v27 = vld [vmem:[%s15647_s0 + $0xfdc] ss:$84 sps:$4 sm:$0xff]   ;;  %v11818_v28 = vld [vmem:[%s15647_s0 + $0xac4] ss:$84 sps:$4 sm:$0xff]  }
 0x394   :  { %8090 = vmatprep.subr.bf16.mxu0 %v12243_v0 }
 0x397   :  { %8091 = vmatpush1.bf16.msra.mxu0 %v11783_v29  ;;  %v11820_v29 = vld [vmem:[%s15647_s0 + $0xfd8] ss:$84 sps:$4 sm:$0xff]  }
 0x398   :  { %8092 = vmatprep.subr.bf16.mxu0 %v12243_v0 }
 0x399   :  { %6467 = vmatmul.mubr.bf16.gmra.mrb[44].mxu1 %v11736_v30  ;;  %v11821_v30 = vld [vmem:[%s15647_s0 + $0xac0] ss:$84 sps:$4 sm:$0xff]  }
 0x39a   :  { %7848 = vmatmul.mubr.bf16.gmra.mrb[12].mxu0 %v11737_v31  ;;  %6474 = vmatprep.mubr.bf16.mxu1 %v11738_v32  ;;  %v11823_v31 = vld [vmem:[%s15647_s0 + $0x1084] ss:$84 sps:$4 sm:$0xff]   ;;  %v11825_v32 = vld [vmem:[%s15647_s0 + $0xb6c] ss:$84 sps:$4 sm:$0xff]  }
 0x39b   :  { %7855 = vmatprep.mubr.bf16.mxu0 %v11740_v33  ;;  %8093 = vmatpush1.bf16.msra.mxu0 %v11796_v34  ;;  %v11827_v33 = vld [vmem:[%s15647_s0 + $0x1080] ss:$84 sps:$4 sm:$0xff]   ;;  %v11828_v34 = vld [vmem:[%s15647_s0 + $0xb68] ss:$84 sps:$4 sm:$0xff]  }
 0x39c   :  { %8094 = vmatprep.subr.bf16.mxu0 %v12243_v0 }
 0x39f   :  { %8095 = vmatpush1.bf16.msra.mxu0 %v11809_v35  ;;  %v11829_v35 = vld [vmem:[%s15647_s0 + $0x112c] ss:$84 sps:$4 sm:$0xff]  }
 0x3a0   :  { %8096 = vmatprep.subr.bf16.mxu0 %v12243_v0 }
 0x3a1   :  { %6475 = vmatmul.mubr.bf16.gmra.mrb[48].mxu1 %v11742_v36  ;;  %v11831_v36 = vld [vmem:[%s15647_s0 + $0xc14] ss:$84 sps:$4 sm:$0xff]  }
 0x3a2   :  { %7856 = vmatmul.mubr.bf16.gmra.mrb[16].mxu0 %v11743_v37  ;;  %6482 = vmatprep.mubr.bf16.mxu1 %v11745_v38  ;;  %v11833_v37 = vld [vmem:[%s15647_s0 + $0x1128] ss:$84 sps:$4 sm:$0xff]   ;;  %v11834_v38 = vld [vmem:[%s15647_s0 + $0xc10] ss:$84 sps:$4 sm:$0xff]  }
 0x3a3   :  { %7863 = vmatprep.mubr.bf16.mxu0 %v11747_v39  ;;  %8097 = vmatpush1.bf16.msra.mxu0 %v11822_v40  ;;  %v11836_v39 = vld [vmem:[%s15647_s0 + $0x11d4] ss:$84 sps:$4 sm:$0xff]   ;;  %v11838_v40 = vld [vmem:[%s15647_s0 + $0xcbc] ss:$84 sps:$4 sm:$0xff]  }
 0x3a4   :  { %8098 = vmatprep.subr.bf16.mxu0 %v12243_v0 }
 0x3a7   :  { %8099 = vmatpush1.bf16.msra.mxu0 %v11835_v41 }
 0x3a8   :  { %8100 = vmatprep.subr.bf16.mxu0 %v12243_v0 }
 0x3a9   :  { %6483 = vmatmul.mubr.bf16.gmra.mrb[52].mxu1 %v11749_v42 }
 0x3aa   :  { %7864 = vmatmul.mubr.bf16.gmra.mrb[20].mxu0 %v11750_v43  ;;  %6490 = vmatprep.mubr.bf16.mxu1 %v11751_v44  ;;  %v11840_v43 = vld [vmem:[%s15647_s0 + $0x11d0] ss:$84 sps:$4 sm:$0xff]  }
 0x3ab   :  { %7871 = vmatprep.mubr.bf16.mxu0 %v11753_v45  ;;  %8101 = vmatpush1.bf16.msra.mxu0 %v11848_v46  ;;  %v11841_v45 = vld [vmem:[%s15647_s0 + $0xcb8] ss:$84 sps:$4 sm:$0xff]   ;;  %v11842_v46 = vld [vmem:[%s15647_s0 + $0x127c] ss:$84 sps:$4 sm:$0xff]  }
 0x3ac   :  { %8102 = vmatprep.subr.bf16.mxu0 %v12243_v0 }
 0x3af   :  { %8103 = vmatpush1.bf16.msra.mxu0 %v11861_v51  ;;  %v11846_v51 = vld [vmem:[%s15647_s0 + $0x1278] ss:$84 sps:$4 sm:$0xff]  }
 0x3b0   :  { %8104 = vmatprep.subr.bf16.mxu0 %v12243_v0 }
 0x3b1   :  { %6491 = vmatmul.mubr.bf16.gmra.mrb[56].mxu1 %v11755_v47 }
 0x3b2   :  { %7872 = vmatmul.mubr.bf16.gmra.mrb[24].mxu0 %v11756_v48  ;;  %6498 = vmatprep.mubr.bf16.mxu1 %v11758_v49  ;;  %v11844_v48 = vld [vmem:[%s15647_s0 + $0xd64] ss:$84 sps:$4 sm:$0xff]  }
 0x3b3   :  { %7879 = vmatprep.mubr.bf16.mxu0 %v11760_v50  ;;  %8105 = vmatpush1.bf16.msra.mxu0 %v11874_v60 }
 0x3b4   :  { %8106 = vmatprep.subr.bf16.mxu0 %v12243_v0 }
 0x3b7   :  { %8107 = vmatpush1.bf16.msra.mxu0 %v11888_v7  ;;  %v11860_v7 = vld [vmem:[%s15647_s0 + $0xeb0] ss:$84 sps:$4 sm:$0xff]  }
 0x3b8   :  { %8108 = vmatprep.subr.bf16.mxu0 %v12243_v0 }
 0x3b9   :  { %6499 = vmatmul.mubr.bf16.gmra.mrb[60].mxu1 %v11762_v52 }
 0x3ba   :  { %7880 = vmatmul.mubr.bf16.gmra.mrb[28].mxu0 %v11763_v53  ;;  %6506 = vmatprep.mubr.bf16.mxu1 %v11764_v54  ;;  %v11847_v53 = vld [vmem:[%s15647_s0 + $0xd60] ss:$84 sps:$4 sm:$0xff]   ;;  %v11849_v54 = vld [vmem:[%s15647_s0 + $0x1324] ss:$84 sps:$4 sm:$0xff]  }
 0x3bb   :  { %7887 = vmatprep.mubr.bf16.mxu0 %v11766_v55  ;;  %8109 = vmatpush1.bf16.msra.mxu0 %v11901_v16  ;;  %v11870_v16 = vld [vmem:[%s15647_s0 + $0x564] ss:$84 sps:$4 sm:$0xff]  }
 0x3bc   :  { %8110 = vmatprep.subr.bf16.mxu0 %v12243_v0  ;;  %v11807_v0 = vld [vmem:[%s15647_s0 + $0xe88] ss:$84 sps:$4 sm:$0xff]  }
 0x3bf   :  { %8111 = vmatpush1.bf16.msra.mxu0 %v11914_v24  ;;  %v11876_v24 = vld [vmem:[%s15647_s0 + $0x60c] ss:$84 sps:$4 sm:$0xff]  }
 0x3c1   :  { %6507 = vmatmul.mubr.bf16.gmra.mrb[64].mxu1 %v11768_v56  ;;  %v11851_v56 = vld [vmem:[%s15647_s0 + $0xe0c] ss:$84 sps:$4 sm:$0xff]  }
 0x3c2   :  { %7888 = vmatmul.mubr.bf16.gmra.mrb[32].mxu0 %v11769_v57  ;;  %6514 = vmatprep.mubr.bf16.mxu1 %v11771_v58 }
 0x3c3   :  { %7895 = vmatprep.mubr.bf16.mxu0 %v11773_v59  ;;  %v11853_v59 = vld [vmem:[%s15647_s0 + $0x1320] ss:$84 sps:$4 sm:$0xff]  }
 0x3c9   :  { %6515 = vmatmul.mubr.bf16.gmra.mrb[68].mxu1 %v11775_v62  ;;  %v11854_v62 = vld [vmem:[%s15647_s0 + $0xe08] ss:$84 sps:$4 sm:$0xff]  }
 0x3ca   :  { %7896 = vmatmul.mubr.bf16.gmra.mrb[36].mxu0 %v11776_v63  ;;  %6522 = vmatprep.mubr.bf16.mxu1 %v11777_v1  ;;  %v11855_v63 = vld [vmem:[%s15647_s0 + $0x13cc] ss:$84 sps:$4 sm:$0xff]  }
 0x3cb   :  { %7903 = vmatprep.mubr.bf16.mxu0 %v11779_v2  ;;  %v11857_v2 = vld [vmem:[%s15647_s0 + $0xeb4] ss:$84 sps:$4 sm:$0xff]  }
 0x3d1   :  { %6523 = vmatmul.mubr.bf16.gmra.mrb[72].mxu1 %v11781_v3 }
 0x3d2   :  { %7904 = vmatmul.mubr.bf16.gmra.mrb[40].mxu0 %v11782_v4  ;;  %6530 = vmatprep.mubr.bf16.mxu1 %v11784_v5  ;;  %v11859_v5 = vld [vmem:[%s15647_s0 + $0x13c8] ss:$84 sps:$4 sm:$0xff]  }
 0x3d3   :  { %7911 = vmatprep.mubr.bf16.mxu0 %v11786_v6 }
 0x3d9   :  { %6531 = vmatmul.mubr.bf16.gmra.mrb[76].mxu1 %v11788_v8  ;;  %v11862_v8 = vld [vmem:[%s15647_s0 + $0x1474] ss:$84 sps:$4 sm:$0xff]  }
 0x3da   :  { %7912 = vmatmul.mubr.bf16.gmra.mrb[44].mxu0 %v11789_v9  ;;  %6538 = vmatprep.mubr.bf16.mxu1 %v11790_v10  ;;  %v11864_v10 = vld [vmem:[%s15647_s0 + $0xf5c] ss:$84 sps:$4 sm:$0xff]  }
 0x3db   :  { %7919 = vmatprep.mubr.bf16.mxu0 %v11792_v11 }
 0x3e1   :  { %6539 = vmatmul.mubr.bf16.gmra.mrb[80].mxu1 %v11794_v12 }
 0x3e2   :  { %7920 = vmatmul.mubr.bf16.gmra.mrb[48].mxu0 %v11795_v13  ;;  %6546 = vmatprep.mubr.bf16.mxu1 %v11797_v14  ;;  %v11866_v13 = vld [vmem:[%s15647_s0 + $0x1470] ss:$84 sps:$4 sm:$0xff]  }
 0x3e3   :  { %7927 = vmatprep.mubr.bf16.mxu0 %v11799_v15  ;;  %v11867_v15 = vld [vmem:[%s15647_s0 + $0xf58] ss:$84 sps:$4 sm:$0xff]  }
 0x3e9   :  { %6547 = vmatmul.mubr.bf16.gmra.mrb[84].mxu1 %v11801_v17 }
 0x3ea   :  { %7928 = vmatmul.mubr.bf16.gmra.mrb[52].mxu0 %v11802_v18  ;;  %6554 = vmatprep.mubr.bf16.mxu1 %v11803_v19  ;;  %v11871_v18 = vld [vmem:[%s15647_s0 + $0x1004] ss:$84 sps:$4 sm:$0xff]  }
 0x3eb   :  { %7935 = vmatprep.mubr.bf16.mxu0 %v11805_v20 }
 0x3f1   :  { %6555 = vmatmul.mubr.bf16.gmra.mrb[88].mxu1 %v11807_v0  ;;  %v11868_v0 = vld [vmem:[%s15647_s0 + $0x560] ss:$84 sps:$4 sm:$0xff]  }
 0x3f2   :  { %7936 = vmatmul.mubr.bf16.gmra.mrb[56].mxu0 %v11808_v21  ;;  %6562 = vmatprep.mubr.bf16.mxu1 %v11810_v22  ;;  %v11873_v22 = vld [vmem:[%s15647_s0 + $0x1000] ss:$84 sps:$4 sm:$0xff]  }
 0x3f3   :  { %7943 = vmatprep.mubr.bf16.mxu0 %v11812_v23 }
 0x3f9   :  { %6563 = vmatmul.mubr.bf16.gmra.mrb[92].mxu1 %v11814_v25  ;;  %v11878_v25 = vld [vmem:[%s15647_s0 + $0x10ac] ss:$84 sps:$4 sm:$0xff]  }
 0x3fa   :  { %7944 = vmatmul.mubr.bf16.gmra.mrb[60].mxu0 %v11815_v26  ;;  %6570 = vmatprep.mubr.bf16.mxu1 %v11816_v27  ;;  %v11951_v26 = vld [vmem:[%s15646_s1 + $0x508] sm:$0xff]  }
 0x3fb   :  { %7951 = vmatprep.mubr.bf16.mxu0 %v11818_v28 }
 0x401   :  { %6571 = vmatmul.mubr.bf16.gmra.mrb[96].mxu1 %v11820_v29  ;;  %v11880_v29 = vld [vmem:[%s15647_s0 + $0x608] ss:$84 sps:$4 sm:$0xff]  }
 0x402   :  { %7952 = vmatmul.mubr.bf16.gmra.mrb[64].mxu0 %v11821_v30  ;;  %6578 = vmatprep.mubr.bf16.mxu1 %v11823_v31  ;;  %v11881_v31 = vld [vmem:[%s15647_s0 + $0x10a8] ss:$84 sps:$4 sm:$0xff]  }
 0x403   :  { %7959 = vmatprep.mubr.bf16.mxu0 %v11825_v32 }
 0x409   :  { %6579 = vmatmul.mubr.bf16.gmra.mrb[100].mxu1 %v11827_v33  ;;  %v11884_v33 = vld [vmem:[%s15647_s0 + $0x1154] ss:$84 sps:$4 sm:$0xff]  }
 0x40a   :  { %7960 = vmatmul.mubr.bf16.gmra.mrb[68].mxu0 %v11828_v34  ;;  %6586 = vmatprep.mubr.bf16.mxu1 %v11829_v35 }
 0x40b   :  { %7967 = vmatprep.mubr.bf16.mxu0 %v11831_v36  ;;  %v11886_v36 = vld [vmem:[%s15647_s0 + $0x6b0] ss:$84 sps:$4 sm:$0xff]  }
 0x411   :  { %6587 = vmatmul.mubr.bf16.gmra.mrb[104].mxu1 %v11833_v37 }
 0x412   :  { %7968 = vmatmul.mubr.bf16.gmra.mrb[72].mxu0 %v11834_v38  ;;  %6594 = vmatprep.mubr.bf16.mxu1 %v11836_v39  ;;  %v11887_v38 = vld [vmem:[%s15647_s0 + $0x1150] ss:$84 sps:$4 sm:$0xff]  }
 0x413   :  { %7975 = vmatprep.mubr.bf16.mxu0 %v11838_v40  ;;  %v11889_v39 = vld [vmem:[%s15647_s0 + $0x75c] ss:$84 sps:$4 sm:$0xff]  }
 0x414   :  { %v14456_v41 = vpop.f32.mrb[0].mxu1 }
 0x415   :  { %v6382_v42 = vpop.f32.mrb[1].mxu1 }
 0x416   :  { %v14461_v44 = vpop.f32.mrb[2].mxu1  ;;  %v11891_v42 = vld [vmem:[%s15647_s0 + $0x11fc] ss:$84 sps:$4 sm:$0xff]  }
 0x417   :  { %v6385_v47 = vpop.f32.mrb[3].mxu1 }
 0x418   :  { %v11897_v47 = vld [vmem:[%s15647_s0 + $0x12a4] ss:$84 sps:$4 sm:$0xff]  }
 0x419   :  { %6595 = vmatmul.mubr.bf16.gmra.mrb[108].mxu1 %v11840_v43  ;;  %v11893_v43 = vld [vmem:[%s15647_s0 + $0x758] ss:$84 sps:$4 sm:$0xff]  }
 0x41a   :  { %7976 = vmatmul.mubr.bf16.gmra.mrb[76].mxu0 %v11841_v45  ;;  %6602 = vmatprep.mubr.bf16.mxu1 %v11842_v46  ;;  %v11894_v45 = vld [vmem:[%s15647_s0 + $0x11f8] ss:$84 sps:$4 sm:$0xff]  }
 0x41b   :  { %7983 = vmatprep.mubr.bf16.mxu0 %v11844_v48  ;;  %v11895_v46 = vld [vmem:[%s15647_s0 + $0x804] ss:$84 sps:$4 sm:$0xff]   ;;  %v11899_v48 = vld [vmem:[%s15647_s0 + $0x800] ss:$84 sps:$4 sm:$0xff]  }
 0x41c   :  { %v14472_v49 = vpop.f32.mrb[4].mxu1 }
 0x41d   :  { %v6390_v50 = vpop.f32.mrb[5].mxu1 }
 0x41e   :  { %v14477_v52 = vpop.f32.mrb[6].mxu1  ;;  %v11900_v50 = vld [vmem:[%s15647_s0 + $0x12a0] ss:$84 sps:$4 sm:$0xff]  }
 0x41f   :  { %v6393_v55 = vpop.f32.mrb[7].mxu1 }
 0x420   :  { %v11907_v55 = vld [vmem:[%s15647_s0 + $0x1348] ss:$84 sps:$4 sm:$0xff]  }
 0x421   :  { %6603 = vmatmul.mubr.bf16.gmra.mrb[112].mxu1 %v11846_v51  ;;  %v11902_v51 = vld [vmem:[%s15647_s0 + $0x8ac] ss:$84 sps:$4 sm:$0xff]  }
 0x422   :  { %7984 = vmatmul.mubr.bf16.gmra.mrb[80].mxu0 %v11847_v53  ;;  %6610 = vmatprep.mubr.bf16.mxu1 %v11849_v54  ;;  %v11904_v53 = vld [vmem:[%s15647_s0 + $0x134c] ss:$84 sps:$4 sm:$0xff]   ;;  %v11906_v54 = vld [vmem:[%s15647_s0 + $0x8a8] ss:$84 sps:$4 sm:$0xff]  }
 0x423   :  { %7991 = vmatprep.mubr.bf16.mxu0 %v11851_v56  ;;  %v11908_v56 = vld [vmem:[%s15647_s0 + $0x954] ss:$84 sps:$4 sm:$0xff]  }
 0x424   :  { %v14488_v57 = vpop.f32.mrb[8].mxu1 }
 0x425   :  { %v6398_v58 = vpop.f32.mrb[9].mxu1 }
 0x426   :  { %v14493_v60 = vpop.f32.mrb[10].mxu1  ;;  %v11910_v58 = vld [vmem:[%s15647_s0 + $0x13f4] ss:$84 sps:$4 sm:$0xff]  }
 0x427   :  { %v6401_v1 = vpop.f32.mrb[11].mxu1 }
 0x428   :  { %v11917_v1 = vld [vmem:[%s15647_s0 + $0x149c] ss:$84 sps:$4 sm:$0xff]  }
 0x429   :  { %6611 = vmatmul.mubr.bf16.gmra.mrb[116].mxu1 %v11853_v59  ;;  %v11912_v59 = vld [vmem:[%s15647_s0 + $0x950] ss:$84 sps:$4 sm:$0xff]  }
 0x42a   :  { %7992 = vmatmul.mubr.bf16.gmra.mrb[84].mxu0 %v11854_v62  ;;  %6618 = vmatprep.mubr.bf16.mxu1 %v11855_v63  ;;  %v11913_v62 = vld [vmem:[%s15647_s0 + $0x13f0] ss:$84 sps:$4 sm:$0xff]  }
 0x42b   :  { %7999 = vmatprep.mubr.bf16.mxu0 %v11857_v2  ;;  %v11915_v63 = vld [vmem:[%s15647_s0 + $0x9fc] ss:$84 sps:$4 sm:$0xff]   ;;  %v11919_v2 = vld [vmem:[%s15647_s0 + $0x9f8] ss:$84 sps:$4 sm:$0xff]  }
 0x42c   :  { %v14504_v3 = vpop.f32.mrb[12].mxu1 }
 0x42d   :  { %v6406_v4 = vpop.f32.mrb[13].mxu1 }
 0x42e   :  { %v14509_v6 = vpop.f32.mrb[14].mxu1  ;;  %v11920_v4 = vld [vmem:[%s15647_s0 + $0x1498] ss:$84 sps:$4 sm:$0xff]  }
 0x42f   :  { %v6409_v9 = vpop.f32.mrb[15].mxu1 }
 0x430   :  { %v11923_v9 = vld [vmem:[%s15647_s0 + $0x48] ss:$84 sps:$4 sm:$0xff]  }
 0x431   :  { %6619 = vmatmul.mubr.bf16.gmra.mrb[120].mxu1 %v11859_v5  ;;  %v11921_v5 = vld [vmem:[%s15647_s0 + $0xaa4] ss:$84 sps:$4 sm:$0xff]  }
 0x432   :  { %8000 = vmatmul.mubr.bf16.gmra.mrb[88].mxu0 %v11860_v7  ;;  %6626 = vmatprep.mubr.bf16.mxu1 %v11862_v8  ;;  %v11925_v7 = vld [vmem:[%s15647_s0 + $0x4c] ss:$84 sps:$4 sm:$0xff]  }
 0x433   :  { %8007 = vmatprep.mubr.bf16.mxu0 %v11864_v10  ;;  %v11926_v8 = vld [vmem:[%s15647_s0 + $0xaa0] ss:$84 sps:$4 sm:$0xff]  }
 0x434   :  { %v14520_v11 = vpop.f32.mrb[16].mxu1  ;;  %v11927_v10 = vld [vmem:[%s15647_s0 + $0xb4c] ss:$84 sps:$4 sm:$0xff]  }
 0x435   :  { %v6414_v12 = vpop.f32.mrb[17].mxu1 }
 0x436   :  { %v14525_v14 = vpop.f32.mrb[18].mxu1  ;;  %v11929_v12 = vld [vmem:[%s15647_s0 + $0xf4] ss:$84 sps:$4 sm:$0xff]  }
 0x437   :  { %v6417_v17 = vpop.f32.mrb[19].mxu1 }
 0x438   :  { %v11935_v17 = vld [vmem:[%s15647_s0 + $0x19c] ss:$84 sps:$4 sm:$0xff]  }
 0x439   :  { %6627 = vmatmul.mubr.bf16.gmra.mrb[124].mxu1 %v11866_v13  ;;  %v11931_v13 = vld [vmem:[%s15647_s0 + $0xb48] ss:$84 sps:$4 sm:$0xff]  }
 0x43a   :  { %8008 = vmatmul.mubr.bf16.gmra.mrb[92].mxu0 %v11867_v15  ;;  %6731 = vmatprep.mubr.bf16.mxu1 %v11870_v16  ;;  %v11932_v15 = vld [vmem:[%s15647_s0 + $0xf0] ss:$84 sps:$4 sm:$0xff]   ;;  %v11933_v16 = vld [vmem:[%s15647_s0 + $0xbf4] ss:$84 sps:$4 sm:$0xff]  }
 0x43b   :  { %8015 = vmatprep.mubr.bf16.mxu0 %v11871_v18  ;;  %v11937_v18 = vld [vmem:[%s15647_s0 + $0xbf0] ss:$84 sps:$4 sm:$0xff]  }
 0x43c   :  { %v14536_v19 = vpop.f32.mrb[20].mxu1 }
 0x43d   :  { %v6422_v20 = vpop.f32.mrb[21].mxu1 }
 0x43e   :  { %v14541_v21 = vpop.f32.mrb[22].mxu1  ;;  %v11938_v20 = vld [vmem:[%s15647_s0 + $0x198] ss:$84 sps:$4 sm:$0xff]  }
 0x43f   :  { %v6425_v23 = vpop.f32.mrb[23].mxu1 }
 0x440   :  { %v11943_v23 = vld [vmem:[%s15647_s0 + $0xc98] ss:$84 sps:$4 sm:$0xff]  }
 0x441   :  { %6732 = vmatmul.mubr.bf16.vlgmr.msra.gmra.mrb[32].mxu1 %v11868_v0  ;;  %v11939_v0 = vld [vmem:[%s15647_s0 + $0xc9c] ss:$84 sps:$4 sm:$0xff]  }
 0x442   :  { %8016 = vmatmul.mubr.bf16.gmra.mrb[96].mxu0 %v11873_v22  ;;  %9692 = vmatpush3.bf16.msra.mxu1 %v14321_v61  ;;  %v11882_v61 = vld [vmem:[%s15647_s0 + $0x6b4] ss:$84 sps:$4 sm:$0xff]   ;;  %v11941_v22 = vld [vmem:[%s15647_s0 + $0x244] ss:$84 sps:$4 sm:$0xff]  }
 0x443   :  { %6739 = vmatprep.mubr.bf16.mxu1 %v11876_v24  ;;  %8023 = vmatprep.mubr.bf16.mxu0 %v11878_v25  ;;  %v11944_v24 = vld [vmem:[%s15647_s0 + $0x240] ss:$84 sps:$4 sm:$0xff]   ;;  %v11945_v25 = vld [vmem:[%s15647_s0 + $0xd44] ss:$84 sps:$4 sm:$0xff]  }
 0x444   :  { %v14556_v27 = vpop.f32.mrb[24].mxu1  ;;  %9693 = vmatprep.subr.bf16.mxu1 %v11951_v26 }
 0x445   :  { %v6430_v28 = vpop.f32.mrb[25].mxu1 }
 0x446   :  { %v14561_v30 = vpop.f32.mrb[26].mxu1  ;;  %9694 = vmatpush3.bf16.msra.mxu1 %v11951_v26  ;;  %v11947_v26 = vld [vmem:[%s15647_s0 + $0x2ec] ss:$84 sps:$4 sm:$0xff]  }
 0x447   :  { %v6433_v32 = vpop.f32.mrb[27].mxu1  ;;  %v11949_v28 = vld [vmem:[%s15647_s0 + $0xd40] ss:$84 sps:$4 sm:$0xff]  }
 0x448   :  { %v11956_v32 = vld [vmem:[%s15647_s0 + $0xde8] ss:$84 sps:$4 sm:$0xff]  }
 0x449   :  { %6740 = vmatmul.mubr.bf16.gmra.mrb[36].mxu1 %v11880_v29  ;;  %v11950_v29 = vld [vmem:[%s15647_s0 + $0x2e8] ss:$84 sps:$4 sm:$0xff]  }
 0x44a   :  { %8024 = vmatmul.mubr.bf16.gmra.mrb[100].mxu0 %v11881_v31  ;;  %6747 = vmatprep.mubr.bf16.mxu1 %v11882_v61  ;;  %v11952_v31 = vld [vmem:[%s15647_s0 + $0xdec] ss:$84 sps:$4 sm:$0xff]   ;;  %v11954_v61 = vld [vmem:[%s15647_s0 + $0x394] ss:$84 sps:$4 sm:$0xff]  }
 0x44b   :  { %8031 = vmatprep.mubr.bf16.mxu0 %v11884_v33  ;;  %v11957_v33 = vld [vmem:[%s15647_s0 + $0x390] ss:$84 sps:$4 sm:$0xff]  }
 0x44c   :  { %v14572_v34 = vpop.f32.mrb[28].mxu1 }
 0x44d   :  { %v6438_v35 = vpop.f32.mrb[29].mxu1 }
 0x44e   :  { %v14577_v37 = vpop.f32.mrb[30].mxu1  ;;  %v11958_v35 = vld [vmem:[%s15647_s0 + $0xe94] ss:$84 sps:$4 sm:$0xff]  }
 0x44f   :  { %v6441_v40 = vpop.f32.mrb[31].mxu1 }
 0x450   :  { %v11964_v40 = vld [vmem:[%s15647_s0 + $0xf3c] ss:$84 sps:$4 sm:$0xff]  }
 0x451   :  { %6748 = vmatmul.mubr.bf16.gmra.mrb[40].mxu1 %v11886_v36  ;;  %v11960_v36 = vld [vmem:[%s15647_s0 + $0x43c] ss:$84 sps:$4 sm:$0xff]  }
 0x452   :  { %8032 = vmatmul.mubr.bf16.gmra.mrb[104].mxu0 %v11887_v38  ;;  %6755 = vmatprep.mubr.bf16.mxu1 %v11889_v39  ;;  %v11962_v38 = vld [vmem:[%s15647_s0 + $0xe90] ss:$84 sps:$4 sm:$0xff]   ;;  %v11963_v39 = vld [vmem:[%s15647_s0 + $0x438] ss:$84 sps:$4 sm:$0xff]  }
 0x453   :  { %8039 = vmatprep.mubr.bf16.mxu0 %v11891_v42  ;;  %v11966_v42 = vld [vmem:[%s15647_s0 + $0x4e4] ss:$84 sps:$4 sm:$0xff]  }
 0x459   :  { %6756 = vmatmul.mubr.bf16.gmra.mrb[44].mxu1 %v11893_v43  ;;  %v11968_v43 = vld [vmem:[%s15647_s0 + $0xf38] ss:$84 sps:$4 sm:$0xff]  }
 0x45a   :  { %8040 = vmatmul.mubr.bf16.gmra.mrb[108].mxu0 %v11894_v45  ;;  %6763 = vmatprep.mubr.bf16.mxu1 %v11895_v46  ;;  %v11969_v45 = vld [vmem:[%s15647_s0 + $0x4e0] ss:$84 sps:$4 sm:$0xff]   ;;  %v11970_v46 = vld [vmem:[%s15647_s0 + $0xfe4] ss:$84 sps:$4 sm:$0xff]  }
 0x45b   :  { %8047 = vmatprep.mubr.bf16.mxu0 %v11897_v47  ;;  %v11972_v47 = vld [vmem:[%s15647_s0 + $0x58c] ss:$84 sps:$4 sm:$0xff]  }
 0x461   :  { %6764 = vmatmul.mubr.bf16.gmra.mrb[48].mxu1 %v11899_v48  ;;  %v11974_v48 = vld [vmem:[%s15647_s0 + $0xfe0] ss:$84 sps:$4 sm:$0xff]  }
 0x462   :  { %8048 = vmatmul.mubr.bf16.gmra.mrb[112].mxu0 %v11900_v50  ;;  %6771 = vmatprep.mubr.bf16.mxu1 %v11902_v51  ;;  %v11975_v50 = vld [vmem:[%s15647_s0 + $0x588] ss:$84 sps:$4 sm:$0xff]   ;;  %v11976_v51 = vld [vmem:[%s15647_s0 + $0x108c] ss:$84 sps:$4 sm:$0xff]  }
 0x463   :  { %8055 = vmatprep.mubr.bf16.mxu0 %v11904_v53  ;;  %v11978_v53 = vld [vmem:[%s15647_s0 + $0x634] ss:$84 sps:$4 sm:$0xff]  }
 0x469   :  { %6772 = vmatmul.mubr.bf16.gmra.mrb[52].mxu1 %v11906_v54  ;;  %v11980_v54 = vld [vmem:[%s15647_s0 + $0x1088] ss:$84 sps:$4 sm:$0xff]  }
 0x46a   :  { %8056 = vmatmul.mubr.bf16.gmra.mrb[116].mxu0 %v11907_v55  ;;  %6779 = vmatprep.mubr.bf16.mxu1 %v11908_v56  ;;  %v11981_v55 = vld [vmem:[%s15647_s0 + $0x630] ss:$84 sps:$4 sm:$0xff]   ;;  %v11982_v56 = vld [vmem:[%s15647_s0 + $0x1134] ss:$84 sps:$4 sm:$0xff]  }
 0x46b   :  { %8063 = vmatprep.mubr.bf16.mxu0 %v11910_v58  ;;  %v11984_v58 = vld [vmem:[%s15647_s0 + $0x6dc] ss:$84 sps:$4 sm:$0xff]  }
 0x471   :  { %6780 = vmatmul.mubr.bf16.gmra.mrb[56].mxu1 %v11912_v59  ;;  %v11986_v59 = vld [vmem:[%s15647_s0 + $0x1130] ss:$84 sps:$4 sm:$0xff]  }
 0x472   :  { %8064 = vmatmul.mubr.bf16.gmra.mrb[120].mxu0 %v11913_v62  ;;  %6787 = vmatprep.mubr.bf16.mxu1 %v11915_v63  ;;  %v11987_v62 = vld [vmem:[%s15647_s0 + $0x6d8] ss:$84 sps:$4 sm:$0xff]   ;;  %v11988_v63 = vld [vmem:[%s15647_s0 + $0x11dc] ss:$84 sps:$4 sm:$0xff]  }
 0x473   :  { %8071 = vmatprep.mubr.bf16.mxu0 %v11917_v1  ;;  %v11990_v1 = vld [vmem:[%s15647_s0 + $0x784] ss:$84 sps:$4 sm:$0xff]  }
 0x479   :  { %6788 = vmatmul.mubr.bf16.gmra.mrb[60].mxu1 %v11919_v2  ;;  %v11992_v2 = vld [vmem:[%s15647_s0 + $0x11d8] ss:$84 sps:$4 sm:$0xff]  }
 0x47a   :  { %8072 = vmatmul.mubr.bf16.gmra.mrb[124].mxu0 %v11920_v4  ;;  %6795 = vmatprep.mubr.bf16.mxu1 %v11921_v5  ;;  %v11993_v4 = vld [vmem:[%s15647_s0 + $0x780] ss:$84 sps:$4 sm:$0xff]   ;;  %v11994_v5 = vld [vmem:[%s15647_s0 + $0x1284] ss:$84 sps:$4 sm:$0xff]  }
 0x47b   :  { %8112 = vmatprep.mubr.bf16.mxu0 %v11925_v7  ;;  %v11996_v7 = vld [vmem:[%s15647_s0 + $0x82c] ss:$84 sps:$4 sm:$0xff]  }
 0x481   :  { %6796 = vmatmul.mubr.bf16.gmra.mrb[64].mxu1 %v11926_v8  ;;  %v11998_v8 = vld [vmem:[%s15647_s0 + $0x1280] ss:$84 sps:$4 sm:$0xff]  }
 0x482   :  { %8113 = vmatmul.mubr.bf16.vlgmr.msra.gmra.mrb[0].mxu0 %v11923_v9  ;;  %6803 = vmatprep.mubr.bf16.mxu1 %v11927_v10  ;;  %v11999_v9 = vld [vmem:[%s15647_s0 + $0x828] ss:$84 sps:$4 sm:$0xff]   ;;  %v12000_v10 = vld [vmem:[%s15647_s0 + $0x132c] ss:$84 sps:$4 sm:$0xff]  }
 0x483   :  { %8120 = vmatprep.mubr.bf16.mxu0 %v11929_v12  ;;  %v12002_v12 = vld [vmem:[%s15647_s0 + $0x8d4] ss:$84 sps:$4 sm:$0xff]  }
 0x489   :  { %6804 = vmatmul.mubr.bf16.gmra.mrb[68].mxu1 %v11931_v13  ;;  %v12004_v13 = vld [vmem:[%s15647_s0 + $0x1328] ss:$84 sps:$4 sm:$0xff]  }
 0x48a   :  { %8121 = vmatmul.mubr.bf16.gmra.mrb[4].mxu0 %v11932_v15  ;;  %6811 = vmatprep.mubr.bf16.mxu1 %v11933_v16  ;;  %v12005_v15 = vld [vmem:[%s15647_s0 + $0x8d0] ss:$84 sps:$4 sm:$0xff]   ;;  %v12006_v16 = vld [vmem:[%s15647_s0 + $0x13d4] ss:$84 sps:$4 sm:$0xff]  }
 0x48b   :  { %8128 = vmatprep.mubr.bf16.mxu0 %v11935_v17  ;;  %v12008_v17 = vld [vmem:[%s15647_s0 + $0x97c] ss:$84 sps:$4 sm:$0xff]  }
 0x491   :  { %6812 = vmatmul.mubr.bf16.gmra.mrb[72].mxu1 %v11937_v18  ;;  %v12010_v18 = vld [vmem:[%s15647_s0 + $0x13d0] ss:$84 sps:$4 sm:$0xff]  }
 0x492   :  { %8129 = vmatmul.mubr.bf16.gmra.mrb[8].mxu0 %v11938_v20  ;;  %6819 = vmatprep.mubr.bf16.mxu1 %v11939_v0  ;;  %v12011_v20 = vld [vmem:[%s15647_s0 + $0x978] ss:$84 sps:$4 sm:$0xff]   ;;  %v12012_v0 = vld [vmem:[%s15647_s0 + $0x147c] ss:$84 sps:$4 sm:$0xff]  }
 0x493   :  { %8136 = vmatprep.mubr.bf16.mxu0 %v11941_v22  ;;  %v12014_v22 = vld [vmem:[%s15647_s0 + $0xa24] ss:$84 sps:$4 sm:$0xff]  }
 0x499   :  { %6820 = vmatmul.mubr.bf16.gmra.mrb[76].mxu1 %v11943_v23  ;;  %v12016_v23 = vld [vmem:[%s15647_s0 + $0x1478] ss:$84 sps:$4 sm:$0xff]  }
 0x49a   :  { %8137 = vmatmul.mubr.bf16.gmra.mrb[12].mxu0 %v11944_v24  ;;  %6827 = vmatprep.mubr.bf16.mxu1 %v11945_v25  ;;  %v12017_v24 = vld [vmem:[%s15647_s0 + $0xa20] ss:$84 sps:$4 sm:$0xff]   ;;  %v12020_v25 = vld [vmem:[%s15647_s0 + $0x50] ss:$84 sps:$4 sm:$0xff]  }
 0x49b   :  { %8144 = vmatprep.mubr.bf16.mxu0 %v11947_v26  ;;  %v12018_v26 = vld [vmem:[%s15647_s0 + $0xacc] ss:$84 sps:$4 sm:$0xff]  }
 0x4a1   :  { %6828 = vmatmul.mubr.bf16.gmra.mrb[80].mxu1 %v11949_v28  ;;  %v12022_v28 = vld [vmem:[%s15647_s0 + $0xf8] ss:$84 sps:$4 sm:$0xff]  }
 0x4a2   :  { %8145 = vmatmul.mubr.bf16.gmra.mrb[16].mxu0 %v11950_v29  ;;  %6835 = vmatprep.mubr.bf16.mxu1 %v11952_v31  ;;  %v12021_v29 = vld [vmem:[%s15647_s0 + $0xac8] ss:$84 sps:$4 sm:$0xff]   ;;  %v12025_v31 = vld [vmem:[%s15647_s0 + $0x1a0] ss:$84 sps:$4 sm:$0xff]  }
 0x4a3   :  { %8152 = vmatprep.mubr.bf16.mxu0 %v11954_v61  ;;  %v12023_v61 = vld [vmem:[%s15647_s0 + $0xb74] ss:$84 sps:$4 sm:$0xff]  }
 0x4a9   :  { %6836 = vmatmul.mubr.bf16.gmra.mrb[84].mxu1 %v11956_v32  ;;  %v12027_v32 = vld [vmem:[%s15647_s0 + $0x248] ss:$84 sps:$4 sm:$0xff]  }
 0x4aa   :  { %8153 = vmatmul.mubr.bf16.gmra.mrb[20].mxu0 %v11957_v33  ;;  %6843 = vmatprep.mubr.bf16.mxu1 %v11958_v35  ;;  %v12026_v33 = vld [vmem:[%s15647_s0 + $0xb70] ss:$84 sps:$4 sm:$0xff]  }
 0x4ab   :  { %8160 = vmatprep.mubr.bf16.mxu0 %v11960_v36  ;;  %v12030_v35 = vld [vmem:[%s15647_s0 + $0x2f0] ss:$84 sps:$4 sm:$0xff]  }
 0x4ac   :  { %v12028_v36 = vld [vmem:[%s15647_s0 + $0xc1c] ss:$84 sps:$4 sm:$0xff]  }
 0x4b1   :  { %6844 = vmatmul.mubr.bf16.gmra.mrb[88].mxu1 %v11962_v38  ;;  %v12032_v38 = vld [vmem:[%s15647_s0 + $0x398] ss:$84 sps:$4 sm:$0xff]  }
 0x4b2   :  { %8161 = vmatmul.mubr.bf16.gmra.mrb[24].mxu0 %v11963_v39  ;;  %6851 = vmatprep.mubr.bf16.mxu1 %v11964_v40  ;;  %v12031_v39 = vld [vmem:[%s15647_s0 + $0xc18] ss:$84 sps:$4 sm:$0xff]   ;;  %v12035_v40 = vld [vmem:[%s15647_s0 + $0x440] ss:$84 sps:$4 sm:$0xff]  }
 0x4b3   :  { %8168 = vmatprep.mubr.bf16.mxu0 %v11966_v42  ;;  %v12033_v42 = vld [vmem:[%s15647_s0 + $0xcc4] ss:$84 sps:$4 sm:$0xff]  }
 0x4b9   :  { %6852 = vmatmul.mubr.bf16.gmra.mrb[92].mxu1 %v11968_v43 }
 0x4ba   :  { %8169 = vmatmul.mubr.bf16.gmra.mrb[28].mxu0 %v11969_v45  ;;  %6859 = vmatprep.mubr.bf16.mxu1 %v11970_v46  ;;  %v12037_v46 = vld [vmem:[%s15647_s0 + $0x4e8] ss:$84 sps:$4 sm:$0xff]  }
 0x4bb   :  { %8176 = vmatprep.mubr.bf16.mxu0 %v11972_v47 }
 0x4c1   :  { %6860 = vmatmul.mubr.bf16.gmra.mrb[96].mxu1 %v11974_v48  ;;  %v12036_v48 = vld [vmem:[%s15647_s0 + $0xcc0] ss:$84 sps:$4 sm:$0xff]  }
 0x4c2   :  { %8177 = vmatmul.mubr.bf16.gmra.mrb[32].mxu0 %v11975_v50  ;;  %6867 = vmatprep.mubr.bf16.mxu1 %v11976_v51  ;;  %v12040_v50 = vld [vmem:[%s15647_s0 + $0x590] ss:$84 sps:$4 sm:$0xff]  }
 0x4c3   :  { %8184 = vmatprep.mubr.bf16.mxu0 %v11978_v53  ;;  %v12038_v53 = vld [vmem:[%s15647_s0 + $0xd6c] ss:$84 sps:$4 sm:$0xff]  }
 0x4c9   :  { %6868 = vmatmul.mubr.bf16.gmra.mrb[100].mxu1 %v11980_v54 }
 0x4ca   :  { %8185 = vmatmul.mubr.bf16.gmra.mrb[36].mxu0 %v11981_v55  ;;  %6875 = vmatprep.mubr.bf16.mxu1 %v11982_v56  ;;  %v12042_v56 = vld [vmem:[%s15647_s0 + $0x638] ss:$84 sps:$4 sm:$0xff]  }
 0x4cb   :  { %8192 = vmatprep.mubr.bf16.mxu0 %v11984_v58 }
 0x4d1   :  { %6876 = vmatmul.mubr.bf16.gmra.mrb[104].mxu1 %v11986_v59  ;;  %v12041_v59 = vld [vmem:[%s15647_s0 + $0xd68] ss:$84 sps:$4 sm:$0xff]  }
 0x4d2   :  { %8193 = vmatmul.mubr.bf16.gmra.mrb[40].mxu0 %v11987_v62  ;;  %6883 = vmatprep.mubr.bf16.mxu1 %v11988_v63  ;;  %v12045_v62 = vld [vmem:[%s15647_s0 + $0x6e0] ss:$84 sps:$4 sm:$0xff]  }
 0x4d3   :  { %8200 = vmatprep.mubr.bf16.mxu0 %v11990_v1  ;;  %v12043_v1 = vld [vmem:[%s15647_s0 + $0xe14] ss:$84 sps:$4 sm:$0xff]  }
 0x4d9   :  { %6884 = vmatmul.mubr.bf16.gmra.mrb[108].mxu1 %v11992_v2 }
 0x4da   :  { %8201 = vmatmul.mubr.bf16.gmra.mrb[44].mxu0 %v11993_v4  ;;  %6891 = vmatprep.mubr.bf16.mxu1 %v11994_v5  ;;  %v12047_v5 = vld [vmem:[%s15647_s0 + $0x788] ss:$84 sps:$4 sm:$0xff]  }
 0x4db   :  { %8208 = vmatprep.mubr.bf16.mxu0 %v11996_v7 }
 0x4e1   :  { %6892 = vmatmul.mubr.bf16.gmra.mrb[112].mxu1 %v11998_v8  ;;  %v12046_v8 = vld [vmem:[%s15647_s0 + $0xe10] ss:$84 sps:$4 sm:$0xff]  }
 0x4e2   :  { %8209 = vmatmul.mubr.bf16.gmra.mrb[48].mxu0 %v11999_v9  ;;  %6899 = vmatprep.mubr.bf16.mxu1 %v12000_v10  ;;  %v12050_v9 = vld [vmem:[%s15647_s0 + $0x830] ss:$84 sps:$4 sm:$0xff]  }
 0x4e3   :  { %8216 = vmatprep.mubr.bf16.mxu0 %v12002_v12  ;;  %v12048_v12 = vld [vmem:[%s15647_s0 + $0xebc] ss:$84 sps:$4 sm:$0xff]  }
 0x4e9   :  { %6900 = vmatmul.mubr.bf16.gmra.mrb[116].mxu1 %v12004_v13 }
 0x4ea   :  { %8217 = vmatmul.mubr.bf16.gmra.mrb[52].mxu0 %v12005_v15  ;;  %6907 = vmatprep.mubr.bf16.mxu1 %v12006_v16  ;;  %v12052_v16 = vld [vmem:[%s15647_s0 + $0x8d8] ss:$84 sps:$4 sm:$0xff]  }
 0x4eb   :  { %8224 = vmatprep.mubr.bf16.mxu0 %v12008_v17 }
 0x4f1   :  { %6908 = vmatmul.mubr.bf16.gmra.mrb[120].mxu1 %v12010_v18  ;;  %v12051_v18 = vld [vmem:[%s15647_s0 + $0xeb8] ss:$84 sps:$4 sm:$0xff]  }
 0x4f2   :  { %8225 = vmatmul.mubr.bf16.gmra.mrb[56].mxu0 %v12011_v20  ;;  %6915 = vmatprep.mubr.bf16.mxu1 %v12012_v0  ;;  %v12055_v20 = vld [vmem:[%s15647_s0 + $0x980] ss:$84 sps:$4 sm:$0xff]  }
 0x4f3   :  { %8232 = vmatprep.mubr.bf16.mxu0 %v12014_v22  ;;  %v12053_v22 = vld [vmem:[%s15647_s0 + $0xf64] ss:$84 sps:$4 sm:$0xff]  }
 0x4f9   :  { %6916 = vmatmul.mubr.bf16.gmra.mrb[124].mxu1 %v12016_v23 }
 0x4fa   :  { %8233 = vmatmul.mubr.bf16.gmra.mrb[60].mxu0 %v12017_v24  ;;  %9695 = vmatprep.mubr.msk.bf16.mxu1 %vm5382_vm0, %v12020_v25  ;;  %v12057_v25 = vld [vmem:[%s15647_s0 + $0xa28] ss:$84 sps:$4 sm:$0xff]  }
 0x4fb   :  { %8240 = vmatprep.mubr.bf16.mxu0 %v12018_v26 }
 0x501   :  { %9696 = vmatmul.mubr.msk.bf16.vlgmr.msra.gmra.mrb[128].mxu1 %vm5382_vm0, %v12022_v28  ;;  %v12056_v28 = vld [vmem:[%s15647_s0 + $0xf60] ss:$84 sps:$4 sm:$0xff]  }
 0x502   :  { %8241 = vmatmul.mubr.bf16.gmra.mrb[64].mxu0 %v12021_v29  ;;  %9699 = vmatprep.mubr.msk.bf16.mxu1 %vm5382_vm0, %v12025_v31  ;;  %v12060_v29 = vld [vmem:[%s15647_s0 + $0xad0] ss:$84 sps:$4 sm:$0xff]  }
 0x503   :  { %8248 = vmatprep.mubr.bf16.mxu0 %v12023_v61  ;;  %v12058_v61 = vld [vmem:[%s15647_s0 + $0x100c] ss:$84 sps:$4 sm:$0xff]  }
 0x509   :  { %9700 = vmatmul.mubr.msk.bf16.gmra.mrb[132].mxu1 %vm5382_vm0, %v12027_v32 }
 0x50a   :  { %8249 = vmatmul.mubr.bf16.gmra.mrb[68].mxu0 %v12026_v33  ;;  %9703 = vmatprep.mubr.msk.bf16.mxu1 %vm5382_vm0, %v12030_v35  ;;  %v12062_v35 = vld [vmem:[%s15647_s0 + $0xb78] ss:$84 sps:$4 sm:$0xff]  }
 0x50b   :  { %8256 = vmatprep.mubr.bf16.mxu0 %v12028_v36 }
 0x511   :  { %9704 = vmatmul.mubr.msk.bf16.gmra.mrb[136].mxu1 %vm5382_vm0, %v12032_v38  ;;  %v12061_v38 = vld [vmem:[%s15647_s0 + $0x1008] ss:$84 sps:$4 sm:$0xff]  }
 0x512   :  { %8257 = vmatmul.mubr.bf16.gmra.mrb[72].mxu0 %v12031_v39  ;;  %9707 = vmatprep.mubr.msk.bf16.mxu1 %vm5382_vm0, %v12035_v40  ;;  %v12065_v39 = vld [vmem:[%s15647_s0 + $0xc20] ss:$84 sps:$4 sm:$0xff]  }
 0x513   :  { %8264 = vmatprep.mubr.bf16.mxu0 %v12033_v42  ;;  %v12063_v42 = vld [vmem:[%s15647_s0 + $0x10b4] ss:$84 sps:$4 sm:$0xff]  }
 0x514   :  { %v14883_v43 = vpop.f32.mrb[32].mxu1 }
 0x515   :  { %v6735_v45 = vpop.f32.mrb[33].mxu1 }
 0x516   :  { %v14888_v47 = vpop.f32.mrb[34].mxu1 }
 0x517   :  { %v6738_v51 = vpop.f32.mrb[35].mxu1 }
 0x518   :  { %v12066_v51 = vld [vmem:[%s15647_s0 + $0x10b0] ss:$84 sps:$4 sm:$0xff]  }
 0x519   :  { %9708 = vmatmul.mubr.msk.bf16.gmra.mrb[140].mxu1 %vm5382_vm0, %v12037_v46 }
 0x51a   :  { %8265 = vmatmul.mubr.bf16.gmra.mrb[76].mxu0 %v12036_v48  ;;  %9711 = vmatprep.mubr.msk.bf16.mxu1 %vm5382_vm0, %v12040_v50  ;;  %v12067_v48 = vld [vmem:[%s15647_s0 + $0xcc8] ss:$84 sps:$4 sm:$0xff]  }
 0x51b   :  { %8272 = vmatprep.mubr.bf16.mxu0 %v12038_v53  ;;  %v12070_v53 = vld [vmem:[%s15647_s0 + $0xd70] ss:$84 sps:$4 sm:$0xff]  }
 0x51c   :  { %v14901_v54 = vpop.f32.mrb[36].mxu1 }
 0x51d   :  { %v6743_v55 = vpop.f32.mrb[37].mxu1 }
 0x51e   :  { %v14906_v58 = vpop.f32.mrb[38].mxu1 }
 0x51f   :  { %v6746_v63 = vpop.f32.mrb[39].mxu1 }
 0x520   :  { %v12072_v63 = vld [vmem:[%s15647_s0 + $0xe18] ss:$84 sps:$4 sm:$0xff]  }
 0x521   :  { %9712 = vmatmul.mubr.msk.bf16.gmra.mrb[144].mxu1 %vm5382_vm0, %v12042_v56  ;;  %v12068_v56 = vld [vmem:[%s15647_s0 + $0x115c] ss:$84 sps:$4 sm:$0xff]  }
 0x522   :  { %8273 = vmatmul.mubr.bf16.gmra.mrb[80].mxu0 %v12041_v59  ;;  %9715 = vmatprep.mubr.msk.bf16.mxu1 %vm5382_vm0, %v12045_v62 }
 0x523   :  { %8280 = vmatprep.mubr.bf16.mxu0 %v12043_v1 }
 0x524   :  { %v14919_v2 = vpop.f32.mrb[40].mxu1 }
 0x525   :  { %v6751_v4 = vpop.f32.mrb[41].mxu1 }
 0x526   :  { %v14924_v7 = vpop.f32.mrb[42].mxu1  ;;  %v12071_v4 = vld [vmem:[%s15647_s0 + $0x1158] ss:$84 sps:$4 sm:$0xff]  }
 0x527   :  { %v6754_v10 = vpop.f32.mrb[43].mxu1 }
 0x528   :  { %v15028_v10 = vld [vmem:[%s15648_s2] ss:$0 sm:$0xff] }
 0x529   :  { %9716 = vmatmul.mubr.msk.bf16.gmra.mrb[148].mxu1 %vm5382_vm0, %v12047_v5  ;;  %v12075_v5 = vld [vmem:[%s15647_s0 + $0xec0] ss:$84 sps:$4 sm:$0xff]  }
 0x52a   :  { %8281 = vmatmul.mubr.bf16.gmra.mrb[84].mxu0 %v12046_v8  ;;  %9719 = vmatprep.mubr.msk.bf16.mxu1 %vm5382_vm0, %v12050_v9  ;;  %v12073_v9 = vld [vmem:[%s15647_s0 + $0x1204] ss:$84 sps:$4 sm:$0xff]  }
 0x52b   :  { %8288 = vmatprep.mubr.bf16.mxu0 %v12048_v12  ;;  %v9791_v12 = vadd.f32 %v15028_v10, %v14456_v41  ;;  %v12076_v41 = vld [vmem:[%s15647_s0 + $0x1200] ss:$84 sps:$4 sm:$0xff]  }
 0x52c   :  { %v14937_v13 = vpop.f32.mrb[44].mxu1 }
 0x52d   :  { %v6759_v15 = vpop.f32.mrb[45].mxu1 }
 0x52e   :  { %v14942_v17 = vpop.f32.mrb[46].mxu1 }
 0x52f   :  { %v6762_v0 = vpop.f32.mrb[47].mxu1 }
 0x530   :  { %v9793_v0 = vadd.f32 %v15028_v10, %v14461_v44 }
 0x531   :  { %9720 = vmatmul.mubr.msk.bf16.gmra.mrb[152].mxu1 %vm5382_vm0, %v12052_v16 }
 0x532   :  { %8289 = vmatmul.mubr.bf16.gmra.mrb[88].mxu0 %v12051_v18  ;;  %9723 = vmatprep.mubr.msk.bf16.mxu1 %vm5382_vm0, %v12055_v20  ;;  %v12077_v20 = vld [vmem:[%s15647_s0 + $0xf68] ss:$84 sps:$4 sm:$0xff]  }
 0x533   :  { %8296 = vmatprep.mubr.bf16.mxu0 %v12053_v22 }
 0x534   :  { %v14955_v23 = vpop.f32.mrb[48].mxu1 }
 0x535   :  { %v6767_v24 = vpop.f32.mrb[49].mxu1 }
 0x536   :  { %v14960_v26 = vpop.f32.mrb[50].mxu1 }
 0x537   :  { %v6770_v31 = vpop.f32.mrb[51].mxu1 }
 0x539   :  { %9724 = vmatmul.mubr.msk.bf16.gmra.mrb[156].mxu1 %vm5382_vm0, %v12057_v25 }
 0x53a   :  { %8297 = vmatmul.mubr.bf16.gmra.mrb[92].mxu0 %v12056_v28  ;;  %9727 = vmatprep.mubr.msk.bf16.mxu1 %vm5382_vm0, %v12060_v29  ;;  %v12080_v28 = vld [vmem:[%s15647_s0 + $0x1010] ss:$84 sps:$4 sm:$0xff]  }
 0x53b   :  { %8304 = vmatprep.mubr.bf16.mxu0 %v12058_v61  ;;  %v12078_v61 = vld [vmem:[%s15647_s0 + $0x12ac] ss:$84 sps:$4 sm:$0xff]  }
 0x53c   :  { %v14973_v32 = vpop.f32.mrb[52].mxu1 }
 0x53d   :  { %v6775_v33 = vpop.f32.mrb[53].mxu1 }
 0x53e   :  { %v14978_v36 = vpop.f32.mrb[54].mxu1 }
 0x53f   :  { %v6778_v40 = vpop.f32.mrb[55].mxu1 }
 0x541   :  { %9728 = vmatmul.mubr.msk.bf16.gmra.mrb[160].mxu1 %vm5382_vm0, %v12062_v35  ;;  %v9795_v35 = vadd.f32 %v15028_v10, %v14472_v49  ;;  %v12081_v49 = vld [vmem:[%s15647_s0 + $0x12a8] ss:$84 sps:$4 sm:$0xff]  }
 0x542   :  { %8305 = vmatmul.mubr.bf16.gmra.mrb[96].mxu0 %v12061_v38  ;;  %9731 = vmatprep.mubr.msk.bf16.mxu1 %vm5382_vm0, %v12065_v39 }
 0x543   :  { %8312 = vmatprep.mubr.bf16.mxu0 %v12063_v42  ;;  %v12082_v42 = vld [vmem:[%s15647_s0 + $0x10b8] ss:$84 sps:$4 sm:$0xff]  }
 0x544   :  { %v14991_v45 = vpop.f32.mrb[56].mxu1 }
 0x545   :  { %v6783_v46 = vpop.f32.mrb[57].mxu1 }
 0x546   :  { %v14996_v50 = vpop.f32.mrb[58].mxu1  ;;  %v9797_v46 = vadd.f32 %v15028_v10, %v14477_v52 }
 0x547   :  { %v6786_v55 = vpop.f32.mrb[59].mxu1 }
 0x548   :  { %v12085_v55 = vld [vmem:[%s15647_s0 + $0x1160] ss:$84 sps:$4 sm:$0xff]  }
 0x549   :  { %9732 = vmatmul.mubr.msk.bf16.gmra.mrb[164].mxu1 %vm5382_vm0, %v12067_v48 }
 0x54a   :  { %8313 = vmatmul.mubr.bf16.gmra.mrb[100].mxu0 %v12066_v51  ;;  %9735 = vmatprep.mubr.msk.bf16.mxu1 %vm5382_vm0, %v12070_v53 }
 0x54b   :  { %8320 = vmatprep.mubr.bf16.mxu0 %v12068_v56 }
 0x54c   :  { %v15009_v59 = vpop.f32.mrb[60].mxu1 }
 0x54d   :  { %v6791_v62 = vpop.f32.mrb[61].mxu1 }
 0x54e   :  { %v15014_v1 = vpop.f32.mrb[62].mxu1 }
 0x54f   :  { %v6794_v8 = vpop.f32.mrb[63].mxu1 }
 0x551   :  { %9736 = vmatmul.mubr.msk.bf16.gmra.mrb[168].mxu1 %vm5382_vm0, %v12072_v63  ;;  %v12083_v63 = vld [vmem:[%s15647_s0 + $0x1354] ss:$84 sps:$4 sm:$0xff]  }
 0x552   :  { %8321 = vmatmul.mubr.bf16.gmra.mrb[104].mxu0 %v12071_v4  ;;  %9739 = vmatprep.mubr.msk.bf16.mxu1 %vm5382_vm0, %v12075_v5  ;;  %v9799_v5 = vadd.f32 %v15028_v10, %v14488_v57  ;;  %v12086_v57 = vld [vmem:[%s15647_s0 + $0x1350] ss:$84 sps:$4 sm:$0xff]  }
 0x553   :  { %8328 = vmatprep.mubr.bf16.mxu0 %v12073_v9 }
 0x554   :  { %v15034_v15 = vpop.f32.mrb[64].mxu1 }
 0x555   :  { %v8114_v16 = vpop.f32.mrb[0].mxu0  ;;  %v6799_v18 = vpop.f32.mrb[65].mxu1 }
 0x556   :  { %v15041_v22 = vadd.f32 %v9791_v12, %v8114_v16  ;;  %v8116_v24 = vpop.f32.mrb[1].mxu0  ;;  %v15043_v25 = vpop.f32.mrb[66].mxu1  ;;  %v12087_v16 = vld [vmem:[%s15647_s0 + $0x1208] ss:$84 sps:$4 sm:$0xff]   ;;  %v9801_v18 = vadd.f32 %v15028_v10, %v14493_v60 }
 0x557   :  { %v8117_v29 = vpop.f32.mrb[2].mxu0  ;;  %v6802_v31 = vpop.f32.mrb[67].mxu1 }
 0x558   :  { %v15054_v44 = vadd.f32 %v9793_v0, %v8117_v29  ;;  %v8119_v33 = vpop.f32.mrb[3].mxu0  ;;  %v12088_v31 = vld [vmem:[%s15647_s0 + $0x13fc] ss:$84 sps:$4 sm:$0xff]  }
 0x559   :  { %9740 = vmatmul.mubr.msk.bf16.gmra.mrb[172].mxu1 %vm5382_vm0, %v12077_v20  ;;  %v9803_v33 = vadd.f32 %v15028_v10, %v14504_v3  ;;  %v12091_v3 = vld [vmem:[%s15647_s0 + $0x13f8] ss:$84 sps:$4 sm:$0xff]  }
 0x55a   :  { %8329 = vmatmul.mubr.bf16.gmra.mrb[108].mxu0 %v12076_v41  ;;  %9743 = vmatprep.mubr.msk.bf16.mxu1 %vm5382_vm0, %v12080_v28  ;;  %v12090_v41 = vld [vmem:[%s15647_s0 + $0x12b0] ss:$84 sps:$4 sm:$0xff]  }
 0x55b   :  { %8336 = vmatprep.mubr.bf16.mxu0 %v12078_v61 }
 0x55c   :  { %v15060_v38 = vpop.f32.mrb[68].mxu1 }
 0x55d   :  { %v8122_v39 = vpop.f32.mrb[4].mxu0  ;;  %v6807_v40 = vpop.f32.mrb[69].mxu1 }
 0x55e   :  { %v15067_v48 = vadd.f32 %v9795_v35, %v8122_v39  ;;  %v8124_v51 = vpop.f32.mrb[5].mxu0  ;;  %v15069_v53 = vpop.f32.mrb[70].mxu1 }
 0x55f   :  { %v8125_v56 = vpop.f32.mrb[6].mxu0  ;;  %v6810_v62 = vpop.f32.mrb[71].mxu1 }
 0x560   :  { %v15080_v52 = vadd.f32 %v9797_v46, %v8125_v56  ;;  %v8127_v4 = vpop.f32.mrb[7].mxu0  ;;  %v9805_v46 = vadd.f32 %v15028_v10, %v14509_v6  ;;  %v12095_v56 = vld [vmem:[%s15647_s0 + $0x1400] ss:$84 sps:$4 sm:$0xff]  }
 0x561   :  { %9744 = vmatmul.mubr.msk.bf16.gmra.mrb[176].mxu1 %vm5382_vm0, %v12082_v42  ;;  %v12092_v42 = vld [vmem:[%s15647_s0 + $0x1358] ss:$84 sps:$4 sm:$0xff]  }
 0x562   :  { %8337 = vmatmul.mubr.bf16.gmra.mrb[112].mxu0 %v12081_v49  ;;  %9747 = vmatprep.mubr.msk.bf16.mxu1 %vm5382_vm0, %v12085_v55  ;;  %v12093_v4 = vld [vmem:[%s15647_s0 + $0x14a4] ss:$84 sps:$4 sm:$0xff]  }
 0x563   :  { %8344 = vmatprep.mubr.bf16.mxu0 %v12083_v63 }
 0x564   :  { %v15086_v8 = vpop.f32.mrb[72].mxu1 }
 0x565   :  { %v8130_v9 = vpop.f32.mrb[8].mxu0  ;;  %v6815_v12 = vpop.f32.mrb[73].mxu1 }
 0x566   :  { %v15093_v20 = vadd.f32 %v9799_v5, %v8130_v9  ;;  %v8132_v0 = vpop.f32.mrb[9].mxu0  ;;  %v15095_v24 = vpop.f32.mrb[74].mxu1  ;;  %v9807_v9 = vadd.f32 %v15028_v10, %v14520_v11  ;;  %v12096_v11 = vld [vmem:[%s15647_s0 + $0x14a0] ss:$84 sps:$4 sm:$0xff]  }
 0x567   :  { %v8133_v28 = vpop.f32.mrb[10].mxu0  ;;  %v6818_v29 = vpop.f32.mrb[75].mxu1  ;;  %v12097_v0 = vld [vmem:[%s15647_s0 + $0x14a8] ss:$84 sps:$4 sm:$0xff]  }
 0x568   :  { %v15106_v60 = vadd.f32 %v9801_v18, %v8133_v28  ;;  %v8135_v61 = vpop.f32.mrb[11].mxu0 }
 0x569   :  { %9748 = vmatmul.mubr.msk.bf16.gmra.mrb[180].mxu1 %vm5382_vm0, %v12087_v16 }
 0x56a   :  { %8345 = vmatmul.mubr.bf16.gmra.mrb[116].mxu0 %v12086_v57  ;;  %9751 = vmatprep.mubr.msk.bf16.mxu1 %vm5382_vm0, %v12090_v41  ;;  %v9809_v57 = vadd.f32 %v15028_v10, %v14525_v14  ;;  %v9811_v14 = vadd.f32 %v15028_v10, %v14536_v19  ;;  %v9815_v19 = vadd.f32 %v15028_v10, %v14556_v27 }
 0x56b   :  { %8352 = vmatprep.mubr.bf16.mxu0 %v12088_v31  ;;  %v9819_v27 = vadd.f32 %v15028_v10, %v14572_v34  ;;  %v9823_v34 = vadd.f32 %v15028_v10, %v14883_v43  ;;  %v9827_v43 = vadd.f32 %v15028_v10, %v14901_v54  ;;  %v9831_v54 = vadd.f32 %v15028_v10, %v14919_v2 }
 0x56c   :  { %v15112_v35 = vpop.f32.mrb[76].mxu1  ;;  %v9835_v2 = vadd.f32 %v15028_v10, %v14937_v13  ;;  %v9839_v13 = vadd.f32 %v15028_v10, %v14955_v23  ;;  %v9843_v23 = vadd.f32 %v15028_v10, %v14973_v32  ;;  %v9847_v32 = vadd.f32 %v15028_v10, %v14991_v45 }
 0x56d   :  { %v8138_v39 = vpop.f32.mrb[12].mxu0  ;;  %v6823_v40 = vpop.f32.mrb[77].mxu1  ;;  %v9851_v45 = vadd.f32 %v15028_v10, %v15009_v59  ;;  %v9855_v59 = vadd.f32 %v15028_v10, %v15034_v15 }
 0x56e   :  { %v15119_v51 = vadd.f32 %v9803_v33, %v8138_v39  ;;  %v8140_v49 = vpop.f32.mrb[13].mxu0  ;;  %v15121_v55 = vpop.f32.mrb[78].mxu1 }
 0x56f   :  { %v8141_v62 = vpop.f32.mrb[14].mxu0  ;;  %v6826_v63 = vpop.f32.mrb[79].mxu1  ;;  %v9813_v49 = vadd.f32 %v15028_v10, %v14541_v21  ;;  %v9817_v21 = vadd.f32 %v15028_v10, %v14561_v30  ;;  %v9821_v30 = vadd.f32 %v15028_v10, %v14577_v37  ;;  %v9825_v37 = vadd.f32 %v15028_v10, %v14888_v47 }
 0x570   :  { %v15132_v6 = vadd.f32 %v9805_v46, %v8141_v62  ;;  %v8143_v5 = vpop.f32.mrb[15].mxu0  ;;  %v9829_v47 = vadd.f32 %v15028_v10, %v14906_v58  ;;  %v9833_v58 = vadd.f32 %v15028_v10, %v14924_v7  ;;  %v9837_v7 = vadd.f32 %v15028_v10, %v14942_v17 }
 0x571   :  { %9752 = vmatmul.mubr.msk.bf16.gmra.mrb[184].mxu1 %vm5382_vm0, %v12092_v42  ;;  %v9841_v17 = vadd.f32 %v15028_v10, %v14960_v26  ;;  %v9845_v26 = vadd.f32 %v15028_v10, %v14978_v36  ;;  %v9849_v36 = vadd.f32 %v15028_v10, %v14996_v50  ;;  %v9853_v50 = vadd.f32 %v15028_v10, %v15014_v1 }
 0x572   :  { %8353 = vmatmul.mubr.bf16.gmra.mrb[120].mxu0 %v12091_v3  ;;  %9755 = vmatprep.mubr.msk.bf16.mxu1 %vm5382_vm0, %v12095_v56  ;;  %v9857_v1 = vadd.f32 %v15028_v10, %v15043_v25  ;;  %v9859_v25 = vadd.f32 %v15028_v10, %v15060_v38 }
 0x573   :  { %8360 = vmatprep.mubr.bf16.mxu0 %v12093_v4 }
 0x574   :  { %v15138_v12 = vpop.f32.mrb[80].mxu1 }
 0x575   :  { %v8146_v16 = vpop.f32.mrb[16].mxu0  ;;  %v6831_v18 = vpop.f32.mrb[81].mxu1 }
 0x576   :  { %v15145_v41 = vadd.f32 %v9807_v9, %v8146_v16  ;;  %v8148_v28 = vpop.f32.mrb[17].mxu0  ;;  %v15147_v29 = vpop.f32.mrb[82].mxu1 }
 0x577   :  { %v8149_v31 = vpop.f32.mrb[18].mxu0  ;;  %v6834_v61 = vpop.f32.mrb[83].mxu1 }
 0x578   :  { %v15152_v33 = vadd.f32 %v9809_v57, %v8149_v31  ;;  %v8151_v39 = vpop.f32.mrb[19].mxu0 }
 0x579   :  { %9756 = vmatmul.mubr.msk.bf16.gmra.mrb[188].mxu1 %vm5382_vm0, %v12097_v0 }
 0x57a   :  { %8361 = vmatmul.mubr.bf16.gmra.mrb[124].mxu0 %v12096_v11 }
 0x57c   :  { %v15157_v40 = vpop.f32.mrb[84].mxu1 }
 0x57d   :  { %v8154_v42 = vpop.f32.mrb[20].mxu0  ;;  %v6839_v46 = vpop.f32.mrb[85].mxu1 }
 0x57e   :  { %v15161_v3 = vadd.f32 %v9811_v14, %v8154_v42  ;;  %v8156_v56 = vpop.f32.mrb[21].mxu0  ;;  %v15163_v62 = vpop.f32.mrb[86].mxu1 }
 0x57f   :  { %v8157_v63 = vpop.f32.mrb[22].mxu0  ;;  %v6842_v4 = vpop.f32.mrb[87].mxu1 }
 0x580   :  { %v15165_v5 = vadd.f32 %v9813_v49, %v8157_v63  ;;  %v8159_v9 = vpop.f32.mrb[23].mxu0 }
 0x584   :  { %v15169_v16 = vpop.f32.mrb[88].mxu1 }
 0x585   :  { %v8162_v18 = vpop.f32.mrb[24].mxu0  ;;  %v6847_v0 = vpop.f32.mrb[89].mxu1 }
 0x586   :  { %v15173_v57 = vadd.f32 %v9815_v19, %v8162_v18  ;;  %v8164_v28 = vpop.f32.mrb[25].mxu0  ;;  %v15175_v11 = vpop.f32.mrb[90].mxu1 }
 0x587   :  { %v8165_v31 = vpop.f32.mrb[26].mxu0  ;;  %v6850_v61 = vpop.f32.mrb[91].mxu1 }
 0x588   :  { %v15177_v39 = vadd.f32 %v9817_v21, %v8165_v31  ;;  %v8167_v14 = vpop.f32.mrb[27].mxu0 }
 0x58c   :  { %v15181_v42 = vpop.f32.mrb[92].mxu1 }
 0x58d   :  { %v8170_v46 = vpop.f32.mrb[28].mxu0  ;;  %v6855_v49 = vpop.f32.mrb[93].mxu1 }
 0x58e   :  { %v15185_v56 = vadd.f32 %v9819_v27, %v8170_v46  ;;  %v8172_v63 = vpop.f32.mrb[29].mxu0  ;;  %v15187_v4 = vpop.f32.mrb[94].mxu1 }
 0x58f   :  { %v8173_v9 = vpop.f32.mrb[30].mxu0  ;;  %v6858_v19 = vpop.f32.mrb[95].mxu1 }
 0x590   :  { %v15189_v18 = vadd.f32 %v9821_v30, %v8173_v9  ;;  %v8175_v0 = vpop.f32.mrb[31].mxu0 }
 0x594   :  { %v15193_v21 = vpop.f32.mrb[96].mxu1 }
 0x595   :  { %v8178_v28 = vpop.f32.mrb[32].mxu0  ;;  %v6863_v31 = vpop.f32.mrb[97].mxu1 }
 0x596   :  { %v15197_v61 = vadd.f32 %v9823_v34, %v8178_v28  ;;  %v8180_v14 = vpop.f32.mrb[33].mxu0  ;;  %v15199_v27 = vpop.f32.mrb[98].mxu1 }
 0x597   :  { %15650 = vst [vmem:[#allocation2_spill] sm:$0xff] %v15199_v27  ;;  %v8181_v46 = vpop.f32.mrb[34].mxu0  ;;  %v6866_v49 = vpop.f32.mrb[99].mxu1 }
 0x598   :  { %v15201_v30 = vadd.f32 %v9825_v37, %v8181_v46  ;;  %v8183_v63 = vpop.f32.mrb[35].mxu0 }
 0x59c   :  { %v15205_v9 = vpop.f32.mrb[100].mxu1 }
 0x59d   :  { %15651 = vst [vmem:[#allocation3_spill] sm:$0xff] %v15205_v9  ;;  %v8186_v19 = vpop.f32.mrb[36].mxu0  ;;  %v6871_v0 = vpop.f32.mrb[101].mxu1 }
 0x59e   :  { %v15209_v34 = vadd.f32 %v9827_v43, %v8186_v19  ;;  %v8188_v28 = vpop.f32.mrb[37].mxu0  ;;  %v15211_v31 = vpop.f32.mrb[102].mxu1 }
 0x59f   :  { %15652 = vst [vmem:[#allocation4_spill] sm:$0xff] %v15211_v31  ;;  %v8189_v14 = vpop.f32.mrb[38].mxu0  ;;  %v6874_v49 = vpop.f32.mrb[103].mxu1 }
 0x5a0   :  { %v15213_v37 = vadd.f32 %v9829_v47, %v8189_v14  ;;  %v8191_v46 = vpop.f32.mrb[39].mxu0 }
 0x5a4   :  { %v15217_v63 = vpop.f32.mrb[104].mxu1 }
 0x5a5   :  { %15653 = vst [vmem:[#allocation5_spill] sm:$0xff] %v15217_v63  ;;  %v8194_v9 = vpop.f32.mrb[40].mxu0  ;;  %v6879_v0 = vpop.f32.mrb[105].mxu1 }
 0x5a6   :  { %v15221_v43 = vadd.f32 %v9831_v54, %v8194_v9  ;;  %v8196_v19 = vpop.f32.mrb[41].mxu0  ;;  %v15223_v28 = vpop.f32.mrb[106].mxu1 }
 0x5a7   :  { %15654 = vst [vmem:[#allocation6_spill] sm:$0xff] %v15223_v28  ;;  %v8197_v31 = vpop.f32.mrb[42].mxu0  ;;  %v6882_v49 = vpop.f32.mrb[107].mxu1 }
 0x5a8   :  { %v15225_v47 = vadd.f32 %v9833_v58, %v8197_v31  ;;  %v8199_v14 = vpop.f32.mrb[43].mxu0 }
 0x5ac   :  { %v15229_v46 = vpop.f32.mrb[108].mxu1 }
 0x5ad   :  { %15655 = vst [vmem:[#allocation7_spill] sm:$0xff] %v15229_v46  ;;  %v8202_v63 = vpop.f32.mrb[44].mxu0  ;;  %v6887_v0 = vpop.f32.mrb[109].mxu1 }
 0x5ae   :  { %v15233_v9 = vadd.f32 %v9835_v2, %v8202_v63  ;;  %v8204_v54 = vpop.f32.mrb[45].mxu0  ;;  %v15235_v19 = vpop.f32.mrb[110].mxu1 }
 0x5af   :  { %15656 = vst [vmem:[#allocation8_spill] sm:$0xff] %v15235_v19  ;;  %v8205_v28 = vpop.f32.mrb[46].mxu0  ;;  %v6890_v49 = vpop.f32.mrb[111].mxu1 }
 0x5b0   :  { %v15237_v31 = vadd.f32 %v9837_v7, %v8205_v28  ;;  %v8207_v58 = vpop.f32.mrb[47].mxu0 }
 0x5b4   :  { %v15241_v14 = vpop.f32.mrb[112].mxu1 }
 0x5b5   :  { %15657 = vst [vmem:[#allocation9_spill] sm:$0xff] %v15241_v14  ;;  %v8210_v46 = vpop.f32.mrb[48].mxu0  ;;  %v6895_v0 = vpop.f32.mrb[113].mxu1 }
 0x5b6   :  { %v15245_v63 = vadd.f32 %v9839_v13, %v8210_v46  ;;  %v8212_v2 = vpop.f32.mrb[49].mxu0  ;;  %v15247_v54 = vpop.f32.mrb[114].mxu1 }
 0x5b7   :  { %15658 = vst [vmem:[#allocation10_spill] sm:$0xff] %v15247_v54  ;;  %v8213_v19 = vpop.f32.mrb[50].mxu0  ;;  %v6898_v49 = vpop.f32.mrb[115].mxu1 }
 0x5b8   :  { %v15249_v28 = vadd.f32 %v9841_v17, %v8213_v19  ;;  %v8215_v7 = vpop.f32.mrb[51].mxu0 }
 0x5bc   :  { %v15253_v58 = vpop.f32.mrb[116].mxu1 }
 0x5bd   :  { %15659 = vst [vmem:[#allocation11_spill] sm:$0xff] %v15253_v58  ;;  %v8218_v14 = vpop.f32.mrb[52].mxu0  ;;  %v6903_v0 = vpop.f32.mrb[117].mxu1 }
 0x5be   :  { %v15257_v46 = vadd.f32 %v9843_v23, %v8218_v14  ;;  %v8220_v13 = vpop.f32.mrb[53].mxu0  ;;  %v15259_v2 = vpop.f32.mrb[118].mxu1 }
 0x5bf   :  { %15660 = vst [vmem:[#allocation12_spill] sm:$0xff] %v15259_v2  ;;  %v8221_v54 = vpop.f32.mrb[54].mxu0  ;;  %v6906_v49 = vpop.f32.mrb[119].mxu1 }
 0x5c0   :  { %v15261_v19 = vadd.f32 %v9845_v26, %v8221_v54  ;;  %v8223_v17 = vpop.f32.mrb[55].mxu0 }
 0x5c4   :  { %v15265_v7 = vpop.f32.mrb[120].mxu1 }
 0x5c5   :  { %15661 = vst [vmem:[#allocation13_spill] sm:$0xff] %v15265_v7  ;;  %v8226_v58 = vpop.f32.mrb[56].mxu0  ;;  %v6911_v0 = vpop.f32.mrb[121].mxu1 }
 0x5c6   :  { %v15269_v14 = vadd.f32 %v9847_v32, %v8226_v58  ;;  %v8228_v23 = vpop.f32.mrb[57].mxu0  ;;  %v15271_v13 = vpop.f32.mrb[122].mxu1 }
 0x5c7   :  { %15662 = vst [vmem:[#allocation14_spill] sm:$0xff] %v15271_v13  ;;  %v8229_v2 = vpop.f32.mrb[58].mxu0  ;;  %v6914_v49 = vpop.f32.mrb[123].mxu1 }
 0x5c8   :  { %v15273_v54 = vadd.f32 %v9849_v36, %v8229_v2  ;;  %v8231_v26 = vpop.f32.mrb[59].mxu0 }
 0x5cc   :  { %v15277_v17 = vpop.f32.mrb[124].mxu1 }
 0x5cd   :  { %15663 = vst [vmem:[#allocation15_spill] sm:$0xff] %v15277_v17  ;;  %v8234_v7 = vpop.f32.mrb[60].mxu0  ;;  %v6919_v0 = vpop.f32.mrb[125].mxu1 }
 0x5ce   :  { %v15281_v58 = vadd.f32 %v9851_v45, %v8234_v7  ;;  %v8236_v32 = vpop.f32.mrb[61].mxu0  ;;  %v15283_v23 = vpop.f32.mrb[126].mxu1 }
 0x5cf   :  { %15664 = vst [vmem:[#allocation16_spill] sm:$0xff] %v15283_v23  ;;  %v8237_v13 = vpop.f32.mrb[62].mxu0  ;;  %v6922_v49 = vpop.f32.mrb[127].mxu1 }
 0x5d0   :  { %v15285_v2 = vadd.f32 %v9853_v50, %v8237_v13  ;;  %v8239_v36 = vpop.f32.mrb[63].mxu0 }
 0x5d4   :  { %v9697_v26 = vpop.f32.mrb[128].mxu1 }
 0x5d5   :  { %v8242_v17 = vpop.f32.mrb[64].mxu0  ;;  %v8412_v0 = vadd.f32 %v15067_v48, %v9697_v26  ;;  %v8403_v27 = vpop.f32.mrb[129].mxu1 }
 0x5d6   :  { %v15292_v7 = vadd.f32 %v9855_v59, %v8242_v17  ;;  %v8244_v45 = vpop.f32.mrb[65].mxu0  ;;  %v8404_v32 = vadd.f32 %v15041_v22, %v8403_v27  ;;  %v9698_v49 = vpop.f32.mrb[130].mxu1 }
 0x5d7   :  { %12098 = vtanh.f32 %v8412_v0  ;;  %v8245_v13 = vpop.f32.mrb[66].mxu0  ;;  %v8415_v50 = vadd.f32 %v15080_v52, %v9698_v49  ;;  %v8406_v36 = vpop.f32.mrb[131].mxu1  ;;  %v9861_v52 = vadd.f32 %v15028_v10, %v15069_v53 }
 0x5d8   :  { %12100 = vtanh.f32 %v8404_v32  ;;  %v15296_v15 = vadd.f32 %v9857_v1, %v8245_v13  ;;  %v8247_v23 = vpop.f32.mrb[67].mxu0  ;;  %v8407_v48 = vadd.f32 %v15054_v44, %v8406_v36 }
 0x5d9   :  { %12102 = vtanh.f32 %v8415_v50  ;;  %v9863_v50 = vadd.f32 %v15028_v10, %v15086_v8 }
 0x5da   :  { %12104 = vtanh.f32 %v8407_v48 }
 0x5dc   :  { %v9701_v17 = vpop.f32.mrb[132].mxu1 }
 0x5dd   :  { %v8250_v59 = vpop.f32.mrb[68].mxu0  ;;  %v8428_v22 = vadd.f32 %v15119_v51, %v9701_v17  ;;  %v8419_v27 = vpop.f32.mrb[133].mxu1  ;;  %v9865_v17 = vadd.f32 %v15028_v10, %v15095_v24 }
 0x5de   :  { %v15304_v26 = vadd.f32 %v9859_v25, %v8250_v59  ;;  %v8252_v0 = vpop.f32.mrb[69].mxu0  ;;  %v8420_v23 = vadd.f32 %v15093_v20, %v8419_v27  ;;  %v9702_v1 = vpop.f32.mrb[134].mxu1 }
 0x5df   :  { %12106 = vtanh.f32 %v8428_v22  ;;  %v8253_v44 = vpop.f32.mrb[70].mxu0  ;;  %v8431_v45 = vadd.f32 %v15132_v6, %v9702_v1  ;;  %v8422_v32 = vpop.f32.mrb[135].mxu1 }
 0x5e0   :  { %12108 = vtanh.f32 %v8420_v23  ;;  %v15308_v38 = vadd.f32 %v9861_v52, %v8253_v44  ;;  %v8255_v49 = vpop.f32.mrb[71].mxu0  ;;  %v8423_v51 = vadd.f32 %v15106_v60, %v8422_v32  ;;  %v9867_v32 = vadd.f32 %v15028_v10, %v15112_v35 }
 0x5e1   :  { %v12099_v13 = vpop.eup %12098  ;;  %12110 = vtanh.f32 %v8431_v45 }
 0x5e2   :  { %v12101_v53 = vpop.eup %12100  ;;  %8724 = vst [vmem:[%s15649_s3 + $0x10] sm:$0xff] %v12099_v13  ;;  %12112 = vtanh.f32 %v8423_v51 }
 0x5e3   :  { %v12103_v20 = vpop.eup %12102  ;;  %8722 = vst [vmem:[%s15649_s3] sm:$0xff] %v12101_v53  ;;  %v9869_v53 = vadd.f32 %v15028_v10, %v15121_v55 }
 0x5e4   :  { %v12105_v6 = vpop.eup %12104  ;;  %8725 = vst [vmem:[%s15649_s3 + $0x18] sm:$0xff] %v12103_v20  ;;  %v9705_v60 = vpop.f32.mrb[136].mxu1 }
 0x5e5   :  { %8723 = vst [vmem:[%s15649_s3 + $0x8] sm:$0xff] %v12105_v6  ;;  %v8258_v36 = vpop.f32.mrb[72].mxu0  ;;  %v8444_v48 = vadd.f32 %v15161_v3, %v9705_v60  ;;  %v8435_v25 = vpop.f32.mrb[137].mxu1 }
 0x5e6   :  { %v15328_v59 = vadd.f32 %v9863_v50, %v8258_v36  ;;  %v8260_v22 = vpop.f32.mrb[73].mxu0  ;;  %v8436_v8 = vadd.f32 %v15145_v41, %v8435_v25  ;;  %v9706_v27 = vpop.f32.mrb[138].mxu1 }
 0x5e7   :  { %12114 = vtanh.f32 %v8444_v48  ;;  %v8261_v52 = vpop.f32.mrb[74].mxu0  ;;  %v8447_v0 = vadd.f32 %v15165_v5, %v9706_v27  ;;  %v8438_v23 = vpop.f32.mrb[139].mxu1 }
 0x5e8   :  { %12116 = vtanh.f32 %v8436_v8  ;;  %v15332_v1 = vadd.f32 %v9865_v17, %v8261_v52  ;;  %v8263_v44 = vpop.f32.mrb[75].mxu0  ;;  %v8439_v3 = vadd.f32 %v15152_v33, %v8438_v23  ;;  %v9871_v8 = vadd.f32 %v15028_v10, %v15138_v12 }
 0x5e9   :  { %v12107_v45 = vpop.eup %12106  ;;  %12118 = vtanh.f32 %v8447_v0  ;;  %v9873_v23 = vadd.f32 %v15028_v10, %v15147_v29 }
 0x5ea   :  { %v12109_v24 = vpop.eup %12108  ;;  %8728 = vst [vmem:[%s15649_s3 + $0x30] sm:$0xff] %v12107_v45  ;;  %12120 = vtanh.f32 %v8439_v3 }
 0x5eb   :  { %v12111_v41 = vpop.eup %12110  ;;  %8726 = vst [vmem:[%s15649_s3 + $0x20] sm:$0xff] %v12109_v24 }
 0x5ec   :  { %v12113_v5 = vpop.eup %12112  ;;  %8729 = vst [vmem:[%s15649_s3 + $0x38] sm:$0xff] %v12111_v41  ;;  %v9709_v33 = vpop.f32.mrb[140].mxu1 }
 0x5ed   :  { %8727 = vst [vmem:[%s15649_s3 + $0x28] sm:$0xff] %v12113_v5  ;;  %v8266_v49 = vpop.f32.mrb[76].mxu0  ;;  %v8460_v51 = vadd.f32 %v15185_v56, %v9709_v33  ;;  %v8451_v13 = vpop.f32.mrb[141].mxu1 }
 0x5ee   :  { %v15352_v20 = vadd.f32 %v9867_v32, %v8266_v49  ;;  %v8268_v6 = vpop.f32.mrb[77].mxu0  ;;  %v8452_v35 = vadd.f32 %v15173_v57, %v8451_v13  ;;  %v9710_v50 = vpop.f32.mrb[142].mxu1 }
 0x5ef   :  { %12122 = vtanh.f32 %v8460_v51  ;;  %v8269_v60 = vpop.f32.mrb[78].mxu0  ;;  %v8463_v36 = vadd.f32 %v15189_v18, %v9710_v50  ;;  %v8454_v48 = vpop.f32.mrb[143].mxu1  ;;  %v9875_v51 = vadd.f32 %v15028_v10, %v15157_v40 }
 0x5f0   :  { %12124 = vtanh.f32 %v8452_v35  ;;  %v15356_v25 = vadd.f32 %v9869_v53, %v8269_v60  ;;  %v8271_v17 = vpop.f32.mrb[79].mxu0  ;;  %v8455_v56 = vadd.f32 %v15177_v39, %v8454_v48  ;;  %v9877_v35 = vadd.f32 %v15028_v10, %v15163_v62 }
 0x5f1   :  { %v12115_v22 = vpop.eup %12114  ;;  %12126 = vtanh.f32 %v8463_v36 }
 0x5f2   :  { %v12117_v55 = vpop.eup %12116  ;;  %8732 = vst [vmem:[%s15649_s3 + $0x50] sm:$0xff] %v12115_v22  ;;  %12128 = vtanh.f32 %v8455_v56 }
 0x5f3   :  { %v12119_v57 = vpop.eup %12118  ;;  %8730 = vst [vmem:[%s15649_s3 + $0x40] sm:$0xff] %v12117_v55 }
 0x5f4   :  { %v12121_v18 = vpop.eup %12120  ;;  %8733 = vst [vmem:[%s15649_s3 + $0x58] sm:$0xff] %v12119_v57  ;;  %v9713_v39 = vpop.f32.mrb[144].mxu1 }
 0x5f5   :  { %8731 = vst [vmem:[%s15649_s3 + $0x48] sm:$0xff] %v12121_v18  ;;  %v8274_v27 = vpop.f32.mrb[80].mxu0  ;;  %v8476_v52 = vadd.f32 %v15209_v34, %v9713_v39  ;;  %v8467_v0 = vpop.f32.mrb[145].mxu1  ;;  %v9879_v18 = vadd.f32 %v15028_v10, %v15169_v16 }
 0x5f6   :  { %v15376_v44 = vadd.f32 %v9871_v8, %v8274_v27  ;;  %v8276_v3 = vpop.f32.mrb[81].mxu0  ;;  %v8468_v12 = vadd.f32 %v15197_v61, %v8467_v0  ;;  %v9714_v45 = vpop.f32.mrb[146].mxu1 }
 0x5f7   :  { %12130 = vtanh.f32 %v8476_v52  ;;  %v8277_v24 = vpop.f32.mrb[82].mxu0  ;;  %v8479_v41 = vadd.f32 %v15213_v37, %v9714_v45  ;;  %v8470_v5 = vpop.f32.mrb[147].mxu1  ;;  %v9881_v52 = vadd.f32 %v15028_v10, %v15175_v11 }
 0x5f8   :  { %12132 = vtanh.f32 %v8468_v12  ;;  %v15380_v32 = vadd.f32 %v9873_v23, %v8277_v24  ;;  %v8279_v33 = vpop.f32.mrb[83].mxu0  ;;  %v8471_v34 = vadd.f32 %v15201_v30, %v8470_v5 }
 0x5f9   :  { %v12123_v49 = vpop.eup %12122  ;;  %12134 = vtanh.f32 %v8479_v41 }
 0x5fa   :  { %v12125_v29 = vpop.eup %12124  ;;  %8736 = vst [vmem:[%s15649_s3 + $0x70] sm:$0xff] %v12123_v49  ;;  %12136 = vtanh.f32 %v8471_v34  ;;  %v9883_v34 = vadd.f32 %v15028_v10, %v15181_v42 }
 0x5fb   :  { %v12127_v61 = vpop.eup %12126  ;;  %8734 = vst [vmem:[%s15649_s3 + $0x60] sm:$0xff] %v12125_v29 }
 0x5fc   :  { %v12129_v37 = vpop.eup %12128  ;;  %8737 = vst [vmem:[%s15649_s3 + $0x78] sm:$0xff] %v12127_v61  ;;  %v9717_v30 = vpop.f32.mrb[148].mxu1 }
 0x5fd   :  { %8735 = vst [vmem:[%s15649_s3 + $0x68] sm:$0xff] %v12129_v37  ;;  %v8282_v13 = vpop.f32.mrb[84].mxu0  ;;  %v8492_v53 = vadd.f32 %v15233_v9, %v9717_v30  ;;  %v8483_v6 = vpop.f32.mrb[149].mxu1  ;;  %v9885_v37 = vadd.f32 %v15028_v10, %v15187_v4 }
 0x5fe   :  { %v15400_v50 = vadd.f32 %v9875_v51, %v8282_v13  ;;  %v8284_v60 = vpop.f32.mrb[85].mxu0  ;;  %v8484_v40 = vadd.f32 %v15221_v43, %v8483_v6  ;;  %v9718_v36 = vpop.f32.mrb[150].mxu1 }
 0x5ff   :  { %12138 = vtanh.f32 %v8492_v53  ;;  %v8285_v48 = vpop.f32.mrb[86].mxu0  ;;  %v8495_v17 = vadd.f32 %v15237_v31, %v9718_v36  ;;  %v8486_v56 = vpop.f32.mrb[151].mxu1 }
 0x600   :  { %12140 = vtanh.f32 %v8484_v40  ;;  %v15404_v22 = vadd.f32 %v9877_v35, %v8285_v48  ;;  %v8287_v55 = vpop.f32.mrb[87].mxu0  ;;  %v8487_v9 = vadd.f32 %v15225_v47, %v8486_v56  ;;  %v9887_v48 = vadd.f32 %v15028_v10, %v15193_v21 }
 0x601   :  { %v12131_v57 = vpop.eup %12130  ;;  %12142 = vtanh.f32 %v8495_v17 }
 0x602   :  { %v12133_v62 = vpop.eup %12132  ;;  %8740 = vst [vmem:[%s15649_s3 + $0x90] sm:$0xff] %v12131_v57  ;;  %12144 = vtanh.f32 %v8487_v9  ;;  %v15665_v9 = vld [vmem:[#allocation2_spill] sm:$0xff] }
 0x603   :  { %v12135_v43 = vpop.eup %12134  ;;  %8738 = vst [vmem:[%s15649_s3 + $0x80] sm:$0xff] %v12133_v62  ;;  %v9889_v57 = vadd.f32 %v15028_v10, %v15665_v9 }
 0x604   :  { %v12137_v31 = vpop.eup %12136  ;;  %8741 = vst [vmem:[%s15649_s3 + $0x98] sm:$0xff] %v12135_v43  ;;  %v9721_v47 = vpop.f32.mrb[152].mxu1 }
 0x605   :  { %8739 = vst [vmem:[%s15649_s3 + $0x88] sm:$0xff] %v12137_v31  ;;  %v8290_v8 = vpop.f32.mrb[88].mxu0  ;;  %v8508_v39 = vadd.f32 %v15257_v46, %v9721_v47  ;;  %v8499_v27 = vpop.f32.mrb[153].mxu1 }
 0x606   :  { %v15424_v0 = vadd.f32 %v9879_v18, %v8290_v8  ;;  %v8292_v23 = vpop.f32.mrb[89].mxu0  ;;  %v8500_v16 = vadd.f32 %v15245_v63, %v8499_v27  ;;  %v9722_v3 = vpop.f32.mrb[154].mxu1 }
 0x607   :  { %12146 = vtanh.f32 %v8508_v39  ;;  %v8293_v12 = vpop.f32.mrb[90].mxu0  ;;  %v8511_v45 = vadd.f32 %v15261_v19, %v9722_v3  ;;  %v8502_v24 = vpop.f32.mrb[155].mxu1 }
 0x608   :  { %12148 = vtanh.f32 %v8500_v16  ;;  %v15428_v41 = vadd.f32 %v9881_v52, %v8293_v12  ;;  %v8295_v5 = vpop.f32.mrb[91].mxu0  ;;  %v8503_v46 = vadd.f32 %v15249_v28, %v8502_v24  ;;  %v15666_v16 = vld [vmem:[#allocation3_spill] sm:$0xff] }
 0x609   :  { %v12139_v33 = vpop.eup %12138  ;;  %12150 = vtanh.f32 %v8511_v45  ;;  %v9891_v3 = vadd.f32 %v15028_v10, %v15666_v16  ;;  %v15667_v5 = vld [vmem:[#allocation4_spill] sm:$0xff] }
 0x60a   :  { %v12141_v11 = vpop.eup %12140  ;;  %8744 = vst [vmem:[%s15649_s3 + $0xb0] sm:$0xff] %v12139_v33  ;;  %12152 = vtanh.f32 %v8503_v46  ;;  %v9893_v46 = vadd.f32 %v15028_v10, %v15667_v5  ;;  %v15672_v5 = vld [vmem:[#allocation9_spill] sm:$0xff] }
 0x60b   :  { %v12143_v63 = vpop.eup %12142  ;;  %8742 = vst [vmem:[%s15649_s3 + $0xa0] sm:$0xff] %v12141_v11 }
 0x60c   :  { %v12145_v19 = vpop.eup %12144  ;;  %8745 = vst [vmem:[%s15649_s3 + $0xb8] sm:$0xff] %v12143_v63  ;;  %v9725_v28 = vpop.f32.mrb[156].mxu1 }
 0x60d   :  { %8743 = vst [vmem:[%s15649_s3 + $0xa8] sm:$0xff] %v12145_v19  ;;  %v8298_v49 = vpop.f32.mrb[92].mxu0  ;;  %v8524_v29 = vadd.f32 %v15281_v58, %v9725_v28  ;;  %v8515_v61 = vpop.f32.mrb[157].mxu1 }
 0x60e   :  { %v15448_v51 = vadd.f32 %v9883_v34, %v8298_v49  ;;  %v8300_v30 = vpop.f32.mrb[93].mxu0  ;;  %v8516_v42 = vadd.f32 %v15269_v14, %v8515_v61  ;;  %v9726_v13 = vpop.f32.mrb[158].mxu1 }
 0x60f   :  { %12154 = vtanh.f32 %v8524_v29  ;;  %v8301_v53 = vpop.f32.mrb[94].mxu0  ;;  %v8527_v6 = vadd.f32 %v15285_v2, %v9726_v13  ;;  %v8518_v35 = vpop.f32.mrb[159].mxu1 }
 0x610   :  { %12156 = vtanh.f32 %v8516_v42  ;;  %v15452_v60 = vadd.f32 %v9885_v37, %v8301_v53  ;;  %v8303_v40 = vpop.f32.mrb[95].mxu0  ;;  %v8519_v58 = vadd.f32 %v15273_v54, %v8518_v35  ;;  %v15668_v42 = vld [vmem:[#allocation5_spill] sm:$0xff] }
 0x611   :  { %v12147_v36 = vpop.eup %12146  ;;  %12158 = vtanh.f32 %v8527_v6  ;;  %v9895_v13 = vadd.f32 %v15028_v10, %v15668_v42  ;;  %v15669_v40 = vld [vmem:[#allocation6_spill] sm:$0xff] }
 0x612   :  { %v12149_v4 = vpop.eup %12148  ;;  %8748 = vst [vmem:[%s15649_s3 + $0xd0] sm:$0xff] %v12147_v36  ;;  %12160 = vtanh.f32 %v8519_v58  ;;  %v9897_v58 = vadd.f32 %v15028_v10, %v15669_v40 }
 0x613   :  { %v12151_v14 = vpop.eup %12150  ;;  %8746 = vst [vmem:[%s15649_s3 + $0xc0] sm:$0xff] %v12149_v4 }
 0x614   :  { %v12153_v2 = vpop.eup %12152  ;;  %8749 = vst [vmem:[%s15649_s3 + $0xd8] sm:$0xff] %v12151_v14  ;;  %v9729_v54 = vpop.f32.mrb[160].mxu1 }
 0x615   :  { %8747 = vst [vmem:[%s15649_s3 + $0xc8] sm:$0xff] %v12153_v2  ;;  %v8306_v17 = vpop.f32.mrb[96].mxu0  ;;  %v8540_v56 = vadd.f32 %v15304_v26, %v9729_v54  ;;  %v8531_v55 = vpop.f32.mrb[161].mxu1 }
 0x616   :  { %v15472_v62 = vadd.f32 %v9887_v48, %v8306_v17  ;;  %v8308_v43 = vpop.f32.mrb[97].mxu0  ;;  %v8532_v21 = vadd.f32 %v15292_v7, %v8531_v55  ;;  %v9730_v31 = vpop.f32.mrb[162].mxu1 }
 0x617   :  { %12162 = vtanh.f32 %v8540_v56  ;;  %v8309_v18 = vpop.f32.mrb[98].mxu0  ;;  %v8543_v47 = vadd.f32 %v15308_v38, %v9730_v31  ;;  %v8534_v8 = vpop.f32.mrb[163].mxu1 }
 0x618   :  { %12164 = vtanh.f32 %v8532_v21  ;;  %v15476_v39 = vadd.f32 %v9889_v57, %v8309_v18  ;;  %v8311_v27 = vpop.f32.mrb[99].mxu0  ;;  %v8535_v26 = vadd.f32 %v15296_v15, %v8534_v8  ;;  %v15536_v57 = vld [vmem:[%s15648_s2] ss:$0 sm:$0xff]  ;;  %v15671_v8 = vld [vmem:[#allocation8_spill] sm:$0xff] }
 0x619   :  { %v12155_v52 = vpop.eup %12154  ;;  %12166 = vtanh.f32 %v8543_v47  ;;  %v9901_v27 = vadd.f32 %v15536_v57, %v15671_v8 }
 0x61a   :  { %v12157_v23 = vpop.eup %12156  ;;  %8752 = vst [vmem:[%s15649_s3 + $0xf0] sm:$0xff] %v12155_v52  ;;  %12168 = vtanh.f32 %v8535_v26 }
 0x61b   :  { %v12159_v7 = vpop.eup %12158  ;;  %8750 = vst [vmem:[%s15649_s3 + $0xe0] sm:$0xff] %v12157_v23 }
 0x61c   :  { %v12161_v38 = vpop.eup %12160  ;;  %8753 = vst [vmem:[%s15649_s3 + $0xf8] sm:$0xff] %v12159_v7  ;;  %v9733_v15 = vpop.f32.mrb[164].mxu1 }
 0x61d   :  { %8751 = vst [vmem:[%s15649_s3 + $0xe8] sm:$0xff] %v12161_v38  ;;  %v8314_v12 = vpop.f32.mrb[100].mxu0  ;;  %v8556_v45 = vadd.f32 %v15352_v20, %v9733_v15  ;;  %v8547_v24 = vpop.f32.mrb[165].mxu1 }
 0x61e   :  { %v15496_v33 = vadd.f32 %v9891_v3, %v8314_v12  ;;  %v8316_v11 = vpop.f32.mrb[101].mxu0  ;;  %v8548_v63 = vadd.f32 %v15328_v59, %v8547_v24  ;;  %v9734_v19 = vpop.f32.mrb[166].mxu1 }
 0x61f   :  { %12170 = vtanh.f32 %v8556_v45  ;;  %v8317_v34 = vpop.f32.mrb[102].mxu0  ;;  %v8559_v28 = vadd.f32 %v15356_v25, %v9734_v19  ;;  %v8550_v49 = vpop.f32.mrb[167].mxu1 }
 0x620   :  { %12172 = vtanh.f32 %v8548_v63  ;;  %v15500_v29 = vadd.f32 %v9893_v46, %v8317_v34  ;;  %v8319_v61 = vpop.f32.mrb[103].mxu0  ;;  %v8551_v20 = vadd.f32 %v15332_v1, %v8550_v49  ;;  %v9903_v46 = vadd.f32 %v15536_v57, %v15672_v5  ;;  %v15673_v34 = vld [vmem:[#allocation10_spill] sm:$0xff] }
 0x621   :  { %v12163_v37 = vpop.eup %12162  ;;  %12174 = vtanh.f32 %v8559_v28  ;;  %v9905_v28 = vadd.f32 %v15536_v57, %v15673_v34 }
 0x622   :  { %v12165_v30 = vpop.eup %12164  ;;  %8756 = vst [vmem:[%s15649_s3 + $0x110] sm:$0xff] %v12163_v37  ;;  %12176 = vtanh.f32 %v8551_v20 }
 0x623   :  { %v12167_v59 = vpop.eup %12166  ;;  %8754 = vst [vmem:[%s15649_s3 + $0x100] sm:$0xff] %v12165_v30 }
 0x624   :  { %v12169_v25 = vpop.eup %12168  ;;  %8757 = vst [vmem:[%s15649_s3 + $0x118] sm:$0xff] %v12167_v59  ;;  %v9737_v1 = vpop.f32.mrb[168].mxu1 }
 0x625   :  { %8755 = vst [vmem:[%s15649_s3 + $0x108] sm:$0xff] %v12169_v25  ;;  %v8322_v53 = vpop.f32.mrb[104].mxu0  ;;  %v8572_v6 = vadd.f32 %v15400_v50, %v9737_v1  ;;  %v8563_v35 = vpop.f32.mrb[169].mxu1 }
 0x626   :  { %v15520_v36 = vadd.f32 %v9895_v13, %v8322_v53  ;;  %v8324_v4 = vpop.f32.mrb[105].mxu0  ;;  %v8564_v14 = vadd.f32 %v15376_v44, %v8563_v35  ;;  %v9738_v2 = vpop.f32.mrb[170].mxu1 }
 0x627   :  { %12178 = vtanh.f32 %v8572_v6  ;;  %v8325_v48 = vpop.f32.mrb[106].mxu0  ;;  %v8575_v54 = vadd.f32 %v15404_v22, %v9738_v2  ;;  %v8566_v17 = vpop.f32.mrb[171].mxu1  ;;  %v15674_v6 = vld [vmem:[#allocation11_spill] sm:$0xff] }
 0x628   :  { %12180 = vtanh.f32 %v8564_v14  ;;  %v15524_v56 = vadd.f32 %v9897_v58, %v8325_v48  ;;  %v8327_v55 = vpop.f32.mrb[107].mxu0  ;;  %v8567_v50 = vadd.f32 %v15380_v32, %v8566_v17  ;;  %v15670_v32 = vld [vmem:[#allocation7_spill] sm:$0xff]  ;;  %v9907_v35 = vadd.f32 %v15536_v57, %v15674_v6  ;;  %v15675_v14 = vld [vmem:[#allocation12_spill] sm:$0xff] }
 0x629   :  { %v12171_v9 = vpop.eup %12170  ;;  %12182 = vtanh.f32 %v8575_v54  ;;  %v9899_v43 = vadd.f32 %v15536_v57, %v15670_v32  ;;  %v9909_v2 = vadd.f32 %v15536_v57, %v15675_v14 }
 0x62a   :  { %v12173_v10 = vpop.eup %12172  ;;  %8760 = vst [vmem:[%s15649_s3 + $0x130] sm:$0xff] %v12171_v9  ;;  %12184 = vtanh.f32 %v8567_v50 }
 0x62b   :  { %v12175_v44 = vpop.eup %12174  ;;  %8758 = vst [vmem:[%s15649_s3 + $0x120] sm:$0xff] %v12173_v10 }
 0x62c   :  { %v12177_v22 = vpop.eup %12176  ;;  %8761 = vst [vmem:[%s15649_s3 + $0x138] sm:$0xff] %v12175_v44  ;;  %v9741_v21 = vpop.f32.mrb[172].mxu1 }
 0x62d   :  { %8759 = vst [vmem:[%s15649_s3 + $0x128] sm:$0xff] %v12177_v22  ;;  %v8330_v31 = vpop.f32.mrb[108].mxu0  ;;  %v8588_v18 = vadd.f32 %v15448_v51, %v9741_v21  ;;  %v8579_v47 = vpop.f32.mrb[173].mxu1 }
 0x62e   :  { %v9900_v26 = vadd.f32 %v9899_v43, %v8330_v31  ;;  %v8332_v52 = vpop.f32.mrb[109].mxu0  ;;  %v8580_v23 = vadd.f32 %v15424_v0, %v8579_v47  ;;  %v9742_v7 = vpop.f32.mrb[174].mxu1 }
 0x62f   :  { %12186 = vtanh.f32 %v8588_v18  ;;  %v8333_v38 = vpop.f32.mrb[110].mxu0  ;;  %v8591_v16 = vadd.f32 %v15452_v60, %v9742_v7  ;;  %v8582_v3 = vpop.f32.mrb[175].mxu1  ;;  %v15676_v18 = vld [vmem:[#allocation13_spill] sm:$0xff]  ;;  %v15677_v52 = vld [vmem:[#allocation14_spill] sm:$0xff] }
 0x630   :  { %12188 = vtanh.f32 %v8580_v23  ;;  %v9902_v15 = vadd.f32 %v9901_v27, %v8333_v38  ;;  %v8335_v12 = vpop.f32.mrb[111].mxu0  ;;  %v8583_v45 = vadd.f32 %v15428_v41, %v8582_v3  ;;  %v9911_v47 = vadd.f32 %v15536_v57, %v15676_v18 }
 0x631   :  { %v12179_v51 = vpop.eup %12178  ;;  %12190 = vtanh.f32 %v8591_v16  ;;  %v9913_v23 = vadd.f32 %v15536_v57, %v15677_v52 }
 0x632   :  { %v12181_v24 = vpop.eup %12180  ;;  %8764 = vst [vmem:[%s15649_s3 + $0x150] sm:$0xff] %v12179_v51  ;;  %12192 = vtanh.f32 %v8583_v45 }
 0x633   :  { %v12183_v0 = vpop.eup %12182  ;;  %8762 = vst [vmem:[%s15649_s3 + $0x140] sm:$0xff] %v12181_v24 }
 0x634   :  { %v12185_v60 = vpop.eup %12184  ;;  %8765 = vst [vmem:[%s15649_s3 + $0x158] sm:$0xff] %v12183_v0  ;;  %v9745_v41 = vpop.f32.mrb[176].mxu1 }
 0x635   :  { %8763 = vst [vmem:[%s15649_s3 + $0x148] sm:$0xff] %v12185_v60  ;;  %v8338_v11 = vpop.f32.mrb[112].mxu0  ;;  %v8604_v63 = vadd.f32 %v15496_v33, %v9745_v41  ;;  %v8595_v19 = vpop.f32.mrb[177].mxu1 }
 0x636   :  { %v9904_v49 = vadd.f32 %v9903_v46, %v8338_v11  ;;  %v8340_v61 = vpop.f32.mrb[113].mxu0  ;;  %v8596_v20 = vadd.f32 %v15472_v62, %v8595_v19  ;;  %v9746_v37 = vpop.f32.mrb[178].mxu1  ;;  %v15678_v11 = vld [vmem:[#allocation15_spill] sm:$0xff] }
 0x637   :  { %12194 = vtanh.f32 %v8604_v63  ;;  %v8341_v30 = vpop.f32.mrb[114].mxu0  ;;  %v8607_v59 = vadd.f32 %v15500_v29, %v9746_v37  ;;  %v8598_v25 = vpop.f32.mrb[179].mxu1  ;;  %v9915_v63 = vadd.f32 %v15536_v57, %v15678_v11 }
 0x638   :  { %12196 = vtanh.f32 %v8596_v20  ;;  %v9906_v42 = vadd.f32 %v9905_v28, %v8341_v30  ;;  %v8343_v13 = vpop.f32.mrb[115].mxu0  ;;  %v8599_v1 = vadd.f32 %v15476_v39, %v8598_v25 }
 0x639   :  { %v12187_v33 = vpop.eup %12186  ;;  %12198 = vtanh.f32 %v8607_v59 }
 0x63a   :  { %v12189_v53 = vpop.eup %12188  ;;  %8768 = vst [vmem:[%s15649_s3 + $0x170] sm:$0xff] %v12187_v33  ;;  %12200 = vtanh.f32 %v8599_v1 }
 0x63b   :  { %v12191_v62 = vpop.eup %12190  ;;  %8766 = vst [vmem:[%s15649_s3 + $0x160] sm:$0xff] %v12189_v53 }
 0x63c   :  { %v12193_v29 = vpop.eup %12192  ;;  %8769 = vst [vmem:[%s15649_s3 + $0x178] sm:$0xff] %v12191_v62  ;;  %v9749_v39 = vpop.f32.mrb[180].mxu1 }
 0x63d   :  { %8767 = vst [vmem:[%s15649_s3 + $0x168] sm:$0xff] %v12193_v29  ;;  %v8346_v40 = vpop.f32.mrb[116].mxu0  ;;  %v8620_v58 = vadd.f32 %v9900_v26, %v9749_v39  ;;  %v8611_v4 = vpop.f32.mrb[181].mxu1 }
 0x63e   :  { %v9908_v48 = vadd.f32 %v9907_v35, %v8346_v40  ;;  %v8348_v54 = vpop.f32.mrb[117].mxu0  ;;  %v8612_v17 = vadd.f32 %v15520_v36, %v8611_v4  ;;  %v9750_v55 = vpop.f32.mrb[182].mxu1 }
 0x63f   :  { %12202 = vtanh.f32 %v8620_v58  ;;  %v8349_v50 = vpop.f32.mrb[118].mxu0  ;;  %v8623_v9 = vadd.f32 %v9902_v15, %v9750_v55  ;;  %v8614_v10 = vpop.f32.mrb[183].mxu1 }
 0x640   :  { %12204 = vtanh.f32 %v8612_v17  ;;  %v9910_v44 = vadd.f32 %v9909_v2, %v8349_v50  ;;  %v8351_v22 = vpop.f32.mrb[119].mxu0  ;;  %v8615_v32 = vadd.f32 %v15524_v56, %v8614_v10 }
 0x641   :  { %v12195_v43 = vpop.eup %12194  ;;  %12206 = vtanh.f32 %v8623_v9 }
 0x642   :  { %v12197_v21 = vpop.eup %12196  ;;  %8772 = vst [vmem:[%s15649_s3 + $0x190] sm:$0xff] %v12195_v43  ;;  %12208 = vtanh.f32 %v8615_v32 }
 0x643   :  { %v12199_v31 = vpop.eup %12198  ;;  %8770 = vst [vmem:[%s15649_s3 + $0x180] sm:$0xff] %v12197_v21 }
 0x644   :  { %v12201_v36 = vpop.eup %12200  ;;  %8773 = vst [vmem:[%s15649_s3 + $0x198] sm:$0xff] %v12199_v31  ;;  %v9753_v56 = vpop.f32.mrb[184].mxu1 }
 0x645   :  { %8771 = vst [vmem:[%s15649_s3 + $0x188] sm:$0xff] %v12201_v36  ;;  %v8354_v8 = vpop.f32.mrb[120].mxu0  ;;  %v8636_v27 = vadd.f32 %v9908_v48, %v9753_v56  ;;  %v8627_v26 = vpop.f32.mrb[185].mxu1 }
 0x646   :  { %v9912_v7 = vadd.f32 %v9911_v47, %v8354_v8  ;;  %v8356_v38 = vpop.f32.mrb[121].mxu0  ;;  %v8628_v16 = vadd.f32 %v9904_v49, %v8627_v26  ;;  %v9754_v3 = vpop.f32.mrb[186].mxu1  ;;  %v15679_v49 = vld [vmem:[#allocation16_spill] sm:$0xff] }
 0x647   :  { %12210 = vtanh.f32 %v8636_v27  ;;  %v8357_v15 = vpop.f32.mrb[122].mxu0  ;;  %v8639_v12 = vadd.f32 %v9910_v44, %v9754_v3  ;;  %v8630_v45 = vpop.f32.mrb[187].mxu1  ;;  %v9917_v61 = vadd.f32 %v15536_v57, %v15679_v49 }
 0x648   :  { %12212 = vtanh.f32 %v8628_v16  ;;  %v9914_v51 = vadd.f32 %v9913_v23, %v8357_v15  ;;  %v8359_v24 = vpop.f32.mrb[123].mxu0  ;;  %v8631_v0 = vadd.f32 %v9906_v42, %v8630_v45 }
 0x649   :  { %v12203_v60 = vpop.eup %12202  ;;  %12214 = vtanh.f32 %v8639_v12 }
 0x64a   :  { %v12205_v5 = vpop.eup %12204  ;;  %8776 = vst [vmem:[%s15649_s3 + $0x1b0] sm:$0xff] %v12203_v60  ;;  %12216 = vtanh.f32 %v8631_v0 }
 0x64b   :  { %v12207_v46 = vpop.eup %12206  ;;  %8774 = vst [vmem:[%s15649_s3 + $0x1a0] sm:$0xff] %v12205_v5 }
 0x64c   :  { %v12209_v41 = vpop.eup %12208  ;;  %8777 = vst [vmem:[%s15649_s3 + $0x1b8] sm:$0xff] %v12207_v46  ;;  %v9757_v19 = vpop.f32.mrb[188].mxu1 }
 0x64d   :  { %8775 = vst [vmem:[%s15649_s3 + $0x1a8] sm:$0xff] %v12209_v41  ;;  %v8362_v34 = vpop.f32.mrb[124].mxu0  ;;  %v8643_v28 = vpop.f32.mrb[189].mxu1 }
 0x64e   :  { %v9916_v20 = vadd.f32 %v9915_v63, %v8362_v34  ;;  %v8364_v37 = vpop.f32.mrb[125].mxu0  ;;  %v8644_v30 = vadd.f32 %v9912_v7, %v8643_v28  ;;  %v9758_v59 = vpop.f32.mrb[190].mxu1 }
 0x64f   :  { %v8365_v25 = vpop.f32.mrb[126].mxu0  ;;  %v8646_v42 = vpop.f32.mrb[191].mxu1 }
 0x650   :  { %v8652_v13 = vadd.f32 %v9916_v20, %v9757_v19  ;;  %12218 = vtanh.f32 %v8644_v30  ;;  %v9918_v1 = vadd.f32 %v9917_v61, %v8365_v25  ;;  %v8367_v33 = vpop.f32.mrb[127].mxu0  ;;  %v8647_v53 = vadd.f32 %v9914_v51, %v8646_v42 }
 0x651   :  { %v12211_v62 = vpop.eup %12210 }
 0x652   :  { %v12213_v29 = vpop.eup %12212  ;;  %8780 = vst [vmem:[%s15649_s3 + $0x1d0] sm:$0xff] %v12211_v62  ;;  %12220 = vtanh.f32 %v8652_v13  ;;  %v8655_v6 = vadd.f32 %v9918_v1, %v9758_v59 }
 0x653   :  { %v12215_v57 = vpop.eup %12214  ;;  %8778 = vst [vmem:[%s15649_s3 + $0x1c0] sm:$0xff] %v12213_v29  ;;  %12222 = vtanh.f32 %v8647_v53 }
 0x654   :  { %v12217_v35 = vpop.eup %12216  ;;  %8781 = vst [vmem:[%s15649_s3 + $0x1d8] sm:$0xff] %v12215_v57  ;;  %12224 = vtanh.f32 %v8655_v6 }
 0x655   :  { %8779 = vst [vmem:[%s15649_s3 + $0x1c8] sm:$0xff] %v12217_v35 }
 0x65a   :  { %v12219_v39 = vpop.eup %12218 }
 0x65b   :  { %8782 = vst [vmem:[%s15649_s3 + $0x1e0] sm:$0xff] %v12219_v39 }
 0x65c   :  { %v12221_v40 = vpop.eup %12220 }
 0x65d   :  { %v12223_v58 = vpop.eup %12222  ;;  %8784 = vst [vmem:[%s15649_s3 + $0x1f0] sm:$0xff] %v12221_v40 }
 0x65e   :  { %v12225_v4 = vpop.eup %12224  ;;  %8783 = vst [vmem:[%s15649_s3 + $0x1e8] sm:$0xff] %v12223_v58 }
 0x65f   :  { %8785 = vst [vmem:[%s15649_s3 + $0x1f8] sm:$0xff] %v12225_v4 }

</bundles_post_ra>
